<compile_context>
chip_gen: v5e
topology: v5e:2x2
jax: 0.10.0
libtpu: 0.0.40
codegen_flags: <defaults>
</compile_context>

<pallas_src>
import jax
import jax.numpy as jnp
from jax.experimental import pallas as pl
from jax.experimental.pallas import tpu as pltpu

NODE_FEATURES = 16
EDGE_FEATURES = 8
HIDDEN_DIMS = (64, 128, 64)
HEADS = 4
BN_EPS = 1e-5

LANE = 128   # lane-dense padding for feature / head / node / edge axes


# ---------------------------------------------------------------------------
# helpers (host-side, one-time prep)
# ---------------------------------------------------------------------------
def _round_up(n, m):
    return (n + m - 1) // m * m


def _pad2d(a, rows, cols):
    a = jnp.asarray(a, jnp.float32)
    if a.ndim == 1:
        a = a[None, :]
    out = jnp.zeros((rows, cols), jnp.float32)
    return out.at[:a.shape[0], :a.shape[1]].set(a)


def _fold_att(w, b, att):
    """Fold a per-head attention vector into the linear layer:
    ((x @ w + b).reshape(N,H,C) * att).sum(-1)  ==  x @ w_att + b_att,
    where w_att / b_att have one column per head."""
    h, c = att.shape
    bd = jnp.zeros((h * c, h), jnp.float32)
    bd = bd.at[jnp.arange(h * c), jnp.repeat(jnp.arange(h), c)].set(
        jnp.asarray(att, jnp.float32).reshape(-1))
    return jnp.asarray(w, jnp.float32) @ bd, jnp.asarray(b, jnp.float32) @ bd


def prepare_graph(edge_index, num_nodes):
    """One-hot gather/scatter matrices, built once per graph (outside the
    per-step path).  bf16 is exact for 0/1 values."""
    e = edge_index.shape[1]
    n_pad = _round_up(num_nodes, LANE)
    e_pad = _round_up(e, LANE)
    s = jnp.zeros((e_pad, n_pad), jnp.float32).at[
        jnp.arange(e), edge_index[0]].set(1.0)
    d = jnp.zeros((e_pad, n_pad), jnp.float32).at[
        jnp.arange(e), edge_index[1]].set(1.0)
    return dict(s=s.astype(jnp.bfloat16),
                d=d.astype(jnp.bfloat16),
                dt=d.T.astype(jnp.bfloat16))


def prepare_params(layer_params, mlp_params):
    """Fold attention vectors and BatchNorm into the weights, pad to
    lane-dense shapes and stack the per-layer tensors -- once, offline."""
    wnode, wedge, expands, vecs = [], [], [], []
    for lp in layer_params:
        heads, c = lp["att_src"].shape
        hc = heads * c
        wsrc_att, bsrc_att = _fold_att(lp["wsrc"], lp["bsrc"], lp["att_src"])
        wdst_att, bdst_att = _fold_att(lp["wdst"], lp["bdst"], lp["att_dst"])
        wedge_att, bedge_att = _fold_att(lp["wedge"], lp["bedge"], lp["att_edge"])

        # [wsrc | wsrc@att_src | wdst@att_dst] -> single 384-lane matmul
        wnode.append(jnp.concatenate([
            _pad2d(lp["wsrc"], LANE, LANE),
            _pad2d(wsrc_att, LANE, LANE),
            _pad2d(wdst_att, LANE, LANE)], axis=1))            # (128, 384)
        wedge.append(_pad2d(wedge_att, LANE, LANE))            # (128, 128)

        scale = lp["gamma"] / jnp.sqrt(lp["rv"] + BN_EPS)      # folded BN
        shift = lp["beta"] - lp["rm"] * scale
        vec = jnp.zeros((8, 3 * LANE), jnp.float32)
        vec = vec.at[0:1, :].set(jnp.concatenate([
            _pad2d(lp["bsrc"], 1, LANE),
            _pad2d(bsrc_att, 1, LANE),
            _pad2d(bdst_att, 1, LANE)], axis=1))
        vec = vec.at[1:2, :].set(jnp.concatenate([
            _pad2d(bedge_att, 1, LANE),
            _pad2d(scale, 1, LANE),
            _pad2d(shift, 1, LANE)], axis=1))
        vecs.append(vec)

        exp = jnp.zeros((LANE, LANE), jnp.float32)             # head -> channels
        exp = exp.at[jnp.repeat(jnp.arange(heads), c), jnp.arange(hc)].set(1.0)
        expands.append(exp.astype(jnp.bfloat16))

    mvec = jnp.zeros((8, LANE), jnp.float32)
    mvec = mvec.at[0, :mlp_params["b1"].shape[0]].set(mlp_params["b1"])
    mvec = mvec.at[1, :mlp_params["b2"].shape[0]].set(mlp_params["b2"])
    return dict(
        wnode=jnp.stack(wnode),                    # (L, 128, 384)
        wedge=jnp.concatenate(wedge, axis=1),      # (128, L*128) all layers' edge att
        expand=jnp.stack(expands),                 # (L, 128, 128) bf16 0/1
        vecs=jnp.stack(vecs),                      # (L, 8, 384) biases + BN
        mlp_w1=_pad2d(mlp_params["w1"], LANE, LANE),
        mlp_w2=_pad2d(mlp_params["w2"], LANE, LANE),
        mlp_vec=mvec)                              # (8, 128): rows b1, b2


# ---------------------------------------------------------------------------
# fused Pallas kernel: 3 x (EdgeGATConv -> BN -> ReLU) -> MLP
# ---------------------------------------------------------------------------
def _f1gnn_kernel(x_ref, ea_ref, s_ref, d_ref, dt_ref,
                  wnode_ref, wedge_ref, expand_ref, vecs_ref,
                  w1_ref, w2_ref, mvec_ref, out_ref):
    f32 = jnp.float32
    s_mat = s_ref[...].astype(f32)      # (E, N) one-hot edge source
    d_mat = d_ref[...].astype(f32)      # (E, N) one-hot edge destination
    dt_mat = dt_ref[...].astype(f32)    # (N, E) = D^T

    # Edge-attention logits for all three layers in one matmul
    # (edge_attr is layer-invariant; only the folded weights differ).
    a_edge_all = jnp.dot(ea_ref[...], wedge_ref[...], preferred_element_type=f32)

    h = x_ref[...]
    num_layers = wnode_ref.shape[0]
    for l in range(num_layers):
        vec = vecs_ref[l]                       # (8, 3*LANE)
        b_node = vec[0:1, :]
        b_edge = vec[1:2, 0:LANE]
        bn_scale = vec[1:2, LANE:2 * LANE]
        bn_shift = vec[1:2, 2 * LANE:3 * LANE]
        expand = expand_ref[l].astype(f32)

        # one matmul -> [src features | per-head src logits | per-head dst logits]
        node_proj = jnp.dot(h, wnode_ref[l], preferred_element_type=f32) + b_node

        # gather to edges: S @ [src | a_src] fused, D @ a_dst
        gath = jnp.dot(s_mat, node_proj[:, :2 * LANE], preferred_element_type=f32)
        a_dst_e = jnp.dot(d_mat, node_proj[:, 2 * LANE:3 * LANE],
                          preferred_element_type=f32)
        src_e = gath[:, :LANE]
        alpha = (gath[:, LANE:2 * LANE] + a_dst_e
                 + a_edge_all[:, l * LANE:(l + 1) * LANE] + b_edge)
        alpha = jnp.where(alpha > 0, alpha, 0.2 * alpha)       # LeakyReLU(0.2)

        # destination-segment softmax.  A global per-head max shift is exact
        # (softmax is shift-invariant per segment); normalization is applied
        # after the scatter so no denominator gather is needed.
        # TODO(synk): use a true per-destination max if logits ever grow large
        # enough for exp() underflow to matter.
        m = jnp.max(alpha, axis=0, keepdims=True)
        p = jnp.exp(alpha - m)                                   # (E, LANE)
        p_full = jnp.dot(p, expand, preferred_element_type=f32)  # head -> channels

        # fused scatter-add of weighted messages and softmax denominators
        packed = jnp.concatenate([src_e * p_full, p_full], axis=1)   # (E, 2*LANE)
        agg = jnp.dot(dt_mat, packed, preferred_element_type=f32)    # (N, 2*LANE)
        den = agg[:, LANE:2 * LANE]
        den = jnp.where(den > 0.0, den, 1.0)   # padded channels / isolated nodes
        out = agg[:, :LANE] / den

        # inference-mode BatchNorm (pre-folded scale/shift) + ReLU
        h = jnp.maximum(out * bn_scale + bn_shift, 0.0)

    # output MLP: Linear(64->32) -> ReLU -> Linear(32->1)
    z = jnp.dot(h, w1_ref[...], preferred_element_type=f32) + mvec_ref[0:1, :]
    z = jnp.maximum(z, 0.0)
    out_ref[...] = jnp.dot(z, w2_ref[...], preferred_element_type=f32) + mvec_ref[1:2, :]


_VMEM = pl.BlockSpec(memory_space=pltpu.MemorySpace.VMEM)


@jax.jit
def f1_gnn_forward(x, edge_attr, graph, params):
    """batch=None path of F1GNN.forward: per-node scores.  The per-step work
    is a single fused pallas_call; only x / edge_attr padding runs in XLA."""
    n = x.shape[0]
    n_pad = graph["s"].shape[1]
    e_pad = graph["s"].shape[0]
    x_p = jnp.zeros((n_pad, LANE), jnp.float32).at[:n, :x.shape[1]].set(x)
    ea_p = jnp.zeros((e_pad, LANE), jnp.float32).at[
        :edge_attr.shape[0], :edge_attr.shape[1]].set(edge_attr)

    out = pl.pallas_call(
        _f1gnn_kernel,
        out_shape=jax.ShapeDtypeStruct((n_pad, LANE), jnp.float32),
        in_specs=[_VMEM] * 12,
        out_specs=_VMEM,
    )(x_p, ea_p, graph["s"], graph["d"], graph["dt"],
      params["wnode"], params["wedge"], params["expand"], params["vecs"],
      params["mlp_w1"], params["mlp_w2"], params["mlp_vec"])
    return out[:n, :1]


# ---------------------------------------------------------------------------
# parameters + pure-JAX reference
# ---------------------------------------------------------------------------
def _init_params(key):
    def nrm(k, shape, scale=0.2):
        return scale * jax.random.normal(k, shape, jnp.float32)

    it = iter(jax.random.split(key, 64))
    layers = []
    prev = NODE_FEATURES
    for hd in HIDDEN_DIMS:
        c = hd // HEADS
        hc = HEADS * c
        layers.append(dict(
            wsrc=nrm(next(it), (prev, hc)), bsrc=nrm(next(it), (hc,), 0.1),
            wdst=nrm(next(it), (prev, hc)), bdst=nrm(next(it), (hc,), 0.1),
            wedge=nrm(next(it), (EDGE_FEATURES, hc)), bedge=nrm(next(it), (hc,), 0.1),
            att_src=nrm(next(it), (HEADS, c)),
            att_dst=nrm(next(it), (HEADS, c)),
            att_edge=nrm(next(it), (HEADS, c)),
            gamma=1.0 + nrm(next(it), (hc,), 0.1),
            beta=nrm(next(it), (hc,), 0.1),
            rm=nrm(next(it), (hc,), 0.1),
            rv=jax.random.uniform(next(it), (hc,), jnp.float32, 0.5, 1.5),
        ))
        prev = hc
    mlp = dict(
        w1=nrm(next(it), (prev, 32)), b1=nrm(next(it), (32,), 0.1),
        w2=nrm(next(it), (32, 1)), b2=nrm(next(it), (1,), 0.1),
    )
    return layers, mlp


def _reference_forward(x, edge_index, edge_attr, layer_params, mlp_params):
    h = x.astype(jnp.float32)
    src_i, dst_i = edge_index[0], edge_index[1]
    for lp in layer_params:
        n = h.shape[0]
        hc = lp["wsrc"].shape[1]
        c = hc // HEADS
        src = (h @ lp["wsrc"] + lp["bsrc"]).reshape(n, HEADS, c)
        dst = (h @ lp["wdst"] + lp["bdst"]).reshape(n, HEADS, c)
        ef = (edge_attr @ lp["wedge"] + lp["bedge"]).reshape(-1, HEADS, c)
        a_src = (src * lp["att_src"][None]).sum(-1)
        a_dst = (dst * lp["att_dst"][None]).sum(-1)
        a_edge = (ef * lp["att_edge"][None]).sum(-1)
        a = a_src[src_i] + a_dst[dst_i] + a_edge
        a = jnp.where(a > 0, a, 0.2 * a)
        m = jax.ops.segment_max(a, dst_i, num_segments=n)
        m = jnp.where(jnp.isfinite(m), m, 0.0)
        p = jnp.exp(a - m[dst_i])
        den = jax.ops.segment_sum(p, dst_i, num_segments=n)
        attn = p / den[dst_i]
        msg = src[src_i] * attn[..., None]
        out = jax.ops.segment_sum(msg, dst_i, num_segments=n).reshape(n, hc)
        scale = lp["gamma"] / jnp.sqrt(lp["rv"] + BN_EPS)
        out = (out - lp["rm"]) * scale + lp["beta"]
        h = jnp.maximum(out, 0.0)
    h = jnp.maximum(h @ mlp_params["w1"] + mlp_params["b1"], 0.0)
    return h @ mlp_params["w2"] + mlp_params["b2"]


# ---------------------------------------------------------------------------
# demo
# ---------------------------------------------------------------------------
if __name__ == "__main__":
    key = jax.random.PRNGKey(0)
    k_graph, k_params = jax.random.split(key)
    kx, kei, kea = jax.random.split(k_graph, 3)

    N_NODES, N_EDGES = 20, 60            # e.g. 20 drivers, 60 relation edges
    x = jax.random.normal(kx, (N_NODES, NODE_FEATURES), jnp.float32)
    edge_index = jax.random.randint(kei, (2, N_EDGES), 0, N_NODES, dtype=jnp.int32)
    edge_attr = jax.random.normal(kea, (N_EDGES, EDGE_FEATURES), jnp.float32)

    layer_params, mlp_params = _init_params(k_params)

    # one-time prep, hoisted out of the per-step path
    graph = prepare_graph(edge_index, N_NODES)
    params = prepare_params(layer_params, mlp_params)

    out = f1_gnn_forward(x, edge_attr, graph, params)
    out = jax.block_until_ready(out)

    with jax.default_matmul_precision("highest"):
        ref = _reference_forward(x, edge_index, edge_attr, layer_params, mlp_params)
    ref = jax.block_until_ready(ref)

    assert out.shape == (N_NODES, 1), out.shape
    assert bool(jnp.all(jnp.isfinite(out)))
    err = float(jnp.max(jnp.abs(out - ref)))
    assert bool(jnp.allclose(out, ref, rtol=5e-3, atol=5e-3)), err

    print("KERNEL_OK")
</pallas_src>

<mosaic_0001>
module attributes {stable_mosaic.version = 11 : i64} {
  func.func @_f1gnn_kernel(%arg0: memref<128x128xf32, #tpu.memory_space<vmem>>, %arg1: memref<128x128xf32, #tpu.memory_space<vmem>>, %arg2: memref<128x128xbf16, #tpu.memory_space<vmem>>, %arg3: memref<128x128xbf16, #tpu.memory_space<vmem>>, %arg4: memref<128x128xbf16, #tpu.memory_space<vmem>>, %arg5: memref<3x128x384xf32, #tpu.memory_space<vmem>>, %arg6: memref<128x384xf32, #tpu.memory_space<vmem>>, %arg7: memref<3x128x128xbf16, #tpu.memory_space<vmem>>, %arg8: memref<3x8x384xf32, #tpu.memory_space<vmem>>, %arg9: memref<128x128xf32, #tpu.memory_space<vmem>>, %arg10: memref<128x128xf32, #tpu.memory_space<vmem>>, %arg11: memref<8x128xf32, #tpu.memory_space<vmem>>, %arg12: memref<128x128xf32, #tpu.memory_space<vmem>>) attributes {dimension_semantics = [], scalar_prefetch = 0 : i64, scratch_operands = 0 : i64, tpu.core_type = #tpu.core_type<tc>} {
    %c0 = arith.constant 0 : index
    %c0_0 = arith.constant 0 : index
    %0 = vector.load %arg2[%c0, %c0_0] : memref<128x128xbf16, #tpu.memory_space<vmem>>, vector<128x128xbf16>
    %1 = arith.extf %0 : vector<128x128xbf16> to vector<128x128xf32>
    %c0_1 = arith.constant 0 : index
    %c0_2 = arith.constant 0 : index
    %2 = vector.load %arg3[%c0_1, %c0_2] : memref<128x128xbf16, #tpu.memory_space<vmem>>, vector<128x128xbf16>
    %3 = arith.extf %2 : vector<128x128xbf16> to vector<128x128xf32>
    %c0_3 = arith.constant 0 : index
    %c0_4 = arith.constant 0 : index
    %4 = vector.load %arg4[%c0_3, %c0_4] : memref<128x128xbf16, #tpu.memory_space<vmem>>, vector<128x128xbf16>
    %5 = arith.extf %4 : vector<128x128xbf16> to vector<128x128xf32>
    %c0_5 = arith.constant 0 : index
    %c0_6 = arith.constant 0 : index
    %6 = vector.load %arg1[%c0_5, %c0_6] : memref<128x128xf32, #tpu.memory_space<vmem>>, vector<128x128xf32>
    %c0_7 = arith.constant 0 : index
    %c0_8 = arith.constant 0 : index
    %7 = vector.load %arg6[%c0_7, %c0_8] : memref<128x384xf32, #tpu.memory_space<vmem>>, vector<128x384xf32>
    %cst = arith.constant dense<0.000000e+00> : vector<128x384xf32>
    %8 = tpu.matmul %6, %7, %cst {dimension_numbers = #tpu.dot_dimension_numbers<[1], [0], [0], [1], [0, 0, 1, 1], [], []>} : vector<128x128xf32>, vector<128x384xf32>, vector<128x384xf32> -> vector<128x384xf32>
    %c0_9 = arith.constant 0 : index
    %c0_10 = arith.constant 0 : index
    %9 = vector.load %arg0[%c0_9, %c0_10] : memref<128x128xf32, #tpu.memory_space<vmem>>, vector<128x128xf32>
    %c0_11 = arith.constant 0 : index
    %c0_12 = arith.constant 0 : index
    %c0_13 = arith.constant 0 : index
    %10 = vector.load %arg8[%c0_11, %c0_12, %c0_13] : memref<3x8x384xf32, #tpu.memory_space<vmem>>, vector<1x8x384xf32>
    %11 = vector.shape_cast %10 : vector<1x8x384xf32> to vector<8x384xf32>
    %12 = vector.extract_strided_slice %11 {offsets = [0, 0], sizes = [1, 384], strides = [1, 1]} : vector<8x384xf32> to vector<1x384xf32>
    %13 = vector.extract_strided_slice %11 {offsets = [1, 0], sizes = [1, 128], strides = [1, 1]} : vector<8x384xf32> to vector<1x128xf32>
    %14 = vector.extract_strided_slice %11 {offsets = [1, 128], sizes = [1, 128], strides = [1, 1]} : vector<8x384xf32> to vector<1x128xf32>
    %15 = vector.extract_strided_slice %11 {offsets = [1, 256], sizes = [1, 128], strides = [1, 1]} : vector<8x384xf32> to vector<1x128xf32>
    %c0_14 = arith.constant 0 : index
    %c0_15 = arith.constant 0 : index
    %c0_16 = arith.constant 0 : index
    %16 = vector.load %arg7[%c0_14, %c0_15, %c0_16] : memref<3x128x128xbf16, #tpu.memory_space<vmem>>, vector<1x128x128xbf16>
    %17 = vector.shape_cast %16 : vector<1x128x128xbf16> to vector<128x128xbf16>
    %18 = arith.extf %17 : vector<128x128xbf16> to vector<128x128xf32>
    %c0_17 = arith.constant 0 : index
    %c0_18 = arith.constant 0 : index
    %c0_19 = arith.constant 0 : index
    %19 = vector.load %arg5[%c0_17, %c0_18, %c0_19] : memref<3x128x384xf32, #tpu.memory_space<vmem>>, vector<1x128x384xf32>
    %20 = vector.shape_cast %19 : vector<1x128x384xf32> to vector<128x384xf32>
    %cst_20 = arith.constant dense<0.000000e+00> : vector<128x384xf32>
    %21 = tpu.matmul %9, %20, %cst_20 {dimension_numbers = #tpu.dot_dimension_numbers<[1], [0], [0], [1], [0, 0, 1, 1], [], []>} : vector<128x128xf32>, vector<128x384xf32>, vector<128x384xf32> -> vector<128x384xf32>
    %22 = vector.broadcast %12 : vector<1x384xf32> to vector<128x384xf32>
    %23 = arith.addf %21, %22 : vector<128x384xf32>
    %24 = vector.extract_strided_slice %23 {offsets = [0, 0], sizes = [128, 256], strides = [1, 1]} : vector<128x384xf32> to vector<128x256xf32>
    %cst_21 = arith.constant dense<0.000000e+00> : vector<128x256xf32>
    %25 = tpu.matmul %1, %24, %cst_21 {dimension_numbers = #tpu.dot_dimension_numbers<[1], [0], [0], [1], [0, 0, 1, 1], [], []>} : vector<128x128xf32>, vector<128x256xf32>, vector<128x256xf32> -> vector<128x256xf32>
    %26 = vector.extract_strided_slice %23 {offsets = [0, 256], sizes = [128, 128], strides = [1, 1]} : vector<128x384xf32> to vector<128x128xf32>
    %cst_22 = arith.constant dense<0.000000e+00> : vector<128x128xf32>
    %27 = tpu.matmul %3, %26, %cst_22 {dimension_numbers = #tpu.dot_dimension_numbers<[1], [0], [0], [1], [0, 0, 1, 1], [], []>} : vector<128x128xf32>, vector<128x128xf32>, vector<128x128xf32> -> vector<128x128xf32>
    %28 = vector.extract_strided_slice %25 {offsets = [0, 0], sizes = [128, 128], strides = [1, 1]} : vector<128x256xf32> to vector<128x128xf32>
    %29 = vector.extract_strided_slice %25 {offsets = [0, 128], sizes = [128, 128], strides = [1, 1]} : vector<128x256xf32> to vector<128x128xf32>
    %30 = arith.addf %29, %27 : vector<128x128xf32>
    %31 = vector.extract_strided_slice %8 {offsets = [0, 0], sizes = [128, 128], strides = [1, 1]} : vector<128x384xf32> to vector<128x128xf32>
    %32 = arith.addf %30, %31 : vector<128x128xf32>
    %33 = vector.broadcast %13 : vector<1x128xf32> to vector<128x128xf32>
    %34 = arith.addf %32, %33 : vector<128x128xf32>
    %cst_23 = arith.constant 0.000000e+00 : f32
    %35 = vector.broadcast %cst_23 : f32 to vector<128x128xf32>
    %36 = arith.cmpf ogt, %34, %35 : vector<128x128xf32>
    %cst_24 = arith.constant 2.000000e-01 : f32
    %37 = vector.broadcast %cst_24 : f32 to vector<128x128xf32>
    %38 = arith.mulf %37, %34 : vector<128x128xf32>
    %39 = arith.select %36, %34, %38 : vector<128x128xi1>, vector<128x128xf32>
    %cst_25 = arith.constant dense<0xFF800000> : vector<128xf32>
    %40 = vector.multi_reduction <maximumf>, %39, %cst_25 [0] : vector<128x128xf32> to vector<128xf32>
    %41 = vector.shape_cast %40 : vector<128xf32> to vector<1x128xf32>
    %42 = vector.broadcast %41 : vector<1x128xf32> to vector<128x128xf32>
    %43 = arith.subf %39, %42 : vector<128x128xf32>
    %44 = math.exp %43 : vector<128x128xf32>
    %cst_26 = arith.constant dense<0.000000e+00> : vector<128x128xf32>
    %45 = tpu.matmul %44, %18, %cst_26 {dimension_numbers = #tpu.dot_dimension_numbers<[1], [0], [0], [1], [0, 0, 1, 1], [], []>} : vector<128x128xf32>, vector<128x128xf32>, vector<128x128xf32> -> vector<128x128xf32>
    %46 = arith.mulf %28, %45 : vector<128x128xf32>
    %47 = tpu.concatenate %46, %45 in 1 : vector<128x128xf32>, vector<128x128xf32> -> vector<128x256xf32>
    %cst_27 = arith.constant dense<0.000000e+00> : vector<128x256xf32>
    %48 = tpu.matmul %5, %47, %cst_27 {dimension_numbers = #tpu.dot_dimension_numbers<[1], [0], [0], [1], [0, 0, 1, 1], [], []>} : vector<128x128xf32>, vector<128x256xf32>, vector<128x256xf32> -> vector<128x256xf32>
    %49 = vector.extract_strided_slice %48 {offsets = [0, 128], sizes = [128, 128], strides = [1, 1]} : vector<128x256xf32> to vector<128x128xf32>
    %cst_28 = arith.constant 0.000000e+00 : f32
    %50 = vector.broadcast %cst_28 : f32 to vector<128x128xf32>
    %51 = arith.cmpf ogt, %49, %50 : vector<128x128xf32>
    %cst_29 = arith.constant 1.000000e+00 : f32
    %52 = vector.broadcast %cst_29 : f32 to vector<128x128xf32>
    %53 = arith.select %51, %49, %52 : vector<128x128xi1>, vector<128x128xf32>
    %54 = vector.extract_strided_slice %48 {offsets = [0, 0], sizes = [128, 128], strides = [1, 1]} : vector<128x256xf32> to vector<128x128xf32>
    %55 = arith.divf %54, %53 : vector<128x128xf32>
    %56 = vector.broadcast %14 : vector<1x128xf32> to vector<128x128xf32>
    %57 = arith.mulf %55, %56 : vector<128x128xf32>
    %58 = vector.broadcast %15 : vector<1x128xf32> to vector<128x128xf32>
    %59 = arith.addf %57, %58 : vector<128x128xf32>
    %cst_30 = arith.constant 0.000000e+00 : f32
    %60 = vector.broadcast %cst_30 : f32 to vector<128x128xf32>
    %61 = arith.maximumf %59, %60 : vector<128x128xf32>
    %c1 = arith.constant 1 : index
    %c0_31 = arith.constant 0 : index
    %c0_32 = arith.constant 0 : index
    %62 = vector.load %arg8[%c1, %c0_31, %c0_32] : memref<3x8x384xf32, #tpu.memory_space<vmem>>, vector<1x8x384xf32>
    %63 = vector.shape_cast %62 : vector<1x8x384xf32> to vector<8x384xf32>
    %64 = vector.extract_strided_slice %63 {offsets = [0, 0], sizes = [1, 384], strides = [1, 1]} : vector<8x384xf32> to vector<1x384xf32>
    %65 = vector.extract_strided_slice %63 {offsets = [1, 0], sizes = [1, 128], strides = [1, 1]} : vector<8x384xf32> to vector<1x128xf32>
    %66 = vector.extract_strided_slice %63 {offsets = [1, 128], sizes = [1, 128], strides = [1, 1]} : vector<8x384xf32> to vector<1x128xf32>
    %67 = vector.extract_strided_slice %63 {offsets = [1, 256], sizes = [1, 128], strides = [1, 1]} : vector<8x384xf32> to vector<1x128xf32>
    %c1_33 = arith.constant 1 : index
    %c0_34 = arith.constant 0 : index
    %c0_35 = arith.constant 0 : index
    %68 = vector.load %arg7[%c1_33, %c0_34, %c0_35] : memref<3x128x128xbf16, #tpu.memory_space<vmem>>, vector<1x128x128xbf16>
    %69 = vector.shape_cast %68 : vector<1x128x128xbf16> to vector<128x128xbf16>
    %70 = arith.extf %69 : vector<128x128xbf16> to vector<128x128xf32>
    %c1_36 = arith.constant 1 : index
    %c0_37 = arith.constant 0 : index
    %c0_38 = arith.constant 0 : index
    %71 = vector.load %arg5[%c1_36, %c0_37, %c0_38] : memref<3x128x384xf32, #tpu.memory_space<vmem>>, vector<1x128x384xf32>
    %72 = vector.shape_cast %71 : vector<1x128x384xf32> to vector<128x384xf32>
    %cst_39 = arith.constant dense<0.000000e+00> : vector<128x384xf32>
    %73 = tpu.matmul %61, %72, %cst_39 {dimension_numbers = #tpu.dot_dimension_numbers<[1], [0], [0], [1], [0, 0, 1, 1], [], []>} : vector<128x128xf32>, vector<128x384xf32>, vector<128x384xf32> -> vector<128x384xf32>
    %74 = vector.broadcast %64 : vector<1x384xf32> to vector<128x384xf32>
    %75 = arith.addf %73, %74 : vector<128x384xf32>
    %76 = vector.extract_strided_slice %75 {offsets = [0, 0], sizes = [128, 256], strides = [1, 1]} : vector<128x384xf32> to vector<128x256xf32>
    %cst_40 = arith.constant dense<0.000000e+00> : vector<128x256xf32>
    %77 = tpu.matmul %1, %76, %cst_40 {dimension_numbers = #tpu.dot_dimension_numbers<[1], [0], [0], [1], [0, 0, 1, 1], [], []>} : vector<128x128xf32>, vector<128x256xf32>, vector<128x256xf32> -> vector<128x256xf32>
    %78 = vector.extract_strided_slice %75 {offsets = [0, 256], sizes = [128, 128], strides = [1, 1]} : vector<128x384xf32> to vector<128x128xf32>
    %cst_41 = arith.constant dense<0.000000e+00> : vector<128x128xf32>
    %79 = tpu.matmul %3, %78, %cst_41 {dimension_numbers = #tpu.dot_dimension_numbers<[1], [0], [0], [1], [0, 0, 1, 1], [], []>} : vector<128x128xf32>, vector<128x128xf32>, vector<128x128xf32> -> vector<128x128xf32>
    %80 = vector.extract_strided_slice %77 {offsets = [0, 0], sizes = [128, 128], strides = [1, 1]} : vector<128x256xf32> to vector<128x128xf32>
    %81 = vector.extract_strided_slice %77 {offsets = [0, 128], sizes = [128, 128], strides = [1, 1]} : vector<128x256xf32> to vector<128x128xf32>
    %82 = arith.addf %81, %79 : vector<128x128xf32>
    %83 = vector.extract_strided_slice %8 {offsets = [0, 128], sizes = [128, 128], strides = [1, 1]} : vector<128x384xf32> to vector<128x128xf32>
    %84 = arith.addf %82, %83 : vector<128x128xf32>
    %85 = vector.broadcast %65 : vector<1x128xf32> to vector<128x128xf32>
    %86 = arith.addf %84, %85 : vector<128x128xf32>
    %cst_42 = arith.constant 0.000000e+00 : f32
    %87 = vector.broadcast %cst_42 : f32 to vector<128x128xf32>
    %88 = arith.cmpf ogt, %86, %87 : vector<128x128xf32>
    %cst_43 = arith.constant 2.000000e-01 : f32
    %89 = vector.broadcast %cst_43 : f32 to vector<128x128xf32>
    %90 = arith.mulf %89, %86 : vector<128x128xf32>
    %91 = arith.select %88, %86, %90 : vector<128x128xi1>, vector<128x128xf32>
    %cst_44 = arith.constant dense<0xFF800000> : vector<128xf32>
    %92 = vector.multi_reduction <maximumf>, %91, %cst_44 [0] : vector<128x128xf32> to vector<128xf32>
    %93 = vector.shape_cast %92 : vector<128xf32> to vector<1x128xf32>
    %94 = vector.broadcast %93 : vector<1x128xf32> to vector<128x128xf32>
    %95 = arith.subf %91, %94 : vector<128x128xf32>
    %96 = math.exp %95 : vector<128x128xf32>
    %cst_45 = arith.constant dense<0.000000e+00> : vector<128x128xf32>
    %97 = tpu.matmul %96, %70, %cst_45 {dimension_numbers = #tpu.dot_dimension_numbers<[1], [0], [0], [1], [0, 0, 1, 1], [], []>} : vector<128x128xf32>, vector<128x128xf32>, vector<128x128xf32> -> vector<128x128xf32>
    %98 = arith.mulf %80, %97 : vector<128x128xf32>
    %99 = tpu.concatenate %98, %97 in 1 : vector<128x128xf32>, vector<128x128xf32> -> vector<128x256xf32>
    %cst_46 = arith.constant dense<0.000000e+00> : vector<128x256xf32>
    %100 = tpu.matmul %5, %99, %cst_46 {dimension_numbers = #tpu.dot_dimension_numbers<[1], [0], [0], [1], [0, 0, 1, 1], [], []>} : vector<128x128xf32>, vector<128x256xf32>, vector<128x256xf32> -> vector<128x256xf32>
    %101 = vector.extract_strided_slice %100 {offsets = [0, 128], sizes = [128, 128], strides = [1, 1]} : vector<128x256xf32> to vector<128x128xf32>
    %cst_47 = arith.constant 0.000000e+00 : f32
    %102 = vector.broadcast %cst_47 : f32 to vector<128x128xf32>
    %103 = arith.cmpf ogt, %101, %102 : vector<128x128xf32>
    %cst_48 = arith.constant 1.000000e+00 : f32
    %104 = vector.broadcast %cst_48 : f32 to vector<128x128xf32>
    %105 = arith.select %103, %101, %104 : vector<128x128xi1>, vector<128x128xf32>
    %106 = vector.extract_strided_slice %100 {offsets = [0, 0], sizes = [128, 128], strides = [1, 1]} : vector<128x256xf32> to vector<128x128xf32>
    %107 = arith.divf %106, %105 : vector<128x128xf32>
    %108 = vector.broadcast %66 : vector<1x128xf32> to vector<128x128xf32>
    %109 = arith.mulf %107, %108 : vector<128x128xf32>
    %110 = vector.broadcast %67 : vector<1x128xf32> to vector<128x128xf32>
    %111 = arith.addf %109, %110 : vector<128x128xf32>
    %cst_49 = arith.constant 0.000000e+00 : f32
    %112 = vector.broadcast %cst_49 : f32 to vector<128x128xf32>
    %113 = arith.maximumf %111, %112 : vector<128x128xf32>
    %c2 = arith.constant 2 : index
    %c0_50 = arith.constant 0 : index
    %c0_51 = arith.constant 0 : index
    %114 = vector.load %arg8[%c2, %c0_50, %c0_51] : memref<3x8x384xf32, #tpu.memory_space<vmem>>, vector<1x8x384xf32>
    %115 = vector.shape_cast %114 : vector<1x8x384xf32> to vector<8x384xf32>
    %116 = vector.extract_strided_slice %115 {offsets = [0, 0], sizes = [1, 384], strides = [1, 1]} : vector<8x384xf32> to vector<1x384xf32>
    %117 = vector.extract_strided_slice %115 {offsets = [1, 0], sizes = [1, 128], strides = [1, 1]} : vector<8x384xf32> to vector<1x128xf32>
    %118 = vector.extract_strided_slice %115 {offsets = [1, 128], sizes = [1, 128], strides = [1, 1]} : vector<8x384xf32> to vector<1x128xf32>
    %119 = vector.extract_strided_slice %115 {offsets = [1, 256], sizes = [1, 128], strides = [1, 1]} : vector<8x384xf32> to vector<1x128xf32>
    %c2_52 = arith.constant 2 : index
    %c0_53 = arith.constant 0 : index
    %c0_54 = arith.constant 0 : index
    %120 = vector.load %arg7[%c2_52, %c0_53, %c0_54] : memref<3x128x128xbf16, #tpu.memory_space<vmem>>, vector<1x128x128xbf16>
    %121 = vector.shape_cast %120 : vector<1x128x128xbf16> to vector<128x128xbf16>
    %122 = arith.extf %121 : vector<128x128xbf16> to vector<128x128xf32>
    %c2_55 = arith.constant 2 : index
    %c0_56 = arith.constant 0 : index
    %c0_57 = arith.constant 0 : index
    %123 = vector.load %arg5[%c2_55, %c0_56, %c0_57] : memref<3x128x384xf32, #tpu.memory_space<vmem>>, vector<1x128x384xf32>
    %124 = vector.shape_cast %123 : vector<1x128x384xf32> to vector<128x384xf32>
    %cst_58 = arith.constant dense<0.000000e+00> : vector<128x384xf32>
    %125 = tpu.matmul %113, %124, %cst_58 {dimension_numbers = #tpu.dot_dimension_numbers<[1], [0], [0], [1], [0, 0, 1, 1], [], []>} : vector<128x128xf32>, vector<128x384xf32>, vector<128x384xf32> -> vector<128x384xf32>
    %126 = vector.broadcast %116 : vector<1x384xf32> to vector<128x384xf32>
    %127 = arith.addf %125, %126 : vector<128x384xf32>
    %128 = vector.extract_strided_slice %127 {offsets = [0, 0], sizes = [128, 256], strides = [1, 1]} : vector<128x384xf32> to vector<128x256xf32>
    %cst_59 = arith.constant dense<0.000000e+00> : vector<128x256xf32>
    %129 = tpu.matmul %1, %128, %cst_59 {dimension_numbers = #tpu.dot_dimension_numbers<[1], [0], [0], [1], [0, 0, 1, 1], [], []>} : vector<128x128xf32>, vector<128x256xf32>, vector<128x256xf32> -> vector<128x256xf32>
    %130 = vector.extract_strided_slice %127 {offsets = [0, 256], sizes = [128, 128], strides = [1, 1]} : vector<128x384xf32> to vector<128x128xf32>
    %cst_60 = arith.constant dense<0.000000e+00> : vector<128x128xf32>
    %131 = tpu.matmul %3, %130, %cst_60 {dimension_numbers = #tpu.dot_dimension_numbers<[1], [0], [0], [1], [0, 0, 1, 1], [], []>} : vector<128x128xf32>, vector<128x128xf32>, vector<128x128xf32> -> vector<128x128xf32>
    %132 = vector.extract_strided_slice %129 {offsets = [0, 0], sizes = [128, 128], strides = [1, 1]} : vector<128x256xf32> to vector<128x128xf32>
    %133 = vector.extract_strided_slice %129 {offsets = [0, 128], sizes = [128, 128], strides = [1, 1]} : vector<128x256xf32> to vector<128x128xf32>
    %134 = arith.addf %133, %131 : vector<128x128xf32>
    %135 = vector.extract_strided_slice %8 {offsets = [0, 256], sizes = [128, 128], strides = [1, 1]} : vector<128x384xf32> to vector<128x128xf32>
    %136 = arith.addf %134, %135 : vector<128x128xf32>
    %137 = vector.broadcast %117 : vector<1x128xf32> to vector<128x128xf32>
    %138 = arith.addf %136, %137 : vector<128x128xf32>
    %cst_61 = arith.constant 0.000000e+00 : f32
    %139 = vector.broadcast %cst_61 : f32 to vector<128x128xf32>
    %140 = arith.cmpf ogt, %138, %139 : vector<128x128xf32>
    %cst_62 = arith.constant 2.000000e-01 : f32
    %141 = vector.broadcast %cst_62 : f32 to vector<128x128xf32>
    %142 = arith.mulf %141, %138 : vector<128x128xf32>
    %143 = arith.select %140, %138, %142 : vector<128x128xi1>, vector<128x128xf32>
    %cst_63 = arith.constant dense<0xFF800000> : vector<128xf32>
    %144 = vector.multi_reduction <maximumf>, %143, %cst_63 [0] : vector<128x128xf32> to vector<128xf32>
    %145 = vector.shape_cast %144 : vector<128xf32> to vector<1x128xf32>
    %146 = vector.broadcast %145 : vector<1x128xf32> to vector<128x128xf32>
    %147 = arith.subf %143, %146 : vector<128x128xf32>
    %148 = math.exp %147 : vector<128x128xf32>
    %cst_64 = arith.constant dense<0.000000e+00> : vector<128x128xf32>
    %149 = tpu.matmul %148, %122, %cst_64 {dimension_numbers = #tpu.dot_dimension_numbers<[1], [0], [0], [1], [0, 0, 1, 1], [], []>} : vector<128x128xf32>, vector<128x128xf32>, vector<128x128xf32> -> vector<128x128xf32>
    %150 = arith.mulf %132, %149 : vector<128x128xf32>
    %151 = tpu.concatenate %150, %149 in 1 : vector<128x128xf32>, vector<128x128xf32> -> vector<128x256xf32>
    %cst_65 = arith.constant dense<0.000000e+00> : vector<128x256xf32>
    %152 = tpu.matmul %5, %151, %cst_65 {dimension_numbers = #tpu.dot_dimension_numbers<[1], [0], [0], [1], [0, 0, 1, 1], [], []>} : vector<128x128xf32>, vector<128x256xf32>, vector<128x256xf32> -> vector<128x256xf32>
    %153 = vector.extract_strided_slice %152 {offsets = [0, 128], sizes = [128, 128], strides = [1, 1]} : vector<128x256xf32> to vector<128x128xf32>
    %cst_66 = arith.constant 0.000000e+00 : f32
    %154 = vector.broadcast %cst_66 : f32 to vector<128x128xf32>
    %155 = arith.cmpf ogt, %153, %154 : vector<128x128xf32>
    %cst_67 = arith.constant 1.000000e+00 : f32
    %156 = vector.broadcast %cst_67 : f32 to vector<128x128xf32>
    %157 = arith.select %155, %153, %156 : vector<128x128xi1>, vector<128x128xf32>
    %158 = vector.extract_strided_slice %152 {offsets = [0, 0], sizes = [128, 128], strides = [1, 1]} : vector<128x256xf32> to vector<128x128xf32>
    %159 = arith.divf %158, %157 : vector<128x128xf32>
    %160 = vector.broadcast %118 : vector<1x128xf32> to vector<128x128xf32>
    %161 = arith.mulf %159, %160 : vector<128x128xf32>
    %162 = vector.broadcast %119 : vector<1x128xf32> to vector<128x128xf32>
    %163 = arith.addf %161, %162 : vector<128x128xf32>
    %cst_68 = arith.constant 0.000000e+00 : f32
    %164 = vector.broadcast %cst_68 : f32 to vector<128x128xf32>
    %165 = arith.maximumf %163, %164 : vector<128x128xf32>
    %c0_69 = arith.constant 0 : index
    %c0_70 = arith.constant 0 : index
    %166 = vector.load %arg9[%c0_69, %c0_70] : memref<128x128xf32, #tpu.memory_space<vmem>>, vector<128x128xf32>
    %cst_71 = arith.constant dense<0.000000e+00> : vector<128x128xf32>
    %167 = tpu.matmul %165, %166, %cst_71 {dimension_numbers = #tpu.dot_dimension_numbers<[1], [0], [0], [1], [0, 0, 1, 1], [], []>} : vector<128x128xf32>, vector<128x128xf32>, vector<128x128xf32> -> vector<128x128xf32>
    %c0_72 = arith.constant 0 : index
    %c0_73 = arith.constant 0 : index
    %168 = vector.load %arg11[%c0_72, %c0_73] : memref<8x128xf32, #tpu.memory_space<vmem>>, vector<1x128xf32>
    %169 = vector.broadcast %168 : vector<1x128xf32> to vector<128x128xf32>
    %170 = arith.addf %167, %169 : vector<128x128xf32>
    %cst_74 = arith.constant 0.000000e+00 : f32
    %171 = vector.broadcast %cst_74 : f32 to vector<128x128xf32>
    %172 = arith.maximumf %170, %171 : vector<128x128xf32>
    %c0_75 = arith.constant 0 : index
    %c0_76 = arith.constant 0 : index
    %173 = vector.load %arg10[%c0_75, %c0_76] : memref<128x128xf32, #tpu.memory_space<vmem>>, vector<128x128xf32>
    %cst_77 = arith.constant dense<0.000000e+00> : vector<128x128xf32>
    %174 = tpu.matmul %172, %173, %cst_77 {dimension_numbers = #tpu.dot_dimension_numbers<[1], [0], [0], [1], [0, 0, 1, 1], [], []>} : vector<128x128xf32>, vector<128x128xf32>, vector<128x128xf32> -> vector<128x128xf32>
    %c1_78 = arith.constant 1 : index
    %c0_79 = arith.constant 0 : index
    %175 = vector.load %arg11[%c1_78, %c0_79] : memref<8x128xf32, #tpu.memory_space<vmem>>, vector<1x128xf32>
    %176 = vector.broadcast %175 : vector<1x128xf32> to vector<128x128xf32>
    %177 = arith.addf %174, %176 : vector<128x128xf32>
    %c0_80 = arith.constant 0 : index
    %c0_81 = arith.constant 0 : index
    %178 = vector.load %arg12[%c0_80, %c0_81] : memref<128x128xf32, #tpu.memory_space<vmem>>, vector<128x128xf32>
    tpu.vector_store %arg12[%c0_80, %c0_81], %177 {strides = array<i32>} : memref<128x128xf32, #tpu.memory_space<vmem>>, vector<128x128xf32>,
    return
  }
}

</mosaic_0001>

<bundles_post_ra>
// kernel: f1_gnn_forward.1
= control target key start
LH: loop header
LB: loop body
LE: loop exit
PB: predicated region body
PF: predicated region fallthrough
CT: control target
= control target key end

     0   :  { %17 = vsyncpa [#allocation3], 0  ;;  %s6871_s0 = inlined_call_operand.vmem [shape: f32[128,128], index: 0, kind: input, shape index: {}]   ;;  %s6872_s1 = inlined_call_operand.vmem [shape: f32[128,128], index: 1, kind: input, shape index: {}]   ;;  %s6873_s2 = inlined_call_operand.vmem [shape: bf16[128,128], index: 2, kind: input, shape index: {}]   ;;  %s6874_s3 = inlined_call_operand.hbm [shape: bf16[128,128], index: 3, kind: input, shape index: {}]   ;;  %s6875_s4 = inlined_call_operand.hbm [shape: bf16[128,128], index: 4, kind: input, shape index: {}]   ;;  %s6876_s5 = inlined_call_operand.hbm [shape: f32[3,128,384], index: 5, kind: input, shape index: {}]   ;;  %s6877_s6 = inlined_call_operand.vmem [shape: f32[128,384], index: 6, kind: input, shape index: {}]   ;;  %s6878_s7 = inlined_call_operand.hbm [shape: bf16[3,128,128], index: 7, kind: input, shape index: {}]   ;;  %s6879_s8 = inlined_call_operand.hbm [shape: f32[3,8,384], index: 8, kind: input, shape index: {}]   ;;  %s6880_s9 = inlined_call_operand.hbm [shape: f32[128,128], index: 9, kind: input, shape index: {}]   ;;  %s6881_s10 = inlined_call_operand.hbm [shape: f32[128,128], index: 10, kind: input, shape index: {}]   ;;  %s6882_s11 = inlined_call_operand.hbm [shape: f32[8,128], index: 11, kind: input, shape index: {}]   ;;  %s6883_s12 = inlined_call_operand.vmem [shape: f32[128,128], index: 12, kind: output, shape index: {}]  }
   0x1   :  { %18 = vsyncpa [#allocation5], 0 }
   0x2   :  { %19 = vsyncpa [#allocation8], 0 }
   0x3   :  { %20 = vsyncpa [#allocation11], 0 }
   0x4   :  { %21 = vsyncpa [#allocation14], 0  ;;  %s45_s23 = sshll.u32 %s6875_s4, 4  ;;  %s4923_s24 = smov [#allocation4]   ;;  %s46_s23 = int_to_ptr.hbm [resolvable:$true] %s45_s23 }
   0x5   :  { %s47_s25 = sshll.u32 %s4923_s24, 4  ;;  %s73_s28 = sshll.u32 %s6878_s7, 4  ;;  %s48_s25 = int_to_ptr.vmem [resolvable:$true] %s47_s25  ;;  %s74_s28 = int_to_ptr.hbm [resolvable:$true] %s73_s28 }
   0x6   :  { %s4924_s29 = smov 64   ;;  %s4925_s30 = smov 4  }
   0x7   :  { %53 = dma.hbm_to_vmem [thread:$0]  %s46_s23, 1024, %s48_s25, [#allocation5], %s4924_s29, %s4924_s29, %s4925_s30  }
   0x8   :  { %s4926_s13 = smov [#allocation7]   ;;  %s99_s17 = sshll.u32 %s6880_s9, 4  ;;  %s100_s17 = int_to_ptr.hbm [resolvable:$true] %s99_s17 }
   0x9   :  { %s75_s14 = sshll.u32 %s4926_s13, 4  ;;  %s4927_s4 = smov [#allocation10]   ;;  %s76_s14 = int_to_ptr.vmem [resolvable:$true] %s75_s14 }
   0xa   :  { %81 = dma.hbm_to_vmem [thread:$0]  %s74_s28, 3072, %s76_s14, [#allocation8], %s4924_s29, %s4924_s29, %s4925_s30  }
   0xb   :  { %s101_s18 = sshll.u32 %s4927_s4, 4  ;;  %s32_s7 = sshll.u32 %s6874_s3, 4  ;;  %s102_s18 = int_to_ptr.vmem [resolvable:$true] %s101_s18  ;;  %s33_s7 = int_to_ptr.hbm [resolvable:$true] %s32_s7 }
   0xc   :  { %s4928_s21 = smov 128   ;;  %s4929_s22 = smov 8  }
   0xd   :  { %107 = dma.hbm_to_vmem [thread:$0]  %s100_s17, 2048, %s102_s18, [#allocation11], %s4928_s21, %s4928_s21, %s4929_s22  }
   0xe   :  { %s4930_s23 = smov [#allocation2]   ;;  %s58_s26 = sshll.u32 %s6876_s5, 4  ;;  %s59_s26 = int_to_ptr.hbm [resolvable:$true] %s58_s26 }
   0xf   :  { %s34_s24 = sshll.u32 %s4930_s23, 4  ;;  %s4931_s27 = smov [#allocation6]   ;;  %s35_s24 = int_to_ptr.vmem [resolvable:$true] %s34_s24 }
  0x10   :  { %40 = dma.hbm_to_vmem [thread:$0]  %s33_s7, 1024, %s35_s24, [#allocation3], %s4924_s29, %s4924_s29, %s4925_s30  }
  0x11   :  { %s60_s28 = sshll.u32 %s4931_s27, 4  ;;  %s86_s14 = sshll.u32 %s6879_s8, 4  ;;  %s61_s28 = int_to_ptr.vmem [resolvable:$true] %s60_s28  ;;  %s87_s14 = int_to_ptr.hbm [resolvable:$true] %s86_s14 }
  0x12   :  { %s4932_s15 = smov 384   ;;  %s4933_s16 = smov 24  }
  0x13   :  { %66 = dma.hbm_to_vmem [thread:$0]  %s59_s26, 18432, %s61_s28, [#allocation5], %s4932_s15, %s4932_s15, %s4933_s16  }
  0x14   :  { %s4934_s17 = smov [#allocation9]   ;;  %s112_s5 = sshll.u32 %s6881_s10, 4  ;;  %s113_s5 = int_to_ptr.hbm [resolvable:$true] %s112_s5 }
  0x15   :  { %s88_s4 = sshll.u32 %s4934_s17, 4  ;;  %s126_s20 = sshll.u32 %s6882_s11, 4  ;;  %s89_s4 = int_to_ptr.vmem [resolvable:$true] %s88_s4  ;;  %s127_s20 = int_to_ptr.hbm [resolvable:$true] %s126_s20 }
  0x16   :  { %94 = dma.hbm_to_vmem [thread:$0]  %s87_s14, 1152, %s89_s4, [#allocation8], %s4932_s15, %s4932_s15, %s4933_s16  }
  0x17   :  { %s4935_s7 = smov [#allocation12]   ;;  %s4936_s8 = smov [#allocation13]  }
  0x18   :  { %s114_s23 = sshll.u32 %s4935_s7, 4  ;;  %s128_s24 = sshll.u32 %s4936_s8, 4  ;;  %s115_s23 = int_to_ptr.vmem [resolvable:$true] %s114_s23  ;;  %s129_s24 = int_to_ptr.vmem [resolvable:$true] %s128_s24 }
  0x19   :  { %120 = dma.hbm_to_vmem [thread:$0]  %s113_s5, 2048, %s115_s23, [#allocation11], %s4928_s21, %s4928_s21, %s4929_s22  }
  0x1a   :  { %131 = dma.hbm_to_vmem [thread:$0]  %s127_s20, 128, %s129_s24, [#allocation14]  }
  0x1b   :  { %4913 = dma.done.wait [#allocation3], 1024  }
  0x1c   :  { %4914 = vsyncadd [#allocation3], 4294966272 }
  0x1d   :  { %4915 = dma.done.wait [#allocation5], 19456  }
  0x1e   :  { %4916 = vsyncadd [#allocation5], 4294947840 }
  0x1f   :  { %4917 = dma.done.wait [#allocation8], 4224  }
  0x20   :  { %4918 = vsyncadd [#allocation8], 4294963072 }
  0x21   :  { %4919 = dma.done.wait [#allocation11], 4096  }
  0x22   :  { %4920 = vsyncadd [#allocation11], 4294963200 }
  0x23   :  { %4921 = dma.done.wait [#allocation14], 128  }
  0x24   :  { %4922 = vsyncadd [#allocation14], 4294967168  ;;  %v321_v0 = vld [vmem:[%s6877_s6 + $0x168] sm:$0xff]  ;;  %v322_v1 = vld [vmem:[%s6877_s6 + $0x170] sm:$0xff] }
  0x25   :  { %v318_v2 = vld [vmem:[%s6877_s6 + $0x150] sm:$0xff]  ;;  %324 = vmatpush.msra.mxu0 %v321_v0  ;;  %389 = vmatpush.msra.mxu1 %v322_v1  ;;  %v319_v3 = vld [vmem:[%s6877_s6 + $0x158] sm:$0xff]  ;;  %v316_v5 = vld [vmem:[%s6877_s6 + $0x140] sm:$0xff] }
  0x26   :  { %v315_v4 = vld [vmem:[%s6877_s6 + $0x138] sm:$0xff]  ;;  %v312_v6 = vld [vmem:[%s6877_s6 + $0x120] sm:$0xff]  ;;  %v313_v7 = vld [vmem:[%s6877_s6 + $0x128] sm:$0xff] }
  0x27   :  { %325 = vmatpush.msra.mxu0 %v318_v2  ;;  %390 = vmatpush.msra.mxu1 %v319_v3  ;;  %v309_v8 = vld [vmem:[%s6877_s6 + $0x108] sm:$0xff]  ;;  %v310_v9 = vld [vmem:[%s6877_s6 + $0x110] sm:$0xff]  ;;  %v307_v11 = vld [vmem:[%s6877_s6 + $0xf8] sm:$0xff] }
  0x28   :  { %v306_v10 = vld [vmem:[%s6877_s6 + $0xf0] sm:$0xff]  ;;  %v303_v12 = vld [vmem:[%s6877_s6 + $0xd8] sm:$0xff]  ;;  %v304_v13 = vld [vmem:[%s6877_s6 + $0xe0] sm:$0xff] }
  0x29   :  { %326 = vmatpush.msra.mxu0 %v315_v4  ;;  %391 = vmatpush.msra.mxu1 %v316_v5  ;;  %v300_v14 = vld [vmem:[%s6877_s6 + $0xc0] sm:$0xff]  ;;  %v301_v15 = vld [vmem:[%s6877_s6 + $0xc8] sm:$0xff]  ;;  %v298_v17 = vld [vmem:[%s6877_s6 + $0xb0] sm:$0xff] }
  0x2a   :  { %v297_v16 = vld [vmem:[%s6877_s6 + $0xa8] sm:$0xff]  ;;  %v294_v18 = vld [vmem:[%s6877_s6 + $0x90] sm:$0xff]  ;;  %v295_v19 = vld [vmem:[%s6877_s6 + $0x98] sm:$0xff] }
  0x2b   :  { %327 = vmatpush.msra.mxu0 %v312_v6  ;;  %392 = vmatpush.msra.mxu1 %v313_v7  ;;  %v291_v20 = vld [vmem:[%s6877_s6 + $0x78] sm:$0xff]  ;;  %v292_v21 = vld [vmem:[%s6877_s6 + $0x80] sm:$0xff]  ;;  %v289_v23 = vld [vmem:[%s6877_s6 + $0x68] sm:$0xff] }
  0x2c   :  { %v288_v22 = vld [vmem:[%s6877_s6 + $0x60] sm:$0xff]  ;;  %v285_v24 = vld [vmem:[%s6877_s6 + $0x48] sm:$0xff]  ;;  %v286_v25 = vld [vmem:[%s6877_s6 + $0x50] sm:$0xff] }
  0x2d   :  { %328 = vmatpush.msra.mxu0 %v309_v8  ;;  %393 = vmatpush.msra.mxu1 %v310_v9  ;;  %v282_v26 = vld [vmem:[%s6877_s6 + $0x30] sm:$0xff]  ;;  %v283_v27 = vld [vmem:[%s6877_s6 + $0x38] sm:$0xff]  ;;  %v280_v29 = vld [vmem:[%s6877_s6 + $0x20] sm:$0xff] }
  0x2e   :  { %v279_v28 = vld [vmem:[%s6877_s6 + $0x18] sm:$0xff]  ;;  %v276_v30 = vld [vmem:[%s6877_s6] sm:$0xff]  ;;  %v277_v31 = vld [vmem:[%s6877_s6 + $0x8] sm:$0xff] }
  0x2f   :  { %329 = vmatpush.msra.mxu0 %v306_v10  ;;  %394 = vmatpush.msra.mxu1 %v307_v11  ;;  %v5131_v32 = vld [vmem:[%s6872_s1] sm:$0xff]  ;;  %v5138_v33 = vld [vmem:[%s6872_s1 + $0x8] sm:$0xff]  ;;  %v5145_v34 = vld [vmem:[%s6872_s1 + $0x10] sm:$0xff] }
  0x30   :  { %v5152_v35 = vld [vmem:[%s6872_s1 + $0x18] sm:$0xff]  ;;  %v5159_v36 = vld [vmem:[%s6872_s1 + $0x20] sm:$0xff]  ;;  %v5166_v37 = vld [vmem:[%s6872_s1 + $0x28] sm:$0xff] }
  0x31   :  { %330 = vmatpush.msra.mxu0 %v303_v12  ;;  %395 = vmatpush.msra.mxu1 %v304_v13  ;;  %v5173_v38 = vld [vmem:[%s6872_s1 + $0x30] sm:$0xff]  ;;  %v5180_v39 = vld [vmem:[%s6872_s1 + $0x38] sm:$0xff]  ;;  %v5187_v40 = vld [vmem:[%s6872_s1 + $0x40] sm:$0xff] }
  0x32   :  { %v616_v41 = vld [vmem:[#allocation6 + $0x170] sm:$0xff]  ;;  %v617_v42 = vld [vmem:[#allocation6 + $0x178] sm:$0xff]  ;;  %v615_v43 = vld [vmem:[#allocation6 + $0x168] sm:$0xff] }
  0x33   :  { %331 = vmatpush.msra.mxu0 %v300_v14  ;;  %396 = vmatpush.msra.mxu1 %v301_v15  ;;  %v613_v44 = vld [vmem:[#allocation6 + $0x158] sm:$0xff]  ;;  %v614_v45 = vld [vmem:[#allocation6 + $0x160] sm:$0xff]  ;;  %v612_v46 = vld [vmem:[#allocation6 + $0x150] sm:$0xff] }
  0x34   :  { %621 = vmatpush.msra.mxu3 %v615_v43  ;;  %v610_v47 = vld [vmem:[#allocation6 + $0x140] sm:$0xff]  ;;  %v611_v48 = vld [vmem:[#allocation6 + $0x148] sm:$0xff]  ;;  %v609_v49 = vld [vmem:[#allocation6 + $0x138] sm:$0xff] }
  0x35   :  { %332 = vmatpush.msra.mxu0 %v297_v16  ;;  %397 = vmatpush.msra.mxu1 %v298_v17  ;;  %v607_v50 = vld [vmem:[#allocation6 + $0x128] sm:$0xff]  ;;  %v608_v51 = vld [vmem:[#allocation6 + $0x130] sm:$0xff]  ;;  %v606_v53 = vld [vmem:[#allocation6 + $0x120] sm:$0xff] }
  0x36   :  { %622 = vmatpush.msra.mxu3 %v612_v46  ;;  %v5194_v52 = vld [vmem:[%s6872_s1 + $0x48] sm:$0xff]  ;;  %v604_v54 = vld [vmem:[#allocation6 + $0x110] sm:$0xff]  ;;  %v605_v55 = vld [vmem:[#allocation6 + $0x118] sm:$0xff] }
  0x37   :  { %333 = vmatpush.msra.mxu0 %v294_v18  ;;  %398 = vmatpush.msra.mxu1 %v295_v19  ;;  %v603_v56 = vld [vmem:[#allocation6 + $0x108] sm:$0xff]  ;;  %v601_v57 = vld [vmem:[#allocation6 + $0xf8] sm:$0xff]  ;;  %v602_v58 = vld [vmem:[#allocation6 + $0x100] sm:$0xff] }
  0x38   :  { %623 = vmatpush.msra.mxu3 %v609_v49  ;;  %v600_v59 = vld [vmem:[#allocation6 + $0xf0] sm:$0xff]  ;;  %v598_v60 = vld [vmem:[#allocation6 + $0xe0] sm:$0xff]  ;;  %v599_v61 = vld [vmem:[#allocation6 + $0xe8] sm:$0xff] }
  0x39   :  { %334 = vmatpush.msra.mxu0 %v291_v20  ;;  %399 = vmatpush.msra.mxu1 %v292_v21  ;;  %v597_v62 = vld [vmem:[#allocation6 + $0xd8] sm:$0xff]  ;;  %v595_v63 = vld [vmem:[#allocation6 + $0xc8] sm:$0xff]  ;;  %v5201_v0 = vld [vmem:[%s6872_s1 + $0x50] sm:$0xff] }
  0x3a   :  { %624 = vmatpush.msra.mxu3 %v606_v53  ;;  %v596_v1 = vld [vmem:[#allocation6 + $0xd0] sm:$0xff]  ;;  %v594_v2 = vld [vmem:[#allocation6 + $0xc0] sm:$0xff]  ;;  %v593_v4 = vld [vmem:[#allocation6 + $0xb8] sm:$0xff] }
  0x3b   :  { %335 = vmatpush.msra.mxu0 %v288_v22  ;;  %400 = vmatpush.msra.mxu1 %v289_v23  ;;  %v592_v3 = vld [vmem:[#allocation6 + $0xb0] sm:$0xff]  ;;  %v591_v5 = vld [vmem:[#allocation6 + $0xa8] sm:$0xff]  ;;  %v589_v6 = vld [vmem:[#allocation6 + $0x98] sm:$0xff] }
  0x3c   :  { %625 = vmatpush.msra.mxu3 %v603_v56  ;;  %v590_v7 = vld [vmem:[#allocation6 + $0xa0] sm:$0xff]  ;;  %v588_v8 = vld [vmem:[#allocation6 + $0x90] sm:$0xff]  ;;  %v587_v10 = vld [vmem:[#allocation6 + $0x88] sm:$0xff] }
  0x3d   :  { %336 = vmatpush.msra.mxu0 %v285_v24  ;;  %401 = vmatpush.msra.mxu1 %v286_v25  ;;  %v586_v9 = vld [vmem:[#allocation6 + $0x80] sm:$0xff]  ;;  %v585_v11 = vld [vmem:[#allocation6 + $0x78] sm:$0xff]  ;;  %v583_v13 = vld [vmem:[#allocation6 + $0x68] sm:$0xff] }
  0x3e   :  { %626 = vmatpush.msra.mxu3 %v600_v59  ;;  %v5208_v12 = vld [vmem:[%s6872_s1 + $0x58] sm:$0xff]  ;;  %v584_v14 = vld [vmem:[#allocation6 + $0x70] sm:$0xff]  ;;  %v582_v15 = vld [vmem:[#allocation6 + $0x60] sm:$0xff] }
  0x3f   :  { %337 = vmatpush.msra.mxu0 %v282_v26  ;;  %402 = vmatpush.msra.mxu1 %v283_v27  ;;  %v580_v16 = vld [vmem:[#allocation6 + $0x50] sm:$0xff]  ;;  %v581_v17 = vld [vmem:[#allocation6 + $0x58] sm:$0xff]  ;;  %v579_v18 = vld [vmem:[#allocation6 + $0x48] sm:$0xff] }
  0x40   :  { %627 = vmatpush.msra.mxu3 %v597_v62  ;;  %v577_v19 = vld [vmem:[#allocation6 + $0x38] sm:$0xff]  ;;  %v578_v20 = vld [vmem:[#allocation6 + $0x40] sm:$0xff]  ;;  %v576_v21 = vld [vmem:[#allocation6 + $0x30] sm:$0xff] }
  0x41   :  { %338 = vmatpush.msra.mxu0 %v279_v28  ;;  %403 = vmatpush.msra.mxu1 %v280_v29  ;;  %v574_v22 = vld [vmem:[#allocation6 + $0x20] sm:$0xff]  ;;  %v575_v23 = vld [vmem:[#allocation6 + $0x28] sm:$0xff]  ;;  %v573_v25 = vld [vmem:[#allocation6 + $0x18] sm:$0xff] }
  0x42   :  { %628 = vmatpush.msra.mxu3 %v594_v2  ;;  %v5215_v24 = vld [vmem:[%s6872_s1 + $0x60] sm:$0xff]  ;;  %v571_v26 = vld [vmem:[#allocation6 + $0x8] sm:$0xff]  ;;  %v572_v27 = vld [vmem:[#allocation6 + $0x10] sm:$0xff] }
  0x43   :  { %339 = vmatpush.msra.mxu0 %v276_v30  ;;  %404 = vmatpush.msra.mxu1 %v277_v31  ;;  %7005 = vst [vmem:[#allocation20_spill] sm:$0xff] %v5215_v24  ;;  %v570_v28 = vld [vmem:[#allocation6] sm:$0xff]  ;;  %v5225_v30 = vld [vmem:[%s6872_s1 + $0x68] sm:$0xff]  ;;  %v5245_v43 = vld [vmem:[%s6872_s1 + $0x78] sm:$0xff] }
  0x44   :  { %340 = vmatmul.f32.vlgmr.msra.gmra.mxu0 %v5131_v32  ;;  %405 = vmatmul.f32.vlgmr.msra.gmra.mxu1 %v5131_v32  ;;  %v519_v29 = vld [vmem:[%s6871_s0] sm:$0xff]  ;;  %7006 = vst [vmem:[#allocation21_spill] sm:$0xff] %v5225_v30  ;;  %v520_v31 = vld [vmem:[%s6871_s0 + $0x8] sm:$0xff] }
  0x45   :  { %686 = vmatpush.msrb.mxu0 %v616_v41  ;;  %751 = vmatpush.msrb.mxu1 %v617_v42  ;;  %v5235_v41 = vld [vmem:[%s6872_s1 + $0x70] sm:$0xff]  ;;  %7008 = vst [vmem:[#allocation23_spill] sm:$0xff] %v5245_v43 }
  0x46   :  { %629 = vmatpush.msra.mxu3 %v591_v5  ;;  %7007 = vst [vmem:[#allocation22_spill] sm:$0xff] %v5235_v41  ;;  %v521_v42 = vld [vmem:[%s6871_s0 + $0x10] sm:$0xff] }
  0x47   :  { %687 = vmatpush.msrb.mxu0 %v613_v44  ;;  %752 = vmatpush.msrb.mxu1 %v614_v45  ;;  %v522_v44 = vld [vmem:[%s6871_s0 + $0x18] sm:$0xff] }
  0x48   :  { %630 = vmatpush.msra.mxu3 %v588_v8 }
  0x49   :  { %688 = vmatpush.msrb.mxu0 %v610_v47  ;;  %753 = vmatpush.msrb.mxu1 %v611_v48  ;;  %v523_v47 = vld [vmem:[%s6871_s0 + $0x20] sm:$0xff] }
  0x4a   :  { %631 = vmatpush.msra.mxu3 %v585_v11 }
  0x4b   :  { %689 = vmatpush.msrb.mxu0 %v607_v50  ;;  %754 = vmatpush.msrb.mxu1 %v608_v51  ;;  %v524_v50 = vld [vmem:[%s6871_s0 + $0x28] sm:$0xff] }
  0x4c   :  { %343 = vmatmul.f32.gmra.mxu0 %v5138_v33  ;;  %408 = vmatmul.f32.gmra.mxu1 %v5138_v33 }
  0x4d   :  { %690 = vmatpush.msrb.mxu0 %v604_v54  ;;  %755 = vmatpush.msrb.mxu1 %v605_v55  ;;  %v525_v54 = vld [vmem:[%s6871_s0 + $0x30] sm:$0xff] }
  0x4e   :  { %632 = vmatpush.msra.mxu3 %v582_v15 }
  0x4f   :  { %691 = vmatpush.msrb.mxu0 %v601_v57  ;;  %756 = vmatpush.msrb.mxu1 %v602_v58  ;;  %v526_v57 = vld [vmem:[%s6871_s0 + $0x38] sm:$0xff] }
  0x50   :  { %633 = vmatpush.msra.mxu3 %v579_v18 }
  0x51   :  { %692 = vmatpush.msrb.mxu0 %v598_v60  ;;  %757 = vmatpush.msrb.mxu1 %v599_v61  ;;  %v527_v60 = vld [vmem:[%s6871_s0 + $0x40] sm:$0xff] }
  0x52   :  { %634 = vmatpush.msra.mxu3 %v576_v21 }
  0x53   :  { %693 = vmatpush.msrb.mxu0 %v595_v63  ;;  %758 = vmatpush.msrb.mxu1 %v596_v1  ;;  %v528_v63 = vld [vmem:[%s6871_s0 + $0x48] sm:$0xff] }
  0x54   :  { %346 = vmatmul.f32.gmra.mxu0 %v5145_v34  ;;  %411 = vmatmul.f32.gmra.mxu1 %v5145_v34 }
  0x55   :  { %694 = vmatpush.msrb.mxu0 %v592_v3  ;;  %759 = vmatpush.msrb.mxu1 %v593_v4  ;;  %v529_v3 = vld [vmem:[%s6871_s0 + $0x50] sm:$0xff] }
  0x56   :  { %635 = vmatpush.msra.mxu3 %v573_v25 }
  0x57   :  { %695 = vmatpush.msrb.mxu0 %v589_v6  ;;  %760 = vmatpush.msrb.mxu1 %v590_v7  ;;  %v530_v6 = vld [vmem:[%s6871_s0 + $0x58] sm:$0xff] }
  0x58   :  { %636 = vmatpush.msra.mxu3 %v570_v28 }
  0x59   :  { %696 = vmatpush.msrb.mxu0 %v586_v9  ;;  %761 = vmatpush.msrb.mxu1 %v587_v10  ;;  %v531_v9 = vld [vmem:[%s6871_s0 + $0x60] sm:$0xff] }
  0x5a   :  { %637 = vmatmul.f32.vlgmr.msra.gmra.mxu3 %v519_v29 }
  0x5b   :  { %697 = vmatpush.msrb.mxu0 %v583_v13  ;;  %762 = vmatpush.msrb.mxu1 %v584_v14  ;;  %v532_v13 = vld [vmem:[%s6871_s0 + $0x68] sm:$0xff] }
  0x5c   :  { %349 = vmatmul.f32.gmra.mxu0 %v5152_v35  ;;  %414 = vmatmul.f32.gmra.mxu1 %v5152_v35 }
  0x5d   :  { %698 = vmatpush.msrb.mxu0 %v580_v16  ;;  %763 = vmatpush.msrb.mxu1 %v581_v17  ;;  %v533_v16 = vld [vmem:[%s6871_s0 + $0x70] sm:$0xff] }
  0x5f   :  { %699 = vmatpush.msrb.mxu0 %v577_v19  ;;  %764 = vmatpush.msrb.mxu1 %v578_v20  ;;  %v534_v19 = vld [vmem:[%s6871_s0 + $0x78] sm:$0xff] }
  0x61   :  { %700 = vmatpush.msrb.mxu0 %v574_v22  ;;  %765 = vmatpush.msrb.mxu1 %v575_v23 }
  0x62   :  { %640 = vmatmul.f32.gmra.mxu3 %v520_v31 }
  0x63   :  { %701 = vmatpush.msrb.mxu0 %v571_v26  ;;  %766 = vmatpush.msrb.mxu1 %v572_v27 }
  0x64   :  { %352 = vmatmul.f32.gmra.mxu0 %v5159_v36  ;;  %417 = vmatmul.f32.gmra.mxu1 %v5159_v36 }
  0x6a   :  { %643 = vmatmul.f32.gmra.mxu3 %v521_v42 }
  0x6c   :  { %355 = vmatmul.f32.gmra.mxu0 %v5166_v37  ;;  %420 = vmatmul.f32.gmra.mxu1 %v5166_v37 }
  0x72   :  { %646 = vmatmul.f32.gmra.mxu3 %v522_v44 }
  0x74   :  { %358 = vmatmul.f32.gmra.mxu0 %v5173_v38  ;;  %423 = vmatmul.f32.gmra.mxu1 %v5173_v38 }
  0x7a   :  { %649 = vmatmul.f32.gmra.mxu3 %v523_v47 }
  0x7c   :  { %361 = vmatmul.f32.gmra.mxu0 %v5180_v39  ;;  %426 = vmatmul.f32.gmra.mxu1 %v5180_v39 }
  0x82   :  { %652 = vmatmul.f32.gmra.mxu3 %v524_v50 }
  0x84   :  { %364 = vmatmul.f32.gmra.mxu0 %v5187_v40  ;;  %429 = vmatmul.f32.gmra.mxu1 %v5187_v40 }
  0x8a   :  { %655 = vmatmul.f32.gmra.mxu3 %v525_v54 }
  0x8c   :  { %367 = vmatmul.f32.gmra.mxu0 %v5194_v52  ;;  %432 = vmatmul.f32.gmra.mxu1 %v5194_v52 }
  0x92   :  { %658 = vmatmul.f32.gmra.mxu3 %v526_v57 }
  0x94   :  { %370 = vmatmul.f32.gmra.mxu0 %v5201_v0  ;;  %435 = vmatmul.f32.gmra.mxu1 %v5201_v0 }
  0x9a   :  { %661 = vmatmul.f32.gmra.mxu3 %v527_v60 }
  0x9c   :  { %373 = vmatmul.f32.gmra.mxu0 %v5208_v12  ;;  %438 = vmatmul.f32.gmra.mxu1 %v5208_v12 }
  0xa2   :  { %664 = vmatmul.f32.gmra.mxu3 %v528_v63 }
  0xa4   :  { %376 = vmatmul.f32.gmra.mxu0 %v5215_v24  ;;  %441 = vmatmul.f32.gmra.mxu1 %v5215_v24 }
  0xaa   :  { %667 = vmatmul.f32.gmra.mxu3 %v529_v3 }
  0xac   :  { %379 = vmatmul.f32.gmra.mxu0 %v5225_v30  ;;  %444 = vmatmul.f32.gmra.mxu1 %v5225_v30 }
  0xb2   :  { %670 = vmatmul.f32.gmra.mxu3 %v530_v6 }
  0xb4   :  { %382 = vmatmul.f32.gmra.mxu0 %v5235_v41  ;;  %447 = vmatmul.f32.gmra.mxu1 %v5235_v41 }
  0xba   :  { %673 = vmatmul.f32.gmra.mxu3 %v531_v9 }
  0xbc   :  { %385 = vmatmul.f32.gmra.mxu0 %v5245_v43  ;;  %450 = vmatmul.f32.gmra.mxu1 %v5245_v43 }
  0xc1   :  { %v5252_v45 = vpop.f32.mrf.mxu0  ;;  %v5254_v46 = vpop.f32.mrf.mxu1 }
  0xc2   :  { %7009 = vst [vmem:[#allocation24_spill] sm:$0xff] %v5252_v45  ;;  %676 = vmatmul.f32.gmra.mxu3 %v532_v13 }
  0xc3   :  { %7010 = vst [vmem:[#allocation25_spill] sm:$0xff] %v5254_v46 }
  0xc4   :  { %702 = vmatmul.f32.vlgmr.msrb.gmra.mxu0 %v519_v29  ;;  %767 = vmatmul.f32.vlgmr.msrb.gmra.mxu1 %v519_v29 }
  0xc9   :  { %v5259_v48 = vpop.f32.mrf.mxu0  ;;  %v5261_v49 = vpop.f32.mrf.mxu1 }
  0xca   :  { %7011 = vst [vmem:[#allocation26_spill] sm:$0xff] %v5259_v48  ;;  %679 = vmatmul.f32.gmra.mxu3 %v533_v16 }
  0xcb   :  { %7012 = vst [vmem:[#allocation27_spill] sm:$0xff] %v5261_v49  ;;  %v320_v49 = vld [vmem:[%s6877_s6 + $0x160] sm:$0xff] }
  0xcc   :  { %705 = vmatmul.f32.gmra.mxu0 %v520_v31  ;;  %770 = vmatmul.f32.gmra.mxu1 %v520_v31 }
  0xd1   :  { %v5266_v51 = vpop.f32.mrf.mxu0  ;;  %v5268_v53 = vpop.f32.mrf.mxu1 }
  0xd2   :  { %7013 = vst [vmem:[#allocation28_spill] sm:$0xff] %v5266_v51  ;;  %682 = vmatmul.f32.gmra.mxu3 %v534_v19 }
  0xd3   :  { %7014 = vst [vmem:[#allocation29_spill] sm:$0xff] %v5268_v53  ;;  %v323_v53 = vld [vmem:[%s6877_s6 + $0x178] sm:$0xff] }
  0xd4   :  { %708 = vmatmul.f32.gmra.mxu0 %v521_v42  ;;  %773 = vmatmul.f32.gmra.mxu1 %v521_v42 }
  0xd5   :  { %454 = vmatpush.msra.mxu2 %v323_v53 }
  0xd7   :  { %455 = vmatpush.msra.mxu2 %v320_v49  ;;  %v305_v49 = vld [vmem:[%s6877_s6 + $0xe8] sm:$0xff] }
  0xd9   :  { %v5273_v55 = vpop.f32.mrf.mxu0  ;;  %v5275_v56 = vpop.f32.mrf.mxu1 }
  0xda   :  { %7015 = vst [vmem:[#allocation30_spill] sm:$0xff] %v5273_v55 }
  0xdb   :  { %7016 = vst [vmem:[#allocation31_spill] sm:$0xff] %v5275_v56 }
  0xdc   :  { %711 = vmatmul.f32.gmra.mxu0 %v522_v44  ;;  %776 = vmatmul.f32.gmra.mxu1 %v522_v44 }
  0xdd   :  { %v5344_v25 = vpop.f32.mrf.mxu3 }
  0xe1   :  { %v5280_v58 = vpop.f32.mrf.mxu0  ;;  %v5282_v59 = vpop.f32.mrf.mxu1 }
  0xe2   :  { %7017 = vst [vmem:[#allocation32_spill] sm:$0xff] %v5280_v58  ;;  %v5467_v58 = vld [vmem:[#allocation9] sm:$0xff] }
  0xe3   :  { %7018 = vst [vmem:[#allocation33_spill] sm:$0xff] %v5282_v59  ;;  %v618_v55 = vperm.slane %v5467_v58, 0 }
  0xe4   :  { %714 = vmatmul.f32.gmra.mxu0 %v523_v47  ;;  %779 = vmatmul.f32.gmra.mxu1 %v523_v47  ;;  %7041 = vst [vmem:[#allocation56_spill] sm:$0xff] %v5467_v58 }
  0xe5   :  { %v5350_v28 = vpop.f32.mrf.mxu3 }
  0xe9   :  { %v5287_v61 = vpop.f32.mrf.mxu0  ;;  %v5289_v62 = vpop.f32.mrf.mxu1 }
  0xea   :  { %7019 = vst [vmem:[#allocation34_spill] sm:$0xff] %v5287_v61  ;;  %v287_v61 = vld [vmem:[%s6877_s6 + $0x58] sm:$0xff] }
  0xeb   :  { %7020 = vst [vmem:[#allocation35_spill] sm:$0xff] %v5289_v62 }
  0xec   :  { %717 = vmatmul.f32.gmra.mxu0 %v524_v50  ;;  %782 = vmatmul.f32.gmra.mxu1 %v524_v50 }
  0xed   :  { %v5356_v42 = vpop.f32.mrf.mxu3 }
  0xf1   :  { %v5294_v1 = vpop.f32.mrf.mxu0  ;;  %v5296_v2 = vpop.f32.mrf.mxu1 }
  0xf2   :  { %7021 = vst [vmem:[#allocation36_spill] sm:$0xff] %v5294_v1 }
  0xf3   :  { %7022 = vst [vmem:[#allocation37_spill] sm:$0xff] %v5296_v2 }
  0xf4   :  { %720 = vmatmul.f32.gmra.mxu0 %v525_v54  ;;  %785 = vmatmul.f32.gmra.mxu1 %v525_v54 }
  0xf5   :  { %v5362_v50 = vpop.f32.mrf.mxu3 }
  0xf9   :  { %v5301_v4 = vpop.f32.mrf.mxu0  ;;  %v5303_v5 = vpop.f32.mrf.mxu1 }
  0xfa   :  { %7023 = vst [vmem:[#allocation38_spill] sm:$0xff] %v5301_v4  ;;  %v296_v4 = vld [vmem:[%s6877_s6 + $0xa0] sm:$0xff] }
  0xfb   :  { %7024 = vst [vmem:[#allocation39_spill] sm:$0xff] %v5303_v5 }
  0xfc   :  { %723 = vmatmul.f32.gmra.mxu0 %v526_v57  ;;  %788 = vmatmul.f32.gmra.mxu1 %v526_v57 }
 0x101   :  { %v5308_v7 = vpop.f32.mrf.mxu0  ;;  %v5310_v8 = vpop.f32.mrf.mxu1 }
 0x102   :  { %7025 = vst [vmem:[#allocation40_spill] sm:$0xff] %v5308_v7  ;;  %v299_v7 = vld [vmem:[%s6877_s6 + $0xb8] sm:$0xff] }
 0x103   :  { %7026 = vst [vmem:[#allocation41_spill] sm:$0xff] %v5310_v8 }
 0x104   :  { %726 = vmatmul.f32.gmra.mxu0 %v527_v60  ;;  %791 = vmatmul.f32.gmra.mxu1 %v527_v60  ;;  %v5368_v60 = vpop.f32.mrf.mxu3 }
 0x109   :  { %v5315_v10 = vpop.f32.mrf.mxu0  ;;  %v5317_v11 = vpop.f32.mrf.mxu1 }
 0x10a   :  { %7027 = vst [vmem:[#allocation42_spill] sm:$0xff] %v5315_v10 }
 0x10b   :  { %7028 = vst [vmem:[#allocation43_spill] sm:$0xff] %v5317_v11 }
 0x10c   :  { %729 = vmatmul.f32.gmra.mxu0 %v528_v63  ;;  %794 = vmatmul.f32.gmra.mxu1 %v528_v63 }
 0x111   :  { %v5322_v14 = vpop.f32.mrf.mxu0  ;;  %v5324_v15 = vpop.f32.mrf.mxu1 }
 0x112   :  { %7029 = vst [vmem:[#allocation44_spill] sm:$0xff] %v5322_v14  ;;  %v308_v14 = vld [vmem:[%s6877_s6 + $0x100] sm:$0xff] }
 0x113   :  { %7030 = vst [vmem:[#allocation45_spill] sm:$0xff] %v5324_v15 }
 0x114   :  { %732 = vmatmul.f32.gmra.mxu0 %v529_v3  ;;  %797 = vmatmul.f32.gmra.mxu1 %v529_v3 }
 0x119   :  { %v5329_v17 = vpop.f32.mrf.mxu0  ;;  %v5331_v18 = vpop.f32.mrf.mxu1 }
 0x11a   :  { %7031 = vst [vmem:[#allocation46_spill] sm:$0xff] %v5329_v17  ;;  %v311_v17 = vld [vmem:[%s6877_s6 + $0x118] sm:$0xff] }
 0x11b   :  { %7032 = vst [vmem:[#allocation47_spill] sm:$0xff] %v5331_v18 }
 0x11c   :  { %735 = vmatmul.f32.gmra.mxu0 %v530_v6  ;;  %800 = vmatmul.f32.gmra.mxu1 %v530_v6  ;;  %v5374_v6 = vpop.f32.mrf.mxu3 }
 0x121   :  { %v5336_v20 = vpop.f32.mrf.mxu0  ;;  %v5338_v21 = vpop.f32.mrf.mxu1 }
 0x122   :  { %7033 = vst [vmem:[#allocation48_spill] sm:$0xff] %v5336_v20 }
 0x123   :  { %7034 = vst [vmem:[#allocation49_spill] sm:$0xff] %v5338_v21 }
 0x124   :  { %738 = vmatmul.f32.gmra.mxu0 %v531_v9  ;;  %803 = vmatmul.f32.gmra.mxu1 %v531_v9 }
 0x129   :  { %v5340_v22 = vpop.f32.mrf.mxu0  ;;  %v5342_v23 = vpop.f32.mrf.mxu1 }
 0x12a   :  { %7035 = vst [vmem:[#allocation50_spill] sm:$0xff] %v5340_v22  ;;  %v314_v22 = vld [vmem:[%s6877_s6 + $0x130] sm:$0xff] }
 0x12b   :  { %7036 = vst [vmem:[#allocation51_spill] sm:$0xff] %v5342_v23 }
 0x12c   :  { %741 = vmatmul.f32.gmra.mxu0 %v532_v13  ;;  %806 = vmatmul.f32.gmra.mxu1 %v532_v13 }
 0x131   :  { %v5346_v26 = vpop.f32.mrf.mxu0  ;;  %v5348_v27 = vpop.f32.mrf.mxu1 }
 0x132   :  { %7037 = vst [vmem:[#allocation52_spill] sm:$0xff] %v5346_v26 }
 0x133   :  { %7038 = vst [vmem:[#allocation53_spill] sm:$0xff] %v5348_v27 }
 0x134   :  { %744 = vmatmul.f32.gmra.mxu0 %v533_v16  ;;  %809 = vmatmul.f32.gmra.mxu1 %v533_v16  ;;  %v5380_v16 = vpop.f32.mrf.mxu3 }
 0x139   :  { %v5352_v29 = vpop.f32.mrf.mxu0  ;;  %v5354_v31 = vpop.f32.mrf.mxu1 }
 0x13a   :  { %7039 = vst [vmem:[#allocation54_spill] sm:$0xff] %v5352_v29  ;;  %v317_v29 = vld [vmem:[%s6877_s6 + $0x148] sm:$0xff] }
 0x13b   :  { %7040 = vst [vmem:[#allocation55_spill] sm:$0xff] %v5354_v31  ;;  %456 = vmatpush.msra.mxu2 %v317_v29 }
 0x13c   :  { %747 = vmatmul.f32.gmra.mxu0 %v534_v19  ;;  %812 = vmatmul.f32.gmra.mxu1 %v534_v19  ;;  %v5386_v27 = vpop.f32.mrf.mxu3 }
 0x13d   :  { %457 = vmatpush.msra.mxu2 %v314_v22  ;;  %v302_v22 = vld [vmem:[%s6877_s6 + $0xd0] sm:$0xff] }
 0x13f   :  { %458 = vmatpush.msra.mxu2 %v311_v17 }
 0x141   :  { %v5358_v44 = vpop.f32.mrf.mxu0  ;;  %v5360_v47 = vpop.f32.mrf.mxu1  ;;  %459 = vmatpush.msra.mxu2 %v308_v14  ;;  %v293_v14 = vld [vmem:[%s6877_s6 + $0x88] sm:$0xff] }
 0x143   :  { %460 = vmatpush.msra.mxu2 %v305_v49 }
 0x144   :  { %v5392_v18 = vpop.f32.mrf.mxu3 }
 0x145   :  { %461 = vmatpush.msra.mxu2 %v302_v22  ;;  %v290_v22 = vld [vmem:[%s6877_s6 + $0x70] sm:$0xff] }
 0x147   :  { %462 = vmatpush.msra.mxu2 %v299_v7 }
 0x149   :  { %v5364_v54 = vpop.f32.mrf.mxu0  ;;  %v5366_v57 = vpop.f32.mrf.mxu1  ;;  %463 = vmatpush.msra.mxu2 %v296_v4  ;;  %v284_v4 = vld [vmem:[%s6877_s6 + $0x40] sm:$0xff] }
 0x14b   :  { %464 = vmatpush.msra.mxu2 %v293_v14  ;;  %v281_v14 = vld [vmem:[%s6877_s6 + $0x28] sm:$0xff] }
 0x14c   :  { %v5398_v11 = vpop.f32.mrf.mxu3 }
 0x14d   :  { %465 = vmatpush.msra.mxu2 %v290_v22  ;;  %v278_v22 = vld [vmem:[%s6877_s6 + $0x10] sm:$0xff] }
 0x14f   :  { %466 = vmatpush.msra.mxu2 %v287_v61 }
 0x151   :  { %v5370_v63 = vpop.f32.mrf.mxu0  ;;  %v5372_v3 = vpop.f32.mrf.mxu1  ;;  %467 = vmatpush.msra.mxu2 %v284_v4 }
 0x153   :  { %468 = vmatpush.msra.mxu2 %v281_v14 }
 0x154   :  { %v5404_v62 = vpop.f32.mrf.mxu3 }
 0x155   :  { %469 = vmatpush.msra.mxu2 %v278_v22  ;;  %v669_v58 = vadd.f32 %v5404_v62, %v618_v55  ;;  %v666_v22 = vadd.f32 %v5398_v11, %v618_v55 }
 0x156   :  { %470 = vmatmul.f32.vlgmr.msra.gmra.mxu2 %v5131_v32  ;;  %v663_v32 = vadd.f32 %v5392_v18, %v618_v55  ;;  %v651_v18 = vadd.f32 %v5368_v60, %v618_v55 }
 0x159   :  { %v5376_v9 = vpop.f32.mrf.mxu0  ;;  %v5378_v13 = vpop.f32.mrf.mxu1 }
 0x15c   :  { %v671_v46 = vpop.f32.mrf.mxu3 }
 0x15d   :  { %v672_v24 = vadd.f32 %v671_v46, %v618_v55 }
 0x15e   :  { %473 = vmatmul.f32.gmra.mxu2 %v5138_v33  ;;  %v537_v33 = vld [vmem:[#allocation9 + $0x10] sm:$0xff] }
 0x15f   :  { %v5482_v46 = vperm.slane %v537_v33, 0  ;;  %v4467_v33 = vld [vmem:[%s6873_s2 + $0x18] sm:$0xff]  }
 0x161   :  { %v5382_v19 = vpop.f32.mrf.mxu0  ;;  %v5384_v31 = vpop.f32.mrf.mxu1 }
 0x164   :  { %v674_v53 = vpop.f32.mrf.mxu3 }
 0x165   :  { %v675_v41 = vadd.f32 %v674_v53, %v618_v55 }
 0x166   :  { %476 = vmatmul.f32.gmra.mxu2 %v5145_v34 }
 0x169   :  { %v5388_v21 = vpop.f32.mrf.mxu0  ;;  %v5390_v23 = vpop.f32.mrf.mxu1 }
 0x16c   :  { %v677_v17 = vpop.f32.mrf.mxu3 }
 0x16d   :  { %v678_v43 = vadd.f32 %v677_v17, %v618_v55  ;;  %v645_v17 = vadd.f32 %v5356_v42, %v618_v55 }
 0x16e   :  { %479 = vmatmul.f32.gmra.mxu2 %v5152_v35 }
 0x171   :  { %v5394_v15 = vpop.f32.mrf.mxu0  ;;  %v5396_v8 = vpop.f32.mrf.mxu1 }
 0x174   :  { %v680_v7 = vpop.f32.mrf.mxu3 }
 0x175   :  { %v681_v45 = vadd.f32 %v680_v7, %v618_v55 }
 0x176   :  { %482 = vmatmul.f32.gmra.mxu2 %v5159_v36 }
 0x179   :  { %v5400_v5 = vpop.f32.mrf.mxu0  ;;  %v5402_v2 = vpop.f32.mrf.mxu1 }
 0x17c   :  { %v683_v48 = vpop.f32.mrf.mxu3 }
 0x17d   :  { %v684_v4 = vadd.f32 %v683_v48, %v618_v55 }
 0x17e   :  { %485 = vmatmul.f32.gmra.mxu2 %v5166_v37 }
 0x17f   :  { %816 = vmatpush.msrb.mxu2 %v684_v4 }
 0x181   :  { %v5406_v56 = vpop.f32.mrf.mxu0  ;;  %v5408_v59 = vpop.f32.mrf.mxu1  ;;  %817 = vmatpush.msrb.mxu2 %v681_v45  ;;  %v660_v45 = vadd.f32 %v5386_v27, %v618_v55 }
 0x183   :  { %818 = vmatpush.msrb.mxu2 %v678_v43  ;;  %v657_v43 = vadd.f32 %v5380_v16, %v618_v55  ;;  %v648_v16 = vadd.f32 %v5362_v50, %v618_v55  ;;  %v642_v50 = vadd.f32 %v5350_v28, %v618_v55 }
 0x185   :  { %819 = vmatpush.msrb.mxu2 %v675_v41  ;;  %v536_v41 = vld [vmem:[#allocation9 + $0x8] sm:$0xff] }
 0x186   :  { %488 = vmatmul.f32.gmra.mxu2 %v5173_v38  ;;  %v4465_v38 = vld [vmem:[%s6873_s2 + $0x8] sm:$0xff]  }
 0x187   :  { %820 = vmatpush.msrb.mxu2 %v672_v24  ;;  %v654_v24 = vadd.f32 %v5374_v6, %v618_v55 }
 0x189   :  { %v5419_v26 = vpop.f32.mrf.mxu0  ;;  %v5421_v20 = vpop.f32.mrf.mxu1  ;;  %821 = vmatpush.msrb.mxu2 %v669_v58  ;;  %v5484_v58 = vperm.slane %v536_v41, 0  ;;  %v4474_v41 = vld [vmem:[#allocation2 + $0x18] sm:$0xff]  }
 0x18b   :  { %822 = vmatpush.msrb.mxu2 %v666_v22  ;;  %v722_v36 = vadd.f32 %v5394_v15, %v5484_v58  ;;  %v713_v15 = vadd.f32 %v5376_v9, %v5484_v58  ;;  %v710_v37 = vadd.f32 %v5370_v63, %v5484_v58  ;;  %v707_v9 = vadd.f32 %v5364_v54, %v5484_v58 }
 0x18c   :  { %v769_v63 = vadd.f32 %v5360_v47, %v5482_v46  ;;  %v5570_v47 = vunpack.c.l.bf16 %v4465_v38 }
 0x18d   :  { %823 = vmatpush.msrb.mxu2 %v663_v32  ;;  %v639_v32 = vadd.f32 %v5344_v25, %v618_v55  ;;  %v796_v55 = vadd.f32 %v5421_v20, %v5482_v46  ;;  %v793_v25 = vadd.f32 %v5408_v59, %v5482_v46  ;;  %v725_v20 = vadd.f32 %v5400_v5, %v5484_v58 }
 0x18e   :  { %v784_v59 = vadd.f32 %v5390_v23, %v5482_v46  ;;  %v716_v5 = vadd.f32 %v5382_v19, %v5484_v58  ;;  %v4274_v23 = vld [vmem:[%s6873_s2] sm:$0xff]   ;;  %491 = vmatmul.f32.gmra.mxu2 %v5180_v39  ;;  %v5577_v39 = vunpack.c.h.bf16 %v4465_v38 }
 0x18f   :  { %824 = vmatpush.msrb.mxu2 %v660_v45  ;;  %v5549_v19 = vunpack.c.l.bf16 %v4274_v23  ;;  %v5560_v54 = vunpack.c.h.bf16 %v4274_v23 }
 0x190   :  { %7043 = vst [vmem:[#allocation58_spill] sm:$0xff] %v5577_v39 }
 0x191   :  { %v5435_v29 = vpop.f32.mrf.mxu0  ;;  %v5437_v10 = vpop.f32.mrf.mxu1  ;;  %825 = vmatpush.msrb.mxu2 %v657_v43 }
 0x192   :  { %v799_v28 = vadd.f32 %v5437_v10, %v5482_v46  ;;  %v728_v10 = vadd.f32 %v5406_v56, %v5484_v58  ;;  %v719_v56 = vadd.f32 %v5388_v21, %v5484_v58  ;;  %v775_v21 = vadd.f32 %v5372_v3, %v5482_v46 }
 0x193   :  { %826 = vmatpush.msrb.mxu2 %v654_v24  ;;  %v5606_v24 = vunpack.c.l.bf16 %v4474_v41 }
 0x195   :  { %827 = vmatpush.msrb.mxu2 %v651_v18  ;;  %7050 = vst [vmem:[#allocation65_spill] sm:$0xff] %v5606_v24  ;;  %v4475_v18 = vld [vmem:[#allocation2 + $0x20] sm:$0xff]  }
 0x196   :  { %494 = vmatmul.f32.gmra.mxu2 %v5187_v40 }
 0x197   :  { %828 = vmatpush.msrb.mxu2 %v648_v16  ;;  %v7057_v16 = vld [vmem:[#allocation22_spill] sm:$0xff] }
 0x199   :  { %v5451_v49 = vpop.f32.mrf.mxu0  ;;  %v5453_v1 = vpop.f32.mrf.mxu1  ;;  %829 = vmatpush.msrb.mxu2 %v645_v17  ;;  %v7060_v17 = vld [vmem:[#allocation23_spill] sm:$0xff] }
 0x19a   :  { %v802_v42 = vadd.f32 %v5453_v1, %v5482_v46  ;;  %v731_v1 = vadd.f32 %v5419_v26, %v5484_v58  ;;  %v787_v26 = vadd.f32 %v5396_v8, %v5482_v46  ;;  %v778_v8 = vadd.f32 %v5378_v13, %v5482_v46 }
 0x19b   :  { %830 = vmatpush.msrb.mxu2 %v642_v50  ;;  %v772_v13 = vadd.f32 %v5366_v57, %v5482_v46 }
 0x19d   :  { %831 = vmatpush.msrb.mxu2 %v639_v32 }
 0x19e   :  { %497 = vmatmul.f32.gmra.mxu2 %v5194_v52 }
 0x1a1   :  { %v739_v51 = vpop.f32.mrf.mxu0  ;;  %v804_v61 = vpop.f32.mrf.mxu1 }
 0x1a2   :  { %v805_v35 = vadd.f32 %v804_v61, %v5482_v46  ;;  %v740_v22 = vadd.f32 %v739_v51, %v5484_v58  ;;  %v734_v51 = vadd.f32 %v5435_v29, %v5484_v58  ;;  %v790_v29 = vadd.f32 %v5402_v2, %v5482_v46 }
 0x1a3   :  { %v781_v2 = vadd.f32 %v5384_v31, %v5482_v46  ;;  %v4306_v31 = vld [vmem:[#allocation2] sm:$0xff]  }
 0x1a4   :  { %v5551_v3 = vunpack.c.l.bf16 %v4306_v31  ;;  %v5562_v57 = vunpack.c.h.bf16 %v4306_v31 }
 0x1a6   :  { %500 = vmatmul.f32.gmra.mxu2 %v5201_v0  ;;  %v5604_v0 = vunpack.c.l.bf16 %v4467_v33 }
 0x1a8   :  { %7049 = vst [vmem:[#allocation64_spill] sm:$0xff] %v5604_v0 }
 0x1a9   :  { %v742_v30 = vpop.f32.mrf.mxu0  ;;  %v807_v14 = vpop.f32.mrf.mxu1 }
 0x1aa   :  { %v808_v60 = vadd.f32 %v807_v14, %v5482_v46  ;;  %v743_v4 = vadd.f32 %v742_v30, %v5484_v58  ;;  %v737_v30 = vadd.f32 %v5451_v49, %v5484_v58  ;;  %v704_v49 = vadd.f32 %v5358_v44, %v5484_v58  ;;  %v4472_v44 = vld [vmem:[#allocation2 + $0x8] sm:$0xff]  }
 0x1ab   :  { %v5572_v61 = vunpack.c.l.bf16 %v4472_v44  ;;  %v5579_v14 = vunpack.c.h.bf16 %v4472_v44 }
 0x1ad   :  { %7042 = vst [vmem:[#allocation57_spill] sm:$0xff] %v5572_v61 }
 0x1ae   :  { %7044 = vst [vmem:[#allocation59_spill] sm:$0xff] %v5579_v14  ;;  %503 = vmatmul.f32.gmra.mxu2 %v5208_v12  ;;  %v5611_v12 = vunpack.c.h.bf16 %v4467_v33 }
 0x1b1   :  { %v745_v48 = vpop.f32.mrf.mxu0  ;;  %v810_v7 = vpop.f32.mrf.mxu1 }
 0x1b2   :  { %v811_v6 = vadd.f32 %v810_v7, %v5482_v46  ;;  %v746_v53 = vadd.f32 %v745_v48, %v5484_v58  ;;  %v4466_v48 = vld [vmem:[%s6873_s2 + $0x10] sm:$0xff]  }
 0x1b3   :  { %v4473_v7 = vld [vmem:[#allocation2 + $0x10] sm:$0xff]   ;;  %v5587_v40 = vunpack.c.l.bf16 %v4466_v48  ;;  %v5594_v52 = vunpack.c.h.bf16 %v4466_v48 }
 0x1b4   :  { %v5589_v45 = vunpack.c.l.bf16 %v4473_v7  ;;  %v5596_v43 = vunpack.c.h.bf16 %v4473_v7 }
 0x1b5   :  { %7045 = vst [vmem:[#allocation60_spill] sm:$0xff] %v5587_v40 }
 0x1b6   :  { %7046 = vst [vmem:[#allocation61_spill] sm:$0xff] %v5589_v45 }
 0x1b7   :  { %7047 = vst [vmem:[#allocation62_spill] sm:$0xff] %v5594_v52 }
 0x1b8   :  { %7048 = vst [vmem:[#allocation63_spill] sm:$0xff] %v5596_v43 }
 0x1b9   :  { %v748_v62 = vpop.f32.mrf.mxu0  ;;  %v813_v11 = vpop.f32.mrf.mxu1 }
 0x1ba   :  { %v814_v27 = vadd.f32 %v813_v11, %v5482_v46  ;;  %v749_v34 = vadd.f32 %v748_v62, %v5484_v58  ;;  %v7051_v46 = vld [vmem:[#allocation20_spill] sm:$0xff]  ;;  %v5613_v58 = vunpack.c.h.bf16 %v4474_v41  ;;  %v7054_v62 = vld [vmem:[#allocation21_spill] sm:$0xff]  ;;  %v4468_v11 = vld [vmem:[%s6873_s2 + $0x20] sm:$0xff]  }
 0x1bb   :  { %506 = vmatmul.f32.gmra.mxu2 %v7051_v46  ;;  %7052 = vst [vmem:[#allocation20_spill] sm:$0xff] %v5611_v12 }
 0x1bc   :  { %881 = vmatpush.msrb.mxu3 %v749_v34  ;;  %946 = vmatpush.msra.mxu0 %v814_v27  ;;  %7053 = vst [vmem:[#allocation66_spill] sm:$0xff] %v5613_v58  ;;  %v5621_v27 = vunpack.c.l.bf16 %v4468_v11  ;;  %v5623_v34 = vunpack.c.l.bf16 %v4475_v18 }
 0x1be   :  { %882 = vmatpush.msrb.mxu3 %v746_v53  ;;  %947 = vmatpush.msra.mxu0 %v811_v6  ;;  %7055 = vst [vmem:[#allocation21_spill] sm:$0xff] %v5621_v27  ;;  %v5628_v6 = vunpack.c.h.bf16 %v4468_v11  ;;  %v5630_v53 = vunpack.c.h.bf16 %v4475_v18 }
 0x1bf   :  { %7056 = vst [vmem:[#allocation67_spill] sm:$0xff] %v5623_v34 }
 0x1c0   :  { %883 = vmatpush.msrb.mxu3 %v743_v4  ;;  %948 = vmatpush.msra.mxu0 %v808_v60  ;;  %7058 = vst [vmem:[#allocation22_spill] sm:$0xff] %v5628_v6  ;;  %v4469_v60 = vld [vmem:[%s6873_s2 + $0x28] sm:$0xff]  }
 0x1c1   :  { %7059 = vst [vmem:[#allocation68_spill] sm:$0xff] %v5630_v53  ;;  %v4476_v4 = vld [vmem:[#allocation2 + $0x28] sm:$0xff]   ;;  %v5638_v50 = vunpack.c.l.bf16 %v4469_v60 }
 0x1c2   :  { %884 = vmatpush.msrb.mxu3 %v740_v22  ;;  %949 = vmatpush.msra.mxu0 %v805_v35  ;;  %v5640_v35 = vunpack.c.l.bf16 %v4476_v4  ;;  %v5645_v22 = vunpack.c.h.bf16 %v4469_v60  ;;  %v5647_v32 = vunpack.c.h.bf16 %v4476_v4  ;;  %v7073_v60 = vld [vmem:[#allocation56_spill] sm:$0xff] }
 0x1c3   :  { %509 = vmatmul.f32.gmra.mxu2 %v7054_v62  ;;  %7061 = vst [vmem:[#allocation23_spill] sm:$0xff] %v5638_v50  ;;  %v5691_v4 = vperm.slane %v7073_v60, 1 }
 0x1c4   :  { %885 = vmatpush.msrb.mxu3 %v737_v30  ;;  %950 = vmatpush.msra.mxu0 %v802_v42  ;;  %7062 = vst [vmem:[#allocation69_spill] sm:$0xff] %v5640_v35  ;;  %v4470_v42 = vld [vmem:[%s6873_s2 + $0x30] sm:$0xff]  }
 0x1c5   :  { %7063 = vst [vmem:[#allocation70_spill] sm:$0xff] %v5645_v22  ;;  %v4477_v30 = vld [vmem:[#allocation2 + $0x30] sm:$0xff]  }
 0x1c6   :  { %886 = vmatpush.msrb.mxu3 %v734_v51  ;;  %951 = vmatpush.msra.mxu0 %v799_v28  ;;  %7064 = vst [vmem:[#allocation71_spill] sm:$0xff] %v5647_v32  ;;  %v5655_v28 = vunpack.c.l.bf16 %v4470_v42  ;;  %v5657_v51 = vunpack.c.l.bf16 %v4477_v30 }
 0x1c8   :  { %887 = vmatpush.msrb.mxu3 %v731_v1  ;;  %952 = vmatpush.msra.mxu0 %v796_v55  ;;  %7065 = vst [vmem:[#allocation72_spill] sm:$0xff] %v5655_v28  ;;  %v5662_v55 = vunpack.c.h.bf16 %v4470_v42  ;;  %v5664_v1 = vunpack.c.h.bf16 %v4477_v30  ;;  %v7074_v42 = vld [vmem:[#allocation24_spill] sm:$0xff] }
 0x1c9   :  { %7066 = vst [vmem:[#allocation73_spill] sm:$0xff] %v5657_v51 }
 0x1ca   :  { %888 = vmatpush.msrb.mxu3 %v728_v10  ;;  %953 = vmatpush.msra.mxu0 %v793_v25  ;;  %7067 = vst [vmem:[#allocation74_spill] sm:$0xff] %v5662_v55  ;;  %v4471_v25 = vld [vmem:[%s6873_s2 + $0x38] sm:$0xff]  }
 0x1cb   :  { %512 = vmatmul.f32.gmra.mxu2 %v7057_v16  ;;  %7068 = vst [vmem:[#allocation75_spill] sm:$0xff] %v5664_v1  ;;  %v4478_v10 = vld [vmem:[#allocation2 + $0x38] sm:$0xff]  }
 0x1cc   :  { %889 = vmatpush.msrb.mxu3 %v725_v20  ;;  %954 = vmatpush.msra.mxu0 %v790_v29  ;;  %v5672_v29 = vunpack.c.l.bf16 %v4471_v25  ;;  %v5674_v20 = vunpack.c.l.bf16 %v4478_v10 }
 0x1ce   :  { %890 = vmatpush.msrb.mxu3 %v722_v36  ;;  %955 = vmatpush.msra.mxu0 %v787_v26  ;;  %7069 = vst [vmem:[#allocation76_spill] sm:$0xff] %v5672_v29  ;;  %v5679_v26 = vunpack.c.h.bf16 %v4471_v25  ;;  %v5681_v36 = vunpack.c.h.bf16 %v4478_v10  ;;  %v4492_v25 = vld [vmem:[#allocation7 + $0x38] sm:$0xff]  }
 0x1cf   :  { %7070 = vst [vmem:[#allocation77_spill] sm:$0xff] %v5674_v20 }
 0x1d0   :  { %891 = vmatpush.msrb.mxu3 %v719_v56  ;;  %956 = vmatpush.msra.mxu0 %v784_v59  ;;  %7071 = vst [vmem:[#allocation78_spill] sm:$0xff] %v5679_v26 }
 0x1d1   :  { %7072 = vst [vmem:[#allocation79_spill] sm:$0xff] %v5681_v36 }
 0x1d2   :  { %892 = vmatpush.msrb.mxu3 %v716_v5  ;;  %957 = vmatpush.msra.mxu0 %v781_v2 }
 0x1d3   :  { %515 = vmatmul.f32.gmra.mxu2 %v7060_v17 }
 0x1d4   :  { %893 = vmatpush.msrb.mxu3 %v713_v15  ;;  %958 = vmatpush.msra.mxu0 %v778_v8 }
 0x1d6   :  { %894 = vmatpush.msrb.mxu3 %v710_v37  ;;  %959 = vmatpush.msra.mxu0 %v775_v21 }
 0x1d8   :  { %895 = vmatpush.msrb.mxu3 %v707_v9  ;;  %960 = vmatpush.msra.mxu0 %v772_v13 }
 0x1da   :  { %896 = vmatpush.msrb.mxu3 %v704_v49  ;;  %961 = vmatpush.msra.mxu0 %v769_v63 }
 0x1db   :  { %897 = vmatmul.f32.vlgmr.msrb.gmra.mxu3 %v5549_v19  ;;  %962 = vmatmul.f32.vlgmr.msra.gmra.mxu0 %v5551_v3 }
 0x1dc   :  { %832 = vmatmul.f32.vlgmr.msrb.gmra.mxu2 %v5549_v19 }
 0x1e3   :  { %900 = vmatmul.f32.gmra.mxu3 %v5560_v54  ;;  %965 = vmatmul.f32.gmra.mxu0 %v5562_v57 }
 0x1e4   :  { %835 = vmatmul.f32.gmra.mxu2 %v5560_v54 }
 0x1eb   :  { %903 = vmatmul.f32.gmra.mxu3 %v5570_v47  ;;  %968 = vmatmul.f32.gmra.mxu0 %v5572_v61 }
 0x1ec   :  { %838 = vmatmul.f32.gmra.mxu2 %v5570_v47 }
 0x1f3   :  { %906 = vmatmul.f32.gmra.mxu3 %v5577_v39  ;;  %971 = vmatmul.f32.gmra.mxu0 %v5579_v14 }
 0x1f4   :  { %841 = vmatmul.f32.gmra.mxu2 %v5577_v39 }
 0x1fb   :  { %909 = vmatmul.f32.gmra.mxu3 %v5587_v40  ;;  %974 = vmatmul.f32.gmra.mxu0 %v5589_v45 }
 0x1fc   :  { %844 = vmatmul.f32.gmra.mxu2 %v5587_v40 }
 0x203   :  { %912 = vmatmul.f32.gmra.mxu3 %v5594_v52  ;;  %977 = vmatmul.f32.gmra.mxu0 %v5596_v43 }
 0x204   :  { %847 = vmatmul.f32.gmra.mxu2 %v5594_v52  ;;  %v1713_v52 = vld [vmem:[#allocation9 + $0x28] sm:$0xff] }
 0x20b   :  { %915 = vmatmul.f32.gmra.mxu3 %v5604_v0  ;;  %980 = vmatmul.f32.gmra.mxu0 %v5606_v24 }
 0x20c   :  { %850 = vmatmul.f32.gmra.mxu2 %v5604_v0 }
 0x213   :  { %918 = vmatmul.f32.gmra.mxu3 %v5611_v12  ;;  %983 = vmatmul.f32.gmra.mxu0 %v5613_v58 }
 0x214   :  { %853 = vmatmul.f32.gmra.mxu2 %v5611_v12  ;;  %v7076_v12 = vld [vmem:[#allocation28_spill] sm:$0xff] }
 0x21b   :  { %921 = vmatmul.f32.gmra.mxu3 %v5621_v27  ;;  %986 = vmatmul.f32.gmra.mxu0 %v5623_v34  ;;  %v7075_v34 = vld [vmem:[#allocation26_spill] sm:$0xff] }
 0x223   :  { %924 = vmatmul.f32.gmra.mxu3 %v5628_v6  ;;  %989 = vmatmul.f32.gmra.mxu0 %v5630_v53  ;;  %v4491_v53 = vld [vmem:[#allocation7 + $0x30] sm:$0xff]  }
 0x224   :  { %v4396_v60 = vunpack.c.h.bf16 %v4491_v53 }
 0x22b   :  { %927 = vmatmul.f32.gmra.mxu3 %v5638_v50  ;;  %992 = vmatmul.f32.gmra.mxu0 %v5640_v35 }
 0x233   :  { %930 = vmatmul.f32.gmra.mxu3 %v5645_v22  ;;  %995 = vmatmul.f32.gmra.mxu0 %v5647_v32 }
 0x23b   :  { %933 = vmatmul.f32.gmra.mxu3 %v5655_v28  ;;  %998 = vmatmul.f32.gmra.mxu0 %v5657_v51  ;;  %v4399_v51 = vunpack.c.l.bf16 %v4492_v25 }
 0x243   :  { %936 = vmatmul.f32.gmra.mxu3 %v5662_v55  ;;  %1001 = vmatmul.f32.gmra.mxu0 %v5664_v1 }
 0x24b   :  { %939 = vmatmul.f32.gmra.mxu3 %v5672_v29  ;;  %1004 = vmatmul.f32.gmra.mxu0 %v5674_v20 }
 0x253   :  { %942 = vmatmul.f32.gmra.mxu3 %v5679_v26  ;;  %1007 = vmatmul.f32.gmra.mxu0 %v5681_v36  ;;  %v4400_v36 = vunpack.c.h.bf16 %v4492_v25 }
 0x255   :  { %1177 = vmatpush.msra.mxu1 %v4400_v36 }
 0x257   :  { %1178 = vmatpush.msra.mxu1 %v4399_v51 }
 0x258   :  { %v963_v59 = vpop.f32.mrf.mxu0 }
 0x259   :  { %1179 = vmatpush.msra.mxu1 %v4396_v60 }
 0x25e   :  { %v898_v56 = vpop.f32.mrf.mxu3 }
 0x25f   :  { %v1011_v16 = vadd.f32 %v963_v59, %v898_v56 }
 0x260   :  { %v966_v2 = vpop.f32.mrf.mxu0 }
 0x261   :  { %v1027_v30 = vadd.f32 %v1011_v16, %v7074_v42  ;;  %v4490_v42 = vld [vmem:[#allocation7 + $0x28] sm:$0xff]  }
 0x262   :  { %v4392_v51 = vunpack.c.h.bf16 %v4490_v42 }
 0x263   :  { %v1044_v32 = vadd.f32 %v5691_v4, %v1027_v30  ;;  %v4489_v30 = vld [vmem:[#allocation7 + $0x20] sm:$0xff]  }
 0x265   :  { %vm1060_vm0 = vcmp.gt.f32.partialorder %v1044_v32, 0.0 }
 0x266   :  { %v901_v5 = vpop.f32.mrf.mxu3 }
 0x267   :  { %v1012_v10 = vadd.f32 %v966_v2, %v901_v5  ;;  %v4395_v2 = vunpack.c.l.bf16 %v4491_v53  ;;  %v1076_v5 = vmul.f32 0.2, %v1044_v32  ;;  %v4391_v53 = vunpack.c.l.bf16 %v4490_v42  ;;  %v4488_v42 = vld [vmem:[#allocation7 + $0x18] sm:$0xff]  }
 0x268   :  { %v969_v8 = vpop.f32.mrf.mxu0 }
 0x269   :  { %v1028_v59 = vadd.f32 %v1012_v10, %v7075_v34  ;;  %1180 = vmatpush.msra.mxu1 %v4395_v2 }
 0x26b   :  { %1181 = vmatpush.msra.mxu1 %v4392_v51 }
 0x26d   :  { %1182 = vmatpush.msra.mxu1 %v4391_v53  ;;  %v7086_v53 = vld [vmem:[#allocation50_spill] sm:$0xff] }
 0x26e   :  { %v904_v15 = vpop.f32.mrf.mxu3 }
 0x26f   :  { %v1013_v20 = vadd.f32 %v969_v8, %v904_v15  ;;  %v7077_v8 = vld [vmem:[#allocation30_spill] sm:$0xff] }
 0x270   :  { %v972_v21 = vpop.f32.mrf.mxu0 }
 0x271   :  { %v1029_v24 = vadd.f32 %v1013_v20, %v7076_v12  ;;  %v7079_v12 = vld [vmem:[#allocation34_spill] sm:$0xff] }
 0x276   :  { %v907_v37 = vpop.f32.mrf.mxu3 }
 0x277   :  { %v1014_v35 = vadd.f32 %v972_v21, %v907_v37  ;;  %v5699_v21 = vadd.f32 %v5691_v4, %v1028_v59  ;;  %v7078_v37 = vld [vmem:[#allocation32_spill] sm:$0xff] }
 0x278   :  { %v975_v23 = vpop.f32.mrf.mxu0 }
 0x279   :  { %v1030_v36 = vadd.f32 %v1014_v35, %v7077_v8  ;;  %vm1061_vm1 = vcmp.gt.f32.partialorder %v5699_v21, 0.0  ;;  %v1077_v10 = vmul.f32 0.2, %v5699_v21 }
 0x27b   :  { %v1047_v35 = vadd.f32 %v5691_v4, %v1030_v36 }
 0x27d   :  { %vm1063_vm3 = vcmp.gt.f32.partialorder %v1047_v35, 0.0 }
 0x27e   :  { %v910_v31 = vpop.f32.mrf.mxu3 }
 0x27f   :  { %v1015_v56 = vadd.f32 %v975_v23, %v910_v31  ;;  %v1046_v31 = vadd.f32 %v5691_v4, %v1029_v24  ;;  %v4388_v24 = vunpack.c.h.bf16 %v4489_v30 }
 0x280   :  { %v978_v13 = vpop.f32.mrf.mxu0 }
 0x281   :  { %v1031_v34 = vadd.f32 %v1015_v56, %v7078_v37  ;;  %vm1062_vm2 = vcmp.gt.f32.partialorder %v1046_v31, 0.0  ;;  %1183 = vmatpush.msra.mxu1 %v4388_v24  ;;  %v1079_v37 = vmul.f32 0.2, %v1047_v35 }
 0x286   :  { %v913_v9 = vpop.f32.mrf.mxu3 }
 0x287   :  { %v1016_v16 = vadd.f32 %v978_v13, %v913_v9  ;;  %v5704_v9 = vsel %vm1060_vm0, %v1044_v32, %v1076_v5  ;;  %v1078_v32 = vmul.f32 0.2, %v1046_v31  ;;  %v4387_v5 = vunpack.c.l.bf16 %v4489_v30  ;;  %v4487_v30 = vld [vmem:[#allocation7 + $0x10] sm:$0xff]  }
 0x288   :  { %v981_v63 = vpop.f32.mrf.mxu0  ;;  %v4380_v24 = vunpack.c.h.bf16 %v4487_v30 }
 0x289   :  { %v1032_v20 = vadd.f32 %v1016_v16, %v7079_v12  ;;  %1184 = vmatpush.msra.mxu1 %v4387_v5  ;;  %v7084_v12 = vld [vmem:[#allocation44_spill] sm:$0xff] }
 0x28b   :  { %v1049_v60 = vadd.f32 %v5691_v4, %v1032_v20 }
 0x28d   :  { %vm1065_vm5 = vcmp.gt.f32.partialorder %v1049_v60, 0.0  ;;  %v1081_v51 = vmul.f32 0.2, %v1049_v60 }
 0x28e   :  { %v916_v49 = vpop.f32.mrf.mxu3 }
 0x28f   :  { %v1017_v15 = vadd.f32 %v981_v63, %v916_v49  ;;  %v7080_v63 = vld [vmem:[#allocation36_spill] sm:$0xff] }
 0x290   :  { %v984_v38 = vpop.f32.mrf.mxu0 }
 0x291   :  { %v1033_v49 = vadd.f32 %v1017_v15, %v7080_v63 }
 0x293   :  { %v1050_v8 = vadd.f32 %v5691_v4, %v1033_v49 }
 0x295   :  { %vm1066_vm6 = vcmp.gt.f32.partialorder %v1050_v8, 0.0 }
 0x296   :  { %v919_v44 = vpop.f32.mrf.mxu3 }
 0x297   :  { %v1018_v23 = vadd.f32 %v984_v38, %v919_v44  ;;  %v1048_v38 = vadd.f32 %v5691_v4, %v1031_v34  ;;  %v7081_v44 = vld [vmem:[#allocation38_spill] sm:$0xff] }
 0x298   :  { %v987_v48 = vpop.f32.mrf.mxu0 }
 0x299   :  { %v1034_v25 = vadd.f32 %v1018_v23, %v7081_v44  ;;  %vm1064_vm4 = vcmp.gt.f32.partialorder %v1048_v38, 0.0  ;;  %v7083_v23 = vld [vmem:[#allocation42_spill] sm:$0xff]  ;;  %v1082_v44 = vmul.f32 0.2, %v1050_v8 }
 0x29b   :  { %v1051_v34 = vadd.f32 %v5691_v4, %v1034_v25 }
 0x29d   :  { %vm1067_vm7 = vcmp.gt.f32.partialorder %v1051_v34, 0.0  ;;  %v1083_v25 = vmul.f32 0.2, %v1051_v34 }
 0x29e   :  { %v922_v7 = vpop.f32.mrf.mxu3 }
 0x29f   :  { %v1019_v59 = vadd.f32 %v987_v48, %v922_v7  ;;  %v4384_v48 = vunpack.c.h.bf16 %v4488_v42  ;;  %v1080_v7 = vmul.f32 0.2, %v1048_v38 }
 0x2a0   :  { %v990_v33 = vpop.f32.mrf.mxu0 }
 0x2a1   :  { %1185 = vmatpush.msra.mxu1 %v4384_v48  ;;  %v5735_v48 = vsel %vm1063_vm3, %v1047_v35, %v1079_v37 }
 0x2a6   :  { %v925_v41 = vpop.f32.mrf.mxu3 }
 0x2a7   :  { %v1020_v56 = vadd.f32 %v990_v33, %v925_v41  ;;  %v7082_v33 = vld [vmem:[#allocation40_spill] sm:$0xff] }
 0x2a8   :  { %v993_v46 = vpop.f32.mrf.mxu0  ;;  %v1035_v41 = vadd.f32 %v1019_v59, %v7082_v33  ;;  %v7087_v59 = vld [vmem:[#allocation48_spill] sm:$0xff]  ;;  %v5738_v33 = vsel %vm1064_vm4, %v1048_v38, %v1080_v7 }
 0x2ae   :  { %v928_v62 = vpop.f32.mrf.mxu3 }
 0x2af   :  { %v1021_v16 = vadd.f32 %v993_v46, %v928_v62  ;;  %v1036_v46 = vadd.f32 %v1020_v56, %v7083_v23 }
 0x2b0   :  { %v996_v11 = vpop.f32.mrf.mxu0 }
 0x2b1   :  { %v1037_v20 = vadd.f32 %v1021_v16, %v7084_v12  ;;  %v7088_v16 = vld [vmem:[#allocation52_spill] sm:$0xff] }
 0x2b6   :  { %v931_v18 = vpop.f32.mrf.mxu3 }
 0x2b7   :  { %v1022_v36 = vadd.f32 %v996_v11, %v931_v18  ;;  %v7085_v18 = vld [vmem:[#allocation46_spill] sm:$0xff] }
 0x2b8   :  { %v5688_v17 = vpop.f32.mrf.mxu0 }
 0x2be   :  { %v934_v1 = vpop.f32.mrf.mxu3 }
 0x2bf   :  { %v1023_v62 = vadd.f32 %v5688_v17, %v934_v1  ;;  %v1052_v1 = vadd.f32 %v5691_v4, %v1035_v41  ;;  %v1053_v17 = vadd.f32 %v5691_v4, %v1036_v46  ;;  %v4486_v46 = vld [vmem:[#allocation7 + $0x8] sm:$0xff]  }
 0x2c0   :  { %v1002_v58 = vpop.f32.mrf.mxu0  ;;  %v4376_v35 = vunpack.c.h.bf16 %v4486_v46 }
 0x2c1   :  { %v1039_v56 = vadd.f32 %v1023_v62, %v7087_v59  ;;  %vm1068_vm8 = vcmp.gt.f32.partialorder %v1052_v1, 0.0  ;;  %v1085_v38 = vmul.f32 0.2, %v1053_v17  ;;  %v1084_v62 = vmul.f32 0.2, %v1052_v1 }
 0x2c2   :  { %vm1069_vm9 = vcmp.gt.f32.partialorder %v1053_v17, 0.0 }
 0x2c3   :  { %v1056_v37 = vadd.f32 %v5691_v4, %v1039_v56 }
 0x2c5   :  { %vm1072_vm13 = vcmp.gt.f32.partialorder %v1056_v37, 0.0 }
 0x2c6   :  { %v937_v13 = vpop.f32.mrf.mxu3 }
 0x2c7   :  { %v1024_v15 = vadd.f32 %v1002_v58, %v937_v13  ;;  %v4383_v58 = vunpack.c.l.bf16 %v4488_v42  ;;  %v1038_v13 = vadd.f32 %v1022_v36, %v7085_v18  ;;  %v5728_v36 = vsel %vm1061_vm1, %v5699_v21, %v1077_v10 }
 0x2c8   :  { %v1005_v2 = vpop.f32.mrf.mxu0  ;;  %v4379_v42 = vunpack.c.l.bf16 %v4487_v30  ;;  %v5743_v21 = vsel %vm1065_vm5, %v1049_v60, %v1081_v51  ;;  %v5749_v10 = vsel %vm1067_vm7, %v1051_v34, %v1083_v25  ;;  %v4375_v51 = vunpack.c.l.bf16 %v4486_v46  ;;  %v7090_v30 = vld [vmem:[#allocation54_spill] sm:$0xff] }
 0x2c9   :  { %v1040_v63 = vadd.f32 %v1024_v15, %v7086_v53  ;;  %1186 = vmatpush.msra.mxu1 %v4383_v58  ;;  %v1054_v15 = vadd.f32 %v5691_v4, %v1037_v20  ;;  %v1055_v41 = vadd.f32 %v5691_v4, %v1038_v13  ;;  %v4370_v20 = vld [vmem:[#allocation7] sm:$0xff]   ;;  %v5757_v53 = vsel %vm1069_vm9, %v1053_v17, %v1085_v38 }
 0x2ca   :  { %v4372_v18 = vunpack.c.h.bf16 %v4370_v20  ;;  %v4371_v13 = vunpack.c.l.bf16 %v4370_v20  ;;  %v1109_v25 = vmax.f32 %v5728_v36, %v5743_v21 }
 0x2cb   :  { %1187 = vmatpush.msra.mxu1 %v4380_v24  ;;  %v1057_v23 = vadd.f32 %v5691_v4, %v1040_v63  ;;  %v1086_v12 = vmul.f32 0.2, %v1054_v15  ;;  %v1087_v34 = vmul.f32 0.2, %v1055_v41  ;;  %vm1070_vm10 = vcmp.gt.f32.partialorder %v1054_v15, 0.0 }
 0x2cc   :  { %vm1071_vm11 = vcmp.gt.f32.partialorder %v1055_v41, 0.0  ;;  %v1088_v63 = vmul.f32 0.2, %v1056_v37  ;;  %v5763_v24 = vsel %vm1068_vm8, %v1052_v1, %v1084_v62  ;;  %v1111_v1 = vmax.f32 %v5735_v48, %v5749_v10 }
 0x2cd   :  { %1188 = vmatpush.msra.mxu1 %v4379_v42  ;;  %vm1073_vm12 = vcmp.gt.f32.partialorder %v1057_v23, 0.0  ;;  %v5765_v59 = vsel %vm1070_vm10, %v1054_v15, %v1086_v12  ;;  %v5767_v56 = vsel %vm1071_vm11, %v1055_v41, %v1087_v34  ;;  %v1113_v46 = vmax.f32 %v1109_v25, %v5757_v53 }
 0x2ce   :  { %v940_v11 = vpop.f32.mrf.mxu3  ;;  %v5779_v15 = vsel %vm1072_vm13, %v1056_v37, %v1088_v63 }
 0x2cf   :  { %v1025_v49 = vadd.f32 %v1005_v2, %v940_v11  ;;  %v5731_v2 = vsel %vm1062_vm2, %v1046_v31, %v1078_v32  ;;  %v5746_v31 = vsel %vm1066_vm6, %v1050_v8, %v1082_v44  ;;  %1189 = vmatpush.msra.mxu1 %v4376_v35  ;;  %v5753_v8 = vpop.f32.mrf.mxu2  ;;  %856 = vmatmul.f32.gmra.mxu2 %v5621_v27  ;;  %v1089_v11 = vmul.f32 0.2, %v1057_v23 }
 0x2d0   :  { %v1008_v32 = vpop.f32.mrf.mxu0  ;;  %7089 = vst [vmem:[#allocation56_spill] sm:$0xff] %v5753_v8  ;;  %v1110_v42 = vmax.f32 %v5731_v2, %v5746_v31  ;;  %v1115_v35 = vmax.f32 %v1111_v1, %v5767_v56 }
 0x2d1   :  { %v1041_v5 = vadd.f32 %v1025_v49, %v7088_v16  ;;  %1190 = vmatpush.msra.mxu1 %v4375_v51  ;;  %v5769_v16 = vsel %vm1073_vm12, %v1057_v23, %v1089_v11 }
 0x2d2   :  { %v1117_v38 = vmax.f32 %v1113_v46, %v5769_v16 }
 0x2d3   :  { %v1058_v7 = vadd.f32 %v5691_v4, %v1041_v5  ;;  %1191 = vmatpush.msra.mxu1 %v4372_v18  ;;  %v1108_v5 = vmax.f32 %v5704_v9, %v5738_v33 }
 0x2d5   :  { %v1090_v49 = vmul.f32 0.2, %v1058_v7  ;;  %vm1074_vm14 = vcmp.gt.f32.partialorder %v1058_v7, 0.0  ;;  %1192 = vmatpush.msra.mxu1 %v4371_v13 }
 0x2d6   :  { %v943_v60 = vpop.f32.mrf.mxu3 }
 0x2d7   :  { %v1026_v58 = vadd.f32 %v1008_v32, %v943_v60  ;;  %v5781_v41 = vsel %vm1074_vm14, %v1058_v7, %v1090_v49  ;;  %v1114_v32 = vmax.f32 %v1110_v42, %v5765_v59  ;;  %v5787_v62 = vpop.f32.mrf.mxu2  ;;  %859 = vmatmul.f32.gmra.mxu2 %v5628_v6 }
 0x2d8   :  { %7091 = vst [vmem:[#allocation24_spill] sm:$0xff] %v5787_v62 }
 0x2d9   :  { %v1042_v44 = vadd.f32 %v1026_v58, %v7090_v30  ;;  %v1118_v7 = vmax.f32 %v1114_v32, %v5781_v41 }
 0x2db   :  { %v1059_v17 = vadd.f32 %v5691_v4, %v1042_v44  ;;  %v1112_v4 = vmax.f32 %v1108_v5, %v5763_v24 }
 0x2dd   :  { %vm1075_vm15 = vcmp.gt.f32.partialorder %v1059_v17, 0.0  ;;  %v1091_v23 = vmul.f32 0.2, %v1059_v17  ;;  %v1116_v37 = vmax.f32 %v1112_v4, %v5779_v15 }
 0x2df   :  { %v5790_v12 = vsel %vm1075_vm15, %v1059_v17, %v1091_v23  ;;  %v1120_v51 = vmax.f32 %v1116_v37, %v1117_v38  ;;  %v5795_v58 = vpop.f32.mrf.mxu2  ;;  %862 = vmatmul.f32.gmra.mxu2 %v5638_v50 }
 0x2e0   :  { %v1119_v60 = vmax.f32 %v1115_v35, %v5790_v12  ;;  %7092 = vst [vmem:[#allocation26_spill] sm:$0xff] %v5795_v58 }
 0x2e2   :  { %v1121_v20 = vmax.f32 %v1118_v7, %v1119_v60 }
 0x2e4   :  { %v1122_v34 = vmax.f32 %v1120_v51, %v1121_v20 }
 0x2e6   :  { %v1123_v11 = vrot.slane %v1122_v34, 4 }
 0x2e7   :  { %v5798_v30 = vpop.f32.mrf.mxu2  ;;  %865 = vmatmul.f32.gmra.mxu2 %v5645_v22 }
 0x2e8   :  { %v1124_v18 = vmax.f32 %v1122_v34, %v1123_v11  ;;  %7093 = vst [vmem:[#allocation28_spill] sm:$0xff] %v5798_v30 }
 0x2ea   :  { %v1125_v13 = vrot.slane %v1124_v18, 2 }
 0x2ec   :  { %v1126_v63 = vmax.f32 %v1124_v18, %v1125_v13 }
 0x2ee   :  { %v1127_v49 = vrot.slane %v1126_v63, 1 }
 0x2ef   :  { %v5807_v42 = vpop.f32.mrf.mxu2  ;;  %868 = vmatmul.f32.gmra.mxu2 %v5655_v28 }
 0x2f0   :  { %v5801_v44 = vmax.f32 %v1126_v63, %v1127_v49  ;;  %7094 = vst [vmem:[#allocation30_spill] sm:$0xff] %v5807_v42 }
 0x2f2   :  { %v1144_v25 = vsub.f32 %v5790_v12, %v5801_v44  ;;  %v1129_v17 = vsub.f32 %v5704_v9, %v5801_v44  ;;  %v1130_v1 = vsub.f32 %v5728_v36, %v5801_v44  ;;  %v1139_v46 = vsub.f32 %v5765_v59, %v5801_v44 }
 0x2f3   :  { %v1140_v23 = vsub.f32 %v5767_v56, %v5801_v44  ;;  %v1141_v4 = vsub.f32 %v5779_v15, %v5801_v44  ;;  %v1142_v9 = vsub.f32 %v5769_v16, %v5801_v44  ;;  %v1143_v32 = vsub.f32 %v5781_v41, %v5801_v44 }
 0x2f4   :  { %v1145_v5 = vmul.f32 1.442695, %v1129_v17  ;;  %v1147_v35 = vmul.f32 1.442695, %v1130_v1  ;;  %v1131_v36 = vsub.f32 %v5731_v2, %v5801_v44  ;;  %v1132_v51 = vsub.f32 %v5735_v48, %v5801_v44 }
 0x2f5   :  { %v1133_v2 = vsub.f32 %v5738_v33, %v5801_v44  ;;  %v1134_v48 = vsub.f32 %v5743_v21, %v5801_v44  ;;  %v1135_v1 = vsub.f32 %v5746_v31, %v5801_v44  ;;  %v1175_v15 = vmul.f32 1.442695, %v1144_v25 }
 0x2f6   :  { %4523 = vpow2.f32 %v1145_v5  ;;  %v1149_v59 = vmul.f32 1.442695, %v1131_v36  ;;  %v1151_v20 = vmul.f32 1.442695, %v1132_v51  ;;  %v1136_v36 = vsub.f32 %v5749_v10, %v5801_v44 }
 0x2f7   :  { %v5822_v37 = vpop.f32.mrf.mxu2  ;;  %871 = vmatmul.f32.gmra.mxu2 %v5662_v55  ;;  %4525 = vpow2.f32 %v1147_v35  ;;  %v1153_v18 = vmul.f32 1.442695, %v1133_v2  ;;  %v1155_v49 = vmul.f32 1.442695, %v1134_v48  ;;  %v1157_v35 = vmul.f32 1.442695, %v1135_v1 }
 0x2f8   :  { %7095 = vst [vmem:[#allocation32_spill] sm:$0xff] %v5822_v37  ;;  %4527 = vpow2.f32 %v1149_v59  ;;  %v1159_v59 = vmul.f32 1.442695, %v1136_v36  ;;  %v1137_v51 = vsub.f32 %v5763_v24, %v5801_v44  ;;  %v1138_v2 = vsub.f32 %v5757_v53, %v5801_v44  ;;  %v1712_v55 = vld [vmem:[#allocation9 + $0x20] sm:$0xff] }
 0x2f9   :  { %4529 = vpow2.f32 %v1151_v20  ;;  %v1165_v48 = vmul.f32 1.442695, %v1139_v46  ;;  %v1171_v46 = vmul.f32 1.442695, %v1142_v9  ;;  %v6065_v22 = vperm.slane %v1712_v55, 0 }
 0x2fa   :  { %4531 = vpow2.f32 %v1153_v18  ;;  %v1161_v20 = vmul.f32 1.442695, %v1137_v51  ;;  %v1163_v18 = vmul.f32 1.442695, %v1138_v2  ;;  %v6073_v55 = vperm.slane %v1713_v52, 0 }
 0x2fb   :  { %4533 = vpow2.f32 %v1155_v49 }
 0x2fc   :  { %v4524_v38 = vpop.eup %4523  ;;  %4535 = vpow2.f32 %v1157_v35  ;;  %v1169_v35 = vmul.f32 1.442695, %v1141_v4 }
 0x2fd   :  { %1193 = vmatmul.f32.vlgmr.msra.gmra.mxu1 %v4524_v38  ;;  %v4526_v7 = vpop.eup %4525  ;;  %4537 = vpow2.f32 %v1159_v59 }
 0x2fe   :  { %v4528_v34 = vpop.eup %4527  ;;  %4539 = vpow2.f32 %v1161_v20 }
 0x2ff   :  { %v5827_v60 = vpop.f32.mrf.mxu2  ;;  %874 = vmatmul.f32.gmra.mxu2 %v5672_v29  ;;  %v4530_v13 = vpop.eup %4529  ;;  %4541 = vpow2.f32 %v1163_v18  ;;  %v6060_v29 = vld [vmem:[#allocation9 + $0x18] sm:$0xff] }
 0x300   :  { %7096 = vst [vmem:[#allocation34_spill] sm:$0xff] %v5827_v60  ;;  %v4532_v17 = vpop.eup %4531  ;;  %4543 = vpow2.f32 %v1165_v48  ;;  %v6063_v28 = vperm.slane %v6060_v29, 0 }
 0x301   :  { %v4534_v33 = vpop.eup %4533  ;;  %7122 = vst [vmem:[#allocation95_spill] sm:$0xff] %v6060_v29 }
 0x302   :  { %v4536_v21 = vpop.eup %4535 }
 0x303   :  { %v4538_v31 = vpop.eup %4537 }
 0x304   :  { %v4540_v10 = vpop.eup %4539 }
 0x305   :  { %1196 = vmatmul.f32.gmra.mxu1 %v4526_v7  ;;  %v4542_v49 = vpop.eup %4541 }
 0x306   :  { %v4544_v1 = vpop.eup %4543 }
 0x307   :  { %v5832_v11 = vpop.f32.mrf.mxu2  ;;  %877 = vmatmul.f32.gmra.mxu2 %v5679_v26 }
 0x308   :  { %7097 = vst [vmem:[#allocation36_spill] sm:$0xff] %v5832_v11 }
 0x30d   :  { %1199 = vmatmul.f32.gmra.mxu1 %v4528_v34 }
 0x30f   :  { %v5837_v63 = vpop.f32.mrf.mxu2 }
 0x310   :  { %7098 = vst [vmem:[#allocation38_spill] sm:$0xff] %v5837_v63 }
 0x315   :  { %1202 = vmatmul.f32.gmra.mxu1 %v4530_v13 }
 0x317   :  { %v5841_v5 = vpop.f32.mrf.mxu2 }
 0x318   :  { %7099 = vst [vmem:[#allocation40_spill] sm:$0xff] %v5841_v5 }
 0x31d   :  { %1205 = vmatmul.f32.gmra.mxu1 %v4532_v17  ;;  %v1167_v17 = vmul.f32 1.442695, %v1140_v23  ;;  %v1173_v23 = vmul.f32 1.442695, %v1143_v32 }
 0x31f   :  { %v5845_v38 = vpop.f32.mrf.mxu2  ;;  %4545 = vpow2.f32 %v1167_v17 }
 0x320   :  { %7100 = vst [vmem:[#allocation42_spill] sm:$0xff] %v5845_v38  ;;  %4547 = vpow2.f32 %v1169_v35 }
 0x321   :  { %4549 = vpow2.f32 %v1171_v46 }
 0x322   :  { %4551 = vpow2.f32 %v1173_v23 }
 0x323   :  { %4553 = vpow2.f32 %v1175_v15 }
 0x325   :  { %1208 = vmatmul.f32.gmra.mxu1 %v4534_v33  ;;  %v4546_v33 = vpop.eup %4545 }
 0x326   :  { %v4548_v56 = vpop.eup %4547 }
 0x327   :  { %v5849_v7 = vpop.f32.mrf.mxu2  ;;  %v4550_v59 = vpop.eup %4549 }
 0x328   :  { %7101 = vst [vmem:[#allocation44_spill] sm:$0xff] %v5849_v7  ;;  %v4552_v16 = vpop.eup %4551 }
 0x329   :  { %v4554_v9 = vpop.eup %4553 }
 0x32d   :  { %1211 = vmatmul.f32.gmra.mxu1 %v4536_v21 }
 0x32f   :  { %v5853_v34 = vpop.f32.mrf.mxu2 }
 0x330   :  { %7102 = vst [vmem:[#allocation46_spill] sm:$0xff] %v5853_v34 }
 0x335   :  { %1214 = vmatmul.f32.gmra.mxu1 %v4538_v31 }
 0x337   :  { %v5857_v13 = vpop.f32.mrf.mxu2 }
 0x338   :  { %7103 = vst [vmem:[#allocation50_spill] sm:$0xff] %v5857_v13 }
 0x33d   :  { %1217 = vmatmul.f32.gmra.mxu1 %v4540_v10 }
 0x33f   :  { %v5859_v24 = vpop.f32.mrf.mxu2 }
 0x340   :  { %7104 = vst [vmem:[#allocation48_spill] sm:$0xff] %v5859_v24 }
 0x345   :  { %1220 = vmatmul.f32.gmra.mxu1 %v4542_v49 }
 0x347   :  { %v5864_v53 = vpop.f32.mrf.mxu2 }
 0x348   :  { %7105 = vst [vmem:[#allocation52_spill] sm:$0xff] %v5864_v53 }
 0x34d   :  { %1223 = vmatmul.f32.gmra.mxu1 %v4544_v1 }
 0x34f   :  { %v5872_v36 = vpop.f32.mrf.mxu2 }
 0x355   :  { %1226 = vmatmul.f32.gmra.mxu1 %v4546_v33 }
 0x357   :  { %v5877_v21 = vpop.f32.mrf.mxu2 }
 0x35d   :  { %1229 = vmatmul.f32.gmra.mxu1 %v4548_v56 }
 0x35f   :  { %v5882_v4 = vpop.f32.mrf.mxu2 }
 0x365   :  { %1232 = vmatmul.f32.gmra.mxu1 %v4550_v59 }
 0x367   :  { %v5884_v51 = vpop.f32.mrf.mxu2 }
 0x36d   :  { %1235 = vmatmul.f32.gmra.mxu1 %v4552_v16 }
 0x36f   :  { %v845_v20 = vpop.f32.mrf.mxu2 }
 0x375   :  { %1238 = vmatmul.f32.gmra.mxu1 %v4554_v9 }
 0x377   :  { %v848_v2 = vpop.f32.mrf.mxu2 }
 0x37a   :  { %v5886_v41 = vpop.f32.mrf.mxu1 }
 0x37f   :  { %v851_v12 = vpop.f32.mrf.mxu2 }
 0x382   :  { %v5888_v32 = vpop.f32.mrf.mxu1 }
 0x387   :  { %v854_v25 = vpop.f32.mrf.mxu2 }
 0x38a   :  { %v5890_v31 = vpop.f32.mrf.mxu1 }
 0x38f   :  { %v857_v49 = vpop.f32.mrf.mxu2 }
 0x392   :  { %v1203_v18 = vpop.f32.mrf.mxu1 }
 0x397   :  { %v860_v1 = vpop.f32.mrf.mxu2 }
 0x39a   :  { %v1206_v44 = vpop.f32.mrf.mxu1 }
 0x39f   :  { %v863_v33 = vpop.f32.mrf.mxu2 }
 0x3a2   :  { %v1209_v10 = vpop.f32.mrf.mxu1 }
 0x3a7   :  { %v866_v56 = vpop.f32.mrf.mxu2 }
 0x3aa   :  { %v1212_v48 = vpop.f32.mrf.mxu1 }
 0x3af   :  { %v869_v15 = vpop.f32.mrf.mxu2 }
 0x3b2   :  { %v1215_v17 = vpop.f32.mrf.mxu1 }
 0x3b7   :  { %v872_v9 = vpop.f32.mrf.mxu2 }
 0x3ba   :  { %v1218_v35 = vpop.f32.mrf.mxu1 }
 0x3bf   :  { %v875_v24 = vpop.f32.mrf.mxu2 }
 0x3c2   :  { %v1221_v46 = vpop.f32.mrf.mxu1 }
 0x3c3   :  { %v1251_v30 = vmul.f32 %v1221_v46, %v860_v1  ;;  %v1795_v1 = vld [vmem:[#allocation6 + $0x2f8] sm:$0xff] }
 0x3c7   :  { %v878_v13 = vpop.f32.mrf.mxu2 }
 0x3ca   :  { %v1224_v23 = vpop.f32.mrf.mxu1 }
 0x3cb   :  { %v1252_v37 = vmul.f32 %v1224_v23, %v863_v33  ;;  %v1790_v33 = vld [vmem:[#allocation6 + $0x2d0] sm:$0xff] }
 0x3d2   :  { %v1227_v59 = vpop.f32.mrf.mxu1 }
 0x3d3   :  { %v1253_v60 = vmul.f32 %v1227_v59, %v866_v56  ;;  %v1792_v56 = vld [vmem:[#allocation6 + $0x2e0] sm:$0xff] }
 0x3da   :  { %v1230_v16 = vpop.f32.mrf.mxu1 }
 0x3db   :  { %v1254_v11 = vmul.f32 %v1230_v16, %v869_v15  ;;  %v4485_v15 = vld [vmem:[#allocation4 + $0x38] sm:$0xff]  }
 0x3e2   :  { %v1233_v53 = vpop.f32.mrf.mxu1 }
 0x3e3   :  { %v1255_v5 = vmul.f32 %v1233_v53, %v872_v9  ;;  %v1787_v9 = vld [vmem:[#allocation6 + $0x2b8] sm:$0xff] }
 0x3ea   :  { %v1236_v34 = vpop.f32.mrf.mxu1 }
 0x3eb   :  { %v1256_v63 = vmul.f32 %v1236_v34, %v875_v24  ;;  %v1242_v24 = vmul.f32 %v5886_v41, %v5872_v36 }
 0x3f2   :  { %v1239_v7 = vpop.f32.mrf.mxu1 }
 0x3f3   :  { %v1257_v38 = vmul.f32 %v1239_v7, %v878_v13  ;;  %1323 = vmatpush.msra.mxu3 %v1239_v7  ;;  %v1250_v13 = vmul.f32 %v1218_v35, %v857_v49  ;;  %v1793_v49 = vld [vmem:[#allocation6 + $0x2e8] sm:$0xff] }
 0x3f4   :  { %1799 = vmatpush.msrb.mxu0 %v1793_v49  ;;  %v1772_v49 = vld [vmem:[#allocation6 + $0x240] sm:$0xff] }
 0x3f5   :  { %1258 = vmatpush.msra.mxu2 %v1257_v38  ;;  %1324 = vmatpush.msra.mxu3 %v1236_v34  ;;  %v1249_v38 = vmul.f32 %v1215_v17, %v854_v25  ;;  %v1243_v34 = vmul.f32 %v5888_v32, %v5877_v21  ;;  %v4483_v25 = vld [vmem:[#allocation4 + $0x28] sm:$0xff]  }
 0x3f6   :  { %1800 = vmatpush.msrb.mxu0 %v1790_v33  ;;  %v1770_v33 = vld [vmem:[#allocation6 + $0x230] sm:$0xff] }
 0x3f7   :  { %1259 = vmatpush.msra.mxu2 %v1256_v63  ;;  %1325 = vmatpush.msra.mxu3 %v1233_v53  ;;  %v1248_v63 = vmul.f32 %v1212_v48, %v851_v12 }
 0x3f8   :  { %1801 = vmatpush.msrb.mxu0 %v1787_v9  ;;  %v1768_v9 = vld [vmem:[#allocation6 + $0x220] sm:$0xff] }
 0x3f9   :  { %1260 = vmatpush.msra.mxu2 %v1255_v5  ;;  %1326 = vmatpush.msra.mxu3 %v1230_v16  ;;  %v1247_v5 = vmul.f32 %v1209_v10, %v848_v2  ;;  %v5958_v16 = vunpack.c.l.bf16 %v4485_v15 }
 0x3fb   :  { %1261 = vmatpush.msra.mxu2 %v1254_v11  ;;  %1327 = vmatpush.msra.mxu3 %v1227_v59  ;;  %v1246_v11 = vmul.f32 %v1206_v44, %v845_v20  ;;  %v4481_v20 = vld [vmem:[#allocation4 + $0x18] sm:$0xff]   ;;  %7120 = vst [vmem:[#allocation93_spill] sm:$0xff] %v5958_v16 }
 0x3fc   :  { %v5930_v2 = vunpack.c.h.bf16 %v4481_v20 }
 0x3fd   :  { %1262 = vmatpush.msra.mxu2 %v1253_v60  ;;  %1328 = vmatpush.msra.mxu3 %v1224_v23  ;;  %v1245_v60 = vmul.f32 %v1203_v18, %v5884_v51  ;;  %v4480_v51 = vld [vmem:[#allocation4 + $0x10] sm:$0xff]  }
 0x3fe   :  { %7113 = vst [vmem:[#allocation86_spill] sm:$0xff] %v5930_v2 }
 0x3ff   :  { %1263 = vmatpush.msra.mxu2 %v1252_v37  ;;  %1329 = vmatpush.msra.mxu3 %v1221_v46  ;;  %v4338_v37 = vld [vmem:[#allocation4] sm:$0xff]   ;;  %v1791_v46 = vld [vmem:[#allocation6 + $0x2d8] sm:$0xff] }
 0x400   :  { %v5896_v7 = vunpack.c.l.bf16 %v4338_v37  ;;  %v5906_v53 = vunpack.c.h.bf16 %v4338_v37  ;;  %v1782_v37 = vld [vmem:[#allocation6 + $0x290] sm:$0xff] }
 0x401   :  { %1264 = vmatpush.msra.mxu2 %v1251_v30  ;;  %1330 = vmatpush.msra.mxu3 %v1218_v35  ;;  %v1244_v30 = vmul.f32 %v5890_v31, %v5882_v4  ;;  %v4479_v4 = vld [vmem:[#allocation4 + $0x8] sm:$0xff]   ;;  %v4484_v35 = vld [vmem:[#allocation4 + $0x30] sm:$0xff]  }
 0x402   :  { %7106 = vst [vmem:[#allocation54_spill] sm:$0xff] %v5896_v7  ;;  %v5910_v21 = vunpack.c.l.bf16 %v4479_v4  ;;  %v5914_v36 = vunpack.c.h.bf16 %v4479_v4  ;;  %v5950_v23 = vunpack.c.l.bf16 %v4484_v35  ;;  %v5954_v59 = vunpack.c.h.bf16 %v4484_v35  ;;  %v1779_v4 = vld [vmem:[#allocation6 + $0x278] sm:$0xff]  ;;  %v1769_v35 = vld [vmem:[#allocation6 + $0x228] sm:$0xff] }
 0x403   :  { %1265 = vmatpush.msra.mxu2 %v1250_v13  ;;  %1331 = vmatpush.msra.mxu3 %v1215_v17  ;;  %7107 = vst [vmem:[#allocation80_spill] sm:$0xff] %v5906_v53  ;;  %v1794_v17 = vld [vmem:[#allocation6 + $0x2f0] sm:$0xff]  ;;  %v1788_v13 = vld [vmem:[#allocation6 + $0x2c0] sm:$0xff] }
 0x404   :  { %7108 = vst [vmem:[#allocation81_spill] sm:$0xff] %v5910_v21  ;;  %1864 = vmatpush.msrb.mxu1 %v1794_v17  ;;  %v1773_v17 = vld [vmem:[#allocation6 + $0x248] sm:$0xff] }
 0x405   :  { %1266 = vmatpush.msra.mxu2 %v1249_v38  ;;  %1332 = vmatpush.msra.mxu3 %v1212_v48  ;;  %7109 = vst [vmem:[#allocation82_spill] sm:$0xff] %v5914_v36  ;;  %v5946_v48 = vunpack.c.h.bf16 %v4483_v25  ;;  %v1789_v38 = vld [vmem:[#allocation6 + $0x2c8] sm:$0xff] }
 0x406   :  { %7118 = vst [vmem:[#allocation91_spill] sm:$0xff] %v5950_v23  ;;  %1865 = vmatpush.msrb.mxu1 %v1791_v46  ;;  %v1771_v46 = vld [vmem:[#allocation6 + $0x238] sm:$0xff] }
 0x407   :  { %1267 = vmatpush.msra.mxu2 %v1248_v63  ;;  %1333 = vmatpush.msra.mxu3 %v1209_v10  ;;  %v5942_v10 = vunpack.c.l.bf16 %v4483_v25  ;;  %7117 = vst [vmem:[#allocation90_spill] sm:$0xff] %v5946_v48  ;;  %v1784_v63 = vld [vmem:[#allocation6 + $0x2a0] sm:$0xff]  ;;  %v1777_v25 = vld [vmem:[#allocation6 + $0x268] sm:$0xff] }
 0x408   :  { %7119 = vst [vmem:[#allocation92_spill] sm:$0xff] %v5954_v59  ;;  %1866 = vmatpush.msrb.mxu1 %v1788_v13  ;;  %1802 = vmatpush.msrb.mxu0 %v1784_v63  ;;  %v1763_v13 = vld [vmem:[#allocation6 + $0x1f8] sm:$0xff]  ;;  %v1765_v63 = vld [vmem:[#allocation6 + $0x208] sm:$0xff] }
 0x409   :  { %1268 = vmatpush.msra.mxu2 %v1247_v5  ;;  %1334 = vmatpush.msra.mxu3 %v1206_v44  ;;  %7116 = vst [vmem:[#allocation89_spill] sm:$0xff] %v5942_v10  ;;  %v1785_v5 = vld [vmem:[#allocation6 + $0x2a8] sm:$0xff] }
 0x40a   :  { %1867 = vmatpush.msrb.mxu1 %v1785_v5  ;;  %v1760_v5 = vld [vmem:[#allocation6 + $0x1e0] sm:$0xff] }
 0x40b   :  { %1269 = vmatpush.msra.mxu2 %v1246_v11  ;;  %1335 = vmatpush.msra.mxu3 %v1203_v18  ;;  %v4482_v18 = vld [vmem:[#allocation4 + $0x20] sm:$0xff]   ;;  %v1786_v11 = vld [vmem:[#allocation6 + $0x2b0] sm:$0xff] }
 0x40c   :  { %v5934_v12 = vunpack.c.l.bf16 %v4482_v18  ;;  %v5938_v44 = vunpack.c.h.bf16 %v4482_v18  ;;  %1868 = vmatpush.msrb.mxu1 %v1782_v37  ;;  %v1776_v18 = vld [vmem:[#allocation6 + $0x260] sm:$0xff]  ;;  %v1757_v37 = vld [vmem:[#allocation6 + $0x1c8] sm:$0xff] }
 0x40d   :  { %1270 = vmatpush.msra.mxu2 %v1245_v60  ;;  %1336 = vmatpush.msra.mxu3 %v5890_v31  ;;  %v5926_v31 = vunpack.c.l.bf16 %v4481_v20  ;;  %v1781_v60 = vld [vmem:[#allocation6 + $0x288] sm:$0xff]  ;;  %v1775_v20 = vld [vmem:[#allocation6 + $0x258] sm:$0xff] }
 0x40e   :  { %7114 = vst [vmem:[#allocation87_spill] sm:$0xff] %v5934_v12  ;;  %1803 = vmatpush.msrb.mxu0 %v1781_v60  ;;  %1869 = vmatpush.msrb.mxu1 %v1779_v4  ;;  %v1762_v60 = vld [vmem:[#allocation6 + $0x1f0] sm:$0xff] }
 0x40f   :  { %1271 = vmatpush.msra.mxu2 %v1244_v30  ;;  %1337 = vmatpush.msra.mxu3 %v5888_v32  ;;  %v5922_v32 = vunpack.c.h.bf16 %v4480_v51  ;;  %7112 = vst [vmem:[#allocation85_spill] sm:$0xff] %v5926_v31  ;;  %v1783_v30 = vld [vmem:[#allocation6 + $0x298] sm:$0xff] }
 0x410   :  { %7115 = vst [vmem:[#allocation88_spill] sm:$0xff] %v5938_v44  ;;  %1870 = vmatpush.msrb.mxu1 %v1776_v18  ;;  %v1756_v18 = vld [vmem:[#allocation6 + $0x1c0] sm:$0xff] }
 0x411   :  { %1272 = vmatpush.msra.mxu2 %v1243_v34  ;;  %1338 = vmatpush.msra.mxu3 %v5886_v41  ;;  %v5918_v41 = vunpack.c.l.bf16 %v4480_v51  ;;  %7111 = vst [vmem:[#allocation84_spill] sm:$0xff] %v5922_v32  ;;  %v1778_v34 = vld [vmem:[#allocation6 + $0x270] sm:$0xff]  ;;  %v1780_v51 = vld [vmem:[#allocation6 + $0x280] sm:$0xff] }
 0x412   :  { %1339 = vmatmul.f32.vlgmr.msra.gmra.mxu3 %v5896_v7  ;;  %1804 = vmatpush.msrb.mxu0 %v1778_v34  ;;  %v1759_v34 = vld [vmem:[#allocation6 + $0x1d8] sm:$0xff] }
 0x413   :  { %1273 = vmatpush.msra.mxu2 %v1242_v24  ;;  %7110 = vst [vmem:[#allocation83_spill] sm:$0xff] %v5918_v41  ;;  %v5962_v24 = vunpack.c.h.bf16 %v4485_v15  ;;  %1871 = vmatpush.msrb.mxu1 %v1773_v17  ;;  %v1767_v15 = vld [vmem:[#allocation6 + $0x218] sm:$0xff] }
 0x414   :  { %1274 = vmatmul.f32.vlgmr.msra.gmra.mxu2 %v5896_v7  ;;  %1805 = vmatpush.msrb.mxu0 %v1775_v20  ;;  %v1755_v20 = vld [vmem:[#allocation6 + $0x1b8] sm:$0xff] }
 0x415   :  { %1929 = vmatpush.msrb.mxu2 %v1795_v1  ;;  %7121 = vst [vmem:[#allocation94_spill] sm:$0xff] %v5962_v24  ;;  %v1774_v1 = vld [vmem:[#allocation6 + $0x250] sm:$0xff]  ;;  %1872 = vmatpush.msrb.mxu1 %v1770_v33  ;;  %v1751_v17 = vld [vmem:[#allocation6 + $0x198] sm:$0xff]  ;;  %v1748_v33 = vld [vmem:[#allocation6 + $0x180] sm:$0xff] }
 0x416   :  { %1806 = vmatpush.msrb.mxu0 %v1772_v49 }
 0x417   :  { %1930 = vmatpush.msrb.mxu2 %v1792_v56  ;;  %v1766_v56 = vld [vmem:[#allocation6 + $0x210] sm:$0xff]  ;;  %1873 = vmatpush.msrb.mxu1 %v1767_v15 }
 0x418   :  { %1807 = vmatpush.msrb.mxu0 %v1769_v35  ;;  %v1753_v35 = vld [vmem:[#allocation6 + $0x1a8] sm:$0xff] }
 0x419   :  { %1931 = vmatpush.msrb.mxu2 %v1789_v38  ;;  %v1764_v38 = vld [vmem:[#allocation6 + $0x200] sm:$0xff] }
 0x41a   :  { %1342 = vmatmul.f32.gmra.mxu3 %v5906_v53  ;;  %1808 = vmatpush.msrb.mxu0 %v1766_v56  ;;  %v1750_v56 = vld [vmem:[#allocation6 + $0x190] sm:$0xff] }
 0x41b   :  { %1932 = vmatpush.msrb.mxu2 %v1786_v11  ;;  %v1761_v11 = vld [vmem:[#allocation6 + $0x1e8] sm:$0xff]  ;;  %1874 = vmatpush.msrb.mxu1 %v1764_v38 }
 0x41c   :  { %1277 = vmatmul.f32.gmra.mxu2 %v5906_v53  ;;  %1809 = vmatpush.msrb.mxu0 %v1763_v13 }
 0x41d   :  { %1933 = vmatpush.msrb.mxu2 %v1783_v30  ;;  %v1758_v30 = vld [vmem:[#allocation6 + $0x1d0] sm:$0xff]  ;;  %1875 = vmatpush.msrb.mxu1 %v1761_v11 }
 0x41e   :  { %1810 = vmatpush.msrb.mxu0 %v1760_v5 }
 0x41f   :  { %1934 = vmatpush.msrb.mxu2 %v1780_v51  ;;  %v1754_v51 = vld [vmem:[#allocation6 + $0x1b0] sm:$0xff]  ;;  %1876 = vmatpush.msrb.mxu1 %v1758_v30 }
 0x420   :  { %1811 = vmatpush.msrb.mxu0 %v1757_v37 }
 0x421   :  { %1935 = vmatpush.msrb.mxu2 %v1777_v25  ;;  %1877 = vmatpush.msrb.mxu1 %v1755_v20 }
 0x422   :  { %1345 = vmatmul.f32.gmra.mxu3 %v5910_v21  ;;  %1812 = vmatpush.msrb.mxu0 %v1754_v51  ;;  %v4715_v51 = vld [vmem:[#allocation9 + $0x8] sm:$0xff] }
 0x423   :  { %1936 = vmatpush.msrb.mxu2 %v1774_v1  ;;  %v1752_v1 = vld [vmem:[#allocation6 + $0x1a0] sm:$0xff]  ;;  %v5966_v20 = vperm.slane %v4715_v51, 1 }
 0x424   :  { %1280 = vmatmul.f32.gmra.mxu2 %v5910_v21  ;;  %1813 = vmatpush.msrb.mxu0 %v1751_v17 }
 0x425   :  { %1937 = vmatpush.msrb.mxu2 %v1771_v46  ;;  %v1749_v46 = vld [vmem:[#allocation6 + $0x188] sm:$0xff]  ;;  %1878 = vmatpush.msrb.mxu1 %v1752_v1 }
 0x426   :  { %1814 = vmatpush.msrb.mxu0 %v1748_v33 }
 0x427   :  { %1938 = vmatpush.msrb.mxu2 %v1768_v9  ;;  %1879 = vmatpush.msrb.mxu1 %v1749_v46 }
 0x429   :  { %1939 = vmatpush.msrb.mxu2 %v1765_v63 }
 0x42a   :  { %1348 = vmatmul.f32.gmra.mxu3 %v5914_v36 }
 0x42b   :  { %1940 = vmatpush.msrb.mxu2 %v1762_v60 }
 0x42c   :  { %1283 = vmatmul.f32.gmra.mxu2 %v5914_v36 }
 0x42d   :  { %1941 = vmatpush.msrb.mxu2 %v1759_v34 }
 0x42f   :  { %1942 = vmatpush.msrb.mxu2 %v1756_v18 }
 0x431   :  { %1943 = vmatpush.msrb.mxu2 %v1753_v35 }
 0x432   :  { %1351 = vmatmul.f32.gmra.mxu3 %v5918_v41 }
 0x433   :  { %1944 = vmatpush.msrb.mxu2 %v1750_v56  ;;  %v4716_v56 = vld [vmem:[#allocation9 + $0x10] sm:$0xff] }
 0x434   :  { %1286 = vmatmul.f32.gmra.mxu2 %v5918_v41 }
 0x43a   :  { %1354 = vmatmul.f32.gmra.mxu3 %v5922_v32 }
 0x43c   :  { %1289 = vmatmul.f32.gmra.mxu2 %v5922_v32 }
 0x442   :  { %1357 = vmatmul.f32.gmra.mxu3 %v5926_v31 }
 0x444   :  { %1292 = vmatmul.f32.gmra.mxu2 %v5926_v31 }
 0x44a   :  { %1360 = vmatmul.f32.gmra.mxu3 %v5930_v2 }
 0x44c   :  { %1295 = vmatmul.f32.gmra.mxu2 %v5930_v2 }
 0x452   :  { %1363 = vmatmul.f32.gmra.mxu3 %v5934_v12 }
 0x454   :  { %1298 = vmatmul.f32.gmra.mxu2 %v5934_v12 }
 0x45a   :  { %1366 = vmatmul.f32.gmra.mxu3 %v5938_v44 }
 0x45c   :  { %1301 = vmatmul.f32.gmra.mxu2 %v5938_v44 }
 0x462   :  { %1369 = vmatmul.f32.gmra.mxu3 %v5942_v10 }
 0x464   :  { %1304 = vmatmul.f32.gmra.mxu2 %v5942_v10 }
 0x46a   :  { %1372 = vmatmul.f32.gmra.mxu3 %v5946_v48 }
 0x46c   :  { %1307 = vmatmul.f32.gmra.mxu2 %v5946_v48 }
 0x472   :  { %1375 = vmatmul.f32.gmra.mxu3 %v5950_v23 }
 0x474   :  { %1310 = vmatmul.f32.gmra.mxu2 %v5950_v23 }
 0x47a   :  { %1378 = vmatmul.f32.gmra.mxu3 %v5954_v59 }
 0x47c   :  { %1313 = vmatmul.f32.gmra.mxu2 %v5954_v59 }
 0x482   :  { %1381 = vmatmul.f32.gmra.mxu3 %v5958_v16 }
 0x484   :  { %1316 = vmatmul.f32.gmra.mxu2 %v5958_v16 }
 0x48a   :  { %1384 = vmatmul.f32.gmra.mxu3 %v5962_v24 }
 0x48c   :  { %1319 = vmatmul.f32.gmra.mxu2 %v5962_v24 }
 0x495   :  { %v1340_v4 = vpop.f32.mrf.mxu3 }
 0x496   :  { %vm1388_vm0 = vcmp.gt.f32.partialorder %v1340_v4, 0.0 }
 0x497   :  { %v1404_v25 = vsel %vm1388_vm0, %v1340_v4, 1.0  ;;  %v1275_v49 = vpop.f32.mrf.mxu2 }
 0x498   :  { %4555 = vrcp.f32 %v1404_v25  ;;  %v1431_v11 = vand.u32 2147483648, %v1404_v25  ;;  %v1429_v37 = vand.u32 2147483647, %v1404_v25  ;;  %vm1425_vm3 = vweird.f32 %v1404_v25 }
 0x49a   :  { %v1432_v18 = vor.u32 1.1754944e-38, %v1431_v11  ;;  %vm1430_vm6 = vcmp.eq.f32.partialorder %v1429_v37, 8.507059e+37 }
 0x49d   :  { %v1343_v15 = vpop.f32.mrf.mxu3 }
 0x49e   :  { %v4556_v9 = vpop.eup %4555  ;;  %vm1389_vm1 = vcmp.gt.f32.partialorder %v1343_v15, 0.0 }
 0x49f   :  { %v1421_v13 = vmul.f32 %v4556_v9, %v1404_v25  ;;  %v1405_v38 = vsel %vm1389_vm1, %v1343_v15, 1.0  ;;  %v1278_v63 = vpop.f32.mrf.mxu2  ;;  %vm1426_vm2 = vweird.f32 %v4556_v9  ;;  %v5968_v15 = vperm.slane %v4716_v56, 1 }
 0x4a0   :  { %4557 = vrcp.f32 %v1405_v38  ;;  %vm1427_vm5 = vmor %vm1425_vm3, %vm1426_vm2  ;;  %v1444_v25 = vand.u32 2147483647, %v1405_v38  ;;  %vm1440_vm8 = vweird.f32 %v1405_v38 }
 0x4a1   :  { %v1422_v5 = vsub.f32 1.0, %v1421_v13 }
 0x4a2   :  { %vm1445_vm11 = vcmp.eq.f32.partialorder %v1444_v25, 8.507059e+37 }
 0x4a3   :  { %v1423_v60 = vmul.f32 %v4556_v9, %v1422_v5 }
 0x4a5   :  { %v1346_v30 = vpop.f32.mrf.mxu3  ;;  %v1424_v34 = vadd.f32 %v4556_v9, %v1423_v60  ;;  %v1446_v60 = vand.u32 2147483648, %v1405_v38 }
 0x4a6   :  { %v4558_v4 = vpop.eup %4557  ;;  %vm1390_vm4 = vcmp.gt.f32.partialorder %v1346_v30, 0.0 }
 0x4a7   :  { %v1436_v17 = vmul.f32 %v4558_v4, %v1405_v38  ;;  %v1406_v1 = vsel %vm1390_vm4, %v1346_v30, 1.0  ;;  %v1428_v35 = vsel %vm1427_vm5, %v4556_v9, %v1424_v34  ;;  %v1281_v33 = vpop.f32.mrf.mxu2  ;;  %vm1441_vm7 = vweird.f32 %v4558_v4 }
 0x4a8   :  { %4559 = vrcp.f32 %v1406_v1  ;;  %v1433_v46 = vsel %vm1430_vm6, %v1432_v18, %v1428_v35  ;;  %vm1442_vm10 = vmor %vm1440_vm8, %vm1441_vm7  ;;  %v1447_v37 = vor.u32 1.1754944e-38, %v1446_v60  ;;  %vm1455_vm13 = vweird.f32 %v1406_v1 }
 0x4a9   :  { %v1437_v13 = vsub.f32 1.0, %v1436_v17  ;;  %v1434_v5 = vmul.f32 %v1433_v46, %v1275_v49 }
 0x4ab   :  { %v1661_v51 = vmul.f32 %v5966_v20, %v1434_v5  ;;  %v1438_v42 = vmul.f32 %v4558_v4, %v1437_v13  ;;  %v1459_v5 = vand.u32 2147483647, %v1406_v1 }
 0x4ad   :  { %v1678_v11 = vadd.f32 %v5968_v15, %v1661_v51  ;;  %v1349_v58 = vpop.f32.mrf.mxu3  ;;  %v1439_v30 = vadd.f32 %v4558_v4, %v1438_v42  ;;  %v1461_v42 = vand.u32 2147483648, %v1406_v1  ;;  %vm1460_vm0 = vcmp.eq.f32.partialorder %v1459_v5, 8.507059e+37 }
 0x4ae   :  { %v4560_v9 = vpop.eup %4559  ;;  %vm1391_vm9 = vcmp.gt.f32.partialorder %v1349_v58, 0.0 }
 0x4af   :  { %v1451_v34 = vmul.f32 %v4560_v9, %v1406_v1  ;;  %v1694_v18 = vmax.f32 %v1678_v11, 0.0  ;;  %v1407_v17 = vsel %vm1391_vm9, %v1349_v58, 1.0  ;;  %v1443_v49 = vsel %vm1442_vm10, %v4558_v4, %v1439_v30  ;;  %v1284_v35 = vpop.f32.mrf.mxu2 }
 0x4b0   :  { %4561 = vrcp.f32 %v1407_v17  ;;  %v1448_v46 = vsel %vm1445_vm11, %v1447_v37, %v1443_v49  ;;  %vm1456_vm12 = vweird.f32 %v4560_v9  ;;  %v1462_v11 = vor.u32 1.1754944e-38, %v1461_v42 }
 0x4b1   :  { %v1452_v56 = vsub.f32 1.0, %v1451_v34  ;;  %v1449_v13 = vmul.f32 %v1448_v46, %v1278_v63  ;;  %1815 = vmatmul.f32.vlgmr.msrb.gmra.mxu0 %v1694_v18  ;;  %1880 = vmatmul.f32.vlgmr.msrb.gmra.mxu1 %v1694_v18  ;;  %vm1457_vm15 = vmor %vm1455_vm13, %vm1456_vm12  ;;  %v1474_v1 = vand.u32 2147483647, %v1407_v17  ;;  %vm1470_vm2 = vweird.f32 %v1407_v17 }
 0x4b2   :  { %1945 = vmatmul.f32.vlgmr.msrb.gmra.mxu2 %v1694_v18 }
 0x4b3   :  { %v1662_v38 = vmul.f32 %v5966_v20, %v1449_v13  ;;  %v1453_v51 = vmul.f32 %v4560_v9, %v1452_v56  ;;  %v1476_v13 = vand.u32 2147483648, %v1407_v17  ;;  %vm1475_vm5 = vcmp.eq.f32.partialorder %v1474_v1, 8.507059e+37 }
 0x4b5   :  { %v1352_v25 = vpop.f32.mrf.mxu3  ;;  %v1454_v60 = vadd.f32 %v4560_v9, %v1453_v51  ;;  %v1679_v58 = vadd.f32 %v5968_v15, %v1662_v38 }
 0x4b6   :  { %v4562_v4 = vpop.eup %4561  ;;  %vm1392_vm14 = vcmp.gt.f32.partialorder %v1352_v25, 0.0 }
 0x4b7   :  { %v1466_v63 = vmul.f32 %v4562_v4, %v1407_v17  ;;  %v1408_v30 = vsel %vm1392_vm14, %v1352_v25, 1.0  ;;  %v1458_v37 = vsel %vm1457_vm15, %v4560_v9, %v1454_v60  ;;  %v1695_v34 = vmax.f32 %v1679_v58, 0.0  ;;  %v1287_v18 = vpop.f32.mrf.mxu2 }
 0x4b8   :  { %4563 = vrcp.f32 %v1408_v30  ;;  %v1463_v49 = vsel %vm1460_vm0, %v1462_v11, %v1458_v37  ;;  %vm1471_vm1 = vweird.f32 %v4562_v4  ;;  %v1477_v60 = vor.u32 1.1754944e-38, %v1476_v13 }
 0x4b9   :  { %v1467_v46 = vsub.f32 1.0, %v1466_v63  ;;  %v1464_v56 = vmul.f32 %v1463_v49, %v1281_v33  ;;  %1818 = vmatmul.f32.gmra.mxu0 %v1695_v34  ;;  %1883 = vmatmul.f32.gmra.mxu1 %v1695_v34  ;;  %vm1472_vm4 = vmor %vm1470_vm2, %vm1471_vm1  ;;  %v1489_v17 = vand.u32 2147483647, %v1408_v30  ;;  %vm1485_vm7 = vweird.f32 %v1408_v30 }
 0x4ba   :  { %1948 = vmatmul.f32.gmra.mxu2 %v1695_v34 }
 0x4bb   :  { %v1663_v38 = vmul.f32 %v5966_v20, %v1464_v56  ;;  %v1468_v51 = vmul.f32 %v4562_v4, %v1467_v46  ;;  %v1491_v56 = vand.u32 2147483648, %v1408_v30  ;;  %vm1490_vm10 = vcmp.eq.f32.partialorder %v1489_v17, 8.507059e+37 }
 0x4bd   :  { %v1355_v5 = vpop.f32.mrf.mxu3  ;;  %v1469_v42 = vadd.f32 %v4562_v4, %v1468_v51  ;;  %v1680_v9 = vadd.f32 %v5968_v15, %v1663_v38 }
 0x4be   :  { %v4564_v25 = vpop.eup %4563  ;;  %vm1393_vm3 = vcmp.gt.f32.partialorder %v1355_v5, 0.0 }
 0x4bf   :  { %v1481_v33 = vmul.f32 %v4564_v25, %v1408_v30  ;;  %v1409_v58 = vsel %vm1393_vm3, %v1355_v5, 1.0  ;;  %v1473_v11 = vsel %vm1472_vm4, %v4562_v4, %v1469_v42  ;;  %v1696_v63 = vmax.f32 %v1680_v9, 0.0  ;;  %v1290_v37 = vpop.f32.mrf.mxu2 }
 0x4c0   :  { %4565 = vrcp.f32 %v1409_v58  ;;  %v1478_v34 = vsel %vm1475_vm5, %v1477_v60, %v1473_v11  ;;  %vm1486_vm6 = vweird.f32 %v4564_v25  ;;  %v1492_v42 = vor.u32 1.1754944e-38, %v1491_v56 }
 0x4c1   :  { %v1482_v49 = vsub.f32 1.0, %v1481_v33  ;;  %v1479_v46 = vmul.f32 %v1478_v34, %v1284_v35  ;;  %1821 = vmatmul.f32.gmra.mxu0 %v1696_v63  ;;  %1886 = vmatmul.f32.gmra.mxu1 %v1696_v63  ;;  %vm1487_vm9 = vmor %vm1485_vm7, %vm1486_vm6  ;;  %v1504_v30 = vand.u32 2147483647, %v1409_v58  ;;  %vm1500_vm12 = vweird.f32 %v1409_v58 }
 0x4c2   :  { %1951 = vmatmul.f32.gmra.mxu2 %v1696_v63 }
 0x4c3   :  { %v1664_v38 = vmul.f32 %v5966_v20, %v1479_v46  ;;  %v1483_v51 = vmul.f32 %v4564_v25, %v1482_v49  ;;  %v1506_v46 = vand.u32 2147483648, %v1409_v58  ;;  %vm1505_vm15 = vcmp.eq.f32.partialorder %v1504_v30, 8.507059e+37 }
 0x4c5   :  { %v1358_v1 = vpop.f32.mrf.mxu3  ;;  %v1484_v13 = vadd.f32 %v4564_v25, %v1483_v51  ;;  %v1681_v4 = vadd.f32 %v5968_v15, %v1664_v38 }
 0x4c6   :  { %v4566_v5 = vpop.eup %4565  ;;  %vm1394_vm8 = vcmp.gt.f32.partialorder %v1358_v1, 0.0 }
 0x4c7   :  { %v1496_v35 = vmul.f32 %v4566_v5, %v1409_v58  ;;  %v1410_v9 = vsel %vm1394_vm8, %v1358_v1, 1.0  ;;  %v1488_v60 = vsel %vm1487_vm9, %v4564_v25, %v1484_v13  ;;  %v1697_v33 = vmax.f32 %v1681_v4, 0.0  ;;  %v1293_v11 = vpop.f32.mrf.mxu2 }
 0x4c8   :  { %4567 = vrcp.f32 %v1410_v9  ;;  %v1493_v63 = vsel %vm1490_vm10, %v1492_v42, %v1488_v60  ;;  %vm1501_vm11 = vweird.f32 %v4566_v5  ;;  %v1507_v13 = vor.u32 1.1754944e-38, %v1506_v46 }
 0x4c9   :  { %v1497_v34 = vsub.f32 1.0, %v1496_v35  ;;  %v1494_v49 = vmul.f32 %v1493_v63, %v1287_v18  ;;  %1824 = vmatmul.f32.gmra.mxu0 %v1697_v33  ;;  %1889 = vmatmul.f32.gmra.mxu1 %v1697_v33  ;;  %vm1502_vm14 = vmor %vm1500_vm12, %vm1501_vm11  ;;  %v1519_v58 = vand.u32 2147483647, %v1410_v9  ;;  %vm1515_vm1 = vweird.f32 %v1410_v9 }
 0x4ca   :  { %1954 = vmatmul.f32.gmra.mxu2 %v1697_v33 }
 0x4cb   :  { %v1665_v38 = vmul.f32 %v5966_v20, %v1494_v49  ;;  %v1498_v51 = vmul.f32 %v4566_v5, %v1497_v34  ;;  %v1521_v49 = vand.u32 2147483648, %v1410_v9  ;;  %vm1520_vm4 = vcmp.eq.f32.partialorder %v1519_v58, 8.507059e+37 }
 0x4cd   :  { %v1361_v17 = vpop.f32.mrf.mxu3  ;;  %v1499_v56 = vadd.f32 %v4566_v5, %v1498_v51  ;;  %v1682_v25 = vadd.f32 %v5968_v15, %v1665_v38 }
 0x4ce   :  { %v4568_v1 = vpop.eup %4567  ;;  %vm1395_vm13 = vcmp.gt.f32.partialorder %v1361_v17, 0.0 }
 0x4cf   :  { %v1511_v18 = vmul.f32 %v4568_v1, %v1410_v9  ;;  %v1411_v4 = vsel %vm1395_vm13, %v1361_v17, 1.0  ;;  %v1503_v42 = vsel %vm1502_vm14, %v4566_v5, %v1499_v56  ;;  %v1698_v35 = vmax.f32 %v1682_v25, 0.0  ;;  %v1296_v60 = vpop.f32.mrf.mxu2 }
 0x4d0   :  { %4569 = vrcp.f32 %v1411_v4  ;;  %v1508_v33 = vsel %vm1505_vm15, %v1507_v13, %v1503_v42  ;;  %vm1516_vm0 = vweird.f32 %v4568_v1  ;;  %v1522_v56 = vor.u32 1.1754944e-38, %v1521_v49 }
 0x4d1   :  { %v1512_v63 = vsub.f32 1.0, %v1511_v18  ;;  %v1509_v34 = vmul.f32 %v1508_v33, %v1290_v37  ;;  %1827 = vmatmul.f32.gmra.mxu0 %v1698_v35  ;;  %1892 = vmatmul.f32.gmra.mxu1 %v1698_v35  ;;  %vm1517_vm3 = vmor %vm1515_vm1, %vm1516_vm0  ;;  %v1534_v9 = vand.u32 2147483647, %v1411_v4  ;;  %vm1530_vm6 = vweird.f32 %v1411_v4 }
 0x4d2   :  { %1957 = vmatmul.f32.gmra.mxu2 %v1698_v35 }
 0x4d3   :  { %v1666_v38 = vmul.f32 %v5966_v20, %v1509_v34  ;;  %v1513_v51 = vmul.f32 %v4568_v1, %v1512_v63  ;;  %v1536_v34 = vand.u32 2147483648, %v1411_v4  ;;  %vm1535_vm9 = vcmp.eq.f32.partialorder %v1534_v9, 8.507059e+37 }
 0x4d5   :  { %v1364_v30 = vpop.f32.mrf.mxu3  ;;  %v1514_v46 = vadd.f32 %v4568_v1, %v1513_v51  ;;  %v1683_v5 = vadd.f32 %v5968_v15, %v1666_v38 }
 0x4d6   :  { %v4570_v17 = vpop.eup %4569  ;;  %vm1396_vm2 = vcmp.gt.f32.partialorder %v1364_v30, 0.0 }
 0x4d7   :  { %v1526_v37 = vmul.f32 %v4570_v17, %v1411_v4  ;;  %v1412_v25 = vsel %vm1396_vm2, %v1364_v30, 1.0  ;;  %v1518_v13 = vsel %vm1517_vm3, %v4568_v1, %v1514_v46  ;;  %v1699_v18 = vmax.f32 %v1683_v5, 0.0  ;;  %v1299_v35 = vpop.f32.mrf.mxu2 }
 0x4d8   :  { %4571 = vrcp.f32 %v1412_v25  ;;  %v1523_v42 = vsel %vm1520_vm4, %v1522_v56, %v1518_v13  ;;  %vm1531_vm5 = vweird.f32 %v4570_v17  ;;  %v1537_v46 = vor.u32 1.1754944e-38, %v1536_v34 }
 0x4d9   :  { %v1527_v33 = vsub.f32 1.0, %v1526_v37  ;;  %v1524_v63 = vmul.f32 %v1523_v42, %v1293_v11  ;;  %1830 = vmatmul.f32.gmra.mxu0 %v1699_v18  ;;  %1895 = vmatmul.f32.gmra.mxu1 %v1699_v18  ;;  %vm1532_vm8 = vmor %vm1530_vm6, %vm1531_vm5  ;;  %v1551_v4 = vand.u32 2147483648, %v1412_v25  ;;  %vm1545_vm11 = vweird.f32 %v1412_v25 }
 0x4da   :  { %1960 = vmatmul.f32.gmra.mxu2 %v1699_v18 }
 0x4db   :  { %v1667_v38 = vmul.f32 %v5966_v20, %v1524_v63  ;;  %v1528_v51 = vmul.f32 %v4570_v17, %v1527_v33  ;;  %v1549_v33 = vand.u32 2147483647, %v1412_v25 }
 0x4dd   :  { %v1367_v58 = vpop.f32.mrf.mxu3  ;;  %v1529_v49 = vadd.f32 %v4570_v17, %v1528_v51  ;;  %v1684_v1 = vadd.f32 %v5968_v15, %v1667_v38  ;;  %vm1550_vm14 = vcmp.eq.f32.partialorder %v1549_v33, 8.507059e+37 }
 0x4de   :  { %v4572_v30 = vpop.eup %4571  ;;  %vm1397_vm7 = vcmp.gt.f32.partialorder %v1367_v58, 0.0 }
 0x4df   :  { %v1541_v11 = vmul.f32 %v4572_v30, %v1412_v25  ;;  %v1413_v5 = vsel %vm1397_vm7, %v1367_v58, 1.0  ;;  %v1533_v56 = vsel %vm1532_vm8, %v4570_v17, %v1529_v49  ;;  %v1700_v37 = vmax.f32 %v1684_v1, 0.0  ;;  %v1302_v63 = vpop.f32.mrf.mxu2 }
 0x4e0   :  { %4573 = vrcp.f32 %v1413_v5  ;;  %v1538_v13 = vsel %vm1535_vm9, %v1537_v46, %v1533_v56  ;;  %vm1546_vm10 = vweird.f32 %v4572_v30  ;;  %v1566_v25 = vand.u32 2147483648, %v1413_v5 }
 0x4e1   :  { %v1542_v18 = vsub.f32 1.0, %v1541_v11  ;;  %v1539_v42 = vmul.f32 %v1538_v13, %v1296_v60  ;;  %1833 = vmatmul.f32.gmra.mxu0 %v1700_v37  ;;  %1898 = vmatmul.f32.gmra.mxu1 %v1700_v37  ;;  %vm1547_vm13 = vmor %vm1545_vm11, %vm1546_vm10  ;;  %v1552_v60 = vor.u32 1.1754944e-38, %v1551_v4  ;;  %vm1560_vm0 = vweird.f32 %v1413_v5 }
 0x4e2   :  { %1963 = vmatmul.f32.gmra.mxu2 %v1700_v37 }
 0x4e3   :  { %v1668_v38 = vmul.f32 %v5966_v20, %v1539_v42  ;;  %v1543_v51 = vmul.f32 %v4572_v30, %v1542_v18  ;;  %v1564_v18 = vand.u32 2147483647, %v1413_v5 }
 0x4e5   :  { %v1370_v9 = vpop.f32.mrf.mxu3  ;;  %v1544_v34 = vadd.f32 %v4572_v30, %v1543_v51  ;;  %v1685_v17 = vadd.f32 %v5968_v15, %v1668_v38  ;;  %vm1565_vm3 = vcmp.eq.f32.partialorder %v1564_v18, 8.507059e+37 }
 0x4e6   :  { %v4574_v58 = vpop.eup %4573  ;;  %vm1398_vm12 = vcmp.gt.f32.partialorder %v1370_v9, 0.0 }
 0x4e7   :  { %v1556_v49 = vmul.f32 %v4574_v58, %v1413_v5  ;;  %v1414_v1 = vsel %vm1398_vm12, %v1370_v9, 1.0  ;;  %v1548_v46 = vsel %vm1547_vm13, %v4572_v30, %v1544_v34  ;;  %v1701_v11 = vmax.f32 %v1685_v17, 0.0  ;;  %v1305_v51 = vpop.f32.mrf.mxu2 }
 0x4e8   :  { %4575 = vrcp.f32 %v1414_v1  ;;  %v1553_v56 = vsel %vm1550_vm14, %v1552_v60, %v1548_v46  ;;  %vm1561_vm15 = vweird.f32 %v4574_v58  ;;  %v1581_v5 = vand.u32 2147483648, %v1414_v1 }
 0x4e9   :  { %v1557_v37 = vsub.f32 1.0, %v1556_v49  ;;  %v1554_v13 = vmul.f32 %v1553_v56, %v1299_v35  ;;  %1836 = vmatmul.f32.gmra.mxu0 %v1701_v11  ;;  %1901 = vmatmul.f32.gmra.mxu1 %v1701_v11  ;;  %vm1562_vm2 = vmor %vm1560_vm0, %vm1561_vm15  ;;  %v1567_v35 = vor.u32 1.1754944e-38, %v1566_v25  ;;  %vm1575_vm5 = vweird.f32 %v1414_v1 }
 0x4ea   :  { %1966 = vmatmul.f32.gmra.mxu2 %v1701_v11 }
 0x4eb   :  { %v1669_v42 = vmul.f32 %v5966_v20, %v1554_v13  ;;  %v1558_v38 = vmul.f32 %v4574_v58, %v1557_v37  ;;  %v1579_v37 = vand.u32 2147483647, %v1414_v1 }
 0x4ed   :  { %v1373_v33 = vpop.f32.mrf.mxu3  ;;  %v1559_v4 = vadd.f32 %v4574_v58, %v1558_v38  ;;  %v1686_v30 = vadd.f32 %v5968_v15, %v1669_v42  ;;  %vm1580_vm8 = vcmp.eq.f32.partialorder %v1579_v37, 8.507059e+37 }
 0x4ee   :  { %v4576_v9 = vpop.eup %4575  ;;  %vm1399_vm1 = vcmp.gt.f32.partialorder %v1373_v33, 0.0 }
 0x4ef   :  { %v1571_v34 = vmul.f32 %v4576_v9, %v1414_v1  ;;  %v1415_v17 = vsel %vm1399_vm1, %v1373_v33, 1.0  ;;  %v1563_v60 = vsel %vm1562_vm2, %v4574_v58, %v1559_v4  ;;  %v1702_v49 = vmax.f32 %v1686_v30, 0.0 }
 0x4f0   :  { %4577 = vrcp.f32 %v1415_v17  ;;  %v1568_v46 = vsel %vm1565_vm3, %v1567_v35, %v1563_v60  ;;  %vm1576_vm4 = vweird.f32 %v4576_v9  ;;  %v1582_v33 = vor.u32 1.1754944e-38, %v1581_v5 }
 0x4f1   :  { %v1572_v11 = vsub.f32 1.0, %v1571_v34  ;;  %v1569_v56 = vmul.f32 %v1568_v46, %v1302_v63  ;;  %1839 = vmatmul.f32.gmra.mxu0 %v1702_v49  ;;  %1904 = vmatmul.f32.gmra.mxu1 %v1702_v49  ;;  %vm1577_vm7 = vmor %vm1575_vm5, %vm1576_vm4  ;;  %v1308_v63 = vpop.f32.mrf.mxu2  ;;  %v1594_v1 = vand.u32 2147483647, %v1415_v17  ;;  %vm1590_vm10 = vweird.f32 %v1415_v17 }
 0x4f2   :  { %1969 = vmatmul.f32.gmra.mxu2 %v1702_v49 }
 0x4f3   :  { %v1670_v13 = vmul.f32 %v5966_v20, %v1569_v56  ;;  %v1573_v42 = vmul.f32 %v4576_v9, %v1572_v11  ;;  %v1596_v11 = vand.u32 2147483648, %v1415_v17  ;;  %vm1595_vm13 = vcmp.eq.f32.partialorder %v1594_v1, 8.507059e+37 }
 0x4f5   :  { %v1376_v38 = vpop.f32.mrf.mxu3  ;;  %v1574_v18 = vadd.f32 %v4576_v9, %v1573_v42  ;;  %v1687_v25 = vadd.f32 %v5968_v15, %v1670_v13 }
 0x4f6   :  { %v4578_v58 = vpop.eup %4577  ;;  %vm1400_vm6 = vcmp.gt.f32.partialorder %v1376_v38, 0.0 }
 0x4f7   :  { %v1586_v4 = vmul.f32 %v4578_v58, %v1415_v17  ;;  %v1416_v30 = vsel %vm1400_vm6, %v1376_v38, 1.0  ;;  %v1578_v35 = vsel %vm1577_vm7, %v4576_v9, %v1574_v18  ;;  %v1703_v34 = vmax.f32 %v1687_v25, 0.0 }
 0x4f8   :  { %4579 = vrcp.f32 %v1416_v30  ;;  %v1583_v60 = vsel %vm1580_vm8, %v1582_v33, %v1578_v35  ;;  %vm1591_vm9 = vweird.f32 %v4578_v58  ;;  %v1597_v38 = vor.u32 1.1754944e-38, %v1596_v11 }
 0x4f9   :  { %v1587_v49 = vsub.f32 1.0, %v1586_v4  ;;  %v1584_v46 = vmul.f32 %v1583_v60, %v1305_v51  ;;  %1842 = vmatmul.f32.gmra.mxu0 %v1703_v34  ;;  %1907 = vmatmul.f32.gmra.mxu1 %v1703_v34  ;;  %vm1592_vm12 = vmor %vm1590_vm10, %vm1591_vm9  ;;  %v1311_v35 = vpop.f32.mrf.mxu2  ;;  %v1609_v17 = vand.u32 2147483647, %v1416_v30  ;;  %vm1605_vm15 = vweird.f32 %v1416_v30 }
 0x4fa   :  { %1972 = vmatmul.f32.gmra.mxu2 %v1703_v34 }
 0x4fb   :  { %v1671_v56 = vmul.f32 %v5966_v20, %v1584_v46  ;;  %v1588_v13 = vmul.f32 %v4578_v58, %v1587_v49  ;;  %v1611_v49 = vand.u32 2147483648, %v1416_v30  ;;  %vm1610_vm2 = vcmp.eq.f32.partialorder %v1609_v17, 8.507059e+37 }
 0x4fd   :  { %v1379_v37 = vpop.f32.mrf.mxu3  ;;  %v1589_v5 = vadd.f32 %v4578_v58, %v1588_v13  ;;  %v1688_v42 = vadd.f32 %v5968_v15, %v1671_v56 }
 0x4fe   :  { %v4580_v9 = vpop.eup %4579  ;;  %vm1401_vm11 = vcmp.gt.f32.partialorder %v1379_v37, 0.0 }
 0x4ff   :  { %v1601_v51 = vmul.f32 %v4580_v9, %v1416_v30  ;;  %v1417_v18 = vsel %vm1401_vm11, %v1379_v37, 1.0  ;;  %v1593_v25 = vsel %vm1592_vm12, %v4578_v58, %v1589_v5  ;;  %v1704_v33 = vmax.f32 %v1688_v42, 0.0 }
 0x500   :  { %4581 = vrcp.f32 %v1417_v18  ;;  %v1598_v4 = vsel %vm1595_vm13, %v1597_v38, %v1593_v25  ;;  %vm1606_vm14 = vweird.f32 %v4580_v9  ;;  %v1612_v37 = vor.u32 1.1754944e-38, %v1611_v49 }
 0x501   :  { %v1602_v34 = vsub.f32 1.0, %v1601_v51  ;;  %v1599_v60 = vmul.f32 %v1598_v4, %v1308_v63  ;;  %1845 = vmatmul.f32.gmra.mxu0 %v1704_v33  ;;  %1910 = vmatmul.f32.gmra.mxu1 %v1704_v33  ;;  %vm1607_vm1 = vmor %vm1605_vm15, %vm1606_vm14  ;;  %v1314_v4 = vpop.f32.mrf.mxu2  ;;  %v1624_v30 = vand.u32 2147483647, %v1417_v18  ;;  %vm1620_vm4 = vweird.f32 %v1417_v18 }
 0x502   :  { %1975 = vmatmul.f32.gmra.mxu2 %v1704_v33 }
 0x503   :  { %v1672_v46 = vmul.f32 %v5966_v20, %v1599_v60  ;;  %v1603_v56 = vmul.f32 %v4580_v9, %v1602_v34  ;;  %v1626_v34 = vand.u32 2147483648, %v1417_v18  ;;  %vm1625_vm7 = vcmp.eq.f32.partialorder %v1624_v30, 8.507059e+37 }
 0x505   :  { %v1382_v1 = vpop.f32.mrf.mxu3  ;;  %v1604_v11 = vadd.f32 %v4580_v9, %v1603_v56  ;;  %v1689_v58 = vadd.f32 %v5968_v15, %v1672_v46 }
 0x506   :  { %v4582_v13 = vpop.eup %4581  ;;  %vm1402_vm0 = vcmp.gt.f32.partialorder %v1382_v1, 0.0 }
 0x507   :  { %v1616_v63 = vmul.f32 %v4582_v13, %v1417_v18  ;;  %v1418_v5 = vsel %vm1402_vm0, %v1382_v1, 1.0  ;;  %v1608_v42 = vsel %vm1607_vm1, %v4580_v9, %v1604_v11  ;;  %v1705_v38 = vmax.f32 %v1689_v58, 0.0 }
 0x508   :  { %4583 = vrcp.f32 %v1418_v5  ;;  %v1613_v51 = vsel %vm1610_vm2, %v1612_v37, %v1608_v42  ;;  %vm1621_vm3 = vweird.f32 %v4582_v13  ;;  %vm1635_vm9 = vweird.f32 %v1418_v5 }
 0x509   :  { %v1617_v25 = vsub.f32 1.0, %v1616_v63  ;;  %v1614_v33 = vmul.f32 %v1613_v51, %v1311_v35  ;;  %1848 = vmatmul.f32.gmra.mxu0 %v1705_v38  ;;  %1913 = vmatmul.f32.gmra.mxu1 %v1705_v38  ;;  %vm1622_vm6 = vmor %vm1620_vm4, %vm1621_vm3  ;;  %v1627_v35 = vor.u32 1.1754944e-38, %v1626_v34  ;;  %v1641_v51 = vand.u32 2147483648, %v1418_v5 }
 0x50a   :  { %1978 = vmatmul.f32.gmra.mxu2 %v1705_v38 }
 0x50b   :  { %v1673_v60 = vmul.f32 %v5966_v20, %v1614_v33  ;;  %v1618_v46 = vmul.f32 %v4582_v13, %v1617_v25  ;;  %v1639_v33 = vand.u32 2147483647, %v1418_v5 }
 0x50d   :  { %v1385_v17 = vpop.f32.mrf.mxu3  ;;  %v1619_v49 = vadd.f32 %v4582_v13, %v1618_v46  ;;  %v1690_v9 = vadd.f32 %v5968_v15, %v1673_v60  ;;  %v1317_v60 = vpop.f32.mrf.mxu2  ;;  %v1642_v46 = vor.u32 1.1754944e-38, %v1641_v51  ;;  %vm1640_vm11 = vcmp.eq.f32.partialorder %v1639_v33, 8.507059e+37 }
 0x50e   :  { %v4584_v56 = vpop.eup %4583  ;;  %vm1403_vm5 = vcmp.gt.f32.partialorder %v1385_v17, 0.0 }
 0x50f   :  { %v1631_v1 = vmul.f32 %v4584_v56, %v1418_v5  ;;  %v1419_v11 = vsel %vm1403_vm5, %v1385_v17, 1.0  ;;  %v1623_v58 = vsel %vm1622_vm6, %v4582_v13, %v1619_v49  ;;  %v1706_v37 = vmax.f32 %v1690_v9, 0.0 }
 0x510   :  { %4585 = vrcp.f32 %v1419_v11  ;;  %v1628_v63 = vsel %vm1625_vm7, %v1627_v35, %v1623_v58  ;;  %vm1636_vm8 = vweird.f32 %v4584_v56  ;;  %v1656_v58 = vand.u32 2147483648, %v1419_v11 }
 0x511   :  { %v1632_v42 = vsub.f32 1.0, %v1631_v1  ;;  %v1629_v38 = vmul.f32 %v1628_v63, %v1314_v4  ;;  %1851 = vmatmul.f32.gmra.mxu0 %v1706_v37  ;;  %1916 = vmatmul.f32.gmra.mxu1 %v1706_v37  ;;  %vm1637_vm10 = vmor %vm1635_vm9, %vm1636_vm8  ;;  %v1654_v5 = vand.u32 2147483647, %v1419_v11  ;;  %vm1650_vm13 = vweird.f32 %v1419_v11 }
 0x512   :  { %1981 = vmatmul.f32.gmra.mxu2 %v1706_v37 }
 0x513   :  { %v1674_v18 = vmul.f32 %v5966_v20, %v1629_v38  ;;  %v1633_v25 = vmul.f32 %v4584_v56, %v1632_v42  ;;  %vm1655_vm15 = vcmp.eq.f32.partialorder %v1654_v5, 8.507059e+37 }
 0x515   :  { %v1634_v30 = vadd.f32 %v4584_v56, %v1633_v25  ;;  %v1691_v34 = vadd.f32 %v5968_v15, %v1674_v18  ;;  %v1320_v51 = vpop.f32.mrf.mxu2 }
 0x516   :  { %v4586_v13 = vpop.eup %4585 }
 0x517   :  { %v1646_v17 = vmul.f32 %v4586_v13, %v1419_v11  ;;  %v1638_v49 = vsel %vm1637_vm10, %v4584_v56, %v1634_v30  ;;  %v1707_v4 = vmax.f32 %v1691_v34, 0.0  ;;  %vm1651_vm12 = vweird.f32 %v4586_v13 }
 0x518   :  { %v1643_v9 = vsel %vm1640_vm11, %v1642_v46, %v1638_v49  ;;  %vm1652_vm14 = vmor %vm1650_vm13, %vm1651_vm12  ;;  %v1657_v56 = vor.u32 1.1754944e-38, %v1656_v58 }
 0x519   :  { %v1647_v35 = vsub.f32 1.0, %v1646_v17  ;;  %v1644_v1 = vmul.f32 %v1643_v9, %v1317_v60  ;;  %1854 = vmatmul.f32.gmra.mxu0 %v1707_v4  ;;  %1919 = vmatmul.f32.gmra.mxu1 %v1707_v4 }
 0x51a   :  { %1984 = vmatmul.f32.gmra.mxu2 %v1707_v4 }
 0x51b   :  { %v1675_v37 = vmul.f32 %v5966_v20, %v1644_v1  ;;  %v1648_v63 = vmul.f32 %v4586_v13, %v1647_v35 }
 0x51d   :  { %v1649_v42 = vadd.f32 %v4586_v13, %v1648_v63  ;;  %v1692_v38 = vadd.f32 %v5968_v15, %v1675_v37 }
 0x51f   :  { %v1653_v18 = vsel %vm1652_vm14, %v4586_v13, %v1649_v42  ;;  %v1708_v25 = vmax.f32 %v1692_v38, 0.0 }
 0x520   :  { %v1658_v33 = vsel %vm1655_vm15, %v1657_v56, %v1653_v18 }
 0x521   :  { %v1659_v60 = vmul.f32 %v1658_v33, %v1320_v51  ;;  %1857 = vmatmul.f32.gmra.mxu0 %v1708_v25  ;;  %1922 = vmatmul.f32.gmra.mxu1 %v1708_v25 }
 0x522   :  { %1987 = vmatmul.f32.gmra.mxu2 %v1708_v25 }
 0x523   :  { %v1676_v30 = vmul.f32 %v5966_v20, %v1659_v60 }
 0x525   :  { %v1693_v34 = vadd.f32 %v5968_v15, %v1676_v30 }
 0x527   :  { %v1709_v46 = vmax.f32 %v1693_v34, 0.0 }
 0x529   :  { %1860 = vmatmul.f32.gmra.mxu0 %v1709_v46  ;;  %1925 = vmatmul.f32.gmra.mxu1 %v1709_v46 }
 0x52a   :  { %1990 = vmatmul.f32.gmra.mxu2 %v1709_v46 }
 0x52e   :  { %v6002_v11 = vpop.f32.mrf.mxu0  ;;  %v6004_v17 = vpop.f32.mrf.mxu1 }
 0x535   :  { %v6006_v13 = vpop.f32.mrf.mxu2 }
 0x536   :  { %v6008_v49 = vpop.f32.mrf.mxu0  ;;  %v6010_v4 = vpop.f32.mrf.mxu1 }
 0x53d   :  { %v6012_v9 = vpop.f32.mrf.mxu2 }
 0x53e   :  { %v6014_v35 = vpop.f32.mrf.mxu0  ;;  %v6016_v20 = vpop.f32.mrf.mxu1 }
 0x545   :  { %v6018_v15 = vpop.f32.mrf.mxu2 }
 0x546   :  { %v6020_v1 = vpop.f32.mrf.mxu0  ;;  %v6022_v58 = vpop.f32.mrf.mxu1 }
 0x54d   :  { %v6024_v37 = vpop.f32.mrf.mxu2 }
 0x54e   :  { %v6026_v63 = vpop.f32.mrf.mxu0  ;;  %v6028_v5 = vpop.f32.mrf.mxu1 }
 0x555   :  { %v6030_v42 = vpop.f32.mrf.mxu2 }
 0x556   :  { %v6032_v38 = vpop.f32.mrf.mxu0  ;;  %v6034_v51 = vpop.f32.mrf.mxu1 }
 0x55d   :  { %v6036_v56 = vpop.f32.mrf.mxu2 }
 0x55e   :  { %v6038_v18 = vpop.f32.mrf.mxu0  ;;  %v6040_v25 = vpop.f32.mrf.mxu1 }
 0x565   :  { %v6042_v33 = vpop.f32.mrf.mxu2 }
 0x566   :  { %v6044_v60 = vpop.f32.mrf.mxu0  ;;  %v6046_v30 = vpop.f32.mrf.mxu1 }
 0x56d   :  { %v6048_v34 = vpop.f32.mrf.mxu2 }
 0x56e   :  { %v6050_v46 = vpop.f32.mrf.mxu0  ;;  %v6052_v62 = vpop.f32.mrf.mxu1 }
 0x575   :  { %v6054_v8 = vpop.f32.mrf.mxu2 }
 0x576   :  { %v1843_v24 = vpop.f32.mrf.mxu0  ;;  %v1908_v16 = vpop.f32.mrf.mxu1 }
 0x57d   :  { %v6056_v59 = vpop.f32.mrf.mxu2 }
 0x57e   :  { %v1846_v23 = vpop.f32.mrf.mxu0  ;;  %v1911_v48 = vpop.f32.mrf.mxu1 }
 0x57f   :  { %v1912_v52 = vadd.f32 %v1911_v48, %v6065_v22  ;;  %v1829_v48 = vadd.f32 %v6026_v63, %v6063_v28  ;;  %v1823_v63 = vadd.f32 %v6014_v35, %v6063_v28  ;;  %v1959_v35 = vadd.f32 %v6030_v42, %v6073_v55  ;;  %v7129_v42 = vld [vmem:[#allocation64_spill] sm:$0xff] }
 0x585   :  { %v6058_v10 = vpop.f32.mrf.mxu2 }
 0x586   :  { %v1849_v44 = vpop.f32.mrf.mxu0  ;;  %v1914_v12 = vpop.f32.mrf.mxu1 }
 0x58d   :  { %v1979_v2 = vpop.f32.mrf.mxu2 }
 0x58e   :  { %v1852_v31 = vpop.f32.mrf.mxu0  ;;  %v1917_v32 = vpop.f32.mrf.mxu1 }
 0x58f   :  { %v1853_v39 = vadd.f32 %v1852_v31, %v6063_v28  ;;  %v1900_v31 = vadd.f32 %v6040_v25, %v6065_v22  ;;  %v7132_v25 = vld [vmem:[#allocation66_spill] sm:$0xff] }
 0x595   :  { %v1982_v41 = vpop.f32.mrf.mxu2 }
 0x596   :  { %v1855_v36 = vpop.f32.mrf.mxu0  ;;  %v1920_v21 = vpop.f32.mrf.mxu1 }
 0x597   :  { %v1856_v14 = vadd.f32 %v1855_v36, %v6063_v28  ;;  %v1921_v29 = vadd.f32 %v1920_v21, %v6065_v22  ;;  %v1906_v21 = vadd.f32 %v6052_v62, %v6065_v22  ;;  %v1838_v36 = vadd.f32 %v6044_v60, %v6063_v28  ;;  %v7134_v60 = vld [vmem:[#allocation67_spill] sm:$0xff] }
 0x598   :  { %v1835_v62 = vadd.f32 %v6038_v18, %v6063_v28  ;;  %v7131_v18 = vld [vmem:[#allocation20_spill] sm:$0xff] }
 0x59d   :  { %v1985_v53 = vpop.f32.mrf.mxu2 }
 0x59e   :  { %v1858_v7 = vpop.f32.mrf.mxu0  ;;  %v1923_v26 = vpop.f32.mrf.mxu1 }
 0x59f   :  { %v1859_v45 = vadd.f32 %v1858_v7, %v6063_v28  ;;  %v1924_v40 = vadd.f32 %v1923_v26, %v6065_v22  ;;  %v1909_v26 = vadd.f32 %v1908_v16, %v6065_v22  ;;  %v1826_v16 = vadd.f32 %v6020_v1, %v6063_v28 }
 0x5a0   :  { %v1962_v1 = vadd.f32 %v6036_v56, %v6073_v55  ;;  %v7130_v56 = vld [vmem:[#allocation65_spill] sm:$0xff] }
 0x5a5   :  { %v1988_v50 = vpop.f32.mrf.mxu2 }
 0x5a6   :  { %v1861_v6 = vpop.f32.mrf.mxu0  ;;  %v1926_v27 = vpop.f32.mrf.mxu1 }
 0x5a7   :  { %v1862_v0 = vadd.f32 %v1861_v6, %v6063_v28  ;;  %v1927_v43 = vadd.f32 %v1926_v27, %v6065_v22  ;;  %v1918_v6 = vadd.f32 %v1917_v32, %v6065_v22  ;;  %v1903_v32 = vadd.f32 %v6046_v30, %v6065_v22  ;;  %v7135_v30 = vld [vmem:[#allocation22_spill] sm:$0xff] }
 0x5a9   :  { %1994 = vmatpush.msrb.mxu3 %v1862_v0  ;;  %2059 = vmatpush.msra.mxu0 %v1927_v43  ;;  %v1850_v0 = vadd.f32 %v1849_v44, %v6063_v28  ;;  %v1915_v43 = vadd.f32 %v1914_v12, %v6065_v22  ;;  %v1832_v12 = vadd.f32 %v6032_v38, %v6063_v28 }
 0x5aa   :  { %v1897_v44 = vadd.f32 %v6034_v51, %v6065_v22  ;;  %v1885_v38 = vadd.f32 %v6010_v4, %v6065_v22  ;;  %v1882_v51 = vadd.f32 %v6004_v17, %v6065_v22  ;;  %v1953_v4 = vadd.f32 %v6018_v15, %v6073_v55  ;;  %v7124_v17 = vld [vmem:[#allocation59_spill] sm:$0xff]  ;;  %v7127_v15 = vld [vmem:[#allocation62_spill] sm:$0xff] }
 0x5ab   :  { %1995 = vmatpush.msrb.mxu3 %v1859_v45  ;;  %2060 = vmatpush.msra.mxu0 %v1924_v40  ;;  %v1989_v45 = vadd.f32 %v1988_v50, %v6073_v55  ;;  %v1847_v40 = vadd.f32 %v1846_v23, %v6063_v28  ;;  %v1841_v50 = vadd.f32 %v6050_v46, %v6063_v28  ;;  %v7137_v46 = vld [vmem:[#allocation23_spill] sm:$0xff] }
 0x5ac   :  { %v1894_v23 = vadd.f32 %v6028_v5, %v6065_v22  ;;  %v1888_v5 = vadd.f32 %v6016_v20, %v6065_v22  ;;  %v1817_v20 = vadd.f32 %v6002_v11, %v6063_v28  ;;  %v7123_v11 = vld [vmem:[#allocation58_spill] sm:$0xff] }
 0x5ad   :  { %v1991_v27 = vpop.f32.mrf.mxu2  ;;  %1996 = vmatpush.msrb.mxu3 %v1856_v14  ;;  %2061 = vmatpush.msra.mxu0 %v1921_v29  ;;  %v1986_v14 = vadd.f32 %v1985_v53, %v6073_v55  ;;  %v1844_v29 = vadd.f32 %v1843_v24, %v6063_v28  ;;  %v1980_v53 = vadd.f32 %v1979_v2, %v6073_v55 }
 0x5ae   :  { %v1992_v7 = vadd.f32 %v1991_v27, %v6073_v55  ;;  %v1974_v2 = vadd.f32 %v6056_v59, %v6073_v55  ;;  %v1968_v59 = vadd.f32 %v6048_v34, %v6073_v55  ;;  %v1891_v24 = vadd.f32 %v6022_v58, %v6065_v22  ;;  %v7136_v34 = vld [vmem:[#allocation68_spill] sm:$0xff]  ;;  %v7140_v27 = vld [vmem:[#allocation71_spill] sm:$0xff] }
 0x5af   :  { %1997 = vmatpush.msrb.mxu3 %v1853_v39  ;;  %2062 = vmatpush.msra.mxu0 %v1918_v6  ;;  %v1983_v39 = vadd.f32 %v1982_v41, %v6073_v55  ;;  %v1977_v41 = vadd.f32 %v6058_v10, %v6073_v55  ;;  %v1971_v10 = vadd.f32 %v6054_v8, %v6073_v55  ;;  %v7139_v6 = vld [vmem:[#allocation70_spill] sm:$0xff] }
 0x5b0   :  { %2124 = vmatpush.msra.mxu1 %v1992_v7  ;;  %v1965_v8 = vadd.f32 %v6042_v33, %v6073_v55  ;;  %v1820_v58 = vadd.f32 %v6008_v49, %v6063_v28  ;;  %v1956_v49 = vadd.f32 %v6024_v37, %v6073_v55  ;;  %v1950_v28 = vadd.f32 %v6012_v9, %v6073_v55  ;;  %v7126_v9 = vld [vmem:[#allocation61_spill] sm:$0xff]  ;;  %v7128_v37 = vld [vmem:[#allocation63_spill] sm:$0xff]  ;;  %v7141_v7 = vld [vmem:[#allocation72_spill] sm:$0xff] }
 0x5b1   :  { %1998 = vmatpush.msrb.mxu3 %v1850_v0  ;;  %2063 = vmatpush.msra.mxu0 %v1915_v43  ;;  %v1947_v22 = vadd.f32 %v6006_v13, %v6073_v55  ;;  %v7125_v13 = vld [vmem:[#allocation60_spill] sm:$0xff]  ;;  %v7133_v33 = vld [vmem:[#allocation21_spill] sm:$0xff]  ;;  %v7143_v43 = vld [vmem:[#allocation74_spill] sm:$0xff] }
 0x5b2   :  { %2125 = vmatpush.msra.mxu1 %v1989_v45  ;;  %v7138_v55 = vld [vmem:[#allocation69_spill] sm:$0xff]  ;;  %v7144_v45 = vld [vmem:[#allocation75_spill] sm:$0xff] }
 0x5b3   :  { %1999 = vmatpush.msrb.mxu3 %v1847_v40  ;;  %2064 = vmatpush.msra.mxu0 %v1912_v52  ;;  %v7142_v0 = vld [vmem:[#allocation73_spill] sm:$0xff]  ;;  %v7145_v40 = vld [vmem:[#allocation76_spill] sm:$0xff] }
 0x5b4   :  { %2126 = vmatpush.msra.mxu1 %v1986_v14  ;;  %v7146_v52 = vld [vmem:[#allocation77_spill] sm:$0xff]  ;;  %v7147_v14 = vld [vmem:[#allocation78_spill] sm:$0xff] }
 0x5b5   :  { %2000 = vmatpush.msrb.mxu3 %v1844_v29  ;;  %2065 = vmatpush.msra.mxu0 %v1909_v26  ;;  %v7148_v26 = vld [vmem:[#allocation79_spill] sm:$0xff] }
 0x5b6   :  { %2127 = vmatpush.msra.mxu1 %v1983_v39 }
 0x5b7   :  { %2001 = vmatpush.msrb.mxu3 %v1841_v50  ;;  %2066 = vmatpush.msra.mxu0 %v1906_v21 }
 0x5b8   :  { %2128 = vmatpush.msra.mxu1 %v1980_v53 }
 0x5b9   :  { %2002 = vmatpush.msrb.mxu3 %v1838_v36  ;;  %2067 = vmatpush.msra.mxu0 %v1903_v32 }
 0x5ba   :  { %2129 = vmatpush.msra.mxu1 %v1977_v41 }
 0x5bb   :  { %2003 = vmatpush.msrb.mxu3 %v1835_v62  ;;  %2068 = vmatpush.msra.mxu0 %v1900_v31 }
 0x5bc   :  { %2130 = vmatpush.msra.mxu1 %v1974_v2 }
 0x5bd   :  { %2004 = vmatpush.msrb.mxu3 %v1832_v12  ;;  %2069 = vmatpush.msra.mxu0 %v1897_v44 }
 0x5be   :  { %2131 = vmatpush.msra.mxu1 %v1971_v10 }
 0x5bf   :  { %2005 = vmatpush.msrb.mxu3 %v1829_v48  ;;  %2070 = vmatpush.msra.mxu0 %v1894_v23 }
 0x5c0   :  { %2132 = vmatpush.msra.mxu1 %v1968_v59 }
 0x5c1   :  { %2006 = vmatpush.msrb.mxu3 %v1826_v16  ;;  %2071 = vmatpush.msra.mxu0 %v1891_v24 }
 0x5c2   :  { %2133 = vmatpush.msra.mxu1 %v1965_v8 }
 0x5c3   :  { %2007 = vmatpush.msrb.mxu3 %v1823_v63  ;;  %2072 = vmatpush.msra.mxu0 %v1888_v5 }
 0x5c4   :  { %2134 = vmatpush.msra.mxu1 %v1962_v1 }
 0x5c5   :  { %2008 = vmatpush.msrb.mxu3 %v1820_v58  ;;  %2073 = vmatpush.msra.mxu0 %v1885_v38 }
 0x5c6   :  { %2135 = vmatpush.msra.mxu1 %v1959_v35 }
 0x5c7   :  { %2009 = vmatpush.msrb.mxu3 %v1817_v20  ;;  %2074 = vmatpush.msra.mxu0 %v1882_v51  ;;  %v7149_v51 = vld [vmem:[#allocation25_spill] sm:$0xff] }
 0x5c8   :  { %2136 = vmatpush.msra.mxu1 %v1956_v49  ;;  %2075 = vmatmul.f32.vlgmr.msra.gmra.mxu0 %v5549_v19 }
 0x5c9   :  { %2010 = vmatmul.f32.vlgmr.msrb.gmra.mxu3 %v5549_v19 }
 0x5ca   :  { %2137 = vmatpush.msra.mxu1 %v1953_v4  ;;  %v7150_v4 = vld [vmem:[#allocation95_spill] sm:$0xff] }
 0x5cc   :  { %2138 = vmatpush.msra.mxu1 %v1950_v28  ;;  %v6196_v28 = vperm.slane %v7150_v4, 1 }
 0x5ce   :  { %2139 = vmatpush.msra.mxu1 %v1947_v22  ;;  %v7151_v22 = vld [vmem:[#allocation27_spill] sm:$0xff] }
 0x5cf   :  { %2140 = vmatmul.f32.vlgmr.msra.gmra.mxu1 %v5551_v3 }
 0x5d0   :  { %2078 = vmatmul.f32.gmra.mxu0 %v5560_v54 }
 0x5d1   :  { %2013 = vmatmul.f32.gmra.mxu3 %v5560_v54 }
 0x5d7   :  { %2143 = vmatmul.f32.gmra.mxu1 %v5562_v57 }
 0x5d8   :  { %2081 = vmatmul.f32.gmra.mxu0 %v5570_v47 }
 0x5d9   :  { %2016 = vmatmul.f32.gmra.mxu3 %v5570_v47 }
 0x5df   :  { %2146 = vmatmul.f32.gmra.mxu1 %v5572_v61 }
 0x5e0   :  { %2084 = vmatmul.f32.gmra.mxu0 %v7123_v11 }
 0x5e1   :  { %2019 = vmatmul.f32.gmra.mxu3 %v7123_v11 }
 0x5e7   :  { %2149 = vmatmul.f32.gmra.mxu1 %v7124_v17 }
 0x5e8   :  { %2087 = vmatmul.f32.gmra.mxu0 %v7125_v13 }
 0x5e9   :  { %2022 = vmatmul.f32.gmra.mxu3 %v7125_v13 }
 0x5ef   :  { %2152 = vmatmul.f32.gmra.mxu1 %v7126_v9 }
 0x5f0   :  { %2090 = vmatmul.f32.gmra.mxu0 %v7127_v15 }
 0x5f1   :  { %2025 = vmatmul.f32.gmra.mxu3 %v7127_v15 }
 0x5f7   :  { %2155 = vmatmul.f32.gmra.mxu1 %v7128_v37 }
 0x5f8   :  { %2093 = vmatmul.f32.gmra.mxu0 %v7129_v42 }
 0x5f9   :  { %2028 = vmatmul.f32.gmra.mxu3 %v7129_v42 }
 0x5ff   :  { %2158 = vmatmul.f32.gmra.mxu1 %v7130_v56  ;;  %v2891_v56 = vld [vmem:[#allocation9 + $0x40] sm:$0xff] }
 0x600   :  { %2096 = vmatmul.f32.gmra.mxu0 %v7131_v18  ;;  %v6480_v9 = vperm.slane %v2891_v56, 0 }
 0x601   :  { %2031 = vmatmul.f32.gmra.mxu3 %v7131_v18  ;;  %v2890_v18 = vld [vmem:[#allocation9 + $0x38] sm:$0xff] }
 0x602   :  { %v6477_v37 = vperm.slane %v2890_v18, 0 }
 0x607   :  { %2161 = vmatmul.f32.gmra.mxu1 %v7132_v25 }
 0x608   :  { %2099 = vmatmul.f32.gmra.mxu0 %v7133_v33 }
 0x609   :  { %2034 = vmatmul.f32.gmra.mxu3 %v7133_v33 }
 0x60f   :  { %2164 = vmatmul.f32.gmra.mxu1 %v7134_v60 }
 0x610   :  { %2102 = vmatmul.f32.gmra.mxu0 %v7135_v30 }
 0x611   :  { %2037 = vmatmul.f32.gmra.mxu3 %v7135_v30 }
 0x617   :  { %2167 = vmatmul.f32.gmra.mxu1 %v7136_v34 }
 0x618   :  { %2105 = vmatmul.f32.gmra.mxu0 %v7137_v46 }
 0x619   :  { %2040 = vmatmul.f32.gmra.mxu3 %v7137_v46  ;;  %v6470_v46 = vld [vmem:[#allocation9 + $0x30] sm:$0xff] }
 0x61a   :  { %7182 = vst [vmem:[#allocation25_spill] sm:$0xff] %v6470_v46  ;;  %v6473_v30 = vperm.slane %v6470_v46, 0 }
 0x61f   :  { %2170 = vmatmul.f32.gmra.mxu1 %v7138_v55 }
 0x620   :  { %2108 = vmatmul.f32.gmra.mxu0 %v7139_v6 }
 0x621   :  { %2043 = vmatmul.f32.gmra.mxu3 %v7139_v6  ;;  %v7154_v6 = vld [vmem:[#allocation31_spill] sm:$0xff] }
 0x627   :  { %2173 = vmatmul.f32.gmra.mxu1 %v7140_v27  ;;  %v7152_v27 = vld [vmem:[#allocation29_spill] sm:$0xff] }
 0x628   :  { %2111 = vmatmul.f32.gmra.mxu0 %v7141_v7 }
 0x629   :  { %2046 = vmatmul.f32.gmra.mxu3 %v7141_v7 }
 0x62f   :  { %2176 = vmatmul.f32.gmra.mxu1 %v7142_v0 }
 0x630   :  { %2114 = vmatmul.f32.gmra.mxu0 %v7143_v43 }
 0x631   :  { %2049 = vmatmul.f32.gmra.mxu3 %v7143_v43 }
 0x637   :  { %2179 = vmatmul.f32.gmra.mxu1 %v7144_v45 }
 0x638   :  { %2117 = vmatmul.f32.gmra.mxu0 %v7145_v40 }
 0x639   :  { %2052 = vmatmul.f32.gmra.mxu3 %v7145_v40 }
 0x63f   :  { %2182 = vmatmul.f32.gmra.mxu1 %v7146_v52 }
 0x640   :  { %2120 = vmatmul.f32.gmra.mxu0 %v7147_v14 }
 0x641   :  { %2055 = vmatmul.f32.gmra.mxu3 %v7147_v14 }
 0x645   :  { %v2076_v29 = vpop.f32.mrf.mxu0 }
 0x647   :  { %2185 = vmatmul.f32.gmra.mxu1 %v7148_v26 }
 0x64c   :  { %v2141_v39 = vpop.f32.mrf.mxu1 }
 0x64d   :  { %v2079_v50 = vpop.f32.mrf.mxu0  ;;  %v2189_v38 = vadd.f32 %v2141_v39, %v2076_v29  ;;  %v7153_v39 = vld [vmem:[#allocation33_spill] sm:$0xff] }
 0x64f   :  { %v2205_v49 = vadd.f32 %v2189_v38, %v7149_v51 }
 0x651   :  { %v2222_v45 = vadd.f32 %v6196_v28, %v2205_v49 }
 0x653   :  { %v2254_v51 = vmul.f32 0.2, %v2222_v45  ;;  %vm2238_vm0 = vcmp.gt.f32.partialorder %v2222_v45, 0.0 }
 0x654   :  { %v2144_v21 = vpop.f32.mrf.mxu1 }
 0x655   :  { %v2082_v53 = vpop.f32.mrf.mxu0  ;;  %v2190_v20 = vadd.f32 %v2144_v21, %v2079_v50 }
 0x657   :  { %v2206_v26 = vadd.f32 %v2190_v20, %v7151_v22 }
 0x659   :  { %v2223_v43 = vadd.f32 %v6196_v28, %v2206_v26  ;;  %v7155_v26 = vld [vmem:[#allocation35_spill] sm:$0xff] }
 0x65b   :  { %v2255_v4 = vmul.f32 0.2, %v2223_v43  ;;  %vm2239_vm1 = vcmp.gt.f32.partialorder %v2223_v43, 0.0 }
 0x65c   :  { %v2147_v36 = vpop.f32.mrf.mxu1 }
 0x65d   :  { %v2085_v32 = vpop.f32.mrf.mxu0  ;;  %v2191_v14 = vadd.f32 %v2147_v36, %v2082_v53 }
 0x65f   :  { %v2207_v29 = vadd.f32 %v2191_v14, %v7152_v27  ;;  %v6208_v14 = vsel %vm2238_vm0, %v2222_v45, %v2254_v51 }
 0x661   :  { %v2224_v36 = vadd.f32 %v6196_v28, %v2207_v29 }
 0x663   :  { %vm2240_vm2 = vcmp.gt.f32.partialorder %v2224_v36, 0.0 }
 0x664   :  { %v2150_v41 = vpop.f32.mrf.mxu1 }
 0x665   :  { %v2088_v62 = vpop.f32.mrf.mxu0  ;;  %v2192_v0 = vadd.f32 %v2150_v41, %v2085_v32  ;;  %v7156_v41 = vld [vmem:[#allocation37_spill] sm:$0xff] }
 0x667   :  { %v2208_v20 = vadd.f32 %v2192_v0, %v7154_v6  ;;  %v4499_v0 = vld [vmem:[#allocation7 + $0x78] sm:$0xff]  }
 0x66c   :  { %v2153_v31 = vpop.f32.mrf.mxu1 }
 0x66d   :  { %v2091_v2 = vpop.f32.mrf.mxu0  ;;  %v2193_v52 = vadd.f32 %v2153_v31, %v2088_v62 }
 0x66f   :  { %v2209_v50 = vadd.f32 %v2193_v52, %v7153_v39  ;;  %v6210_v52 = vsel %vm2239_vm1, %v2223_v43, %v2255_v4  ;;  %v2256_v39 = vmul.f32 0.2, %v2224_v36 }
 0x671   :  { %v2226_v62 = vadd.f32 %v6196_v28, %v2209_v50 }
 0x673   :  { %vm2242_vm3 = vcmp.gt.f32.partialorder %v2226_v62, 0.0 }
 0x674   :  { %v2156_v12 = vpop.f32.mrf.mxu1 }
 0x675   :  { %v2094_v44 = vpop.f32.mrf.mxu0  ;;  %v2194_v21 = vadd.f32 %v2156_v12, %v2091_v2  ;;  %v2225_v2 = vadd.f32 %v6196_v28, %v2208_v20  ;;  %v7157_v12 = vld [vmem:[#allocation39_spill] sm:$0xff]  ;;  %v7159_v20 = vld [vmem:[#allocation41_spill] sm:$0xff] }
 0x677   :  { %v2210_v32 = vadd.f32 %v2194_v21, %v7155_v26  ;;  %v4431_v21 = vunpack.c.l.bf16 %v4499_v0  ;;  %vm2241_vm4 = vcmp.gt.f32.partialorder %v2225_v2, 0.0  ;;  %v7161_v26 = vld [vmem:[#allocation47_spill] sm:$0xff] }
 0x679   :  { %v2227_v49 = vadd.f32 %v6196_v28, %v2210_v32 }
 0x67b   :  { %vm2243_vm5 = vcmp.gt.f32.partialorder %v2227_v49, 0.0 }
 0x67c   :  { %v2159_v10 = vpop.f32.mrf.mxu1 }
 0x67d   :  { %v2097_v48 = vpop.f32.mrf.mxu0  ;;  %v2195_v38 = vadd.f32 %v2159_v10, %v2094_v44  ;;  %v2258_v10 = vmul.f32 0.2, %v2226_v62 }
 0x67f   :  { %v2211_v31 = vadd.f32 %v2195_v38, %v7156_v41  ;;  %v6219_v4 = vsel %vm2242_vm3, %v2226_v62, %v2258_v10  ;;  %v7162_v41 = vld [vmem:[#allocation51_spill] sm:$0xff] }
 0x681   :  { %v2228_v22 = vadd.f32 %v6196_v28, %v2211_v31 }
 0x683   :  { %vm2244_vm6 = vcmp.gt.f32.partialorder %v2228_v22, 0.0 }
 0x684   :  { %v2162_v23 = vpop.f32.mrf.mxu1 }
 0x685   :  { %v2100_v59 = vpop.f32.mrf.mxu0  ;;  %v2196_v53 = vadd.f32 %v2162_v23, %v2097_v48  ;;  %v4432_v23 = vunpack.c.h.bf16 %v4499_v0  ;;  %v4497_v0 = vld [vmem:[#allocation7 + $0x68] sm:$0xff]  }
 0x687   :  { %v2212_v44 = vadd.f32 %v2196_v53, %v7157_v12  ;;  %2355 = vmatpush.msra.mxu2 %v4432_v23 }
 0x689   :  { %2356 = vmatpush.msra.mxu2 %v4431_v21 }
 0x68c   :  { %v2165_v16 = vpop.f32.mrf.mxu1 }
 0x68d   :  { %v2103_v24 = vpop.f32.mrf.mxu0  ;;  %v2197_v48 = vadd.f32 %v2165_v16, %v2100_v59  ;;  %v4498_v59 = vld [vmem:[#allocation7 + $0x70] sm:$0xff]   ;;  %v2257_v16 = vmul.f32 0.2, %v2225_v2 }
 0x68f   :  { %v2213_v53 = vadd.f32 %v2197_v48, %v7159_v20  ;;  %v7164_v48 = vld [vmem:[#allocation53_spill] sm:$0xff] }
 0x691   :  { %v2230_v10 = vadd.f32 %v6196_v28, %v2213_v53  ;;  %v4496_v53 = vld [vmem:[#allocation7 + $0x60] sm:$0xff]  }
 0x693   :  { %vm2246_vm8 = vcmp.gt.f32.partialorder %v2230_v10, 0.0 }
 0x694   :  { %v2168_v8 = vpop.f32.mrf.mxu1 }
 0x695   :  { %v2106_v63 = vpop.f32.mrf.mxu0  ;;  %v2198_v6 = vadd.f32 %v2168_v8, %v2103_v24  ;;  %v2229_v24 = vadd.f32 %v6196_v28, %v2212_v44  ;;  %v7158_v8 = vld [vmem:[#allocation43_spill] sm:$0xff]  ;;  %v7163_v44 = vld [vmem:[#allocation49_spill] sm:$0xff] }
 0x697   :  { %v2214_v38 = vadd.f32 %v2198_v6, %v7158_v8  ;;  %v2261_v62 = vmul.f32 0.2, %v2229_v24  ;;  %vm2245_vm7 = vcmp.gt.f32.partialorder %v2229_v24, 0.0 }
 0x699   :  { %v2231_v12 = vadd.f32 %v6196_v28, %v2214_v38 }
 0x69b   :  { %vm2247_vm9 = vcmp.gt.f32.partialorder %v2231_v12, 0.0 }
 0x69c   :  { %v2171_v5 = vpop.f32.mrf.mxu1 }
 0x69d   :  { %v2109_v1 = vpop.f32.mrf.mxu0  ;;  %v2199_v29 = vadd.f32 %v2171_v5, %v2106_v63  ;;  %v4428_v63 = vunpack.c.h.bf16 %v4498_v59  ;;  %v2259_v5 = vmul.f32 0.2, %v2227_v49 }
 0x69f   :  { %2357 = vmatpush.msra.mxu2 %v4428_v63  ;;  %v6239_v8 = vsel %vm2243_vm5, %v2227_v49, %v2259_v5  ;;  %v4420_v63 = vunpack.c.h.bf16 %v4496_v53  ;;  %v2262_v5 = vmul.f32 0.2, %v2230_v10 }
 0x6a4   :  { %v2174_v58 = vpop.f32.mrf.mxu1 }
 0x6a5   :  { %v2112_v35 = vpop.f32.mrf.mxu0  ;;  %v2200_v43 = vadd.f32 %v2174_v58, %v2109_v1 }
 0x6a7   :  { %v2216_v32 = vadd.f32 %v2200_v43, %v7161_v26  ;;  %v6230_v43 = vsel %vm2240_vm2, %v2224_v36, %v2256_v39  ;;  %v6246_v39 = vsel %vm2245_vm7, %v2229_v24, %v2261_v62  ;;  %v7165_v62 = vld [vmem:[#allocation55_spill] sm:$0xff] }
 0x6a9   :  { %v2233_v38 = vadd.f32 %v6196_v28, %v2216_v32 }
 0x6ab   :  { %v2265_v26 = vmul.f32 0.2, %v2233_v38  ;;  %vm2249_vm11 = vcmp.gt.f32.partialorder %v2233_v38, 0.0 }
 0x6ac   :  { %v2177_v40 = vpop.f32.mrf.mxu1 }
 0x6ad   :  { %v2115_v7 = vpop.f32.mrf.mxu0  ;;  %v2201_v51 = vadd.f32 %v2177_v40, %v2112_v35  ;;  %v4427_v35 = vunpack.c.l.bf16 %v4498_v59  ;;  %v4423_v59 = vunpack.c.l.bf16 %v4497_v0 }
 0x6af   :  { %v2217_v6 = vadd.f32 %v2201_v51, %v7163_v44  ;;  %2358 = vmatpush.msra.mxu2 %v4427_v35  ;;  %v4494_v35 = vld [vmem:[#allocation7 + $0x50] sm:$0xff]  }
 0x6b4   :  { %v2180_v27 = vpop.f32.mrf.mxu1 }
 0x6b5   :  { %v2118_v45 = vpop.f32.mrf.mxu0  ;;  %v2202_v50 = vadd.f32 %v2180_v27, %v2115_v7  ;;  %v7160_v7 = vld [vmem:[#allocation45_spill] sm:$0xff]  ;;  %v2260_v27 = vmul.f32 0.2, %v2228_v22 }
 0x6b6   :  { %v2215_v1 = vadd.f32 %v2199_v29, %v7160_v7  ;;  %v4424_v29 = vunpack.c.h.bf16 %v4497_v0  ;;  %v2287_v0 = vmax.f32 %v6210_v52, %v6239_v8 }
 0x6b7   :  { %v2218_v31 = vadd.f32 %v2202_v50, %v7162_v41  ;;  %v2286_v50 = vmax.f32 %v6208_v14, %v6219_v4  ;;  %v6244_v36 = vsel %vm2244_vm6, %v2228_v22, %v2260_v27  ;;  %v4495_v22 = vld [vmem:[#allocation7 + $0x58] sm:$0xff]  }
 0x6b8   :  { %v2232_v21 = vadd.f32 %v6196_v28, %v2215_v1  ;;  %2359 = vmatpush.msra.mxu2 %v4424_v29  ;;  %v4416_v41 = vunpack.c.h.bf16 %v4495_v22 }
 0x6b9   :  { %v2235_v51 = vadd.f32 %v6196_v28, %v2218_v31 }
 0x6ba   :  { %2360 = vmatpush.msra.mxu2 %v4423_v59  ;;  %vm2248_vm10 = vcmp.gt.f32.partialorder %v2232_v21, 0.0  ;;  %v2264_v7 = vmul.f32 0.2, %v2232_v21 }
 0x6bb   :  { %v2267_v24 = vmul.f32 0.2, %v2235_v51  ;;  %vm2251_vm12 = vcmp.gt.f32.partialorder %v2235_v51, 0.0 }
 0x6bc   :  { %v2183_v58 = vpop.f32.mrf.mxu1  ;;  %2361 = vmatpush.msra.mxu2 %v4420_v63  ;;  %v4493_v63 = vld [vmem:[#allocation7 + $0x48] sm:$0xff]  }
 0x6bd   :  { %v2203_v40 = vadd.f32 %v2183_v58, %v2118_v45  ;;  %v6233_v45 = vsel %vm2241_vm4, %v2225_v2, %v2257_v16  ;;  %v2263_v2 = vmul.f32 0.2, %v2231_v12  ;;  %v2234_v16 = vadd.f32 %v6196_v28, %v2217_v6  ;;  %v2121_v20 = vpop.f32.mrf.mxu0 }
 0x6be   :  { %v4419_v58 = vunpack.c.l.bf16 %v4496_v53  ;;  %v4415_v6 = vunpack.c.l.bf16 %v4495_v22  ;;  %v6263_v29 = vsel %vm2251_vm12, %v2235_v51, %v2267_v24  ;;  %v2289_v53 = vmax.f32 %v6233_v45, %v6246_v39 }
 0x6bf   :  { %v2219_v23 = vadd.f32 %v2203_v40, %v7164_v48  ;;  %v6250_v31 = vsel %vm2247_vm9, %v2231_v12, %v2263_v2  ;;  %v2266_v40 = vmul.f32 0.2, %v2234_v16  ;;  %vm2250_vm13 = vcmp.gt.f32.partialorder %v2234_v16, 0.0 }
 0x6c0   :  { %2362 = vmatpush.msra.mxu2 %v4419_v58  ;;  %v6256_v48 = vsel %vm2246_vm8, %v2230_v10, %v2262_v5  ;;  %v6261_v12 = vsel %vm2249_vm11, %v2233_v38, %v2265_v26  ;;  %v4412_v2 = vunpack.c.h.bf16 %v4494_v35  ;;  %v2291_v10 = vmax.f32 %v2287_v0, %v6250_v31 }
 0x6c1   :  { %v2236_v49 = vadd.f32 %v6196_v28, %v2219_v23  ;;  %v6259_v23 = vsel %vm2248_vm10, %v2232_v21, %v2264_v7  ;;  %v6272_v21 = vsel %vm2250_vm13, %v2234_v16, %v2266_v40  ;;  %v2290_v5 = vmax.f32 %v2286_v50, %v6256_v48 }
 0x6c2   :  { %2363 = vmatpush.msra.mxu2 %v4416_v41  ;;  %v2295_v58 = vmax.f32 %v2291_v10, %v6263_v29  ;;  %v4408_v16 = vunpack.c.h.bf16 %v4493_v63  ;;  %v4407_v41 = vunpack.c.l.bf16 %v4493_v63 }
 0x6c3   :  { %v2268_v27 = vmul.f32 0.2, %v2236_v49  ;;  %vm2252_vm14 = vcmp.gt.f32.partialorder %v2236_v49, 0.0  ;;  %v2294_v26 = vmax.f32 %v2290_v5, %v6272_v21 }
 0x6c4   :  { %v2186_v1 = vpop.f32.mrf.mxu1  ;;  %2364 = vmatpush.msra.mxu2 %v4415_v6 }
 0x6c5   :  { %v2204_v32 = vadd.f32 %v2186_v1, %v2121_v20  ;;  %v2288_v20 = vmax.f32 %v6230_v43, %v6244_v36  ;;  %v6274_v38 = vsel %vm2252_vm14, %v2236_v49, %v2268_v27  ;;  %v2293_v1 = vmax.f32 %v2289_v53, %v6261_v12 }
 0x6c6   :  { %2365 = vmatpush.msra.mxu2 %v4412_v2  ;;  %v2298_v50 = vmax.f32 %v2294_v26, %v2295_v58 }
 0x6c7   :  { %v2220_v44 = vadd.f32 %v2204_v32, %v7165_v62  ;;  %v2292_v7 = vmax.f32 %v2288_v20, %v6259_v23  ;;  %v4402_v32 = vld [vmem:[#allocation7 + $0x40] sm:$0xff]  }
 0x6c8   :  { %v4403_v62 = vunpack.c.l.bf16 %v4402_v32 }
 0x6c9   :  { %v2237_v59 = vadd.f32 %v6196_v28, %v2220_v44  ;;  %v4411_v28 = vunpack.c.l.bf16 %v4494_v35  ;;  %v2296_v49 = vmax.f32 %v2292_v7, %v6274_v38  ;;  %v4404_v35 = vunpack.c.h.bf16 %v4402_v32 }
 0x6cb   :  { %vm2253_vm15 = vcmp.gt.f32.partialorder %v2237_v59, 0.0  ;;  %v2269_v51 = vmul.f32 0.2, %v2237_v59  ;;  %2366 = vmatpush.msra.mxu2 %v4411_v28 }
 0x6cd   :  { %v6280_v22 = vsel %vm2253_vm15, %v2237_v59, %v2269_v51  ;;  %2367 = vmatpush.msra.mxu2 %v4408_v16 }
 0x6ce   :  { %v2297_v24 = vmax.f32 %v2293_v1, %v6280_v22 }
 0x6cf   :  { %2368 = vmatpush.msra.mxu2 %v4407_v41 }
 0x6d0   :  { %v2299_v40 = vmax.f32 %v2296_v49, %v2297_v24 }
 0x6d1   :  { %2369 = vmatpush.msra.mxu2 %v4404_v35 }
 0x6d2   :  { %v2300_v27 = vmax.f32 %v2298_v50, %v2299_v40 }
 0x6d3   :  { %2370 = vmatpush.msra.mxu2 %v4403_v62 }
 0x6d4   :  { %v2301_v44 = vrot.slane %v2300_v27, 4 }
 0x6d6   :  { %v2302_v6 = vmax.f32 %v2300_v27, %v2301_v44 }
 0x6d8   :  { %v2303_v0 = vrot.slane %v2302_v6, 2 }
 0x6da   :  { %v2304_v59 = vmax.f32 %v2302_v6, %v2303_v0 }
 0x6dc   :  { %v2305_v2 = vrot.slane %v2304_v59, 1 }
 0x6de   :  { %v6285_v20 = vmax.f32 %v2304_v59, %v2305_v2 }
 0x6e0   :  { %v2322_v53 = vsub.f32 %v6280_v22, %v6285_v20  ;;  %v2307_v10 = vsub.f32 %v6208_v14, %v6285_v20  ;;  %v2308_v51 = vsub.f32 %v6210_v52, %v6285_v20  ;;  %v2317_v28 = vsub.f32 %v6259_v23, %v6285_v20 }
 0x6e1   :  { %v2318_v5 = vsub.f32 %v6261_v12, %v6285_v20  ;;  %v2319_v7 = vsub.f32 %v6272_v21, %v6285_v20  ;;  %v2320_v1 = vsub.f32 %v6263_v29, %v6285_v20  ;;  %v2321_v14 = vsub.f32 %v6274_v38, %v6285_v20 }
 0x6e2   :  { %v2323_v63 = vmul.f32 1.442695, %v2307_v10  ;;  %v2325_v58 = vmul.f32 1.442695, %v2308_v51  ;;  %v2309_v52 = vsub.f32 %v6230_v43, %v6285_v20  ;;  %v2310_v12 = vsub.f32 %v6233_v45, %v6285_v20 }
 0x6e3   :  { %v2311_v29 = vsub.f32 %v6219_v4, %v6285_v20  ;;  %v2312_v43 = vsub.f32 %v6239_v8, %v6285_v20  ;;  %v2313_v45 = vsub.f32 %v6244_v36, %v6285_v20  ;;  %v2314_v4 = vsub.f32 %v6246_v39, %v6285_v20 }
 0x6e4   :  { %4587 = vpow2.f32 %v2323_v63  ;;  %v2327_v23 = vmul.f32 1.442695, %v2309_v52  ;;  %v2329_v21 = vmul.f32 1.442695, %v2310_v12  ;;  %v2315_v8 = vsub.f32 %v6256_v48, %v6285_v20 }
 0x6e5   :  { %4589 = vpow2.f32 %v2325_v58  ;;  %v2331_v38 = vmul.f32 1.442695, %v2311_v29  ;;  %v2333_v32 = vmul.f32 1.442695, %v2312_v43  ;;  %v2335_v50 = vmul.f32 1.442695, %v2313_v45 }
 0x6e6   :  { %4591 = vpow2.f32 %v2327_v23  ;;  %v2337_v35 = vmul.f32 1.442695, %v2314_v4  ;;  %v2339_v62 = vmul.f32 1.442695, %v2315_v8  ;;  %v2316_v36 = vsub.f32 %v6250_v31, %v6285_v20  ;;  %v6319_v31 = vpop.f32.mrf.mxu3 }
 0x6e7   :  { %4593 = vpow2.f32 %v2329_v21  ;;  %v2343_v59 = vmul.f32 1.442695, %v2317_v28  ;;  %v2345_v2 = vmul.f32 1.442695, %v2318_v5  ;;  %v2347_v48 = vmul.f32 1.442695, %v2319_v7 }
 0x6e8   :  { %4595 = vpow2.f32 %v2331_v38  ;;  %v2341_v6 = vmul.f32 1.442695, %v2316_v36  ;;  %v2349_v51 = vmul.f32 1.442695, %v2320_v1  ;;  %v2353_v28 = vmul.f32 1.442695, %v2322_v53 }
 0x6e9   :  { %4597 = vpow2.f32 %v2333_v32 }
 0x6ea   :  { %v4588_v16 = vpop.eup %4587  ;;  %4599 = vpow2.f32 %v2335_v50 }
 0x6eb   :  { %2371 = vmatmul.f32.vlgmr.msra.gmra.mxu2 %v4588_v16  ;;  %v4590_v26 = vpop.eup %4589  ;;  %4601 = vpow2.f32 %v2337_v35  ;;  %v2351_v16 = vmul.f32 1.442695, %v2321_v14 }
 0x6ec   :  { %v4592_v49 = vpop.eup %4591  ;;  %4603 = vpow2.f32 %v2339_v62 }
 0x6ed   :  { %v4594_v24 = vpop.eup %4593  ;;  %4605 = vpow2.f32 %v2341_v6 }
 0x6ee   :  { %v4596_v41 = vpop.eup %4595  ;;  %4607 = vpow2.f32 %v2343_v59  ;;  %v6324_v5 = vpop.f32.mrf.mxu3 }
 0x6ef   :  { %v4598_v40 = vpop.eup %4597  ;;  %4609 = vpow2.f32 %v2345_v2 }
 0x6f0   :  { %v4600_v27 = vpop.eup %4599  ;;  %4611 = vpow2.f32 %v2347_v48 }
 0x6f1   :  { %v4602_v44 = vpop.eup %4601  ;;  %4613 = vpow2.f32 %v2349_v51 }
 0x6f2   :  { %v4604_v0 = vpop.eup %4603  ;;  %4615 = vpow2.f32 %v2351_v16 }
 0x6f3   :  { %2374 = vmatmul.f32.gmra.mxu2 %v4590_v26  ;;  %v4606_v39 = vpop.eup %4605  ;;  %4617 = vpow2.f32 %v2353_v28 }
 0x6f4   :  { %v4608_v10 = vpop.eup %4607 }
 0x6f5   :  { %v4610_v63 = vpop.eup %4609 }
 0x6f6   :  { %v4612_v58 = vpop.eup %4611  ;;  %v6326_v1 = vpop.f32.mrf.mxu3 }
 0x6f7   :  { %v4614_v52 = vpop.eup %4613 }
 0x6f8   :  { %v4616_v7 = vpop.eup %4615 }
 0x6f9   :  { %v4618_v23 = vpop.eup %4617 }
 0x6fb   :  { %2377 = vmatmul.f32.gmra.mxu2 %v4592_v49 }
 0x6fe   :  { %v6328_v26 = vpop.f32.mrf.mxu3 }
 0x703   :  { %2380 = vmatmul.f32.gmra.mxu2 %v4594_v24 }
 0x706   :  { %v2023_v21 = vpop.f32.mrf.mxu3 }
 0x70b   :  { %2383 = vmatmul.f32.gmra.mxu2 %v4596_v41 }
 0x70e   :  { %v2026_v22 = vpop.f32.mrf.mxu3 }
 0x713   :  { %2386 = vmatmul.f32.gmra.mxu2 %v4598_v40 }
 0x716   :  { %v2029_v53 = vpop.f32.mrf.mxu3 }
 0x71b   :  { %2389 = vmatmul.f32.gmra.mxu2 %v4600_v27 }
 0x71e   :  { %v2032_v38 = vpop.f32.mrf.mxu3 }
 0x723   :  { %2392 = vmatmul.f32.gmra.mxu2 %v4602_v44 }
 0x726   :  { %v2035_v32 = vpop.f32.mrf.mxu3 }
 0x72b   :  { %2395 = vmatmul.f32.gmra.mxu2 %v4604_v0 }
 0x72e   :  { %v2038_v45 = vpop.f32.mrf.mxu3 }
 0x733   :  { %2398 = vmatmul.f32.gmra.mxu2 %v4606_v39 }
 0x736   :  { %v2041_v40 = vpop.f32.mrf.mxu3 }
 0x73b   :  { %2401 = vmatmul.f32.gmra.mxu2 %v4608_v10 }
 0x73e   :  { %v2044_v35 = vpop.f32.mrf.mxu3 }
 0x743   :  { %2404 = vmatmul.f32.gmra.mxu2 %v4610_v63 }
 0x746   :  { %v2047_v62 = vpop.f32.mrf.mxu3 }
 0x74b   :  { %2407 = vmatmul.f32.gmra.mxu2 %v4612_v58 }
 0x74e   :  { %v2050_v36 = vpop.f32.mrf.mxu3 }
 0x753   :  { %2410 = vmatmul.f32.gmra.mxu2 %v4614_v52 }
 0x756   :  { %v2053_v0 = vpop.f32.mrf.mxu3 }
 0x75b   :  { %2413 = vmatmul.f32.gmra.mxu2 %v4616_v7 }
 0x75e   :  { %v2056_v39 = vpop.f32.mrf.mxu3 }
 0x763   :  { %2416 = vmatmul.f32.gmra.mxu2 %v4618_v23 }
 0x76e   :  { %v6330_v12 = vpop.f32.mrf.mxu2 }
 0x776   :  { %v6332_v14 = vpop.f32.mrf.mxu2 }
 0x77e   :  { %v6334_v49 = vpop.f32.mrf.mxu2 }
 0x786   :  { %v2381_v20 = vpop.f32.mrf.mxu2 }
 0x78e   :  { %v2384_v29 = vpop.f32.mrf.mxu2 }
 0x796   :  { %v2387_v24 = vpop.f32.mrf.mxu2 }
 0x79e   :  { %v2390_v43 = vpop.f32.mrf.mxu2 }
 0x79f   :  { %v2426_v23 = vmul.f32 %v2390_v43, %v2029_v53  ;;  %v2421_v53 = vmul.f32 %v6332_v14, %v6324_v5  ;;  %v7169_v5 = vld [vmem:[#allocation82_spill] sm:$0xff] }
 0x7a6   :  { %v2393_v41 = vpop.f32.mrf.mxu2 }
 0x7a7   :  { %v2427_v7 = vmul.f32 %v2393_v41, %v2032_v38  ;;  %v7176_v38 = vld [vmem:[#allocation89_spill] sm:$0xff] }
 0x7ae   :  { %v2396_v50 = vpop.f32.mrf.mxu2 }
 0x7af   :  { %v2428_v28 = vmul.f32 %v2396_v50, %v2035_v32  ;;  %v2422_v32 = vmul.f32 %v6334_v49, %v6326_v1  ;;  %v7167_v1 = vld [vmem:[#allocation80_spill] sm:$0xff] }
 0x7b6   :  { %v2399_v4 = vpop.f32.mrf.mxu2 }
 0x7b7   :  { %v2429_v52 = vmul.f32 %v2399_v4, %v2038_v45  ;;  %v2973_v45 = vld [vmem:[#allocation6 + $0x478] sm:$0xff] }
 0x7be   :  { %v2402_v27 = vpop.f32.mrf.mxu2 }
 0x7bf   :  { %v2430_v16 = vmul.f32 %v2402_v27, %v2041_v40  ;;  %v2423_v40 = vmul.f32 %v2381_v20, %v6328_v26  ;;  %v7166_v26 = vld [vmem:[#allocation54_spill] sm:$0xff] }
 0x7c6   :  { %v2405_v8 = vpop.f32.mrf.mxu2 }
 0x7c7   :  { %v2431_v58 = vmul.f32 %v2405_v8, %v2044_v35  ;;  %v2424_v35 = vmul.f32 %v2384_v29, %v2023_v21  ;;  %v2420_v21 = vmul.f32 %v6330_v12, %v6319_v31  ;;  %v7170_v31 = vld [vmem:[#allocation83_spill] sm:$0xff] }
 0x7ce   :  { %v2408_v44 = vpop.f32.mrf.mxu2 }
 0x7cf   :  { %v2432_v51 = vmul.f32 %v2408_v44, %v2047_v62  ;;  %v2425_v62 = vmul.f32 %v2387_v24, %v2026_v22  ;;  %v7173_v22 = vld [vmem:[#allocation86_spill] sm:$0xff] }
 0x7d6   :  { %v2411_v6 = vpop.f32.mrf.mxu2 }
 0x7d7   :  { %v2433_v63 = vmul.f32 %v2411_v6, %v2050_v36  ;;  %v2965_v36 = vld [vmem:[#allocation6 + $0x438] sm:$0xff] }
 0x7de   :  { %v2414_v59 = vpop.f32.mrf.mxu2 }
 0x7df   :  { %v2434_v48 = vmul.f32 %v2414_v59, %v2053_v0  ;;  %v2967_v0 = vld [vmem:[#allocation6 + $0x448] sm:$0xff] }
 0x7e6   :  { %v2417_v2 = vpop.f32.mrf.mxu2 }
 0x7e7   :  { %v2435_v10 = vmul.f32 %v2417_v2, %v2056_v39  ;;  %2501 = vmatpush.msrb.mxu0 %v2417_v2  ;;  %v2963_v39 = vld [vmem:[#allocation6 + $0x428] sm:$0xff]  ;;  %v2964_v2 = vld [vmem:[#allocation6 + $0x430] sm:$0xff] }
 0x7e9   :  { %2436 = vmatpush.msra.mxu3 %v2435_v10  ;;  %2502 = vmatpush.msrb.mxu0 %v2414_v59  ;;  %v2962_v59 = vld [vmem:[#allocation6 + $0x420] sm:$0xff]  ;;  %v2959_v10 = vld [vmem:[#allocation6 + $0x408] sm:$0xff] }
 0x7eb   :  { %2437 = vmatpush.msra.mxu3 %v2434_v48  ;;  %2503 = vmatpush.msrb.mxu0 %v2411_v6  ;;  %v2966_v6 = vld [vmem:[#allocation6 + $0x440] sm:$0xff]  ;;  %v2960_v48 = vld [vmem:[#allocation6 + $0x410] sm:$0xff] }
 0x7ed   :  { %2438 = vmatpush.msra.mxu3 %v2433_v63  ;;  %2504 = vmatpush.msrb.mxu0 %v2408_v44  ;;  %v7179_v44 = vld [vmem:[#allocation92_spill] sm:$0xff]  ;;  %v2961_v63 = vld [vmem:[#allocation6 + $0x418] sm:$0xff] }
 0x7ef   :  { %2439 = vmatpush.msra.mxu3 %v2432_v51  ;;  %2505 = vmatpush.msrb.mxu0 %v2405_v8  ;;  %v7178_v8 = vld [vmem:[#allocation91_spill] sm:$0xff]  ;;  %v2956_v51 = vld [vmem:[#allocation6 + $0x3f0] sm:$0xff] }
 0x7f1   :  { %2440 = vmatpush.msra.mxu3 %v2431_v58  ;;  %2506 = vmatpush.msrb.mxu0 %v2402_v27  ;;  %v2970_v27 = vld [vmem:[#allocation6 + $0x460] sm:$0xff]  ;;  %v2957_v58 = vld [vmem:[#allocation6 + $0x3f8] sm:$0xff] }
 0x7f3   :  { %2441 = vmatpush.msra.mxu3 %v2430_v16  ;;  %2507 = vmatpush.msrb.mxu0 %v2399_v4  ;;  %v2969_v4 = vld [vmem:[#allocation6 + $0x458] sm:$0xff]  ;;  %v2958_v16 = vld [vmem:[#allocation6 + $0x400] sm:$0xff] }
 0x7f5   :  { %2442 = vmatpush.msra.mxu3 %v2429_v52  ;;  %2508 = vmatpush.msrb.mxu0 %v2396_v50  ;;  %v2968_v50 = vld [vmem:[#allocation6 + $0x450] sm:$0xff]  ;;  %v7180_v52 = vld [vmem:[#allocation93_spill] sm:$0xff] }
 0x7f7   :  { %2443 = vmatpush.msra.mxu3 %v2428_v28  ;;  %2509 = vmatpush.msrb.mxu0 %v2393_v41  ;;  %v2972_v41 = vld [vmem:[#allocation6 + $0x470] sm:$0xff]  ;;  %v2953_v28 = vld [vmem:[#allocation6 + $0x3d8] sm:$0xff] }
 0x7f8   :  { %3042 = vmatpush.msrb.mxu2 %v2972_v41  ;;  %v2945_v41 = vld [vmem:[#allocation6 + $0x398] sm:$0xff] }
 0x7f9   :  { %2444 = vmatpush.msra.mxu3 %v2427_v7  ;;  %2510 = vmatpush.msrb.mxu0 %v2390_v43  ;;  %v2971_v43 = vld [vmem:[#allocation6 + $0x468] sm:$0xff]  ;;  %v2954_v7 = vld [vmem:[#allocation6 + $0x3e0] sm:$0xff] }
 0x7fa   :  { %2977 = vmatpush.msrb.mxu1 %v2971_v43  ;;  %3043 = vmatpush.msrb.mxu2 %v2969_v4  ;;  %v2944_v43 = vld [vmem:[#allocation6 + $0x390] sm:$0xff]  ;;  %v2941_v4 = vld [vmem:[#allocation6 + $0x378] sm:$0xff] }
 0x7fb   :  { %2445 = vmatpush.msra.mxu3 %v2426_v23  ;;  %2511 = vmatpush.msrb.mxu0 %v2387_v24  ;;  %v7177_v24 = vld [vmem:[#allocation90_spill] sm:$0xff]  ;;  %v2955_v23 = vld [vmem:[#allocation6 + $0x3e8] sm:$0xff] }
 0x7fc   :  { %2978 = vmatpush.msrb.mxu1 %v2968_v50  ;;  %3044 = vmatpush.msrb.mxu2 %v2966_v6  ;;  %v7181_v50 = vld [vmem:[#allocation94_spill] sm:$0xff] }
 0x7fd   :  { %2446 = vmatpush.msra.mxu3 %v2425_v62  ;;  %2512 = vmatpush.msrb.mxu0 %v2384_v29  ;;  %v7175_v29 = vld [vmem:[#allocation88_spill] sm:$0xff]  ;;  %v2950_v62 = vld [vmem:[#allocation6 + $0x3c0] sm:$0xff] }
 0x7fe   :  { %2979 = vmatpush.msrb.mxu1 %v2965_v36  ;;  %3045 = vmatpush.msrb.mxu2 %v2963_v39  ;;  %v2943_v36 = vld [vmem:[#allocation6 + $0x388] sm:$0xff]  ;;  %v2938_v6 = vld [vmem:[#allocation6 + $0x360] sm:$0xff] }
 0x7ff   :  { %2447 = vmatpush.msra.mxu3 %v2424_v35  ;;  %2513 = vmatpush.msrb.mxu0 %v2381_v20  ;;  %v7174_v20 = vld [vmem:[#allocation87_spill] sm:$0xff] }
 0x800   :  { %2980 = vmatpush.msrb.mxu1 %v2962_v59  ;;  %3046 = vmatpush.msrb.mxu2 %v2960_v48  ;;  %v2951_v35 = vld [vmem:[#allocation6 + $0x3c8] sm:$0xff]  ;;  %v2940_v59 = vld [vmem:[#allocation6 + $0x370] sm:$0xff] }
 0x801   :  { %2448 = vmatpush.msra.mxu3 %v2423_v40  ;;  %2514 = vmatpush.msrb.mxu0 %v6334_v49  ;;  %v7168_v49 = vld [vmem:[#allocation81_spill] sm:$0xff]  ;;  %v2952_v40 = vld [vmem:[#allocation6 + $0x3d0] sm:$0xff]  ;;  %v2935_v39 = vld [vmem:[#allocation6 + $0x348] sm:$0xff] }
 0x802   :  { %2981 = vmatpush.msrb.mxu1 %v2959_v10  ;;  %3047 = vmatpush.msrb.mxu2 %v2957_v58  ;;  %v2937_v10 = vld [vmem:[#allocation6 + $0x358] sm:$0xff]  ;;  %v2934_v58 = vld [vmem:[#allocation6 + $0x340] sm:$0xff] }
 0x803   :  { %2449 = vmatpush.msra.mxu3 %v2422_v32  ;;  %2515 = vmatpush.msrb.mxu0 %v6332_v14  ;;  %v7172_v14 = vld [vmem:[#allocation85_spill] sm:$0xff]  ;;  %v2947_v32 = vld [vmem:[#allocation6 + $0x3a8] sm:$0xff] }
 0x804   :  { %2982 = vmatpush.msrb.mxu1 %v2956_v51  ;;  %3048 = vmatpush.msrb.mxu2 %v2954_v7  ;;  %v2933_v51 = vld [vmem:[#allocation6 + $0x338] sm:$0xff]  ;;  %v2930_v7 = vld [vmem:[#allocation6 + $0x320] sm:$0xff] }
 0x805   :  { %2450 = vmatpush.msra.mxu3 %v2421_v53  ;;  %2516 = vmatpush.msrb.mxu0 %v6330_v12  ;;  %v7171_v12 = vld [vmem:[#allocation84_spill] sm:$0xff] }
 0x806   :  { %2517 = vmatmul.f32.vlgmr.msrb.gmra.mxu0 %v7166_v26  ;;  %2983 = vmatpush.msrb.mxu1 %v2953_v28  ;;  %v2948_v53 = vld [vmem:[#allocation6 + $0x3b0] sm:$0xff]  ;;  %v2929_v28 = vld [vmem:[#allocation6 + $0x318] sm:$0xff] }
 0x807   :  { %2451 = vmatpush.msra.mxu3 %v2420_v21  ;;  %v2949_v21 = vld [vmem:[#allocation6 + $0x3b8] sm:$0xff]  ;;  %3049 = vmatpush.msrb.mxu2 %v2951_v35  ;;  %v2927_v35 = vld [vmem:[#allocation6 + $0x308] sm:$0xff] }
 0x808   :  { %2452 = vmatmul.f32.vlgmr.msra.gmra.mxu3 %v7166_v26  ;;  %2984 = vmatpush.msrb.mxu1 %v2950_v62  ;;  %v2926_v62 = vld [vmem:[#allocation6 + $0x300] sm:$0xff] }
 0x809   :  { %3107 = vmatpush.msrb.mxu3 %v2973_v45  ;;  %v2946_v45 = vld [vmem:[#allocation6 + $0x3a0] sm:$0xff]  ;;  %3050 = vmatpush.msrb.mxu2 %v2948_v53 }
 0x80a   :  { %2985 = vmatpush.msrb.mxu1 %v2947_v32 }
 0x80b   :  { %3108 = vmatpush.msrb.mxu3 %v2970_v27  ;;  %3051 = vmatpush.msrb.mxu2 %v2945_v41  ;;  %v2942_v27 = vld [vmem:[#allocation6 + $0x380] sm:$0xff] }
 0x80c   :  { %2986 = vmatpush.msrb.mxu1 %v2944_v43 }
 0x80d   :  { %3109 = vmatpush.msrb.mxu3 %v2967_v0  ;;  %v2939_v0 = vld [vmem:[#allocation6 + $0x368] sm:$0xff]  ;;  %3052 = vmatpush.msrb.mxu2 %v2942_v27 }
 0x80e   :  { %2520 = vmatmul.f32.gmra.mxu0 %v7167_v1  ;;  %2987 = vmatpush.msrb.mxu1 %v2941_v4 }
 0x80f   :  { %3110 = vmatpush.msrb.mxu3 %v2964_v2  ;;  %v2936_v2 = vld [vmem:[#allocation6 + $0x350] sm:$0xff]  ;;  %3053 = vmatpush.msrb.mxu2 %v2939_v0 }
 0x810   :  { %2455 = vmatmul.f32.gmra.mxu3 %v7167_v1  ;;  %2988 = vmatpush.msrb.mxu1 %v2938_v6 }
 0x811   :  { %3111 = vmatpush.msrb.mxu3 %v2961_v63  ;;  %v2932_v63 = vld [vmem:[#allocation6 + $0x330] sm:$0xff]  ;;  %3054 = vmatpush.msrb.mxu2 %v2936_v2 }
 0x812   :  { %2989 = vmatpush.msrb.mxu1 %v2935_v39 }
 0x813   :  { %3112 = vmatpush.msrb.mxu3 %v2958_v16  ;;  %3055 = vmatpush.msrb.mxu2 %v2933_v51 }
 0x814   :  { %2990 = vmatpush.msrb.mxu1 %v2932_v63 }
 0x815   :  { %3113 = vmatpush.msrb.mxu3 %v2955_v23  ;;  %v2931_v23 = vld [vmem:[#allocation6 + $0x328] sm:$0xff]  ;;  %3056 = vmatpush.msrb.mxu2 %v2930_v7 }
 0x816   :  { %2523 = vmatmul.f32.gmra.mxu0 %v7168_v49  ;;  %2991 = vmatpush.msrb.mxu1 %v2929_v28  ;;  %v4718_v7 = vld [vmem:[#allocation9 + $0x28] sm:$0xff] }
 0x817   :  { %3114 = vmatpush.msrb.mxu3 %v2952_v40  ;;  %v2928_v40 = vld [vmem:[#allocation6 + $0x310] sm:$0xff]  ;;  %3057 = vmatpush.msrb.mxu2 %v2927_v35 }
 0x818   :  { %2458 = vmatmul.f32.gmra.mxu3 %v7168_v49  ;;  %2992 = vmatpush.msrb.mxu1 %v2926_v62 }
 0x819   :  { %3115 = vmatpush.msrb.mxu3 %v2949_v21 }
 0x81b   :  { %3116 = vmatpush.msrb.mxu3 %v2946_v45 }
 0x81d   :  { %3117 = vmatpush.msrb.mxu3 %v2943_v36 }
 0x81e   :  { %2526 = vmatmul.f32.gmra.mxu0 %v7169_v5 }
 0x81f   :  { %3118 = vmatpush.msrb.mxu3 %v2940_v59 }
 0x820   :  { %2461 = vmatmul.f32.gmra.mxu3 %v7169_v5 }
 0x821   :  { %3119 = vmatpush.msrb.mxu3 %v2937_v10  ;;  %v4717_v10 = vld [vmem:[#allocation9 + $0x20] sm:$0xff] }
 0x823   :  { %3120 = vmatpush.msrb.mxu3 %v2934_v58 }
 0x825   :  { %3121 = vmatpush.msrb.mxu3 %v2931_v23  ;;  %v6380_v23 = vperm.slane %v4718_v7, 1 }
 0x826   :  { %2529 = vmatmul.f32.gmra.mxu0 %v7170_v31 }
 0x827   :  { %3122 = vmatpush.msrb.mxu3 %v2928_v40 }
 0x828   :  { %2464 = vmatmul.f32.gmra.mxu3 %v7170_v31 }
 0x82e   :  { %2532 = vmatmul.f32.gmra.mxu0 %v7171_v12 }
 0x830   :  { %2467 = vmatmul.f32.gmra.mxu3 %v7171_v12 }
 0x836   :  { %2535 = vmatmul.f32.gmra.mxu0 %v7172_v14 }
 0x838   :  { %2470 = vmatmul.f32.gmra.mxu3 %v7172_v14 }
 0x83e   :  { %2538 = vmatmul.f32.gmra.mxu0 %v7173_v22 }
 0x840   :  { %2473 = vmatmul.f32.gmra.mxu3 %v7173_v22 }
 0x846   :  { %2541 = vmatmul.f32.gmra.mxu0 %v7174_v20 }
 0x848   :  { %2476 = vmatmul.f32.gmra.mxu3 %v7174_v20 }
 0x84e   :  { %2544 = vmatmul.f32.gmra.mxu0 %v7175_v29 }
 0x850   :  { %2479 = vmatmul.f32.gmra.mxu3 %v7175_v29 }
 0x856   :  { %2547 = vmatmul.f32.gmra.mxu0 %v7176_v38 }
 0x858   :  { %2482 = vmatmul.f32.gmra.mxu3 %v7176_v38 }
 0x85e   :  { %2550 = vmatmul.f32.gmra.mxu0 %v7177_v24 }
 0x860   :  { %2485 = vmatmul.f32.gmra.mxu3 %v7177_v24 }
 0x866   :  { %2553 = vmatmul.f32.gmra.mxu0 %v7178_v8 }
 0x868   :  { %2488 = vmatmul.f32.gmra.mxu3 %v7178_v8 }
 0x86e   :  { %2556 = vmatmul.f32.gmra.mxu0 %v7179_v44 }
 0x870   :  { %2491 = vmatmul.f32.gmra.mxu3 %v7179_v44 }
 0x876   :  { %2559 = vmatmul.f32.gmra.mxu0 %v7180_v52 }
 0x878   :  { %2494 = vmatmul.f32.gmra.mxu3 %v7180_v52 }
 0x87e   :  { %2562 = vmatmul.f32.gmra.mxu0 %v7181_v50 }
 0x880   :  { %2497 = vmatmul.f32.gmra.mxu3 %v7181_v50 }
 0x883   :  { %v2518_v48 = vpop.f32.mrf.mxu0 }
 0x884   :  { %vm2566_vm0 = vcmp.gt.f32.partialorder %v2518_v48, 0.0 }
 0x885   :  { %v2582_v16 = vsel %vm2566_vm0, %v2518_v48, 1.0  ;;  %v6378_v48 = vperm.slane %v4717_v10, 1 }
 0x886   :  { %4619 = vrcp.f32 %v2582_v16  ;;  %v2609_v4 = vand.u32 2147483648, %v2582_v16  ;;  %v2607_v36 = vand.u32 2147483647, %v2582_v16  ;;  %vm2603_vm3 = vweird.f32 %v2582_v16 }
 0x888   :  { %v2610_v2 = vor.u32 1.1754944e-38, %v2609_v4  ;;  %vm2608_vm6 = vcmp.eq.f32.partialorder %v2607_v36, 8.507059e+37 }
 0x88b   :  { %v2521_v32 = vpop.f32.mrf.mxu0  ;;  %v2453_v53 = vpop.f32.mrf.mxu3 }
 0x88c   :  { %v4620_v21 = vpop.eup %4619  ;;  %vm2567_vm1 = vcmp.gt.f32.partialorder %v2521_v32, 0.0 }
 0x88d   :  { %v2599_v43 = vmul.f32 %v4620_v21, %v2582_v16  ;;  %v2583_v41 = vsel %vm2567_vm1, %v2521_v32, 1.0  ;;  %vm2604_vm2 = vweird.f32 %v4620_v21 }
 0x88e   :  { %4621 = vrcp.f32 %v2583_v41  ;;  %vm2605_vm5 = vmor %vm2603_vm3, %vm2604_vm2  ;;  %v2622_v16 = vand.u32 2147483647, %v2583_v41  ;;  %v2624_v40 = vand.u32 2147483648, %v2583_v41  ;;  %vm2618_vm8 = vweird.f32 %v2583_v41 }
 0x88f   :  { %v2600_v45 = vsub.f32 1.0, %v2599_v43 }
 0x890   :  { %vm2623_vm11 = vcmp.eq.f32.partialorder %v2622_v16, 8.507059e+37 }
 0x891   :  { %v2601_v27 = vmul.f32 %v4620_v21, %v2600_v45 }
 0x893   :  { %v2524_v6 = vpop.f32.mrf.mxu0  ;;  %v2602_v0 = vadd.f32 %v4620_v21, %v2601_v27  ;;  %v2456_v59 = vpop.f32.mrf.mxu3 }
 0x894   :  { %v4622_v39 = vpop.eup %4621  ;;  %vm2568_vm4 = vcmp.gt.f32.partialorder %v2524_v6, 0.0 }
 0x895   :  { %v2614_v63 = vmul.f32 %v4622_v39, %v2583_v41  ;;  %v2584_v51 = vsel %vm2568_vm4, %v2524_v6, 1.0  ;;  %v2606_v58 = vsel %vm2605_vm5, %v4620_v21, %v2602_v0  ;;  %vm2619_vm7 = vweird.f32 %v4622_v39 }
 0x896   :  { %4623 = vrcp.f32 %v2584_v51  ;;  %v2611_v28 = vsel %vm2608_vm6, %v2610_v2, %v2606_v58  ;;  %vm2620_vm10 = vmor %vm2618_vm8, %vm2619_vm7  ;;  %v2625_v6 = vor.u32 1.1754944e-38, %v2624_v40  ;;  %v2637_v7 = vand.u32 2147483647, %v2584_v51 }
 0x897   :  { %v2615_v62 = vsub.f32 1.0, %v2614_v63  ;;  %v2612_v35 = vmul.f32 %v2611_v28, %v2453_v53  ;;  %vm2633_vm13 = vweird.f32 %v2584_v51 }
 0x898   :  { %vm2638_vm0 = vcmp.eq.f32.partialorder %v2637_v7, 8.507059e+37 }
 0x899   :  { %v2839_v32 = vmul.f32 %v6378_v48, %v2612_v35  ;;  %v2616_v43 = vmul.f32 %v4622_v39, %v2615_v62  ;;  %v2639_v62 = vand.u32 2147483648, %v2584_v51 }
 0x89b   :  { %v2856_v45 = vadd.f32 %v6380_v23, %v2839_v32  ;;  %v2527_v4 = vpop.f32.mrf.mxu0  ;;  %v2617_v27 = vadd.f32 %v4622_v39, %v2616_v43  ;;  %v2459_v21 = vpop.f32.mrf.mxu3 }
 0x89c   :  { %v4624_v36 = vpop.eup %4623  ;;  %vm2569_vm9 = vcmp.gt.f32.partialorder %v2527_v4, 0.0 }
 0x89d   :  { %v2629_v0 = vmul.f32 %v4624_v36, %v2584_v51  ;;  %v2872_v2 = vmax.f32 %v2856_v45, 0.0  ;;  %v2585_v53 = vsel %vm2569_vm9, %v2527_v4, 1.0  ;;  %v2621_v10 = vsel %vm2620_vm10, %v4622_v39, %v2617_v27 }
 0x89e   :  { %4625 = vrcp.f32 %v2585_v53  ;;  %v2626_v63 = vsel %vm2623_vm11, %v2625_v6, %v2621_v10  ;;  %vm2634_vm12 = vweird.f32 %v4624_v36  ;;  %v2652_v51 = vand.u32 2147483647, %v2585_v53 }
 0x89f   :  { %v2630_v58 = vsub.f32 1.0, %v2629_v0  ;;  %v2627_v28 = vmul.f32 %v2626_v63, %v2456_v59  ;;  %2993 = vmatmul.f32.vlgmr.msrb.gmra.mxu1 %v2872_v2  ;;  %3058 = vmatmul.f32.vlgmr.msrb.gmra.mxu2 %v2872_v2  ;;  %vm2635_vm15 = vmor %vm2633_vm13, %vm2634_vm12  ;;  %v2640_v59 = vor.u32 1.1754944e-38, %v2639_v62  ;;  %v2654_v63 = vand.u32 2147483648, %v2585_v53 }
 0x8a0   :  { %3123 = vmatmul.f32.vlgmr.msrb.gmra.mxu3 %v2872_v2  ;;  %vm2648_vm2 = vweird.f32 %v2585_v53  ;;  %vm2653_vm5 = vcmp.eq.f32.partialorder %v2652_v51, 8.507059e+37 }
 0x8a1   :  { %v2840_v41 = vmul.f32 %v6378_v48, %v2627_v28  ;;  %v2631_v35 = vmul.f32 %v4624_v36, %v2630_v58 }
 0x8a3   :  { %v2530_v32 = vpop.f32.mrf.mxu0  ;;  %v2632_v16 = vadd.f32 %v4624_v36, %v2631_v35  ;;  %v2857_v40 = vadd.f32 %v6380_v23, %v2840_v41  ;;  %v2462_v43 = vpop.f32.mrf.mxu3 }
 0x8a4   :  { %v4626_v39 = vpop.eup %4625  ;;  %vm2570_vm14 = vcmp.gt.f32.partialorder %v2530_v32, 0.0 }
 0x8a5   :  { %v2644_v45 = vmul.f32 %v4626_v39, %v2585_v53  ;;  %v2586_v4 = vsel %vm2570_vm14, %v2530_v32, 1.0  ;;  %v2636_v27 = vsel %vm2635_vm15, %v4624_v36, %v2632_v16  ;;  %v2873_v6 = vmax.f32 %v2857_v40, 0.0 }
 0x8a6   :  { %4627 = vrcp.f32 %v2586_v4  ;;  %v2641_v0 = vsel %vm2638_vm0, %v2640_v59, %v2636_v27  ;;  %vm2649_vm1 = vweird.f32 %v4626_v39  ;;  %v2667_v53 = vand.u32 2147483647, %v2586_v4 }
 0x8a7   :  { %v2645_v2 = vsub.f32 1.0, %v2644_v45  ;;  %v2642_v10 = vmul.f32 %v2641_v0, %v2459_v21  ;;  %2996 = vmatmul.f32.gmra.mxu1 %v2873_v6  ;;  %3061 = vmatmul.f32.gmra.mxu2 %v2873_v6  ;;  %vm2650_vm4 = vmor %vm2648_vm2, %vm2649_vm1  ;;  %v2655_v21 = vor.u32 1.1754944e-38, %v2654_v63  ;;  %v2669_v0 = vand.u32 2147483648, %v2586_v4 }
 0x8a8   :  { %3126 = vmatmul.f32.gmra.mxu3 %v2873_v6  ;;  %vm2663_vm7 = vweird.f32 %v2586_v4  ;;  %vm2668_vm10 = vcmp.eq.f32.partialorder %v2667_v53, 8.507059e+37 }
 0x8a9   :  { %v2841_v58 = vmul.f32 %v6378_v48, %v2642_v10  ;;  %v2646_v28 = vmul.f32 %v4626_v39, %v2645_v2 }
 0x8ab   :  { %v2533_v41 = vpop.f32.mrf.mxu0  ;;  %v2647_v7 = vadd.f32 %v4626_v39, %v2646_v28  ;;  %v2858_v62 = vadd.f32 %v6380_v23, %v2841_v58  ;;  %v2465_v36 = vpop.f32.mrf.mxu3 }
 0x8ac   :  { %v4628_v35 = vpop.eup %4627  ;;  %vm2571_vm3 = vcmp.gt.f32.partialorder %v2533_v41, 0.0 }
 0x8ad   :  { %v2659_v32 = vmul.f32 %v4628_v35, %v2586_v4  ;;  %v2587_v16 = vsel %vm2571_vm3, %v2533_v41, 1.0  ;;  %v2651_v40 = vsel %vm2650_vm4, %v4626_v39, %v2647_v7  ;;  %v2874_v59 = vmax.f32 %v2858_v62, 0.0 }
 0x8ae   :  { %4629 = vrcp.f32 %v2587_v16  ;;  %v2656_v45 = vsel %vm2653_vm5, %v2655_v21, %v2651_v40  ;;  %vm2664_vm6 = vweird.f32 %v4628_v35  ;;  %v2682_v4 = vand.u32 2147483647, %v2587_v16 }
 0x8af   :  { %v2660_v27 = vsub.f32 1.0, %v2659_v32  ;;  %v2657_v6 = vmul.f32 %v2656_v45, %v2462_v43  ;;  %2999 = vmatmul.f32.gmra.mxu1 %v2874_v59  ;;  %3064 = vmatmul.f32.gmra.mxu2 %v2874_v59  ;;  %vm2665_vm9 = vmor %vm2663_vm7, %vm2664_vm6  ;;  %v2670_v43 = vor.u32 1.1754944e-38, %v2669_v0  ;;  %v2684_v45 = vand.u32 2147483648, %v2587_v16 }
 0x8b0   :  { %3129 = vmatmul.f32.gmra.mxu3 %v2874_v59  ;;  %vm2678_vm12 = vweird.f32 %v2587_v16  ;;  %vm2683_vm15 = vcmp.eq.f32.partialorder %v2682_v4, 8.507059e+37 }
 0x8b1   :  { %v2842_v2 = vmul.f32 %v6378_v48, %v2657_v6  ;;  %v2661_v10 = vmul.f32 %v4628_v35, %v2660_v27 }
 0x8b3   :  { %v2536_v58 = vpop.f32.mrf.mxu0  ;;  %v2662_v51 = vadd.f32 %v4628_v35, %v2661_v10  ;;  %v2859_v63 = vadd.f32 %v6380_v23, %v2842_v2  ;;  %v2468_v39 = vpop.f32.mrf.mxu3 }
 0x8b4   :  { %v4630_v28 = vpop.eup %4629  ;;  %vm2572_vm8 = vcmp.gt.f32.partialorder %v2536_v58, 0.0 }
 0x8b5   :  { %v2674_v41 = vmul.f32 %v4630_v28, %v2587_v16  ;;  %v2588_v7 = vsel %vm2572_vm8, %v2536_v58, 1.0  ;;  %v2666_v62 = vsel %vm2665_vm9, %v4628_v35, %v2662_v51  ;;  %v2875_v21 = vmax.f32 %v2859_v63, 0.0 }
 0x8b6   :  { %4631 = vrcp.f32 %v2588_v7  ;;  %v2671_v32 = vsel %vm2668_vm10, %v2670_v43, %v2666_v62  ;;  %vm2679_vm11 = vweird.f32 %v4630_v28  ;;  %v2697_v16 = vand.u32 2147483647, %v2588_v7 }
 0x8b7   :  { %v2675_v40 = vsub.f32 1.0, %v2674_v41  ;;  %v2672_v59 = vmul.f32 %v2671_v32, %v2465_v36  ;;  %3002 = vmatmul.f32.gmra.mxu1 %v2875_v21  ;;  %3067 = vmatmul.f32.gmra.mxu2 %v2875_v21  ;;  %vm2680_vm14 = vmor %vm2678_vm12, %vm2679_vm11  ;;  %v2685_v36 = vor.u32 1.1754944e-38, %v2684_v45  ;;  %v2699_v32 = vand.u32 2147483648, %v2588_v7 }
 0x8b8   :  { %3132 = vmatmul.f32.gmra.mxu3 %v2875_v21  ;;  %vm2693_vm1 = vweird.f32 %v2588_v7  ;;  %vm2698_vm4 = vcmp.eq.f32.partialorder %v2697_v16, 8.507059e+37 }
 0x8b9   :  { %v2843_v27 = vmul.f32 %v6378_v48, %v2672_v59  ;;  %v2676_v6 = vmul.f32 %v4630_v28, %v2675_v40 }
 0x8bb   :  { %v2539_v2 = vpop.f32.mrf.mxu0  ;;  %v2677_v53 = vadd.f32 %v4630_v28, %v2676_v6  ;;  %v2860_v0 = vadd.f32 %v6380_v23, %v2843_v27  ;;  %v2471_v35 = vpop.f32.mrf.mxu3 }
 0x8bc   :  { %v4632_v10 = vpop.eup %4631  ;;  %vm2573_vm13 = vcmp.gt.f32.partialorder %v2539_v2, 0.0 }
 0x8bd   :  { %v2689_v58 = vmul.f32 %v4632_v10, %v2588_v7  ;;  %v2589_v51 = vsel %vm2573_vm13, %v2539_v2, 1.0  ;;  %v2681_v63 = vsel %vm2680_vm14, %v4630_v28, %v2677_v53  ;;  %v2876_v43 = vmax.f32 %v2860_v0, 0.0 }
 0x8be   :  { %4633 = vrcp.f32 %v2589_v51  ;;  %v2686_v41 = vsel %vm2683_vm15, %v2685_v36, %v2681_v63  ;;  %vm2694_vm0 = vweird.f32 %v4632_v10  ;;  %v2712_v7 = vand.u32 2147483647, %v2589_v51 }
 0x8bf   :  { %v2690_v62 = vsub.f32 1.0, %v2689_v58  ;;  %v2687_v21 = vmul.f32 %v2686_v41, %v2468_v39  ;;  %3005 = vmatmul.f32.gmra.mxu1 %v2876_v43  ;;  %3070 = vmatmul.f32.gmra.mxu2 %v2876_v43  ;;  %vm2695_vm3 = vmor %vm2693_vm1, %vm2694_vm0  ;;  %v2700_v39 = vor.u32 1.1754944e-38, %v2699_v32  ;;  %v2714_v41 = vand.u32 2147483648, %v2589_v51 }
 0x8c0   :  { %3135 = vmatmul.f32.gmra.mxu3 %v2876_v43  ;;  %vm2708_vm6 = vweird.f32 %v2589_v51  ;;  %vm2713_vm9 = vcmp.eq.f32.partialorder %v2712_v7, 8.507059e+37 }
 0x8c1   :  { %v2844_v40 = vmul.f32 %v6378_v48, %v2687_v21  ;;  %v2691_v59 = vmul.f32 %v4632_v10, %v2690_v62 }
 0x8c3   :  { %v2542_v27 = vpop.f32.mrf.mxu0  ;;  %v2692_v4 = vadd.f32 %v4632_v10, %v2691_v59  ;;  %v2861_v45 = vadd.f32 %v6380_v23, %v2844_v40  ;;  %v2474_v28 = vpop.f32.mrf.mxu3 }
 0x8c4   :  { %v4634_v6 = vpop.eup %4633  ;;  %vm2574_vm2 = vcmp.gt.f32.partialorder %v2542_v27, 0.0 }
 0x8c5   :  { %v2704_v2 = vmul.f32 %v4634_v6, %v2589_v51  ;;  %v2590_v53 = vsel %vm2574_vm2, %v2542_v27, 1.0  ;;  %v2696_v0 = vsel %vm2695_vm3, %v4632_v10, %v2692_v4  ;;  %v2877_v36 = vmax.f32 %v2861_v45, 0.0 }
 0x8c6   :  { %4635 = vrcp.f32 %v2590_v53  ;;  %v2701_v58 = vsel %vm2698_vm4, %v2700_v39, %v2696_v0  ;;  %vm2709_vm5 = vweird.f32 %v4634_v6  ;;  %v2727_v51 = vand.u32 2147483647, %v2590_v53 }
 0x8c7   :  { %v2705_v63 = vsub.f32 1.0, %v2704_v2  ;;  %v2702_v43 = vmul.f32 %v2701_v58, %v2471_v35  ;;  %3008 = vmatmul.f32.gmra.mxu1 %v2877_v36  ;;  %3073 = vmatmul.f32.gmra.mxu2 %v2877_v36  ;;  %vm2710_vm8 = vmor %vm2708_vm6, %vm2709_vm5  ;;  %v2715_v35 = vor.u32 1.1754944e-38, %v2714_v41  ;;  %v2729_v58 = vand.u32 2147483648, %v2590_v53 }
 0x8c8   :  { %3138 = vmatmul.f32.gmra.mxu3 %v2877_v36  ;;  %vm2723_vm11 = vweird.f32 %v2590_v53  ;;  %vm2728_vm14 = vcmp.eq.f32.partialorder %v2727_v51, 8.507059e+37 }
 0x8c9   :  { %v2845_v62 = vmul.f32 %v6378_v48, %v2702_v43  ;;  %v2706_v21 = vmul.f32 %v4634_v6, %v2705_v63 }
 0x8cb   :  { %v2545_v40 = vpop.f32.mrf.mxu0  ;;  %v2707_v16 = vadd.f32 %v4634_v6, %v2706_v21  ;;  %v2862_v32 = vadd.f32 %v6380_v23, %v2845_v62  ;;  %v2477_v10 = vpop.f32.mrf.mxu3 }
 0x8cc   :  { %v4636_v59 = vpop.eup %4635  ;;  %vm2575_vm7 = vcmp.gt.f32.partialorder %v2545_v40, 0.0 }
 0x8cd   :  { %v2719_v27 = vmul.f32 %v4636_v59, %v2590_v53  ;;  %v2591_v4 = vsel %vm2575_vm7, %v2545_v40, 1.0  ;;  %v2711_v45 = vsel %vm2710_vm8, %v4634_v6, %v2707_v16  ;;  %v2878_v39 = vmax.f32 %v2862_v32, 0.0 }
 0x8ce   :  { %4637 = vrcp.f32 %v2591_v4  ;;  %v2716_v2 = vsel %vm2713_vm9, %v2715_v35, %v2711_v45  ;;  %vm2724_vm10 = vweird.f32 %v4636_v59  ;;  %v2742_v53 = vand.u32 2147483647, %v2591_v4 }
 0x8cf   :  { %v2720_v0 = vsub.f32 1.0, %v2719_v27  ;;  %v2717_v36 = vmul.f32 %v2716_v2, %v2474_v28  ;;  %3011 = vmatmul.f32.gmra.mxu1 %v2878_v39  ;;  %3076 = vmatmul.f32.gmra.mxu2 %v2878_v39  ;;  %vm2725_vm13 = vmor %vm2723_vm11, %vm2724_vm10  ;;  %v2730_v28 = vor.u32 1.1754944e-38, %v2729_v58  ;;  %v2744_v2 = vand.u32 2147483648, %v2591_v4 }
 0x8d0   :  { %3141 = vmatmul.f32.gmra.mxu3 %v2878_v39  ;;  %vm2738_vm0 = vweird.f32 %v2591_v4  ;;  %vm2743_vm3 = vcmp.eq.f32.partialorder %v2742_v53, 8.507059e+37 }
 0x8d1   :  { %v2846_v63 = vmul.f32 %v6378_v48, %v2717_v36  ;;  %v2721_v43 = vmul.f32 %v4636_v59, %v2720_v0 }
 0x8d3   :  { %v2548_v62 = vpop.f32.mrf.mxu0  ;;  %v2722_v7 = vadd.f32 %v4636_v59, %v2721_v43  ;;  %v2863_v41 = vadd.f32 %v6380_v23, %v2846_v63  ;;  %v2480_v6 = vpop.f32.mrf.mxu3 }
 0x8d4   :  { %v4638_v21 = vpop.eup %4637  ;;  %vm2576_vm12 = vcmp.gt.f32.partialorder %v2548_v62, 0.0 }
 0x8d5   :  { %v2734_v40 = vmul.f32 %v4638_v21, %v2591_v4  ;;  %v2592_v16 = vsel %vm2576_vm12, %v2548_v62, 1.0  ;;  %v2726_v32 = vsel %vm2725_vm13, %v4636_v59, %v2722_v7  ;;  %v2879_v35 = vmax.f32 %v2863_v41, 0.0 }
 0x8d6   :  { %4639 = vrcp.f32 %v2592_v16  ;;  %v2731_v27 = vsel %vm2728_vm14, %v2730_v28, %v2726_v32  ;;  %vm2739_vm15 = vweird.f32 %v4638_v21  ;;  %v2757_v4 = vand.u32 2147483647, %v2592_v16 }
 0x8d7   :  { %v2735_v45 = vsub.f32 1.0, %v2734_v40  ;;  %v2732_v39 = vmul.f32 %v2731_v27, %v2477_v10  ;;  %3014 = vmatmul.f32.gmra.mxu1 %v2879_v35  ;;  %3079 = vmatmul.f32.gmra.mxu2 %v2879_v35  ;;  %vm2740_vm2 = vmor %vm2738_vm0, %vm2739_vm15  ;;  %v2745_v10 = vor.u32 1.1754944e-38, %v2744_v2  ;;  %v2759_v27 = vand.u32 2147483648, %v2592_v16 }
 0x8d8   :  { %3144 = vmatmul.f32.gmra.mxu3 %v2879_v35  ;;  %vm2753_vm5 = vweird.f32 %v2592_v16  ;;  %vm2758_vm8 = vcmp.eq.f32.partialorder %v2757_v4, 8.507059e+37 }
 0x8d9   :  { %v2847_v0 = vmul.f32 %v6378_v48, %v2732_v39  ;;  %v2736_v36 = vmul.f32 %v4638_v21, %v2735_v45 }
 0x8db   :  { %v2551_v63 = vpop.f32.mrf.mxu0  ;;  %v2737_v51 = vadd.f32 %v4638_v21, %v2736_v36  ;;  %v2864_v58 = vadd.f32 %v6380_v23, %v2847_v0  ;;  %v2483_v59 = vpop.f32.mrf.mxu3  ;;  %v2760_v36 = vor.u32 1.1754944e-38, %v2759_v27 }
 0x8dc   :  { %v4640_v43 = vpop.eup %4639  ;;  %vm2577_vm1 = vcmp.gt.f32.partialorder %v2551_v63, 0.0 }
 0x8dd   :  { %v2749_v62 = vmul.f32 %v4640_v43, %v2592_v16  ;;  %v2593_v7 = vsel %vm2577_vm1, %v2551_v63, 1.0  ;;  %v2741_v41 = vsel %vm2740_vm2, %v4638_v21, %v2737_v51  ;;  %v2880_v28 = vmax.f32 %v2864_v58, 0.0 }
 0x8de   :  { %4641 = vrcp.f32 %v2593_v7  ;;  %v2746_v40 = vsel %vm2743_vm3, %v2745_v10, %v2741_v41  ;;  %vm2754_vm4 = vweird.f32 %v4640_v43  ;;  %v2772_v16 = vand.u32 2147483647, %v2593_v7 }
 0x8df   :  { %v2750_v32 = vsub.f32 1.0, %v2749_v62  ;;  %v2747_v35 = vmul.f32 %v2746_v40, %v2480_v6  ;;  %3017 = vmatmul.f32.gmra.mxu1 %v2880_v28  ;;  %3082 = vmatmul.f32.gmra.mxu2 %v2880_v28  ;;  %vm2755_vm7 = vmor %vm2753_vm5, %vm2754_vm4  ;;  %v2774_v40 = vand.u32 2147483648, %v2593_v7  ;;  %vm2768_vm10 = vweird.f32 %v2593_v7 }
 0x8e0   :  { %3147 = vmatmul.f32.gmra.mxu3 %v2880_v28  ;;  %vm2773_vm13 = vcmp.eq.f32.partialorder %v2772_v16, 8.507059e+37 }
 0x8e1   :  { %v2848_v45 = vmul.f32 %v6378_v48, %v2747_v35  ;;  %v2751_v39 = vmul.f32 %v4640_v43, %v2750_v32 }
 0x8e3   :  { %v2554_v0 = vpop.f32.mrf.mxu0  ;;  %v2752_v53 = vadd.f32 %v4640_v43, %v2751_v39  ;;  %v2865_v2 = vadd.f32 %v6380_v23, %v2848_v45  ;;  %v2486_v6 = vpop.f32.mrf.mxu3  ;;  %v2775_v39 = vor.u32 1.1754944e-38, %v2774_v40 }
 0x8e4   :  { %v4642_v21 = vpop.eup %4641  ;;  %vm2578_vm6 = vcmp.gt.f32.partialorder %v2554_v0, 0.0 }
 0x8e5   :  { %v2764_v63 = vmul.f32 %v4642_v21, %v2593_v7  ;;  %v2594_v51 = vsel %vm2578_vm6, %v2554_v0, 1.0  ;;  %v2756_v58 = vsel %vm2755_vm7, %v4640_v43, %v2752_v53  ;;  %v2881_v10 = vmax.f32 %v2865_v2, 0.0 }
 0x8e6   :  { %4643 = vrcp.f32 %v2594_v51  ;;  %v2761_v62 = vsel %vm2758_vm8, %v2760_v36, %v2756_v58  ;;  %vm2769_vm9 = vweird.f32 %v4642_v21  ;;  %v2787_v7 = vand.u32 2147483647, %v2594_v51 }
 0x8e7   :  { %v2765_v41 = vsub.f32 1.0, %v2764_v63  ;;  %v2762_v28 = vmul.f32 %v2761_v62, %v2483_v59  ;;  %3020 = vmatmul.f32.gmra.mxu1 %v2881_v10  ;;  %3085 = vmatmul.f32.gmra.mxu2 %v2881_v10  ;;  %vm2770_vm12 = vmor %vm2768_vm10, %vm2769_vm9  ;;  %v2789_v62 = vand.u32 2147483648, %v2594_v51  ;;  %vm2783_vm15 = vweird.f32 %v2594_v51 }
 0x8e8   :  { %3150 = vmatmul.f32.gmra.mxu3 %v2881_v10  ;;  %vm2788_vm2 = vcmp.eq.f32.partialorder %v2787_v7, 8.507059e+37 }
 0x8e9   :  { %v2849_v32 = vmul.f32 %v6378_v48, %v2762_v28  ;;  %v2766_v35 = vmul.f32 %v4642_v21, %v2765_v41 }
 0x8eb   :  { %v2557_v4 = vpop.f32.mrf.mxu0  ;;  %v2767_v27 = vadd.f32 %v4642_v21, %v2766_v35  ;;  %v2866_v45 = vadd.f32 %v6380_v23, %v2849_v32  ;;  %v2489_v63 = vpop.f32.mrf.mxu3  ;;  %v2790_v35 = vor.u32 1.1754944e-38, %v2789_v62 }
 0x8ec   :  { %v4644_v43 = vpop.eup %4643  ;;  %vm2579_vm11 = vcmp.gt.f32.partialorder %v2557_v4, 0.0 }
 0x8ed   :  { %v2779_v59 = vmul.f32 %v4644_v43, %v2594_v51  ;;  %v2595_v0 = vsel %vm2579_vm11, %v2557_v4, 1.0  ;;  %v2771_v53 = vsel %vm2770_vm12, %v4642_v21, %v2767_v27  ;;  %v2882_v2 = vmax.f32 %v2866_v45, 0.0 }
 0x8ee   :  { %4645 = vrcp.f32 %v2595_v0  ;;  %v2776_v36 = vsel %vm2773_vm13, %v2775_v39, %v2771_v53  ;;  %vm2784_vm14 = vweird.f32 %v4644_v43  ;;  %v2802_v51 = vand.u32 2147483647, %v2595_v0 }
 0x8ef   :  { %v2780_v58 = vsub.f32 1.0, %v2779_v59  ;;  %v2777_v10 = vmul.f32 %v2776_v36, %v2486_v6  ;;  %3023 = vmatmul.f32.gmra.mxu1 %v2882_v2  ;;  %3088 = vmatmul.f32.gmra.mxu2 %v2882_v2  ;;  %vm2785_vm1 = vmor %vm2783_vm15, %vm2784_vm14  ;;  %v2804_v36 = vand.u32 2147483648, %v2595_v0  ;;  %vm2798_vm4 = vweird.f32 %v2595_v0 }
 0x8f0   :  { %3153 = vmatmul.f32.gmra.mxu3 %v2882_v2  ;;  %vm2803_vm7 = vcmp.eq.f32.partialorder %v2802_v51, 8.507059e+37 }
 0x8f1   :  { %v2850_v41 = vmul.f32 %v6378_v48, %v2777_v10  ;;  %v2781_v28 = vmul.f32 %v4644_v43, %v2780_v58 }
 0x8f3   :  { %v2560_v16 = vpop.f32.mrf.mxu0  ;;  %v2782_v40 = vadd.f32 %v4644_v43, %v2781_v28  ;;  %v2867_v21 = vadd.f32 %v6380_v23, %v2850_v41  ;;  %v2492_v2 = vpop.f32.mrf.mxu3 }
 0x8f4   :  { %v4646_v32 = vpop.eup %4645  ;;  %vm2580_vm0 = vcmp.gt.f32.partialorder %v2560_v16, 0.0 }
 0x8f5   :  { %v2794_v6 = vmul.f32 %v4646_v32, %v2595_v0  ;;  %v2596_v4 = vsel %vm2580_vm0, %v2560_v16, 1.0  ;;  %v2786_v27 = vsel %vm2785_vm1, %v4644_v43, %v2782_v40  ;;  %v2883_v45 = vmax.f32 %v2867_v21, 0.0 }
 0x8f6   :  { %4647 = vrcp.f32 %v2596_v4  ;;  %v2791_v39 = vsel %vm2788_vm2, %v2790_v35, %v2786_v27  ;;  %vm2799_vm3 = vweird.f32 %v4646_v32  ;;  %vm2813_vm9 = vweird.f32 %v2596_v4 }
 0x8f7   :  { %v2795_v59 = vsub.f32 1.0, %v2794_v6  ;;  %v2792_v53 = vmul.f32 %v2791_v39, %v2489_v63  ;;  %3026 = vmatmul.f32.gmra.mxu1 %v2883_v45  ;;  %3091 = vmatmul.f32.gmra.mxu2 %v2883_v45  ;;  %vm2800_vm6 = vmor %vm2798_vm4, %vm2799_vm3  ;;  %v2805_v63 = vor.u32 1.1754944e-38, %v2804_v36 }
 0x8f8   :  { %3156 = vmatmul.f32.gmra.mxu3 %v2883_v45  ;;  %v2819_v45 = vand.u32 2147483648, %v2596_v4 }
 0x8f9   :  { %v2851_v58 = vmul.f32 %v6378_v48, %v2792_v53  ;;  %v2796_v10 = vmul.f32 %v4646_v32, %v2795_v59  ;;  %v2817_v59 = vand.u32 2147483647, %v2596_v4 }
 0x8fb   :  { %v2563_v7 = vpop.f32.mrf.mxu0  ;;  %v2797_v62 = vadd.f32 %v4646_v32, %v2796_v10  ;;  %v2868_v43 = vadd.f32 %v6380_v23, %v2851_v58  ;;  %v2495_v53 = vpop.f32.mrf.mxu3  ;;  %v2820_v58 = vor.u32 1.1754944e-38, %v2819_v45  ;;  %vm2818_vm11 = vcmp.eq.f32.partialorder %v2817_v59, 8.507059e+37 }
 0x8fc   :  { %v4648_v41 = vpop.eup %4647  ;;  %vm2581_vm5 = vcmp.gt.f32.partialorder %v2563_v7, 0.0 }
 0x8fd   :  { %v2809_v28 = vmul.f32 %v4648_v41, %v2596_v4  ;;  %v2597_v16 = vsel %vm2581_vm5, %v2563_v7, 1.0  ;;  %v2801_v40 = vsel %vm2800_vm6, %v4646_v32, %v2797_v62  ;;  %v2884_v21 = vmax.f32 %v2868_v43, 0.0 }
 0x8fe   :  { %4649 = vrcp.f32 %v2597_v16  ;;  %v2806_v35 = vsel %vm2803_vm7, %v2805_v63, %v2801_v40  ;;  %vm2814_vm8 = vweird.f32 %v4648_v41  ;;  %v2832_v4 = vand.u32 2147483647, %v2597_v16 }
 0x8ff   :  { %v2810_v6 = vsub.f32 1.0, %v2809_v28  ;;  %v2807_v27 = vmul.f32 %v2806_v35, %v2492_v2  ;;  %3029 = vmatmul.f32.gmra.mxu1 %v2884_v21  ;;  %3094 = vmatmul.f32.gmra.mxu2 %v2884_v21  ;;  %vm2815_vm10 = vmor %vm2813_vm9, %vm2814_vm8  ;;  %v2834_v28 = vand.u32 2147483648, %v2597_v16  ;;  %vm2828_vm13 = vweird.f32 %v2597_v16 }
 0x900   :  { %3159 = vmatmul.f32.gmra.mxu3 %v2884_v21  ;;  %vm2833_vm15 = vcmp.eq.f32.partialorder %v2832_v4, 8.507059e+37 }
 0x901   :  { %v2852_v0 = vmul.f32 %v6378_v48, %v2807_v27  ;;  %v2811_v39 = vmul.f32 %v4648_v41, %v2810_v6 }
 0x903   :  { %v2812_v51 = vadd.f32 %v4648_v41, %v2811_v39  ;;  %v2869_v36 = vadd.f32 %v6380_v23, %v2852_v0  ;;  %v2498_v27 = vpop.f32.mrf.mxu3 }
 0x904   :  { %v4650_v32 = vpop.eup %4649 }
 0x905   :  { %v2824_v10 = vmul.f32 %v4650_v32, %v2597_v16  ;;  %v2816_v7 = vsel %vm2815_vm10, %v4648_v41, %v2812_v51  ;;  %v2885_v2 = vmax.f32 %v2869_v36, 0.0  ;;  %vm2829_vm12 = vweird.f32 %v4650_v32 }
 0x906   :  { %v2821_v62 = vsel %vm2818_vm11, %v2820_v58, %v2816_v7  ;;  %vm2830_vm14 = vmor %vm2828_vm13, %vm2829_vm12  ;;  %v2835_v41 = vor.u32 1.1754944e-38, %v2834_v28 }
 0x907   :  { %v2825_v43 = vsub.f32 1.0, %v2824_v10  ;;  %v2822_v63 = vmul.f32 %v2821_v62, %v2495_v53  ;;  %3032 = vmatmul.f32.gmra.mxu1 %v2885_v2  ;;  %3097 = vmatmul.f32.gmra.mxu2 %v2885_v2 }
 0x908   :  { %3162 = vmatmul.f32.gmra.mxu3 %v2885_v2 }
 0x909   :  { %v2853_v40 = vmul.f32 %v6378_v48, %v2822_v63  ;;  %v2826_v21 = vmul.f32 %v4650_v32, %v2825_v43 }
 0x90b   :  { %v2827_v35 = vadd.f32 %v4650_v32, %v2826_v21  ;;  %v2870_v6 = vadd.f32 %v6380_v23, %v2853_v40 }
 0x90d   :  { %v2831_v45 = vsel %vm2830_vm14, %v4650_v32, %v2827_v35  ;;  %v2886_v0 = vmax.f32 %v2870_v6, 0.0 }
 0x90e   :  { %v2836_v39 = vsel %vm2833_vm15, %v2835_v41, %v2831_v45 }
 0x90f   :  { %v2837_v59 = vmul.f32 %v2836_v39, %v2498_v27  ;;  %3035 = vmatmul.f32.gmra.mxu1 %v2886_v0  ;;  %3100 = vmatmul.f32.gmra.mxu2 %v2886_v0 }
 0x910   :  { %3165 = vmatmul.f32.gmra.mxu3 %v2886_v0 }
 0x911   :  { %v2854_v53 = vmul.f32 %v6378_v48, %v2837_v59 }
 0x913   :  { %v2871_v51 = vadd.f32 %v6380_v23, %v2854_v53 }
 0x915   :  { %v2887_v36 = vmax.f32 %v2871_v51, 0.0 }
 0x917   :  { %3038 = vmatmul.f32.gmra.mxu1 %v2887_v36  ;;  %3103 = vmatmul.f32.gmra.mxu2 %v2887_v36 }
 0x918   :  { %3168 = vmatmul.f32.gmra.mxu3 %v2887_v36 }
 0x91c   :  { %v6414_v16 = vpop.f32.mrf.mxu1 }
 0x922   :  { %v6416_v58 = vpop.f32.mrf.mxu2 }
 0x923   :  { %v6418_v32 = vpop.f32.mrf.mxu3 }
 0x924   :  { %v6420_v10 = vpop.f32.mrf.mxu1 }
 0x92a   :  { %v6422_v7 = vpop.f32.mrf.mxu2 }
 0x92b   :  { %v6424_v2 = vpop.f32.mrf.mxu3 }
 0x92c   :  { %v6426_v62 = vpop.f32.mrf.mxu1 }
 0x932   :  { %v6428_v48 = vpop.f32.mrf.mxu2 }
 0x933   :  { %v6430_v23 = vpop.f32.mrf.mxu3 }
 0x934   :  { %v6432_v43 = vpop.f32.mrf.mxu1 }
 0x93a   :  { %v6434_v63 = vpop.f32.mrf.mxu2 }
 0x93b   :  { %v6436_v28 = vpop.f32.mrf.mxu3 }
 0x93c   :  { %v6438_v40 = vpop.f32.mrf.mxu1 }
 0x942   :  { %v6440_v21 = vpop.f32.mrf.mxu2 }
 0x943   :  { %v6442_v4 = vpop.f32.mrf.mxu3 }
 0x944   :  { %v6444_v35 = vpop.f32.mrf.mxu1 }
 0x94a   :  { %v6446_v6 = vpop.f32.mrf.mxu2 }
 0x94b   :  { %v6448_v27 = vpop.f32.mrf.mxu3 }
 0x94c   :  { %v6450_v41 = vpop.f32.mrf.mxu1 }
 0x952   :  { %v6452_v45 = vpop.f32.mrf.mxu2 }
 0x953   :  { %v6454_v0 = vpop.f32.mrf.mxu3 }
 0x954   :  { %v6456_v39 = vpop.f32.mrf.mxu1 }
 0x95a   :  { %v6458_v59 = vpop.f32.mrf.mxu2 }
 0x95b   :  { %v6460_v53 = vpop.f32.mrf.mxu3 }
 0x95c   :  { %v3018_v51 = vpop.f32.mrf.mxu1 }
 0x962   :  { %v6462_v36 = vpop.f32.mrf.mxu2 }
 0x963   :  { %v6464_v50 = vpop.f32.mrf.mxu3 }
 0x964   :  { %v3021_v52 = vpop.f32.mrf.mxu1 }
 0x96a   :  { %v6466_v44 = vpop.f32.mrf.mxu2 }
 0x96b   :  { %v6468_v8 = vpop.f32.mrf.mxu3 }
 0x96c   :  { %v3024_v24 = vpop.f32.mrf.mxu1 }
 0x972   :  { %v3089_v38 = vpop.f32.mrf.mxu2 }
 0x973   :  { %v3154_v29 = vpop.f32.mrf.mxu3 }
 0x974   :  { %v3027_v20 = vpop.f32.mrf.mxu1 }
 0x975   :  { %v3028_v61 = vadd.f32 %v3027_v20, %v6473_v30  ;;  %v3081_v20 = vadd.f32 %v6458_v59, %v6477_v37  ;;  %v7201_v59 = vld [vmem:[#allocation71_spill] sm:$0xff] }
 0x97a   :  { %v3092_v22 = vpop.f32.mrf.mxu2 }
 0x97b   :  { %v3157_v14 = vpop.f32.mrf.mxu3 }
 0x97c   :  { %v3030_v12 = vpop.f32.mrf.mxu1 }
 0x97d   :  { %v3031_v46 = vadd.f32 %v3030_v12, %v6473_v30  ;;  %v3084_v12 = vadd.f32 %v6462_v36, %v6477_v37  ;;  %v7204_v36 = vld [vmem:[#allocation74_spill] sm:$0xff] }
 0x982   :  { %v3095_v31 = vpop.f32.mrf.mxu2 }
 0x983   :  { %v3160_v5 = vpop.f32.mrf.mxu3 }
 0x984   :  { %v3033_v49 = vpop.f32.mrf.mxu1 }
 0x985   :  { %v3034_v15 = vadd.f32 %v3033_v49, %v6473_v30  ;;  %v3087_v49 = vadd.f32 %v6466_v44, %v6477_v37  ;;  %v3001_v44 = vadd.f32 %v6426_v62, %v6473_v30  ;;  %v3137_v62 = vadd.f32 %v6442_v4, %v6480_v9 }
 0x986   :  { %v3131_v4 = vadd.f32 %v6430_v23, %v6480_v9  ;;  %v7194_v23 = vld [vmem:[#allocation21_spill] sm:$0xff] }
 0x98a   :  { %v3098_v1 = vpop.f32.mrf.mxu2 }
 0x98b   :  { %v3163_v26 = vpop.f32.mrf.mxu3  ;;  %v3099_v56 = vadd.f32 %v3098_v1, %v6477_v37  ;;  %v3013_v1 = vadd.f32 %v6450_v41, %v6473_v30  ;;  %v7197_v41 = vld [vmem:[#allocation68_spill] sm:$0xff] }
 0x98c   :  { %v3036_v55 = vpop.f32.mrf.mxu1 }
 0x98d   :  { %v3037_v42 = vadd.f32 %v3036_v55, %v6473_v30  ;;  %v3090_v55 = vadd.f32 %v3089_v38, %v6477_v37  ;;  %v3004_v38 = vadd.f32 %v6432_v43, %v6473_v30  ;;  %v2998_v43 = vadd.f32 %v6420_v10, %v6473_v30 }
 0x98e   :  { %v3134_v10 = vadd.f32 %v6436_v28, %v6480_v9  ;;  %v7195_v28 = vld [vmem:[#allocation67_spill] sm:$0xff] }
 0x992   :  { %v3101_v34 = vpop.f32.mrf.mxu2 }
 0x993   :  { %v3166_v60 = vpop.f32.mrf.mxu3 }
 0x994   :  { %v3039_v33 = vpop.f32.mrf.mxu1  ;;  %v3167_v18 = vadd.f32 %v3166_v60, %v6480_v9  ;;  %v3019_v60 = vadd.f32 %v3018_v51, %v6473_v30  ;;  %v7203_v51 = vld [vmem:[#allocation73_spill] sm:$0xff] }
 0x995   :  { %v3040_v25 = vadd.f32 %v3039_v33, %v6473_v30 }
 0x997   :  { %3172 = vmatpush.msra.mxu0 %v3040_v25  ;;  %v3102_v25 = vadd.f32 %v3101_v34, %v6477_v37  ;;  %v3093_v34 = vadd.f32 %v3092_v22, %v6477_v37  ;;  %v3007_v22 = vadd.f32 %v6438_v40, %v6473_v30  ;;  %v3072_v40 = vadd.f32 %v6440_v21, %v6477_v37 }
 0x998   :  { %v3066_v21 = vadd.f32 %v6428_v48, %v6477_v37  ;;  %v3125_v48 = vadd.f32 %v6418_v32, %v6480_v9  ;;  %v7191_v32 = vld [vmem:[#allocation65_spill] sm:$0xff] }
 0x999   :  { %3173 = vmatpush.msra.mxu0 %v3037_v42  ;;  %v3025_v42 = vadd.f32 %v3024_v24, %v6473_v30  ;;  %v3078_v24 = vadd.f32 %v6452_v45, %v6477_v37  ;;  %v7198_v45 = vld [vmem:[#allocation23_spill] sm:$0xff] }
 0x99a   :  { %v3104_v13 = vpop.f32.mrf.mxu2 }
 0x99b   :  { %v3105_v17 = vadd.f32 %v3104_v13, %v6477_v37  ;;  %v3169_v11 = vpop.f32.mrf.mxu3  ;;  %3174 = vmatpush.msra.mxu0 %v3034_v15  ;;  %v3164_v13 = vadd.f32 %v3163_v26, %v6480_v9  ;;  %v3096_v15 = vadd.f32 %v3095_v31, %v6477_v37  ;;  %v3155_v26 = vadd.f32 %v3154_v29, %v6480_v9 }
 0x99c   :  { %v3170_v33 = vadd.f32 %v3169_v11, %v6480_v9  ;;  %v3022_v11 = vadd.f32 %v3021_v52, %v6473_v30  ;;  %v3010_v31 = vadd.f32 %v6444_v35, %v6473_v30  ;;  %v3146_v29 = vadd.f32 %v6460_v53, %v6480_v9  ;;  %v7202_v53 = vld [vmem:[#allocation72_spill] sm:$0xff] }
 0x99d   :  { %3175 = vmatpush.msra.mxu0 %v3031_v46  ;;  %3237 = vmatpush.msra.mxu1 %v3105_v17  ;;  %v3161_v17 = vadd.f32 %v3160_v5, %v6480_v9  ;;  %v3016_v46 = vadd.f32 %v6456_v39, %v6473_v30  ;;  %v3152_v5 = vadd.f32 %v6468_v8, %v6480_v9  ;;  %v7200_v39 = vld [vmem:[#allocation70_spill] sm:$0xff] }
 0x99e   :  { %3302 = vmatpush.msra.mxu2 %v3170_v33  ;;  %v3143_v8 = vadd.f32 %v6454_v0, %v6480_v9  ;;  %v3075_v52 = vadd.f32 %v6446_v6, %v6477_v37  ;;  %v2995_v35 = vadd.f32 %v6414_v16, %v6473_v30  ;;  %v3069_v6 = vadd.f32 %v6434_v63, %v6477_v37  ;;  %v7199_v0 = vld [vmem:[#allocation69_spill] sm:$0xff]  ;;  %v7205_v33 = vld [vmem:[#allocation75_spill] sm:$0xff] }
 0x99f   :  { %3176 = vmatpush.msra.mxu0 %v3028_v61  ;;  %3238 = vmatpush.msra.mxu1 %v3102_v25  ;;  %v3158_v61 = vadd.f32 %v3157_v14, %v6480_v9  ;;  %v3149_v14 = vadd.f32 %v6464_v50, %v6480_v9  ;;  %v3140_v50 = vadd.f32 %v6448_v27, %v6480_v9  ;;  %v7196_v27 = vld [vmem:[#allocation22_spill] sm:$0xff]  ;;  %v7206_v25 = vld [vmem:[#allocation76_spill] sm:$0xff] }
 0x9a0   :  { %3303 = vmatpush.msra.mxu2 %v3167_v18  ;;  %v3063_v30 = vadd.f32 %v6422_v7, %v6477_v37  ;;  %v3128_v16 = vadd.f32 %v6424_v2, %v6480_v9  ;;  %v3060_v63 = vadd.f32 %v6416_v58, %v6477_v37  ;;  %v7183_v37 = vld [vmem:[#allocation57_spill] sm:$0xff]  ;;  %v7184_v9 = vld [vmem:[#allocation58_spill] sm:$0xff]  ;;  %v7185_v58 = vld [vmem:[#allocation59_spill] sm:$0xff] }
 0x9a1   :  { %3177 = vmatpush.msra.mxu0 %v3025_v42  ;;  %3239 = vmatpush.msra.mxu1 %v3099_v56  ;;  %v7192_v7 = vld [vmem:[#allocation20_spill] sm:$0xff]  ;;  %v7193_v2 = vld [vmem:[#allocation66_spill] sm:$0xff]  ;;  %v7207_v18 = vld [vmem:[#allocation77_spill] sm:$0xff] }
 0x9a2   :  { %3304 = vmatpush.msra.mxu2 %v3164_v13  ;;  %v7208_v42 = vld [vmem:[#allocation78_spill] sm:$0xff]  ;;  %v7209_v56 = vld [vmem:[#allocation79_spill] sm:$0xff] }
 0x9a3   :  { %3178 = vmatpush.msra.mxu0 %v3022_v11  ;;  %3240 = vmatpush.msra.mxu1 %v3096_v15 }
 0x9a4   :  { %3305 = vmatpush.msra.mxu2 %v3161_v17 }
 0x9a5   :  { %3179 = vmatpush.msra.mxu0 %v3019_v60  ;;  %3241 = vmatpush.msra.mxu1 %v3093_v34 }
 0x9a6   :  { %3306 = vmatpush.msra.mxu2 %v3158_v61 }
 0x9a7   :  { %3180 = vmatpush.msra.mxu0 %v3016_v46  ;;  %3242 = vmatpush.msra.mxu1 %v3090_v55 }
 0x9a8   :  { %3307 = vmatpush.msra.mxu2 %v3155_v26 }
 0x9a9   :  { %3181 = vmatpush.msra.mxu0 %v3013_v1  ;;  %3243 = vmatpush.msra.mxu1 %v3087_v49 }
 0x9aa   :  { %3308 = vmatpush.msra.mxu2 %v3152_v5 }
 0x9ab   :  { %3182 = vmatpush.msra.mxu0 %v3010_v31  ;;  %3244 = vmatpush.msra.mxu1 %v3084_v12 }
 0x9ac   :  { %3309 = vmatpush.msra.mxu2 %v3149_v14 }
 0x9ad   :  { %3183 = vmatpush.msra.mxu0 %v3007_v22  ;;  %3245 = vmatpush.msra.mxu1 %v3081_v20 }
 0x9ae   :  { %3310 = vmatpush.msra.mxu2 %v3146_v29 }
 0x9af   :  { %3184 = vmatpush.msra.mxu0 %v3004_v38  ;;  %3246 = vmatpush.msra.mxu1 %v3078_v24 }
 0x9b0   :  { %3311 = vmatpush.msra.mxu2 %v3143_v8 }
 0x9b1   :  { %3185 = vmatpush.msra.mxu0 %v3001_v44  ;;  %3247 = vmatpush.msra.mxu1 %v3075_v52 }
 0x9b2   :  { %3312 = vmatpush.msra.mxu2 %v3140_v50 }
 0x9b3   :  { %3186 = vmatpush.msra.mxu0 %v2998_v43  ;;  %3248 = vmatpush.msra.mxu1 %v3072_v40 }
 0x9b4   :  { %3313 = vmatpush.msra.mxu2 %v3137_v62  ;;  %v7210_v62 = vld [vmem:[#allocation56_spill] sm:$0xff] }
 0x9b5   :  { %3187 = vmatpush.msra.mxu0 %v2995_v35  ;;  %3249 = vmatpush.msra.mxu1 %v3069_v6  ;;  %v7211_v6 = vld [vmem:[#allocation25_spill] sm:$0xff] }
 0x9b6   :  { %3314 = vmatpush.msra.mxu2 %v3134_v10  ;;  %3188 = vmatmul.f32.vlgmr.msra.gmra.mxu0 %v5549_v19  ;;  %v6605_v10 = vperm.slane %v7211_v6, 1  ;;  %v7223_v6 = vld [vmem:[#allocation50_spill] sm:$0xff] }
 0x9b7   :  { %3250 = vmatpush.msra.mxu1 %v3066_v21  ;;  %v7212_v21 = vld [vmem:[#allocation24_spill] sm:$0xff] }
 0x9b8   :  { %3315 = vmatpush.msra.mxu2 %v3131_v4 }
 0x9b9   :  { %3251 = vmatpush.msra.mxu1 %v3063_v30 }
 0x9ba   :  { %3316 = vmatpush.msra.mxu2 %v3128_v16 }
 0x9bb   :  { %3252 = vmatpush.msra.mxu1 %v3060_v63 }
 0x9bc   :  { %3317 = vmatpush.msra.mxu2 %v3125_v48  ;;  %3253 = vmatmul.f32.vlgmr.msra.gmra.mxu1 %v5549_v19  ;;  %v7186_v19 = vld [vmem:[#allocation60_spill] sm:$0xff] }
 0x9bd   :  { %3318 = vmatmul.f32.vlgmr.msra.gmra.mxu2 %v5551_v3  ;;  %v7187_v3 = vld [vmem:[#allocation61_spill] sm:$0xff] }
 0x9be   :  { %3191 = vmatmul.f32.gmra.mxu0 %v5560_v54 }
 0x9c4   :  { %3256 = vmatmul.f32.gmra.mxu1 %v5560_v54  ;;  %v7188_v54 = vld [vmem:[#allocation62_spill] sm:$0xff] }
 0x9c5   :  { %3321 = vmatmul.f32.gmra.mxu2 %v5562_v57  ;;  %v7189_v57 = vld [vmem:[#allocation63_spill] sm:$0xff] }
 0x9c6   :  { %3194 = vmatmul.f32.gmra.mxu0 %v5570_v47 }
 0x9cc   :  { %3259 = vmatmul.f32.gmra.mxu1 %v5570_v47  ;;  %v7190_v47 = vld [vmem:[#allocation64_spill] sm:$0xff] }
 0x9cd   :  { %3324 = vmatmul.f32.gmra.mxu2 %v7183_v37 }
 0x9ce   :  { %3197 = vmatmul.f32.gmra.mxu0 %v7184_v9 }
 0x9d4   :  { %3262 = vmatmul.f32.gmra.mxu1 %v7184_v9 }
 0x9d5   :  { %3327 = vmatmul.f32.gmra.mxu2 %v7185_v58 }
 0x9d6   :  { %3200 = vmatmul.f32.gmra.mxu0 %v7186_v19 }
 0x9dc   :  { %3265 = vmatmul.f32.gmra.mxu1 %v7186_v19  ;;  %v7213_v19 = vld [vmem:[#allocation26_spill] sm:$0xff] }
 0x9dd   :  { %3330 = vmatmul.f32.gmra.mxu2 %v7187_v3 }
 0x9de   :  { %3203 = vmatmul.f32.gmra.mxu0 %v7188_v54 }
 0x9e4   :  { %3268 = vmatmul.f32.gmra.mxu1 %v7188_v54  ;;  %v7214_v54 = vld [vmem:[#allocation30_spill] sm:$0xff] }
 0x9e5   :  { %3333 = vmatmul.f32.gmra.mxu2 %v7189_v57 }
 0x9e6   :  { %3206 = vmatmul.f32.gmra.mxu0 %v7190_v47 }
 0x9ec   :  { %3271 = vmatmul.f32.gmra.mxu1 %v7190_v47 }
 0x9ed   :  { %3336 = vmatmul.f32.gmra.mxu2 %v7191_v32 }
 0x9ee   :  { %3209 = vmatmul.f32.gmra.mxu0 %v7192_v7 }
 0x9f4   :  { %3274 = vmatmul.f32.gmra.mxu1 %v7192_v7 }
 0x9f5   :  { %3339 = vmatmul.f32.gmra.mxu2 %v7193_v2 }
 0x9f6   :  { %3212 = vmatmul.f32.gmra.mxu0 %v7194_v23 }
 0x9fc   :  { %3277 = vmatmul.f32.gmra.mxu1 %v7194_v23  ;;  %v7215_v23 = vld [vmem:[#allocation28_spill] sm:$0xff] }
 0x9fd   :  { %3342 = vmatmul.f32.gmra.mxu2 %v7195_v28 }
 0x9fe   :  { %3215 = vmatmul.f32.gmra.mxu0 %v7196_v27 }
 0xa04   :  { %3280 = vmatmul.f32.gmra.mxu1 %v7196_v27 }
 0xa05   :  { %3345 = vmatmul.f32.gmra.mxu2 %v7197_v41 }
 0xa06   :  { %3218 = vmatmul.f32.gmra.mxu0 %v7198_v45 }
 0xa0c   :  { %3283 = vmatmul.f32.gmra.mxu1 %v7198_v45 }
 0xa0d   :  { %3348 = vmatmul.f32.gmra.mxu2 %v7199_v0  ;;  %v7216_v0 = vld [vmem:[#allocation32_spill] sm:$0xff] }
 0xa0e   :  { %3221 = vmatmul.f32.gmra.mxu0 %v7200_v39 }
 0xa14   :  { %3286 = vmatmul.f32.gmra.mxu1 %v7200_v39 }
 0xa15   :  { %3351 = vmatmul.f32.gmra.mxu2 %v7201_v59  ;;  %v7217_v59 = vld [vmem:[#allocation34_spill] sm:$0xff] }
 0xa16   :  { %3224 = vmatmul.f32.gmra.mxu0 %v7202_v53 }
 0xa1c   :  { %3289 = vmatmul.f32.gmra.mxu1 %v7202_v53 }
 0xa1d   :  { %3354 = vmatmul.f32.gmra.mxu2 %v7203_v51 }
 0xa1e   :  { %3227 = vmatmul.f32.gmra.mxu0 %v7204_v36 }
 0xa24   :  { %3292 = vmatmul.f32.gmra.mxu1 %v7204_v36 }
 0xa25   :  { %3357 = vmatmul.f32.gmra.mxu2 %v7205_v33 }
 0xa26   :  { %3230 = vmatmul.f32.gmra.mxu0 %v7206_v25 }
 0xa2c   :  { %3295 = vmatmul.f32.gmra.mxu1 %v7206_v25 }
 0xa2d   :  { %3360 = vmatmul.f32.gmra.mxu2 %v7207_v18  ;;  %v7218_v18 = vld [vmem:[#allocation36_spill] sm:$0xff] }
 0xa2e   :  { %3233 = vmatmul.f32.gmra.mxu0 %v7208_v42 }
 0xa34   :  { %3298 = vmatmul.f32.gmra.mxu1 %v7208_v42 }
 0xa35   :  { %3363 = vmatmul.f32.gmra.mxu2 %v7209_v56 }
 0xa39   :  { %v3254_v13 = vpop.f32.mrf.mxu1 }
 0xa40   :  { %v3319_v11 = vpop.f32.mrf.mxu2 }
 0xa41   :  { %v3257_v15 = vpop.f32.mrf.mxu1  ;;  %v3367_v50 = vadd.f32 %v3319_v11, %v3254_v13  ;;  %v4506_v13 = vld [vmem:[#allocation7 + $0xb8] sm:$0xff]  }
 0xa43   :  { %v3383_v35 = vadd.f32 %v3367_v50, %v7210_v62  ;;  %v7222_v62 = vld [vmem:[#allocation44_spill] sm:$0xff] }
 0xa45   :  { %v3400_v48 = vadd.f32 %v6605_v10, %v3383_v35 }
 0xa47   :  { %v3432_v7 = vmul.f32 0.2, %v3400_v48  ;;  %vm3416_vm0 = vcmp.gt.f32.partialorder %v3400_v48, 0.0 }
 0xa48   :  { %v3322_v17 = vpop.f32.mrf.mxu2 }
 0xa49   :  { %v3260_v60 = vpop.f32.mrf.mxu1  ;;  %v3368_v40 = vadd.f32 %v3322_v17, %v3257_v15  ;;  %v6617_v36 = vsel %vm3416_vm0, %v3400_v48, %v3432_v7  ;;  %v4464_v17 = vunpack.c.h.bf16 %v4506_v13  ;;  %v7224_v48 = vld [vmem:[#allocation46_spill] sm:$0xff] }
 0xa4b   :  { %v3384_v4 = vadd.f32 %v3368_v40, %v7212_v21  ;;  %3533 = vmatpush.msra.mxu3 %v4464_v17 }
 0xa4d   :  { %v3401_v37 = vadd.f32 %v6605_v10, %v3384_v4 }
 0xa4f   :  { %v3433_v2 = vmul.f32 0.2, %v3401_v37  ;;  %vm3417_vm1 = vcmp.gt.f32.partialorder %v3401_v37, 0.0 }
 0xa50   :  { %v3325_v34 = vpop.f32.mrf.mxu2 }
 0xa51   :  { %v3263_v61 = vpop.f32.mrf.mxu1  ;;  %v3369_v30 = vadd.f32 %v3325_v34, %v3260_v60  ;;  %v6619_v33 = vsel %vm3417_vm1, %v3401_v37, %v3433_v2 }
 0xa53   :  { %v3385_v3 = vadd.f32 %v3369_v30, %v7213_v19  ;;  %v7225_v19 = vld [vmem:[#allocation48_spill] sm:$0xff] }
 0xa55   :  { %v3402_v41 = vadd.f32 %v6605_v10, %v3385_v3 }
 0xa57   :  { %vm3418_vm2 = vcmp.gt.f32.partialorder %v3402_v41, 0.0 }
 0xa58   :  { %v3328_v46 = vpop.f32.mrf.mxu2 }
 0xa59   :  { %v3266_v55 = vpop.f32.mrf.mxu1  ;;  %v3370_v9 = vadd.f32 %v3328_v46, %v3263_v61 }
 0xa5b   :  { %v3386_v28 = vadd.f32 %v3370_v9, %v7215_v23  ;;  %v4504_v9 = vld [vmem:[#allocation7 + $0xa8] sm:$0xff]  }
 0xa5d   :  { %v3403_v25 = vadd.f32 %v6605_v10, %v3386_v28 }
 0xa5f   :  { %vm3419_vm4 = vcmp.gt.f32.partialorder %v3403_v25, 0.0 }
 0xa60   :  { %v3331_v26 = vpop.f32.mrf.mxu2 }
 0xa61   :  { %v3269_v1 = vpop.f32.mrf.mxu1  ;;  %v3371_v16 = vadd.f32 %v3331_v26, %v3266_v55  ;;  %v3434_v55 = vmul.f32 0.2, %v3402_v41 }
 0xa63   :  { %v3387_v57 = vadd.f32 %v3371_v16, %v7214_v54  ;;  %v4456_v54 = vunpack.c.h.bf16 %v4504_v9 }
 0xa65   :  { %v3404_v45 = vadd.f32 %v6605_v10, %v3387_v57  ;;  %v6639_v57 = vsel %vm3418_vm2, %v3402_v41, %v3434_v55  ;;  %v4501_v55 = vld [vmem:[#allocation7 + $0x90] sm:$0xff]  }
 0xa67   :  { %v3436_v11 = vmul.f32 0.2, %v3404_v45  ;;  %vm3420_vm3 = vcmp.gt.f32.partialorder %v3404_v45, 0.0 }
 0xa68   :  { %v3334_v49 = vpop.f32.mrf.mxu2 }
 0xa69   :  { %v3272_v5 = vpop.f32.mrf.mxu1  ;;  %v3372_v47 = vadd.f32 %v3334_v49, %v3269_v1  ;;  %v4463_v49 = vunpack.c.l.bf16 %v4506_v13 }
 0xa6b   :  { %v3388_v39 = vadd.f32 %v3372_v47, %v7216_v0  ;;  %3534 = vmatpush.msra.mxu3 %v4463_v49 }
 0xa6d   :  { %v3405_v60 = vadd.f32 %v6605_v10, %v3388_v39 }
 0xa6f   :  { %vm3421_vm5 = vcmp.gt.f32.partialorder %v3405_v60, 0.0 }
 0xa70   :  { %v3337_v31 = vpop.f32.mrf.mxu2 }
 0xa71   :  { %v3275_v12 = vpop.f32.mrf.mxu1  ;;  %v3373_v32 = vadd.f32 %v3337_v31, %v3272_v5  ;;  %v7219_v31 = vld [vmem:[#allocation40_spill] sm:$0xff] }
 0xa73   :  { %v3389_v53 = vadd.f32 %v3373_v32, %v7217_v59 }
 0xa75   :  { %v3406_v34 = vadd.f32 %v6605_v10, %v3389_v53  ;;  %v4503_v53 = vld [vmem:[#allocation7 + $0xa0] sm:$0xff]  }
 0xa76   :  { %v4451_v13 = vunpack.c.l.bf16 %v4503_v53 }
 0xa77   :  { %vm3422_vm6 = vcmp.gt.f32.partialorder %v3406_v34, 0.0  ;;  %v3438_v30 = vmul.f32 0.2, %v3406_v34 }
 0xa78   :  { %v3340_v14 = vpop.f32.mrf.mxu2 }
 0xa79   :  { %v3278_v22 = vpop.f32.mrf.mxu1  ;;  %v3374_v27 = vadd.f32 %v3340_v14, %v3275_v12  ;;  %v6653_v41 = vsel %vm3422_vm6, %v3406_v34, %v3438_v30 }
 0xa7b   :  { %v3390_v42 = vadd.f32 %v3374_v27, %v7218_v18  ;;  %v4455_v27 = vunpack.c.l.bf16 %v4504_v9  ;;  %v4434_v9 = vld [vmem:[#allocation7 + $0x80] sm:$0xff]  }
 0xa7d   :  { %v3407_v5 = vadd.f32 %v6605_v10, %v3390_v42 }
 0xa7f   :  { %v3439_v16 = vmul.f32 0.2, %v3407_v5  ;;  %vm3423_vm7 = vcmp.gt.f32.partialorder %v3407_v5, 0.0 }
 0xa80   :  { %v3343_v20 = vpop.f32.mrf.mxu2 }
 0xa81   :  { %v3281_v29 = vpop.f32.mrf.mxu1  ;;  %v3375_v15 = vadd.f32 %v3343_v20, %v3278_v22  ;;  %v4505_v22 = vld [vmem:[#allocation7 + $0xb0] sm:$0xff]   ;;  %v3435_v20 = vmul.f32 0.2, %v3403_v25 }
 0xa82   :  { %v4459_v4 = vunpack.c.l.bf16 %v4505_v22 }
 0xa83   :  { %v6642_v47 = vsel %vm3419_vm4, %v3403_v25, %v3435_v20  ;;  %v4452_v25 = vunpack.c.h.bf16 %v4503_v53 }
 0xa88   :  { %v3346_v38 = vpop.f32.mrf.mxu2 }
 0xa89   :  { %v3284_v24 = vpop.f32.mrf.mxu1  ;;  %v3376_v56 = vadd.f32 %v3346_v38, %v3281_v29  ;;  %v6628_v29 = vsel %vm3420_vm3, %v3404_v45, %v3436_v11  ;;  %v7220_v38 = vld [vmem:[#allocation38_spill] sm:$0xff]  ;;  %v6655_v45 = vsel %vm3423_vm7, %v3407_v5, %v3439_v16  ;;  %v4502_v11 = vld [vmem:[#allocation7 + $0x98] sm:$0xff]  }
 0xa8a   :  { %v3391_v50 = vadd.f32 %v3375_v15, %v7220_v38  ;;  %v3464_v32 = vmax.f32 %v6617_v36, %v6628_v29  ;;  %v4448_v34 = vunpack.c.h.bf16 %v4502_v11  ;;  %v4447_v5 = vunpack.c.l.bf16 %v4502_v11 }
 0xa8b   :  { %v3392_v12 = vadd.f32 %v3376_v56, %v7219_v31 }
 0xa90   :  { %v3349_v8 = vpop.f32.mrf.mxu2 }
 0xa91   :  { %v3287_v44 = vpop.f32.mrf.mxu1  ;;  %v3377_v61 = vadd.f32 %v3349_v8, %v3284_v24  ;;  %v4460_v24 = vunpack.c.h.bf16 %v4505_v22  ;;  %v3437_v8 = vmul.f32 0.2, %v3405_v60 }
 0xa93   :  { %3535 = vmatpush.msra.mxu3 %v4460_v24  ;;  %v6648_v2 = vsel %vm3421_vm5, %v3405_v60, %v3437_v8  ;;  %v3466_v24 = vmax.f32 %v6639_v57, %v6653_v41  ;;  %v3467_v8 = vmax.f32 %v6642_v47, %v6655_v45 }
 0xa94   :  { %v3465_v31 = vmax.f32 %v6619_v33, %v6648_v2 }
 0xa95   :  { %3536 = vmatpush.msra.mxu3 %v4459_v4 }
 0xa97   :  { %3537 = vmatpush.msra.mxu3 %v4456_v54  ;;  %v4436_v54 = vunpack.c.h.bf16 %v4434_v9 }
 0xa98   :  { %v3352_v52 = vpop.f32.mrf.mxu2 }
 0xa99   :  { %v3290_v43 = vpop.f32.mrf.mxu1  ;;  %v3378_v26 = vadd.f32 %v3352_v52, %v3287_v44  ;;  %v7221_v44 = vld [vmem:[#allocation42_spill] sm:$0xff]  ;;  %3538 = vmatpush.msra.mxu3 %v4455_v27 }
 0xa9a   :  { %v3393_v52 = vadd.f32 %v3377_v61, %v7221_v44 }
 0xa9b   :  { %v3394_v35 = vadd.f32 %v3378_v26, %v7222_v62  ;;  %3539 = vmatpush.msra.mxu3 %v4452_v25 }
 0xa9c   :  { %v3410_v7 = vadd.f32 %v6605_v10, %v3393_v52 }
 0xa9d   :  { %v3411_v23 = vadd.f32 %v6605_v10, %v3394_v35  ;;  %3540 = vmatpush.msra.mxu3 %v4451_v13 }
 0xa9e   :  { %vm3426_vm10 = vcmp.gt.f32.partialorder %v3410_v7, 0.0  ;;  %v3442_v42 = vmul.f32 0.2, %v3410_v7 }
 0xa9f   :  { %v3443_v15 = vmul.f32 0.2, %v3411_v23  ;;  %vm3427_vm11 = vcmp.gt.f32.partialorder %v3411_v23, 0.0  ;;  %3541 = vmatpush.msra.mxu3 %v4448_v34 }
 0xaa0   :  { %v3355_v63 = vpop.f32.mrf.mxu2 }
 0xaa1   :  { %v3293_v58 = vpop.f32.mrf.mxu1  ;;  %v3379_v14 = vadd.f32 %v3355_v63, %v3290_v43  ;;  %v3409_v63 = vadd.f32 %v6605_v10, %v3392_v12  ;;  %v6670_v22 = vsel %vm3427_vm11, %v3411_v23, %v3443_v15  ;;  %3542 = vmatpush.msra.mxu3 %v4447_v5 }
 0xaa3   :  { %v3395_v37 = vadd.f32 %v3379_v14, %v7224_v48  ;;  %v3441_v0 = vmul.f32 0.2, %v3409_v63  ;;  %vm3425_vm9 = vcmp.gt.f32.partialorder %v3409_v63, 0.0  ;;  %v6668_v14 = vsel %vm3426_vm10, %v3410_v7, %v3442_v42 }
 0xaa4   :  { %v4435_v7 = vunpack.c.l.bf16 %v4434_v9 }
 0xaa5   :  { %v3412_v39 = vadd.f32 %v6605_v10, %v3395_v37  ;;  %v6659_v61 = vsel %vm3425_vm9, %v3409_v63, %v3441_v0 }
 0xaa6   :  { %v3469_v44 = vmax.f32 %v3465_v31, %v6659_v61 }
 0xaa7   :  { %vm3428_vm13 = vcmp.gt.f32.partialorder %v3412_v39, 0.0 }
 0xaa8   :  { %v3358_v51 = vpop.f32.mrf.mxu2 }
 0xaa9   :  { %v3296_v46 = vpop.f32.mrf.mxu1  ;;  %v3380_v1 = vadd.f32 %v3358_v51, %v3293_v58  ;;  %v3408_v58 = vadd.f32 %v6605_v10, %v3391_v50  ;;  %v4444_v50 = vunpack.c.h.bf16 %v4501_v55 }
 0xaab   :  { %v3396_v21 = vadd.f32 %v3380_v1, %v7223_v6  ;;  %vm3424_vm8 = vcmp.gt.f32.partialorder %v3408_v58, 0.0  ;;  %v3440_v18 = vmul.f32 0.2, %v3408_v58  ;;  %v7226_v1 = vld [vmem:[#allocation52_spill] sm:$0xff]  ;;  %3543 = vmatpush.msra.mxu3 %v4444_v50 }
 0xaad   :  { %v3413_v28 = vadd.f32 %v6605_v10, %v3396_v21  ;;  %v6665_v12 = vsel %vm3424_vm8, %v3408_v58, %v3440_v18  ;;  %v3470_v21 = vmax.f32 %v3466_v24, %v6668_v14 }
 0xaae   :  { %v3468_v6 = vmax.f32 %v3464_v32, %v6665_v12 }
 0xaaf   :  { %v3445_v17 = vmul.f32 0.2, %v3413_v28  ;;  %vm3429_vm12 = vcmp.gt.f32.partialorder %v3413_v28, 0.0 }
 0xab0   :  { %v3361_v40 = vpop.f32.mrf.mxu2 }
 0xab1   :  { %v3381_v43 = vadd.f32 %v3361_v40, %v3296_v46  ;;  %v3299_v59 = vpop.f32.mrf.mxu1  ;;  %v3444_v46 = vmul.f32 0.2, %v3412_v39  ;;  %v6672_v20 = vsel %vm3429_vm12, %v3413_v28, %v3445_v17  ;;  %v4500_v40 = vld [vmem:[#allocation7 + $0x88] sm:$0xff]  }
 0xab2   :  { %v3473_v4 = vmax.f32 %v3469_v44, %v6672_v20  ;;  %v4440_v16 = vunpack.c.h.bf16 %v4500_v40  ;;  %v4439_v58 = vunpack.c.l.bf16 %v4500_v40 }
 0xab3   :  { %v3397_v3 = vadd.f32 %v3381_v43, %v7225_v19  ;;  %v6681_v52 = vsel %vm3428_vm13, %v3412_v39, %v3444_v46  ;;  %v3471_v43 = vmax.f32 %v3467_v8, %v6670_v22 }
 0xab4   :  { %v3472_v63 = vmax.f32 %v3468_v6, %v6681_v52 }
 0xab5   :  { %v3414_v51 = vadd.f32 %v6605_v10, %v3397_v3 }
 0xab6   :  { %v3476_v19 = vmax.f32 %v3472_v63, %v3473_v4 }
 0xab7   :  { %v3446_v26 = vmul.f32 0.2, %v3414_v51  ;;  %vm3430_vm14 = vcmp.gt.f32.partialorder %v3414_v51, 0.0 }
 0xab8   :  { %v3364_v56 = vpop.f32.mrf.mxu2 }
 0xab9   :  { %v3382_v60 = vadd.f32 %v3364_v56, %v3299_v59  ;;  %v6683_v62 = vsel %vm3430_vm14, %v3414_v51, %v3446_v26 }
 0xaba   :  { %v3474_v48 = vmax.f32 %v3470_v21, %v6683_v62 }
 0xabb   :  { %v3398_v49 = vadd.f32 %v3382_v60, %v7226_v1 }
 0xabd   :  { %v3415_v38 = vadd.f32 %v6605_v10, %v3398_v49  ;;  %v4443_v10 = vunpack.c.l.bf16 %v4501_v55 }
 0xabf   :  { %vm3431_vm15 = vcmp.gt.f32.partialorder %v3415_v38, 0.0  ;;  %v3447_v35 = vmul.f32 0.2, %v3415_v38  ;;  %3544 = vmatpush.msra.mxu3 %v4443_v10 }
 0xac1   :  { %v6689_v30 = vsel %vm3431_vm15, %v3415_v38, %v3447_v35  ;;  %3545 = vmatpush.msra.mxu3 %v4440_v16 }
 0xac2   :  { %v3475_v37 = vmax.f32 %v3471_v43, %v6689_v30 }
 0xac3   :  { %3546 = vmatpush.msra.mxu3 %v4439_v58 }
 0xac4   :  { %v3477_v3 = vmax.f32 %v3474_v48, %v3475_v37 }
 0xac5   :  { %3547 = vmatpush.msra.mxu3 %v4436_v54 }
 0xac6   :  { %v3478_v32 = vmax.f32 %v3476_v19, %v3477_v3 }
 0xac7   :  { %3548 = vmatpush.msra.mxu3 %v4435_v7 }
 0xac8   :  { %v3479_v23 = vrot.slane %v3478_v32, 4 }
 0xaca   :  { %v3480_v28 = vmax.f32 %v3478_v32, %v3479_v23 }
 0xacc   :  { %v3481_v27 = vrot.slane %v3480_v28, 2 }
 0xace   :  { %v3482_v0 = vmax.f32 %v3480_v28, %v3481_v27 }
 0xad0   :  { %v3483_v39 = vrot.slane %v3482_v0, 1 }
 0xad2   :  { %v6694_v59 = vmax.f32 %v3482_v0, %v3483_v39 }
 0xad4   :  { %v3500_v53 = vsub.f32 %v6689_v30, %v6694_v59  ;;  %v3485_v51 = vsub.f32 %v6617_v36, %v6694_v59  ;;  %v3486_v18 = vsub.f32 %v6619_v33, %v6694_v59  ;;  %v3495_v42 = vsub.f32 %v6668_v14, %v6694_v59 }
 0xad5   :  { %v3496_v56 = vsub.f32 %v6670_v22, %v6694_v59  ;;  %v3497_v13 = vsub.f32 %v6681_v52, %v6694_v59  ;;  %v3498_v11 = vsub.f32 %v6672_v20, %v6694_v59  ;;  %v3499_v36 = vsub.f32 %v6683_v62, %v6694_v59 }
 0xad6   :  { %v3501_v25 = vmul.f32 1.442695, %v3485_v51  ;;  %v3503_v15 = vmul.f32 1.442695, %v3486_v18  ;;  %v3487_v33 = vsub.f32 %v6639_v57, %v6694_v59  ;;  %v3488_v46 = vsub.f32 %v6642_v47, %v6694_v59 }
 0xad7   :  { %v3489_v1 = vsub.f32 %v6628_v29, %v6694_v59  ;;  %v3490_v57 = vsub.f32 %v6648_v2, %v6694_v59  ;;  %v3491_v47 = vsub.f32 %v6653_v41, %v6694_v59  ;;  %v3492_v29 = vsub.f32 %v6655_v45, %v6694_v59 }
 0xad8   :  { %4651 = vpow2.f32 %v3501_v25  ;;  %v3505_v60 = vmul.f32 1.442695, %v3487_v33  ;;  %v3507_v55 = vmul.f32 1.442695, %v3488_v46  ;;  %v3493_v2 = vsub.f32 %v6665_v12, %v6694_v59 }
 0xad9   :  { %4653 = vpow2.f32 %v3503_v15  ;;  %v3509_v49 = vmul.f32 1.442695, %v3489_v1  ;;  %v3511_v31 = vmul.f32 1.442695, %v3490_v57  ;;  %v3513_v22 = vmul.f32 1.442695, %v3491_v47 }
 0xada   :  { %4655 = vpow2.f32 %v3505_v60  ;;  %v3515_v38 = vmul.f32 1.442695, %v3492_v29  ;;  %v3517_v24 = vmul.f32 1.442695, %v3493_v2  ;;  %v3494_v41 = vsub.f32 %v6659_v61, %v6694_v59  ;;  %v6728_v61 = vpop.f32.mrf.mxu0 }
 0xadb   :  { %4657 = vpow2.f32 %v3507_v55  ;;  %v3521_v40 = vmul.f32 1.442695, %v3495_v42  ;;  %v3523_v62 = vmul.f32 1.442695, %v3496_v56  ;;  %v3525_v12 = vmul.f32 1.442695, %v3497_v13 }
 0xadc   :  { %4659 = vpow2.f32 %v3509_v49  ;;  %v3519_v44 = vmul.f32 1.442695, %v3494_v41  ;;  %v3527_v6 = vmul.f32 1.442695, %v3498_v11  ;;  %v3529_v43 = vmul.f32 1.442695, %v3499_v36 }
 0xadd   :  { %4661 = vpow2.f32 %v3511_v31  ;;  %v3531_v16 = vmul.f32 1.442695, %v3500_v53  ;;  %v7227_v41 = vld [vmem:[#allocation54_spill] sm:$0xff] }
 0xade   :  { %v4652_v17 = vpop.eup %4651  ;;  %4663 = vpow2.f32 %v3513_v22 }
 0xadf   :  { %3549 = vmatmul.f32.vlgmr.msra.gmra.mxu3 %v4652_v17  ;;  %v4654_v34 = vpop.eup %4653  ;;  %4665 = vpow2.f32 %v3515_v38 }
 0xae0   :  { %v4656_v26 = vpop.eup %4655  ;;  %4667 = vpow2.f32 %v3517_v24 }
 0xae1   :  { %v4658_v5 = vpop.eup %4657  ;;  %4669 = vpow2.f32 %v3519_v44  ;;  %v4081_v44 = vld [vmem:[#allocation10 + $0x78] sm:$0xff] }
 0xae2   :  { %v4660_v14 = vpop.eup %4659  ;;  %4671 = vpow2.f32 %v3521_v40  ;;  %v6733_v63 = vpop.f32.mrf.mxu0  ;;  %4084 = vmatpush.msrb.mxu2 %v4081_v44  ;;  %v4080_v40 = vld [vmem:[#allocation10 + $0x70] sm:$0xff] }
 0xae3   :  { %v4662_v20 = vpop.eup %4661  ;;  %4673 = vpow2.f32 %v3523_v62  ;;  %v4079_v62 = vld [vmem:[#allocation10 + $0x68] sm:$0xff] }
 0xae4   :  { %v4664_v50 = vpop.eup %4663  ;;  %4675 = vpow2.f32 %v3525_v12  ;;  %4085 = vmatpush.msrb.mxu2 %v4080_v40  ;;  %v4078_v12 = vld [vmem:[#allocation10 + $0x60] sm:$0xff] }
 0xae5   :  { %v4666_v8 = vpop.eup %4665  ;;  %4677 = vpow2.f32 %v3527_v6  ;;  %v4077_v6 = vld [vmem:[#allocation10 + $0x58] sm:$0xff] }
 0xae6   :  { %v4668_v52 = vpop.eup %4667  ;;  %4679 = vpow2.f32 %v3529_v43  ;;  %4086 = vmatpush.msrb.mxu2 %v4079_v62  ;;  %v7233_v43 = vld [vmem:[#allocation85_spill] sm:$0xff] }
 0xae7   :  { %3552 = vmatmul.f32.gmra.mxu3 %v4654_v34  ;;  %v4670_v45 = vpop.eup %4669  ;;  %4681 = vpow2.f32 %v3531_v16  ;;  %v7234_v16 = vld [vmem:[#allocation86_spill] sm:$0xff] }
 0xae8   :  { %v4672_v35 = vpop.eup %4671  ;;  %4087 = vmatpush.msrb.mxu2 %v4078_v12 }
 0xae9   :  { %v4674_v10 = vpop.eup %4673 }
 0xaea   :  { %v4676_v21 = vpop.eup %4675  ;;  %v6735_v9 = vpop.f32.mrf.mxu0  ;;  %4088 = vmatpush.msrb.mxu2 %v4077_v6 }
 0xaeb   :  { %v4678_v4 = vpop.eup %4677 }
 0xaec   :  { %v4680_v48 = vpop.eup %4679 }
 0xaed   :  { %v4682_v37 = vpop.eup %4681 }
 0xaef   :  { %3555 = vmatmul.f32.gmra.mxu3 %v4656_v26 }
 0xaf2   :  { %v6737_v58 = vpop.f32.mrf.mxu0 }
 0xaf7   :  { %3558 = vmatmul.f32.gmra.mxu3 %v4658_v5 }
 0xafa   :  { %v3201_v54 = vpop.f32.mrf.mxu0 }
 0xaff   :  { %3561 = vmatmul.f32.gmra.mxu3 %v4660_v14 }
 0xb02   :  { %v3204_v30 = vpop.f32.mrf.mxu0 }
 0xb07   :  { %3564 = vmatmul.f32.gmra.mxu3 %v4662_v20 }
 0xb0a   :  { %v3207_v23 = vpop.f32.mrf.mxu0 }
 0xb0f   :  { %3567 = vmatmul.f32.gmra.mxu3 %v4664_v50 }
 0xb12   :  { %v3210_v27 = vpop.f32.mrf.mxu0 }
 0xb17   :  { %3570 = vmatmul.f32.gmra.mxu3 %v4666_v8 }
 0xb1a   :  { %v3213_v59 = vpop.f32.mrf.mxu0 }
 0xb1f   :  { %3573 = vmatmul.f32.gmra.mxu3 %v4668_v52  ;;  %v7228_v52 = vld [vmem:[#allocation80_spill] sm:$0xff] }
 0xb22   :  { %v3216_v51 = vpop.f32.mrf.mxu0 }
 0xb27   :  { %3576 = vmatmul.f32.gmra.mxu3 %v4670_v45  ;;  %v7229_v45 = vld [vmem:[#allocation81_spill] sm:$0xff] }
 0xb2a   :  { %v3219_v42 = vpop.f32.mrf.mxu0 }
 0xb2f   :  { %3579 = vmatmul.f32.gmra.mxu3 %v4672_v35  ;;  %v7230_v35 = vld [vmem:[#allocation82_spill] sm:$0xff] }
 0xb32   :  { %v3222_v13 = vpop.f32.mrf.mxu0 }
 0xb37   :  { %3582 = vmatmul.f32.gmra.mxu3 %v4674_v10  ;;  %v7231_v10 = vld [vmem:[#allocation83_spill] sm:$0xff] }
 0xb3a   :  { %v3225_v15 = vpop.f32.mrf.mxu0 }
 0xb3f   :  { %3585 = vmatmul.f32.gmra.mxu3 %v4676_v21  ;;  %v7232_v21 = vld [vmem:[#allocation84_spill] sm:$0xff] }
 0xb42   :  { %v3228_v33 = vpop.f32.mrf.mxu0 }
 0xb47   :  { %3588 = vmatmul.f32.gmra.mxu3 %v4678_v4  ;;  %v4075_v4 = vld [vmem:[#allocation10 + $0x48] sm:$0xff] }
 0xb4a   :  { %v3231_v34 = vpop.f32.mrf.mxu0 }
 0xb4f   :  { %3591 = vmatmul.f32.gmra.mxu3 %v4680_v48  ;;  %v7235_v48 = vld [vmem:[#allocation87_spill] sm:$0xff] }
 0xb52   :  { %v3234_v55 = vpop.f32.mrf.mxu0 }
 0xb57   :  { %3594 = vmatmul.f32.gmra.mxu3 %v4682_v37  ;;  %v4073_v37 = vld [vmem:[#allocation10 + $0x38] sm:$0xff] }
 0xb62   :  { %v6739_v19 = vpop.f32.mrf.mxu3 }
 0xb63   :  { %v3598_v8 = vmul.f32 %v6739_v19, %v6728_v61  ;;  %v4076_v61 = vld [vmem:[#allocation10 + $0x50] sm:$0xff] }
 0xb64   :  { %4089 = vmatpush.msrb.mxu2 %v4076_v61 }
 0xb66   :  { %4090 = vmatpush.msrb.mxu2 %v4075_v4 }
 0xb6a   :  { %v6741_v3 = vpop.f32.mrf.mxu3 }
 0xb6b   :  { %v3599_v24 = vmul.f32 %v6741_v3, %v6733_v63  ;;  %v4074_v63 = vld [vmem:[#allocation10 + $0x40] sm:$0xff] }
 0xb6c   :  { %4091 = vmatpush.msrb.mxu2 %v4074_v63 }
 0xb6e   :  { %4092 = vmatpush.msrb.mxu2 %v4073_v37 }
 0xb72   :  { %v6743_v32 = vpop.f32.mrf.mxu3 }
 0xb73   :  { %v3600_v2 = vmul.f32 %v6743_v32, %v6735_v9  ;;  %v7236_v9 = vld [vmem:[#allocation88_spill] sm:$0xff] }
 0xb7a   :  { %v3559_v7 = vpop.f32.mrf.mxu3 }
 0xb7b   :  { %v3601_v50 = vmul.f32 %v3559_v7, %v6737_v58  ;;  %v4072_v58 = vld [vmem:[#allocation10 + $0x30] sm:$0xff] }
 0xb7c   :  { %4093 = vmatpush.msrb.mxu2 %v4072_v58 }
 0xb82   :  { %v3562_v28 = vpop.f32.mrf.mxu3 }
 0xb83   :  { %v3602_v38 = vmul.f32 %v3562_v28, %v3201_v54  ;;  %v7238_v54 = vld [vmem:[#allocation90_spill] sm:$0xff] }
 0xb8a   :  { %v3565_v0 = vpop.f32.mrf.mxu3 }
 0xb8b   :  { %v3603_v29 = vmul.f32 %v3565_v0, %v3204_v30  ;;  %v7240_v30 = vld [vmem:[#allocation92_spill] sm:$0xff] }
 0xb92   :  { %v3568_v39 = vpop.f32.mrf.mxu3 }
 0xb93   :  { %v3604_v20 = vmul.f32 %v3568_v39, %v3207_v23  ;;  %v7241_v23 = vld [vmem:[#allocation93_spill] sm:$0xff] }
 0xb9a   :  { %v3571_v53 = vpop.f32.mrf.mxu3 }
 0xb9b   :  { %v3605_v22 = vmul.f32 %v3571_v53, %v3210_v27  ;;  %v7242_v27 = vld [vmem:[#allocation94_spill] sm:$0xff] }
 0xba2   :  { %v3574_v25 = vpop.f32.mrf.mxu3 }
 0xba3   :  { %v3606_v18 = vmul.f32 %v3574_v25, %v3213_v59 }
 0xbaa   :  { %v3577_v56 = vpop.f32.mrf.mxu3 }
 0xbab   :  { %v3607_v47 = vmul.f32 %v3577_v56, %v3216_v51  ;;  %v4067_v51 = vld [vmem:[#allocation10 + $0x8] sm:$0xff] }
 0xbb2   :  { %v3580_v11 = vpop.f32.mrf.mxu3 }
 0xbb3   :  { %v3608_v14 = vmul.f32 %v3580_v11, %v3219_v42 }
 0xbba   :  { %v3583_v36 = vpop.f32.mrf.mxu3 }
 0xbbb   :  { %v3609_v31 = vmul.f32 %v3583_v36, %v3222_v13 }
 0xbc2   :  { %v3586_v17 = vpop.f32.mrf.mxu3 }
 0xbc3   :  { %v3610_v57 = vmul.f32 %v3586_v17, %v3225_v15 }
 0xbca   :  { %v3589_v60 = vpop.f32.mrf.mxu3 }
 0xbcb   :  { %v3611_v5 = vmul.f32 %v3589_v60, %v3228_v33 }
 0xbd2   :  { %v3592_v46 = vpop.f32.mrf.mxu3 }
 0xbd3   :  { %v3612_v49 = vmul.f32 %v3592_v46, %v3231_v34 }
 0xbda   :  { %v3595_v26 = vpop.f32.mrf.mxu3 }
 0xbdb   :  { %v3613_v1 = vmul.f32 %v3595_v26, %v3234_v55  ;;  %3679 = vmatpush.msrb.mxu1 %v3595_v26  ;;  %v4719_v26 = vld [vmem:[#allocation9 + $0x38] sm:$0xff] }
 0xbdd   :  { %3614 = vmatpush.msrb.mxu0 %v3613_v1  ;;  %3680 = vmatpush.msrb.mxu1 %v3592_v46  ;;  %v6787_v1 = vperm.slane %v4719_v26, 1  ;;  %v4178_v26 = vld [vmem:[#allocation12 + $0x68] sm:$0xff] }
 0xbdf   :  { %3615 = vmatpush.msrb.mxu0 %v3612_v49  ;;  %3681 = vmatpush.msrb.mxu1 %v3589_v60 }
 0xbe1   :  { %3616 = vmatpush.msrb.mxu0 %v3611_v5  ;;  %3682 = vmatpush.msrb.mxu1 %v3586_v17 }
 0xbe3   :  { %3617 = vmatpush.msrb.mxu0 %v3610_v57  ;;  %3683 = vmatpush.msrb.mxu1 %v3583_v36 }
 0xbe5   :  { %3618 = vmatpush.msrb.mxu0 %v3609_v31  ;;  %3684 = vmatpush.msrb.mxu1 %v3580_v11 }
 0xbe7   :  { %3619 = vmatpush.msrb.mxu0 %v3608_v14  ;;  %3685 = vmatpush.msrb.mxu1 %v3577_v56 }
 0xbe9   :  { %3620 = vmatpush.msrb.mxu0 %v3607_v47  ;;  %3686 = vmatpush.msrb.mxu1 %v3574_v25  ;;  %v4066_v25 = vld [vmem:[#allocation10] sm:$0xff]  ;;  %v4720_v47 = vld [vmem:[#allocation9 + $0x40] sm:$0xff] }
 0xbeb   :  { %3621 = vmatpush.msrb.mxu0 %v3606_v18  ;;  %3687 = vmatpush.msrb.mxu1 %v3571_v53 }
 0xbed   :  { %3622 = vmatpush.msrb.mxu0 %v3605_v22  ;;  %3688 = vmatpush.msrb.mxu1 %v3568_v39  ;;  %v6789_v22 = vperm.slane %v4720_v47, 1 }
 0xbef   :  { %3623 = vmatpush.msrb.mxu0 %v3604_v20  ;;  %3689 = vmatpush.msrb.mxu1 %v3565_v0  ;;  %v4068_v0 = vld [vmem:[#allocation10 + $0x10] sm:$0xff] }
 0xbf1   :  { %3624 = vmatpush.msrb.mxu0 %v3603_v29  ;;  %3690 = vmatpush.msrb.mxu1 %v3562_v28  ;;  %v4069_v28 = vld [vmem:[#allocation10 + $0x18] sm:$0xff] }
 0xbf3   :  { %3625 = vmatpush.msrb.mxu0 %v3602_v38  ;;  %3691 = vmatpush.msrb.mxu1 %v3559_v7  ;;  %v4070_v7 = vld [vmem:[#allocation10 + $0x20] sm:$0xff] }
 0xbf5   :  { %3626 = vmatpush.msrb.mxu0 %v3601_v50  ;;  %3692 = vmatpush.msrb.mxu1 %v6743_v32  ;;  %v7239_v32 = vld [vmem:[#allocation91_spill] sm:$0xff] }
 0xbf7   :  { %3627 = vmatpush.msrb.mxu0 %v3600_v2  ;;  %3693 = vmatpush.msrb.mxu1 %v6741_v3  ;;  %v4071_v3 = vld [vmem:[#allocation10 + $0x28] sm:$0xff] }
 0xbf8   :  { %4094 = vmatpush.msrb.mxu2 %v4071_v3 }
 0xbf9   :  { %3628 = vmatpush.msrb.mxu0 %v3599_v24  ;;  %3694 = vmatpush.msrb.mxu1 %v6739_v19  ;;  %v7237_v19 = vld [vmem:[#allocation89_spill] sm:$0xff] }
 0xbfa   :  { %3695 = vmatmul.f32.vlgmr.msrb.gmra.mxu1 %v7227_v41  ;;  %4095 = vmatpush.msrb.mxu2 %v4070_v7 }
 0xbfb   :  { %3629 = vmatpush.msrb.mxu0 %v3598_v8 }
 0xbfc   :  { %3630 = vmatmul.f32.vlgmr.msrb.gmra.mxu0 %v7227_v41  ;;  %4096 = vmatpush.msrb.mxu2 %v4069_v28 }
 0xbfe   :  { %4097 = vmatpush.msrb.mxu2 %v4068_v0 }
 0xc00   :  { %4098 = vmatpush.msrb.mxu2 %v4067_v51 }
 0xc02   :  { %3698 = vmatmul.f32.gmra.mxu1 %v7228_v52  ;;  %4099 = vmatpush.msrb.mxu2 %v4066_v25 }
 0xc04   :  { %3633 = vmatmul.f32.gmra.mxu0 %v7228_v52 }
 0xc0a   :  { %3701 = vmatmul.f32.gmra.mxu1 %v7229_v45 }
 0xc0c   :  { %3636 = vmatmul.f32.gmra.mxu0 %v7229_v45 }
 0xc12   :  { %3704 = vmatmul.f32.gmra.mxu1 %v7230_v35 }
 0xc14   :  { %3639 = vmatmul.f32.gmra.mxu0 %v7230_v35 }
 0xc1a   :  { %3707 = vmatmul.f32.gmra.mxu1 %v7231_v10 }
 0xc1c   :  { %3642 = vmatmul.f32.gmra.mxu0 %v7231_v10 }
 0xc22   :  { %3710 = vmatmul.f32.gmra.mxu1 %v7232_v21 }
 0xc24   :  { %3645 = vmatmul.f32.gmra.mxu0 %v7232_v21 }
 0xc2a   :  { %3713 = vmatmul.f32.gmra.mxu1 %v7233_v43 }
 0xc2c   :  { %3648 = vmatmul.f32.gmra.mxu0 %v7233_v43  ;;  %v4180_v43 = vld [vmem:[#allocation12 + $0x78] sm:$0xff] }
 0xc2d   :  { %4183 = vmatpush.msrb.mxu3 %v4180_v43 }
 0xc32   :  { %3716 = vmatmul.f32.gmra.mxu1 %v7234_v16 }
 0xc34   :  { %3651 = vmatmul.f32.gmra.mxu0 %v7234_v16 }
 0xc3a   :  { %3719 = vmatmul.f32.gmra.mxu1 %v7235_v48 }
 0xc3c   :  { %3654 = vmatmul.f32.gmra.mxu0 %v7235_v48 }
 0xc42   :  { %3722 = vmatmul.f32.gmra.mxu1 %v7236_v9 }
 0xc44   :  { %3657 = vmatmul.f32.gmra.mxu0 %v7236_v9 }
 0xc4a   :  { %3725 = vmatmul.f32.gmra.mxu1 %v7237_v19 }
 0xc4c   :  { %3660 = vmatmul.f32.gmra.mxu0 %v7237_v19 }
 0xc52   :  { %3728 = vmatmul.f32.gmra.mxu1 %v7238_v54 }
 0xc54   :  { %3663 = vmatmul.f32.gmra.mxu0 %v7238_v54 }
 0xc5a   :  { %3731 = vmatmul.f32.gmra.mxu1 %v7239_v32 }
 0xc5c   :  { %3666 = vmatmul.f32.gmra.mxu0 %v7239_v32 }
 0xc62   :  { %3734 = vmatmul.f32.gmra.mxu1 %v7240_v30 }
 0xc64   :  { %3669 = vmatmul.f32.gmra.mxu0 %v7240_v30 }
 0xc6a   :  { %3737 = vmatmul.f32.gmra.mxu1 %v7241_v23 }
 0xc6c   :  { %3672 = vmatmul.f32.gmra.mxu0 %v7241_v23 }
 0xc72   :  { %3740 = vmatmul.f32.gmra.mxu1 %v7242_v27 }
 0xc74   :  { %3675 = vmatmul.f32.gmra.mxu0 %v7242_v27 }
 0xc77   :  { %v3696_v39 = vpop.f32.mrf.mxu1 }
 0xc78   :  { %vm3744_vm0 = vcmp.gt.f32.partialorder %v3696_v39, 0.0 }
 0xc79   :  { %v3760_v59 = vsel %vm3744_vm0, %v3696_v39, 1.0  ;;  %v3631_v53 = vpop.f32.mrf.mxu0  ;;  %v4179_v39 = vld [vmem:[#allocation12 + $0x70] sm:$0xff] }
 0xc7a   :  { %4683 = vrcp.f32 %v3760_v59  ;;  %v3787_v15 = vand.u32 2147483648, %v3760_v59  ;;  %v3785_v33 = vand.u32 2147483647, %v3760_v59  ;;  %vm3781_vm3 = vweird.f32 %v3760_v59  ;;  %4184 = vmatpush.msrb.mxu3 %v4179_v39 }
 0xc7c   :  { %v3788_v55 = vor.u32 1.1754944e-38, %v3787_v15  ;;  %vm3786_vm6 = vcmp.eq.f32.partialorder %v3785_v33, 8.507059e+37  ;;  %4185 = vmatpush.msrb.mxu3 %v4178_v26 }
 0xc7f   :  { %v3699_v18 = vpop.f32.mrf.mxu1 }
 0xc80   :  { %v4684_v42 = vpop.eup %4683  ;;  %vm3745_vm1 = vcmp.gt.f32.partialorder %v3699_v18, 0.0 }
 0xc81   :  { %v3777_v56 = vmul.f32 %v4684_v42, %v3760_v59  ;;  %v3761_v13 = vsel %vm3745_vm1, %v3699_v18, 1.0  ;;  %v3634_v11 = vpop.f32.mrf.mxu0  ;;  %vm3782_vm2 = vweird.f32 %v4684_v42 }
 0xc82   :  { %4685 = vrcp.f32 %v3761_v13  ;;  %vm3783_vm5 = vmor %vm3781_vm3, %vm3782_vm2  ;;  %v3800_v38 = vand.u32 2147483647, %v3761_v13  ;;  %v3802_v50 = vand.u32 2147483648, %v3761_v13  ;;  %vm3796_vm8 = vweird.f32 %v3761_v13 }
 0xc83   :  { %v3778_v36 = vsub.f32 1.0, %v3777_v56 }
 0xc84   :  { %vm3801_vm11 = vcmp.eq.f32.partialorder %v3800_v38, 8.507059e+37  ;;  %v3803_v40 = vor.u32 1.1754944e-38, %v3802_v50 }
 0xc85   :  { %v3779_v17 = vmul.f32 %v4684_v42, %v3778_v36 }
 0xc87   :  { %v3702_v60 = vpop.f32.mrf.mxu1  ;;  %v3780_v34 = vadd.f32 %v4684_v42, %v3779_v17 }
 0xc88   :  { %v4686_v46 = vpop.eup %4685  ;;  %vm3746_vm4 = vcmp.gt.f32.partialorder %v3702_v60, 0.0 }
 0xc89   :  { %v3792_v49 = vmul.f32 %v4686_v46, %v3761_v13  ;;  %v3762_v5 = vsel %vm3746_vm4, %v3702_v60, 1.0  ;;  %v3784_v57 = vsel %vm3783_vm5, %v4684_v42, %v3780_v34  ;;  %v3637_v31 = vpop.f32.mrf.mxu0  ;;  %vm3797_vm7 = vweird.f32 %v4686_v46 }
 0xc8a   :  { %4687 = vrcp.f32 %v3762_v5  ;;  %v3789_v14 = vsel %vm3786_vm6, %v3788_v55, %v3784_v57  ;;  %vm3798_vm10 = vmor %vm3796_vm8, %vm3797_vm7  ;;  %v3815_v4 = vand.u32 2147483647, %v3762_v5  ;;  %v3817_v16 = vand.u32 2147483648, %v3762_v5 }
 0xc8b   :  { %v3793_v20 = vsub.f32 1.0, %v3792_v49  ;;  %v3790_v29 = vmul.f32 %v3789_v14, %v3631_v53  ;;  %vm3811_vm13 = vweird.f32 %v3762_v5 }
 0xc8c   :  { %vm3816_vm0 = vcmp.eq.f32.partialorder %v3815_v4, 8.507059e+37  ;;  %v3818_v3 = vor.u32 1.1754944e-38, %v3817_v16 }
 0xc8d   :  { %v4017_v2 = vmul.f32 %v6787_v1, %v3790_v29  ;;  %v3794_v24 = vmul.f32 %v4686_v46, %v3793_v20 }
 0xc8f   :  { %v4034_v8 = vadd.f32 %v6789_v22, %v4017_v2  ;;  %v3705_v41 = vpop.f32.mrf.mxu1  ;;  %v3795_v44 = vadd.f32 %v4686_v46, %v3794_v24 }
 0xc90   :  { %v4688_v52 = vpop.eup %4687  ;;  %vm3747_vm9 = vcmp.gt.f32.partialorder %v3705_v41, 0.0 }
 0xc91   :  { %v3807_v45 = vmul.f32 %v4688_v52, %v3762_v5  ;;  %v4050_v62 = vmax.f32 %v4034_v8, 0.0  ;;  %v3763_v35 = vsel %vm3747_vm9, %v3705_v41, 1.0  ;;  %v3799_v12 = vsel %vm3798_vm10, %v4686_v46, %v3795_v44  ;;  %v3640_v10 = vpop.f32.mrf.mxu0 }
 0xc92   :  { %4689 = vrcp.f32 %v3763_v35  ;;  %v3804_v6 = vsel %vm3801_vm11, %v3803_v40, %v3799_v12  ;;  %vm3812_vm12 = vweird.f32 %v4688_v52  ;;  %v3830_v59 = vand.u32 2147483647, %v3763_v35 }
 0xc93   :  { %v3808_v21 = vsub.f32 1.0, %v3807_v45  ;;  %v3805_v61 = vmul.f32 %v3804_v6, %v3634_v11  ;;  %4100 = vmatmul.f32.vlgmr.msrb.gmra.mxu2 %v4050_v62  ;;  %vm3813_vm15 = vmor %vm3811_vm13, %vm3812_vm12  ;;  %v3832_v53 = vand.u32 2147483648, %v3763_v35  ;;  %vm3826_vm2 = vweird.f32 %v3763_v35  ;;  %v4177_v45 = vld [vmem:[#allocation12 + $0x60] sm:$0xff] }
 0xc94   :  { %vm3831_vm5 = vcmp.eq.f32.partialorder %v3830_v59, 8.507059e+37  ;;  %4186 = vmatpush.msrb.mxu3 %v4177_v45 }
 0xc95   :  { %v4018_v63 = vmul.f32 %v6787_v1, %v3805_v61  ;;  %v3809_v48 = vmul.f32 %v4688_v52, %v3808_v21  ;;  %v3833_v11 = vor.u32 1.1754944e-38, %v3832_v53 }
 0xc97   :  { %v3708_v37 = vpop.f32.mrf.mxu1  ;;  %v3810_v9 = vadd.f32 %v4688_v52, %v3809_v48  ;;  %v4035_v58 = vadd.f32 %v6789_v22, %v4018_v63 }
 0xc98   :  { %v4690_v19 = vpop.eup %4689  ;;  %vm3748_vm14 = vcmp.gt.f32.partialorder %v3708_v37, 0.0 }
 0xc99   :  { %v3822_v54 = vmul.f32 %v4690_v19, %v3763_v35  ;;  %v3764_v32 = vsel %vm3748_vm14, %v3708_v37, 1.0  ;;  %v3814_v30 = vsel %vm3813_vm15, %v4688_v52, %v3810_v9  ;;  %v4051_v7 = vmax.f32 %v4035_v58, 0.0  ;;  %v3643_v23 = vpop.f32.mrf.mxu0 }
 0xc9a   :  { %4691 = vrcp.f32 %v3764_v32  ;;  %v3819_v28 = vsel %vm3816_vm0, %v3818_v3, %v3814_v30  ;;  %vm3827_vm1 = vweird.f32 %v4690_v19  ;;  %v3845_v49 = vand.u32 2147483647, %v3764_v32 }
 0xc9b   :  { %v3823_v27 = vsub.f32 1.0, %v3822_v54  ;;  %v3820_v0 = vmul.f32 %v3819_v28, %v3637_v31  ;;  %4103 = vmatmul.f32.gmra.mxu2 %v4051_v7  ;;  %vm3828_vm4 = vmor %vm3826_vm2, %vm3827_vm1  ;;  %v3847_v5 = vand.u32 2147483648, %v3764_v32  ;;  %vm3841_vm7 = vweird.f32 %v3764_v32  ;;  %v4176_v54 = vld [vmem:[#allocation12 + $0x58] sm:$0xff] }
 0xc9c   :  { %vm3846_vm10 = vcmp.eq.f32.partialorder %v3845_v49, 8.507059e+37  ;;  %4187 = vmatpush.msrb.mxu3 %v4176_v54 }
 0xc9d   :  { %v4019_v51 = vmul.f32 %v6787_v1, %v3820_v0  ;;  %v3824_v25 = vmul.f32 %v4690_v19, %v3823_v27  ;;  %v3848_v38 = vor.u32 1.1754944e-38, %v3847_v5 }
 0xc9f   :  { %v3711_v18 = vpop.f32.mrf.mxu1  ;;  %v3825_v42 = vadd.f32 %v4690_v19, %v3824_v25  ;;  %v4036_v56 = vadd.f32 %v6789_v22, %v4019_v51 }
 0xca0   :  { %v4692_v13 = vpop.eup %4691  ;;  %vm3749_vm3 = vcmp.gt.f32.partialorder %v3711_v18, 0.0 }
 0xca1   :  { %v3837_v36 = vmul.f32 %v4692_v13, %v3764_v32  ;;  %v3765_v15 = vsel %vm3749_vm3, %v3711_v18, 1.0  ;;  %v3829_v17 = vsel %vm3828_vm4, %v4690_v19, %v3825_v42  ;;  %v4052_v33 = vmax.f32 %v4036_v56, 0.0  ;;  %v3646_v60 = vpop.f32.mrf.mxu0 }
 0xca2   :  { %4693 = vrcp.f32 %v3765_v15  ;;  %v3834_v34 = vsel %vm3831_vm5, %v3833_v11, %v3829_v17  ;;  %vm3842_vm6 = vweird.f32 %v4692_v13  ;;  %v3860_v62 = vand.u32 2147483647, %v3765_v15 }
 0xca3   :  { %v3838_v46 = vsub.f32 1.0, %v3837_v36  ;;  %v3835_v55 = vmul.f32 %v3834_v34, %v3640_v10  ;;  %4106 = vmatmul.f32.gmra.mxu2 %v4052_v33  ;;  %vm3843_vm9 = vmor %vm3841_vm7, %vm3842_vm6  ;;  %v3862_v35 = vand.u32 2147483648, %v3765_v15  ;;  %vm3856_vm12 = vweird.f32 %v3765_v15  ;;  %v4175_v36 = vld [vmem:[#allocation12 + $0x50] sm:$0xff] }
 0xca4   :  { %vm3861_vm15 = vcmp.eq.f32.partialorder %v3860_v62, 8.507059e+37  ;;  %4188 = vmatpush.msrb.mxu3 %v4175_v36 }
 0xca5   :  { %v4020_v57 = vmul.f32 %v6787_v1, %v3835_v55  ;;  %v3839_v31 = vmul.f32 %v4692_v13, %v3838_v46  ;;  %v3863_v4 = vor.u32 1.1754944e-38, %v3862_v35 }
 0xca7   :  { %v3714_v14 = vpop.f32.mrf.mxu1  ;;  %v3840_v47 = vadd.f32 %v4692_v13, %v3839_v31  ;;  %v4037_v20 = vadd.f32 %v6789_v22, %v4020_v57 }
 0xca8   :  { %v4694_v29 = vpop.eup %4693  ;;  %vm3750_vm8 = vcmp.gt.f32.partialorder %v3714_v14, 0.0 }
 0xca9   :  { %v3852_v50 = vmul.f32 %v4694_v29, %v3765_v15  ;;  %v3766_v2 = vsel %vm3750_vm8, %v3714_v14, 1.0  ;;  %v3844_v24 = vsel %vm3843_vm9, %v4692_v13, %v3840_v47  ;;  %v4053_v8 = vmax.f32 %v4037_v20, 0.0  ;;  %v3649_v41 = vpop.f32.mrf.mxu0 }
 0xcaa   :  { %4695 = vrcp.f32 %v3766_v2  ;;  %v3849_v44 = vsel %vm3846_vm10, %v3848_v38, %v3844_v24  ;;  %vm3857_vm11 = vweird.f32 %v4694_v29  ;;  %v3875_v32 = vand.u32 2147483647, %v3766_v2  ;;  %v4174_v38 = vld [vmem:[#allocation12 + $0x48] sm:$0xff] }
 0xcab   :  { %v3853_v52 = vsub.f32 1.0, %v3852_v50  ;;  %v3850_v40 = vmul.f32 %v3849_v44, %v3643_v23  ;;  %4109 = vmatmul.f32.gmra.mxu2 %v4053_v8  ;;  %vm3858_vm14 = vmor %vm3856_vm12, %vm3857_vm11  ;;  %v3877_v30 = vand.u32 2147483648, %v3766_v2  ;;  %vm3871_vm1 = vweird.f32 %v3766_v2  ;;  %4189 = vmatpush.msrb.mxu3 %v4174_v38 }
 0xcac   :  { %vm3876_vm4 = vcmp.eq.f32.partialorder %v3875_v32, 8.507059e+37 }
 0xcad   :  { %v4021_v12 = vmul.f32 %v6787_v1, %v3850_v40  ;;  %v3854_v10 = vmul.f32 %v4694_v29, %v3853_v52  ;;  %v3878_v59 = vor.u32 1.1754944e-38, %v3877_v30 }
 0xcaf   :  { %v3717_v6 = vpop.f32.mrf.mxu1  ;;  %v3855_v21 = vadd.f32 %v4694_v29, %v3854_v10  ;;  %v4038_v61 = vadd.f32 %v6789_v22, %v4021_v12 }
 0xcb0   :  { %v4696_v43 = vpop.eup %4695  ;;  %vm3751_vm13 = vcmp.gt.f32.partialorder %v3717_v6, 0.0 }
 0xcb1   :  { %v3867_v16 = vmul.f32 %v4696_v43, %v3766_v2  ;;  %v3767_v63 = vsel %vm3751_vm13, %v3717_v6, 1.0  ;;  %v3859_v48 = vsel %vm3858_vm14, %v4694_v29, %v3855_v21  ;;  %v4054_v37 = vmax.f32 %v4038_v61, 0.0  ;;  %v3652_v9 = vpop.f32.mrf.mxu0 }
 0xcb2   :  { %4697 = vrcp.f32 %v3767_v63  ;;  %v3864_v58 = vsel %vm3861_vm15, %v3863_v4, %v3859_v48  ;;  %vm3872_vm0 = vweird.f32 %v4696_v43  ;;  %v3890_v15 = vand.u32 2147483647, %v3767_v63  ;;  %v4173_v4 = vld [vmem:[#allocation12 + $0x40] sm:$0xff] }
 0xcb3   :  { %v3868_v19 = vsub.f32 1.0, %v3867_v16  ;;  %v3865_v3 = vmul.f32 %v3864_v58, %v3646_v60  ;;  %4112 = vmatmul.f32.gmra.mxu2 %v4054_v37  ;;  %vm3873_vm3 = vmor %vm3871_vm1, %vm3872_vm0  ;;  %v3892_v17 = vand.u32 2147483648, %v3767_v63  ;;  %vm3886_vm6 = vweird.f32 %v3767_v63  ;;  %4190 = vmatpush.msrb.mxu3 %v4173_v4 }
 0xcb4   :  { %vm3891_vm9 = vcmp.eq.f32.partialorder %v3890_v15, 8.507059e+37 }
 0xcb5   :  { %v4022_v7 = vmul.f32 %v6787_v1, %v3865_v3  ;;  %v3869_v23 = vmul.f32 %v4696_v43, %v3868_v19  ;;  %v3893_v49 = vor.u32 1.1754944e-38, %v3892_v17 }
 0xcb7   :  { %v3720_v28 = vpop.f32.mrf.mxu1  ;;  %v3870_v27 = vadd.f32 %v4696_v43, %v3869_v23  ;;  %v4039_v0 = vadd.f32 %v6789_v22, %v4022_v7 }
 0xcb8   :  { %v4698_v39 = vpop.eup %4697  ;;  %vm3752_vm2 = vcmp.gt.f32.partialorder %v3720_v28, 0.0 }
 0xcb9   :  { %v3882_v53 = vmul.f32 %v4698_v39, %v3767_v63  ;;  %v3768_v51 = vsel %vm3752_vm2, %v3720_v28, 1.0  ;;  %v3874_v25 = vsel %vm3873_vm3, %v4696_v43, %v3870_v27  ;;  %v4055_v18 = vmax.f32 %v4039_v0, 0.0  ;;  %v3655_v56 = vpop.f32.mrf.mxu0 }
 0xcba   :  { %4699 = vrcp.f32 %v3768_v51  ;;  %v3879_v42 = vsel %vm3876_vm4, %v3878_v59, %v3874_v25  ;;  %vm3887_vm5 = vweird.f32 %v4698_v39  ;;  %v3905_v50 = vand.u32 2147483647, %v3768_v51  ;;  %v4172_v59 = vld [vmem:[#allocation12 + $0x38] sm:$0xff] }
 0xcbb   :  { %v3883_v13 = vsub.f32 1.0, %v3882_v53  ;;  %v3880_v11 = vmul.f32 %v3879_v42, %v3649_v41  ;;  %4115 = vmatmul.f32.gmra.mxu2 %v4055_v18  ;;  %vm3888_vm8 = vmor %vm3886_vm6, %vm3887_vm5  ;;  %v3907_v2 = vand.u32 2147483648, %v3768_v51  ;;  %vm3901_vm11 = vweird.f32 %v3768_v51  ;;  %4191 = vmatpush.msrb.mxu3 %v4172_v59 }
 0xcbc   :  { %vm3906_vm14 = vcmp.eq.f32.partialorder %v3905_v50, 8.507059e+37  ;;  %v4169_v50 = vld [vmem:[#allocation12 + $0x20] sm:$0xff] }
 0xcbd   :  { %v4023_v33 = vmul.f32 %v6787_v1, %v3880_v11  ;;  %v3884_v60 = vmul.f32 %v4698_v39, %v3883_v13  ;;  %v3908_v62 = vor.u32 1.1754944e-38, %v3907_v2 }
 0xcbf   :  { %v3723_v34 = vpop.f32.mrf.mxu1  ;;  %v3885_v46 = vadd.f32 %v4698_v39, %v3884_v60  ;;  %v4040_v55 = vadd.f32 %v6789_v22, %v4023_v33 }
 0xcc0   :  { %v4700_v26 = vpop.eup %4699  ;;  %vm3753_vm7 = vcmp.gt.f32.partialorder %v3723_v34, 0.0 }
 0xcc1   :  { %v3897_v5 = vmul.f32 %v4700_v26, %v3768_v51  ;;  %v3769_v57 = vsel %vm3753_vm7, %v3723_v34, 1.0  ;;  %v3889_v31 = vsel %vm3888_vm8, %v4698_v39, %v3885_v46  ;;  %v4056_v14 = vmax.f32 %v4040_v55, 0.0  ;;  %v3658_v24 = vpop.f32.mrf.mxu0 }
 0xcc2   :  { %4701 = vrcp.f32 %v3769_v57  ;;  %v3894_v47 = vsel %vm3891_vm9, %v3893_v49, %v3889_v31  ;;  %vm3902_vm10 = vweird.f32 %v4700_v26  ;;  %v3920_v16 = vand.u32 2147483647, %v3769_v57 }
 0xcc3   :  { %v3898_v20 = vsub.f32 1.0, %v3897_v5  ;;  %v3895_v29 = vmul.f32 %v3894_v47, %v3652_v9  ;;  %4118 = vmatmul.f32.gmra.mxu2 %v4056_v14  ;;  %vm3903_vm13 = vmor %vm3901_vm11, %vm3902_vm10  ;;  %v3922_v63 = vand.u32 2147483648, %v3769_v57  ;;  %vm3916_vm0 = vweird.f32 %v3769_v57  ;;  %v4171_v14 = vld [vmem:[#allocation12 + $0x30] sm:$0xff]  ;;  %v4170_v47 = vld [vmem:[#allocation12 + $0x28] sm:$0xff] }
 0xcc4   :  { %vm3921_vm3 = vcmp.eq.f32.partialorder %v3920_v16, 8.507059e+37  ;;  %4192 = vmatpush.msrb.mxu3 %v4171_v14 }
 0xcc5   :  { %v4024_v8 = vmul.f32 %v6787_v1, %v3895_v29  ;;  %v3899_v41 = vmul.f32 %v4700_v26, %v3898_v20  ;;  %v3923_v32 = vor.u32 1.1754944e-38, %v3922_v63 }
 0xcc6   :  { %4193 = vmatpush.msrb.mxu3 %v4170_v47  ;;  %v4166_v47 = vld [vmem:[#allocation12 + $0x8] sm:$0xff] }
 0xcc7   :  { %v3726_v44 = vpop.f32.mrf.mxu1  ;;  %v3900_v52 = vadd.f32 %v4700_v26, %v3899_v41  ;;  %v4041_v40 = vadd.f32 %v6789_v22, %v4024_v8 }
 0xcc8   :  { %v4702_v45 = vpop.eup %4701  ;;  %vm3754_vm12 = vcmp.gt.f32.partialorder %v3726_v44, 0.0  ;;  %4194 = vmatpush.msrb.mxu3 %v4169_v50 }
 0xcc9   :  { %v3912_v35 = vmul.f32 %v4702_v45, %v3769_v57  ;;  %v3770_v12 = vsel %vm3754_vm12, %v3726_v44, 1.0  ;;  %v3904_v10 = vsel %vm3903_vm13, %v4700_v26, %v3900_v52  ;;  %v4057_v6 = vmax.f32 %v4041_v40, 0.0  ;;  %v3661_v9 = vpop.f32.mrf.mxu0 }
 0xcca   :  { %4703 = vrcp.f32 %v3770_v12  ;;  %v3909_v21 = vsel %vm3906_vm14, %v3908_v62, %v3904_v10  ;;  %vm3917_vm15 = vweird.f32 %v4702_v45  ;;  %v3935_v53 = vand.u32 2147483647, %v3770_v12 }
 0xccb   :  { %v3913_v61 = vsub.f32 1.0, %v3912_v35  ;;  %v3910_v43 = vmul.f32 %v3909_v21, %v3655_v56  ;;  %4121 = vmatmul.f32.gmra.mxu2 %v4057_v6  ;;  %vm3918_vm2 = vmor %vm3916_vm0, %vm3917_vm15  ;;  %v3937_v51 = vand.u32 2147483648, %v3770_v12  ;;  %vm3931_vm5 = vweird.f32 %v3770_v12 }
 0xccc   :  { %vm3936_vm8 = vcmp.eq.f32.partialorder %v3935_v53, 8.507059e+37 }
 0xccd   :  { %v4025_v48 = vmul.f32 %v6787_v1, %v3910_v43  ;;  %v3914_v37 = vmul.f32 %v4702_v45, %v3913_v61  ;;  %v3938_v36 = vor.u32 1.1754944e-38, %v3937_v51  ;;  %v4168_v61 = vld [vmem:[#allocation12 + $0x18] sm:$0xff] }
 0xcce   :  { %4195 = vmatpush.msrb.mxu3 %v4168_v61 }
 0xccf   :  { %v3729_v58 = vpop.f32.mrf.mxu1  ;;  %v3915_v19 = vadd.f32 %v4702_v45, %v3914_v37  ;;  %v4042_v3 = vadd.f32 %v6789_v22, %v4025_v48 }
 0xcd0   :  { %v4704_v54 = vpop.eup %4703  ;;  %vm3755_vm1 = vcmp.gt.f32.partialorder %v3729_v58, 0.0 }
 0xcd1   :  { %v3927_v30 = vmul.f32 %v4704_v54, %v3770_v12  ;;  %v3771_v7 = vsel %vm3755_vm1, %v3729_v58, 1.0  ;;  %v3919_v23 = vsel %vm3918_vm2, %v4702_v45, %v3915_v19  ;;  %v4058_v28 = vmax.f32 %v4042_v3, 0.0  ;;  %v3664_v15 = vpop.f32.mrf.mxu0 }
 0xcd2   :  { %4705 = vrcp.f32 %v3771_v7  ;;  %v3924_v27 = vsel %vm3921_vm3, %v3923_v32, %v3919_v23  ;;  %vm3932_vm4 = vweird.f32 %v4704_v54  ;;  %v3950_v49 = vand.u32 2147483647, %v3771_v7 }
 0xcd3   :  { %v3928_v0 = vsub.f32 1.0, %v3927_v30  ;;  %v3925_v39 = vmul.f32 %v3924_v27, %v3658_v24  ;;  %4124 = vmatmul.f32.gmra.mxu2 %v4058_v28  ;;  %vm3933_vm7 = vmor %vm3931_vm5, %vm3932_vm4  ;;  %v3952_v5 = vand.u32 2147483648, %v3771_v7  ;;  %vm3946_vm10 = vweird.f32 %v3771_v7  ;;  %v4167_v30 = vld [vmem:[#allocation12 + $0x10] sm:$0xff] }
 0xcd4   :  { %vm3951_vm13 = vcmp.eq.f32.partialorder %v3950_v49, 8.507059e+37  ;;  %4196 = vmatpush.msrb.mxu3 %v4167_v30 }
 0xcd5   :  { %v4026_v25 = vmul.f32 %v6787_v1, %v3925_v39  ;;  %v3929_v18 = vmul.f32 %v4704_v54, %v3928_v0  ;;  %v3953_v24 = vor.u32 1.1754944e-38, %v3952_v5 }
 0xcd6   :  { %4197 = vmatpush.msrb.mxu3 %v4166_v47 }
 0xcd7   :  { %v3732_v42 = vpop.f32.mrf.mxu1  ;;  %v3930_v56 = vadd.f32 %v4704_v54, %v3929_v18  ;;  %v4043_v13 = vadd.f32 %v6789_v22, %v4026_v25 }
 0xcd8   :  { %v4706_v11 = vpop.eup %4705  ;;  %vm3756_vm6 = vcmp.gt.f32.partialorder %v3732_v42, 0.0 }
 0xcd9   :  { %v3942_v17 = vmul.f32 %v4706_v11, %v3771_v7  ;;  %v3772_v33 = vsel %vm3756_vm6, %v3732_v42, 1.0  ;;  %v3934_v60 = vsel %vm3933_vm7, %v4704_v54, %v3930_v56  ;;  %v4059_v34 = vmax.f32 %v4043_v13, 0.0  ;;  %v3667_v45 = vpop.f32.mrf.mxu0 }
 0xcda   :  { %4707 = vrcp.f32 %v3772_v33  ;;  %v3939_v46 = vsel %vm3936_vm8, %v3938_v36, %v3934_v60  ;;  %vm3947_vm9 = vweird.f32 %v4706_v11  ;;  %v3965_v12 = vand.u32 2147483647, %v3772_v33 }
 0xcdb   :  { %v3943_v55 = vsub.f32 1.0, %v3942_v17  ;;  %v3940_v26 = vmul.f32 %v3939_v46, %v3661_v9  ;;  %4127 = vmatmul.f32.gmra.mxu2 %v4059_v34  ;;  %vm3948_vm12 = vmor %vm3946_vm10, %vm3947_vm9  ;;  %v3967_v10 = vand.u32 2147483648, %v3772_v33  ;;  %vm3961_vm15 = vweird.f32 %v3772_v33 }
 0xcdc   :  { %vm3966_vm2 = vcmp.eq.f32.partialorder %v3965_v12, 8.507059e+37 }
 0xcdd   :  { %v4027_v57 = vmul.f32 %v6787_v1, %v3940_v26  ;;  %v3944_v31 = vmul.f32 %v4706_v11, %v3943_v55  ;;  %v3968_v48 = vor.u32 1.1754944e-38, %v3967_v10 }
 0xcdf   :  { %v3735_v20 = vpop.f32.mrf.mxu1  ;;  %v3945_v29 = vadd.f32 %v4706_v11, %v3944_v31  ;;  %v4044_v38 = vadd.f32 %v6789_v22, %v4027_v57 }
 0xce0   :  { %v4708_v2 = vpop.eup %4707  ;;  %vm3757_vm11 = vcmp.gt.f32.partialorder %v3735_v20, 0.0 }
 0xce1   :  { %v3957_v8 = vmul.f32 %v4708_v2, %v3772_v33  ;;  %v3773_v41 = vsel %vm3757_vm11, %v3735_v20, 1.0  ;;  %v3949_v44 = vsel %vm3948_vm12, %v4706_v11, %v3945_v29  ;;  %v4060_v52 = vmax.f32 %v4044_v38, 0.0  ;;  %v3670_v7 = vpop.f32.mrf.mxu0  ;;  %v4165_v20 = vld [vmem:[#allocation12] sm:$0xff] }
 0xce2   :  { %4709 = vrcp.f32 %v3773_v41  ;;  %v3954_v40 = vsel %vm3951_vm13, %v3953_v24, %v3949_v44  ;;  %vm3962_vm14 = vweird.f32 %v4708_v2  ;;  %v3980_v23 = vand.u32 2147483647, %v3773_v41  ;;  %4198 = vmatpush.msrb.mxu3 %v4165_v20 }
 0xce3   :  { %v3958_v62 = vsub.f32 1.0, %v3957_v8  ;;  %v3955_v35 = vmul.f32 %v3954_v40, %v3664_v15  ;;  %4130 = vmatmul.f32.gmra.mxu2 %v4060_v52  ;;  %vm3963_vm1 = vmor %vm3961_vm15, %vm3962_vm14  ;;  %v3982_v28 = vand.u32 2147483648, %v3773_v41  ;;  %vm3976_vm4 = vweird.f32 %v3773_v41 }
 0xce4   :  { %vm3981_vm7 = vcmp.eq.f32.partialorder %v3980_v23, 8.507059e+37 }
 0xce5   :  { %v4028_v6 = vmul.f32 %v6787_v1, %v3955_v35  ;;  %v3959_v21 = vmul.f32 %v4708_v2, %v3958_v62  ;;  %v3983_v25 = vor.u32 1.1754944e-38, %v3982_v28 }
 0xce7   :  { %v3738_v43 = vpop.f32.mrf.mxu1  ;;  %v3960_v4 = vadd.f32 %v4708_v2, %v3959_v21  ;;  %v4045_v16 = vadd.f32 %v6789_v22, %v4028_v6 }
 0xce8   :  { %v4710_v63 = vpop.eup %4709  ;;  %vm3758_vm0 = vcmp.gt.f32.partialorder %v3738_v43, 0.0 }
 0xce9   :  { %v3972_v37 = vmul.f32 %v4710_v63, %v3773_v41  ;;  %v3774_v9 = vsel %vm3758_vm0, %v3738_v43, 1.0  ;;  %v3964_v58 = vsel %vm3963_vm1, %v4708_v2, %v3960_v4  ;;  %v4061_v19 = vmax.f32 %v4045_v16, 0.0  ;;  %v3673_v46 = vpop.f32.mrf.mxu0  ;;  %v4521_v43 = vld [vmem:[#allocation13] ss:$0 sm:$0xff] }
 0xcea   :  { %4711 = vrcp.f32 %v3774_v9  ;;  %v3969_v3 = vsel %vm3966_vm2, %v3968_v48, %v3964_v58  ;;  %vm3977_vm3 = vweird.f32 %v4710_v63  ;;  %v3997_v17 = vand.u32 2147483648, %v3774_v9 }
 0xceb   :  { %v3973_v54 = vsub.f32 1.0, %v3972_v37  ;;  %v3970_v32 = vmul.f32 %v3969_v3, %v3667_v45  ;;  %4133 = vmatmul.f32.gmra.mxu2 %v4061_v19  ;;  %vm3978_vm6 = vmor %vm3976_vm4, %vm3977_vm3  ;;  %v3995_v34 = vand.u32 2147483647, %v3774_v9  ;;  %vm3991_vm9 = vweird.f32 %v3774_v9 }
 0xcec   :  { %v3998_v5 = vor.u32 1.1754944e-38, %v3997_v17 }
 0xced   :  { %v4029_v27 = vmul.f32 %v6787_v1, %v3970_v32  ;;  %v3974_v0 = vmul.f32 %v4710_v63, %v3973_v54  ;;  %vm3996_vm11 = vcmp.eq.f32.partialorder %v3995_v34, 8.507059e+37 }
 0xcef   :  { %v3741_v39 = vpop.f32.mrf.mxu1  ;;  %v3975_v59 = vadd.f32 %v4710_v63, %v3974_v0  ;;  %v4046_v53 = vadd.f32 %v6789_v22, %v4029_v27 }
 0xcf0   :  { %v4712_v51 = vpop.eup %4711  ;;  %vm3759_vm5 = vcmp.gt.f32.partialorder %v3741_v39, 0.0 }
 0xcf1   :  { %v3987_v18 = vmul.f32 %v4712_v51, %v3774_v9  ;;  %v3775_v42 = vsel %vm3759_vm5, %v3741_v39, 1.0  ;;  %v3979_v56 = vsel %vm3978_vm6, %v4710_v63, %v3975_v59  ;;  %v4062_v13 = vmax.f32 %v4046_v53, 0.0  ;;  %v3676_v40 = vpop.f32.mrf.mxu0 }
 0xcf2   :  { %4713 = vrcp.f32 %v3775_v42  ;;  %v3984_v11 = vsel %vm3981_vm7, %v3983_v25, %v3979_v56  ;;  %vm3992_vm8 = vweird.f32 %v4712_v51  ;;  %v4012_v2 = vand.u32 2147483648, %v3775_v42 }
 0xcf3   :  { %v3988_v36 = vsub.f32 1.0, %v3987_v18  ;;  %v3985_v15 = vmul.f32 %v3984_v11, %v3670_v7  ;;  %4136 = vmatmul.f32.gmra.mxu2 %v4062_v13  ;;  %vm3993_vm10 = vmor %vm3991_vm9, %vm3992_vm8  ;;  %v4010_v41 = vand.u32 2147483647, %v3775_v42  ;;  %vm4006_vm13 = vweird.f32 %v3775_v42 }
 0xcf4   :  { %v4013_v45 = vor.u32 1.1754944e-38, %v4012_v2  ;;  %v4522_v2 = vld [vmem:[#allocation13 + $0x1] ss:$0 sm:$0xff] }
 0xcf5   :  { %v4030_v33 = vmul.f32 %v6787_v1, %v3985_v15  ;;  %v3989_v60 = vmul.f32 %v4712_v51, %v3988_v36  ;;  %vm4011_vm15 = vcmp.eq.f32.partialorder %v4010_v41, 8.507059e+37 }
 0xcf7   :  { %v3990_v55 = vadd.f32 %v4712_v51, %v3989_v60  ;;  %v4047_v26 = vadd.f32 %v6789_v22, %v4030_v33 }
 0xcf8   :  { %v4714_v49 = vpop.eup %4713 }
 0xcf9   :  { %v4002_v57 = vmul.f32 %v4714_v49, %v3775_v42  ;;  %v3994_v31 = vsel %vm3993_vm10, %v4712_v51, %v3990_v55  ;;  %v4063_v14 = vmax.f32 %v4047_v26, 0.0  ;;  %vm4007_vm12 = vweird.f32 %v4714_v49 }
 0xcfa   :  { %v3999_v29 = vsel %vm3996_vm11, %v3998_v5, %v3994_v31  ;;  %vm4008_vm14 = vmor %vm4006_vm13, %vm4007_vm12 }
 0xcfb   :  { %v4003_v38 = vsub.f32 1.0, %v4002_v57  ;;  %v4000_v50 = vmul.f32 %v3999_v29, %v3673_v46  ;;  %4139 = vmatmul.f32.gmra.mxu2 %v4063_v14 }
 0xcfd   :  { %v4004_v24 = vmul.f32 %v4714_v49, %v4003_v38  ;;  %v4031_v8 = vmul.f32 %v6787_v1, %v4000_v50 }
 0xcff   :  { %v4005_v44 = vadd.f32 %v4714_v49, %v4004_v24  ;;  %v4048_v52 = vadd.f32 %v6789_v22, %v4031_v8 }
 0xd01   :  { %v4009_v62 = vsel %vm4008_vm14, %v4714_v49, %v4005_v44  ;;  %v4064_v35 = vmax.f32 %v4048_v52, 0.0 }
 0xd02   :  { %v4014_v12 = vsel %vm4011_vm15, %v4013_v45, %v4009_v62 }
 0xd03   :  { %v4015_v10 = vmul.f32 %v4014_v12, %v3676_v40  ;;  %4142 = vmatmul.f32.gmra.mxu2 %v4064_v35 }
 0xd05   :  { %v4032_v6 = vmul.f32 %v6787_v1, %v4015_v10 }
 0xd07   :  { %v4049_v21 = vadd.f32 %v6789_v22, %v4032_v6 }
 0xd09   :  { %v4065_v61 = vmax.f32 %v4049_v21, 0.0 }
 0xd0b   :  { %4145 = vmatmul.f32.gmra.mxu2 %v4065_v61 }
 0xd16   :  { %v4101_v4 = vpop.f32.mrf.mxu2 }
 0xd17   :  { %v4102_v16 = vadd.f32 %v4521_v43, %v4101_v4 }
 0xd19   :  { %v4149_v63 = vmax.f32 %v4102_v16, 0.0 }
 0xd1b   :  { %4199 = vmatmul.f32.vlgmr.msrb.gmra.mxu3 %v4149_v63 }
 0xd1e   :  { %v4104_v48 = vpop.f32.mrf.mxu2 }
 0xd1f   :  { %v4105_v37 = vadd.f32 %v4521_v43, %v4104_v48 }
 0xd21   :  { %v4150_v9 = vmax.f32 %v4105_v37, 0.0 }
 0xd23   :  { %4202 = vmatmul.f32.gmra.mxu3 %v4150_v9 }
 0xd26   :  { %v4107_v58 = vpop.f32.mrf.mxu2 }
 0xd27   :  { %v4108_v19 = vadd.f32 %v4521_v43, %v4107_v58 }
 0xd29   :  { %v4151_v3 = vmax.f32 %v4108_v19, 0.0 }
 0xd2b   :  { %4205 = vmatmul.f32.gmra.mxu3 %v4151_v3 }
 0xd2e   :  { %v4110_v54 = vpop.f32.mrf.mxu2 }
 0xd2f   :  { %v4111_v32 = vadd.f32 %v4521_v43, %v4110_v54 }
 0xd31   :  { %v4152_v1 = vmax.f32 %v4111_v32, 0.0 }
 0xd33   :  { %4208 = vmatmul.f32.gmra.mxu3 %v4152_v1 }
 0xd36   :  { %v4113_v22 = vpop.f32.mrf.mxu2 }
 0xd37   :  { %v4114_v30 = vadd.f32 %v4521_v43, %v4113_v22 }
 0xd39   :  { %v4153_v7 = vmax.f32 %v4114_v30, 0.0 }
 0xd3b   :  { %4211 = vmatmul.f32.gmra.mxu3 %v4153_v7 }
 0xd3e   :  { %v4116_v23 = vpop.f32.mrf.mxu2 }
 0xd3f   :  { %v4117_v28 = vadd.f32 %v4521_v43, %v4116_v23 }
 0xd41   :  { %v4154_v27 = vmax.f32 %v4117_v28, 0.0 }
 0xd43   :  { %4214 = vmatmul.f32.gmra.mxu3 %v4154_v27 }
 0xd46   :  { %v4119_v0 = vpop.f32.mrf.mxu2 }
 0xd47   :  { %v4120_v39 = vadd.f32 %v4521_v43, %v4119_v0 }
 0xd49   :  { %v4155_v59 = vmax.f32 %v4120_v39, 0.0 }
 0xd4b   :  { %4217 = vmatmul.f32.gmra.mxu3 %v4155_v59 }
 0xd4e   :  { %v4122_v53 = vpop.f32.mrf.mxu2 }
 0xd4f   :  { %v4123_v51 = vadd.f32 %v4521_v43, %v4122_v53 }
 0xd51   :  { %v4156_v25 = vmax.f32 %v4123_v51, 0.0 }
 0xd53   :  { %4220 = vmatmul.f32.gmra.mxu3 %v4156_v25 }
 0xd56   :  { %v4125_v18 = vpop.f32.mrf.mxu2 }
 0xd57   :  { %v4126_v42 = vadd.f32 %v4521_v43, %v4125_v18 }
 0xd59   :  { %v4157_v56 = vmax.f32 %v4126_v42, 0.0 }
 0xd5b   :  { %4223 = vmatmul.f32.gmra.mxu3 %v4157_v56 }
 0xd5e   :  { %v4128_v13 = vpop.f32.mrf.mxu2 }
 0xd5f   :  { %v4129_v11 = vadd.f32 %v4521_v43, %v4128_v13 }
 0xd61   :  { %v4158_v36 = vmax.f32 %v4129_v11, 0.0 }
 0xd63   :  { %4226 = vmatmul.f32.gmra.mxu3 %v4158_v36 }
 0xd66   :  { %v4131_v15 = vpop.f32.mrf.mxu2 }
 0xd67   :  { %v4132_v17 = vadd.f32 %v4521_v43, %v4131_v15 }
 0xd69   :  { %v4159_v33 = vmax.f32 %v4132_v17, 0.0 }
 0xd6b   :  { %4229 = vmatmul.f32.gmra.mxu3 %v4159_v33 }
 0xd6e   :  { %v4134_v60 = vpop.f32.mrf.mxu2 }
 0xd6f   :  { %v4135_v34 = vadd.f32 %v4521_v43, %v4134_v60 }
 0xd71   :  { %v4160_v46 = vmax.f32 %v4135_v34, 0.0 }
 0xd73   :  { %4232 = vmatmul.f32.gmra.mxu3 %v4160_v46 }
 0xd76   :  { %v4137_v55 = vpop.f32.mrf.mxu2 }
 0xd77   :  { %v4138_v26 = vadd.f32 %v4521_v43, %v4137_v55 }
 0xd79   :  { %v4161_v49 = vmax.f32 %v4138_v26, 0.0 }
 0xd7b   :  { %4235 = vmatmul.f32.gmra.mxu3 %v4161_v49 }
 0xd7e   :  { %v4140_v5 = vpop.f32.mrf.mxu2 }
 0xd7f   :  { %v4141_v57 = vadd.f32 %v4521_v43, %v4140_v5 }
 0xd81   :  { %v4162_v31 = vmax.f32 %v4141_v57, 0.0 }
 0xd83   :  { %4238 = vmatmul.f32.gmra.mxu3 %v4162_v31 }
 0xd86   :  { %v4143_v14 = vpop.f32.mrf.mxu2 }
 0xd87   :  { %v4144_v47 = vadd.f32 %v4521_v43, %v4143_v14 }
 0xd89   :  { %v4163_v20 = vmax.f32 %v4144_v47, 0.0 }
 0xd8b   :  { %4241 = vmatmul.f32.gmra.mxu3 %v4163_v20 }
 0xd8e   :  { %v4146_v29 = vpop.f32.mrf.mxu2 }
 0xd8f   :  { %v4147_v38 = vadd.f32 %v4521_v43, %v4146_v29 }
 0xd91   :  { %v4164_v50 = vmax.f32 %v4147_v38, 0.0 }
 0xd93   :  { %4244 = vmatmul.f32.gmra.mxu3 %v4164_v50 }
 0xd9e   :  { %v4200_v24 = vpop.f32.mrf.mxu3 }
 0xd9f   :  { %v4201_v8 = vadd.f32 %v4522_v2, %v4200_v24 }
 0xda1   :  { %4248 = vst [vmem:[%s6883_s12] sm:$0xff] %v4201_v8 }
 0xda6   :  { %v4203_v41 = vpop.f32.mrf.mxu3 }
 0xda7   :  { %v4204_v44 = vadd.f32 %v4522_v2, %v4203_v41 }
 0xda9   :  { %4249 = vst [vmem:[%s6883_s12 + $0x8] sm:$0xff] %v4204_v44 }
 0xdae   :  { %v4206_v52 = vpop.f32.mrf.mxu3 }
 0xdaf   :  { %v4207_v40 = vadd.f32 %v4522_v2, %v4206_v52 }
 0xdb1   :  { %4250 = vst [vmem:[%s6883_s12 + $0x10] sm:$0xff] %v4207_v40 }
 0xdb6   :  { %v4209_v45 = vpop.f32.mrf.mxu3 }
 0xdb7   :  { %v4210_v62 = vadd.f32 %v4522_v2, %v4209_v45 }
 0xdb9   :  { %4251 = vst [vmem:[%s6883_s12 + $0x18] sm:$0xff] %v4210_v62 }
 0xdbe   :  { %v4212_v35 = vpop.f32.mrf.mxu3 }
 0xdbf   :  { %v4213_v12 = vadd.f32 %v4522_v2, %v4212_v35 }
 0xdc1   :  { %4252 = vst [vmem:[%s6883_s12 + $0x20] sm:$0xff] %v4213_v12 }
 0xdc6   :  { %v4215_v10 = vpop.f32.mrf.mxu3 }
 0xdc7   :  { %v4216_v6 = vadd.f32 %v4522_v2, %v4215_v10 }
 0xdc9   :  { %4253 = vst [vmem:[%s6883_s12 + $0x28] sm:$0xff] %v4216_v6 }
 0xdce   :  { %v4218_v21 = vpop.f32.mrf.mxu3 }
 0xdcf   :  { %v4219_v61 = vadd.f32 %v4522_v2, %v4218_v21 }
 0xdd1   :  { %4254 = vst [vmem:[%s6883_s12 + $0x30] sm:$0xff] %v4219_v61 }
 0xdd6   :  { %v4221_v43 = vpop.f32.mrf.mxu3 }
 0xdd7   :  { %v4222_v4 = vadd.f32 %v4522_v2, %v4221_v43 }
 0xdd9   :  { %4255 = vst [vmem:[%s6883_s12 + $0x38] sm:$0xff] %v4222_v4 }
 0xdde   :  { %v4224_v16 = vpop.f32.mrf.mxu3 }
 0xddf   :  { %v4225_v63 = vadd.f32 %v4522_v2, %v4224_v16 }
 0xde1   :  { %4256 = vst [vmem:[%s6883_s12 + $0x40] sm:$0xff] %v4225_v63 }
 0xde6   :  { %v4227_v48 = vpop.f32.mrf.mxu3 }
 0xde7   :  { %v4228_v37 = vadd.f32 %v4522_v2, %v4227_v48 }
 0xde9   :  { %4257 = vst [vmem:[%s6883_s12 + $0x48] sm:$0xff] %v4228_v37 }
 0xdee   :  { %v4230_v9 = vpop.f32.mrf.mxu3 }
 0xdef   :  { %v4231_v58 = vadd.f32 %v4522_v2, %v4230_v9 }
 0xdf1   :  { %4258 = vst [vmem:[%s6883_s12 + $0x50] sm:$0xff] %v4231_v58 }
 0xdf6   :  { %v4233_v19 = vpop.f32.mrf.mxu3 }
 0xdf7   :  { %v4234_v3 = vadd.f32 %v4522_v2, %v4233_v19 }
 0xdf9   :  { %4259 = vst [vmem:[%s6883_s12 + $0x58] sm:$0xff] %v4234_v3 }
 0xdfe   :  { %v4236_v54 = vpop.f32.mrf.mxu3 }
 0xdff   :  { %v4237_v32 = vadd.f32 %v4522_v2, %v4236_v54 }
 0xe01   :  { %4260 = vst [vmem:[%s6883_s12 + $0x60] sm:$0xff] %v4237_v32 }
 0xe06   :  { %v4239_v1 = vpop.f32.mrf.mxu3 }
 0xe07   :  { %v4240_v22 = vadd.f32 %v4522_v2, %v4239_v1 }
 0xe09   :  { %4261 = vst [vmem:[%s6883_s12 + $0x68] sm:$0xff] %v4240_v22 }
 0xe0e   :  { %v4242_v30 = vpop.f32.mrf.mxu3 }
 0xe0f   :  { %v4243_v7 = vadd.f32 %v4522_v2, %v4242_v30 }
 0xe11   :  { %4262 = vst [vmem:[%s6883_s12 + $0x70] sm:$0xff] %v4243_v7 }
 0xe16   :  { %v4245_v23 = vpop.f32.mrf.mxu3 }
 0xe17   :  { %v4246_v28 = vadd.f32 %v4522_v2, %v4245_v23 }
 0xe19   :  { %4263 = vst [vmem:[%s6883_s12 + $0x78] sm:$0xff] %v4246_v28 }
 0xe1a   :  { %4268 = vsyncpa [#allocation3], 1 }
 0xe1b   :  { %4269 = vsyncpa [#allocation5], 1 }
 0xe1c   :  { %4270 = vsyncpa [#allocation8], 1 }
 0xe1d   :  { %4271 = vsyncpa [#allocation11], 1 }
 0xe1e   :  { %4272 = vsyncpa [#allocation14], 1 }

</bundles_post_ra>
